<compile_context>
chip_gen: v7x
topology: tpu7x:2x2x1
jax: 0.10.0
libtpu: 0.0.40
codegen_flags: <defaults>
</compile_context>

<pallas_src>
import math

import jax
import jax.numpy as jnp
from jax import lax
from jax.experimental import pallas as pl
from jax.experimental.pallas import tpu as pltpu

# ---- model hyper-parameters (small but structurally faithful) ----
N_DIMS = 3
NF = 4            # raw node features in xh (D = 3 + NF)
CONTEXT_NF = 2
HIDDEN = 32
N_LAYERS = 2      # EGNN equivariant blocks
INV_SUBLAYERS = 2 # GCLs per block
NORM_FACTOR = 100.0


def _silu(v):
    # exp and approximate reciprocal both land in the EUP slot (VALU stays free)
    return v * pl.reciprocal(1.0 + jnp.exp(-v), approx=True)


def _dot(a, b):
    return jnp.dot(a, b, preferred_element_type=jnp.float32)


def _pick_bt(batch):
    """Batch elements per grid step: keep >= 2 grid steps (v7x megacore),
    require batch % bt == 0, cap per-step batch at 32."""
    if batch < 2:
        return max(batch, 1)
    cap = min(batch // 2, 32)
    for bt in range(cap, 0, -1):
        if batch % bt == 0:
            return bt
    return 1


# ------------------------------------------------------------------
# Fused kernel: whole EGNN + Dynamics tail for Bt batch elements
# ------------------------------------------------------------------
def make_kernel(*, n_blocks, inv_sublayers, bt, n, ndim, nf_raw, ctx_nf,
                hidden, norm_factor):
    H = hidden
    in_nf = nf_raw + 1 + ctx_nf          # h0 + time + context
    inv_nf = 1.0 / norm_factor
    BN = bt * n
    BE = bt * n * n

    def kernel(ndat_ref, em_ref, gclw_ref, gclb_ref, eqw_ref, eqb_ref,
               embp_ref, outp_ref, o_ref):
        # packed node data: [xh(ndim+nf) | node_mask | rgroup_mask | t | ctx]
        ndat = ndat_ref[...]                                   # (bt, n, cols)
        nm = ndat[:, :, ndim + nf_raw:ndim + nf_raw + 1]       # (bt, n, 1)
        rm = ndat[:, :, ndim + nf_raw + 1:ndim + nf_raw + 2]   # (bt, n, 1)
        xh = ndat[:, :, :ndim + nf_raw] * nm                   # masked xh
        x0 = xh[:, :, :ndim]                                   # (bt, n, 3)
        h0 = xh[:, :, ndim:]                                   # (bt, n, nf)
        # time + context are NOT pre-masked (matches the reference)
        tctx = ndat[:, :, ndim + nf_raw + 2:]                  # (bt, n, 1+ctx)

        # embedding
        embp = embp_ref[...]                                   # (in_nf+1, H)
        h_in = jnp.concatenate([h0, tctx], axis=-1).reshape(BN, in_nf)
        h = (_dot(h_in, embp[:in_nf]) + embp[in_nf:in_nf + 1]).reshape(bt, n, H)
        x = x0

        em = em_ref[...]                                       # (bt, n, n, 1)

        # initial distances: reused as the constant edge attr (dist0) and as
        # block-0's coord2diff output (x == x0 there).
        d0 = x0[:, :, None, :] - x0[:, None, :, :]             # (bt, n, n, 3)
        r0 = jnp.sum(d0 * d0, axis=-1, keepdims=True)          # (bt, n, n, 1)
        cd0 = d0 * lax.rsqrt(r0 + 1e-8)
        dist0 = r0

        def row4(v):                     # (1, H) -> (1, 1, 1, H)
            return v.reshape(1, 1, 1, H)

        def edge_first(hcur, w_r, w_c, we_rad, we_d0, b1, radial):
            # cat([h[row], h[col], radial, dist0]) @ W1 + b1, without building
            # the (E, 2H+2) concat: node-level projections broadcast over
            # rows/cols + two VPU broadcast-muls for the edge-attr columns.
            h2 = hcur.reshape(BN, H)
            pr = _dot(h2, w_r).reshape(bt, n, H)
            pc = _dot(h2, w_c).reshape(bt, n, H)
            pe = radial * we_rad + dist0 * we_d0 + b1          # (bt, n, n, H)
            return pr[:, :, None, :] + pc[:, None, :, :] + pe

        for blk in range(n_blocks):
            # coord2diff with norm_constant = 0
            if blk == 0:
                radial, cd = r0, cd0
            else:
                diff = x[:, :, None, :] - x[:, None, :, :]
                radial = jnp.sum(diff * diff, axis=-1, keepdims=True)
                cd = diff * lax.rsqrt(radial + 1e-8)

            # --- GCL sublayers ---
            for sub in range(inv_sublayers):
                li = blk * inv_sublayers + sub
                lw = gclw_ref[li]          # (6H, H): Wr|Wc|W2|W3a|W3b|W4
                lb = gclb_ref[li]          # (6, H):  b1|b2|b3|b4|we_rad|we_d0
                m = _silu(edge_first(h, lw[0:H], lw[H:2 * H],
                                     row4(lb[4:5]), row4(lb[5:6]),
                                     row4(lb[0:1]), radial))
                mij = _silu(_dot(m.reshape(BE, H), lw[2 * H:3 * H]) + lb[1:2])
                eout = mij.reshape(bt, n, n, H) * em           # edge mask
                # unsorted_segment_sum over row, aggregation 'sum' (/100)
                agg = jnp.sum(eout, axis=2) * inv_nf           # (bt, n, H)
                nmid = _silu(_dot(h.reshape(BN, H), lw[3 * H:4 * H]) +
                             _dot(agg.reshape(BN, H), lw[4 * H:5 * H]) +
                             lb[2:3])
                nout = _dot(nmid, lw[5 * H:6 * H]) + lb[3:4]
                h = (h + nout.reshape(bt, n, H)) * nm

            # --- EquivariantUpdate ---
            ew = eqw_ref[blk]              # (4H, H): Wr|Wc|W2|W3(col0 real)
            eb = eqb_ref[blk]              # (4, H):  b1|b2|we_rad|we_d0
            p1 = _silu(edge_first(h, ew[0:H], ew[H:2 * H],
                                  row4(eb[2:3]), row4(eb[3:4]),
                                  row4(eb[0:1]), radial))
            p2 = _silu(_dot(p1.reshape(BE, H), ew[2 * H:3 * H]) + eb[1:2])
            phi = _dot(p2, ew[3 * H:4 * H])[:, 0:1].reshape(bt, n, n, 1)
            trans = cd * phi * em                              # (bt, n, n, 3)
            aggx = jnp.sum(trans, axis=2) * inv_nf * rm        # (bt, n, 3)
            x = (x + aggx) * nm
            h = h * nm                                         # post-block mask

        # output projection (already sliced to kept columns host-side) + tail
        outp = outp_ref[...]                                   # (H+1, keep)
        nm2 = nm.reshape(BN, 1)
        h_keep = (_dot(h.reshape(BN, H), outp[:H]) + outp[H:H + 1]) * nm2
        vel = ((x - x0) * nm).reshape(BN, ndim)
        # TODO(synk): FoundNaNException raise and centering=True
        # (remove_mean_with_mask) are host-side / disabled-by-default paths.
        o_ref[...] = jnp.concatenate([vel, h_keep], axis=-1)   # (BN, 3+keep)

    return kernel


# ------------------------------------------------------------------
# Parameter init (deterministic, shapes per the PyTorch __init__),
# packed into 6 stacked weight slabs.
# ------------------------------------------------------------------
def _linear_init(key, fin, fout):
    k1, k2 = jax.random.split(key)
    s = 1.0 / math.sqrt(fin)
    w = jax.random.uniform(k1, (fin, fout), jnp.float32, minval=-s, maxval=s)
    b = jax.random.uniform(k2, (1, fout), jnp.float32, minval=-s, maxval=s)
    return w, b


def init_params(key, nf_raw, ctx_nf, hidden, n_blocks, inv_sublayers):
    H = hidden
    in_nf = nf_raw + 1 + ctx_nf
    out_nf = in_nf                        # EGNN default out_node_nf = in_node_nf
    keep = out_nf - ctx_nf - 1            # columns kept by the Dynamics tail

    keys = jax.random.split(key, 2 + n_blocks)
    emb_w, emb_b = _linear_init(keys[0], in_nf, H)
    out_w, out_b = _linear_init(keys[1], H, out_nf)
    embp = jnp.concatenate([emb_w, emb_b], axis=0)                    # (in_nf+1, H)
    outp = jnp.concatenate([out_w[:, :keep], out_b[:, :keep]], axis=0)  # (H+1, keep)

    gclw, gclb, eqw, eqb = [], [], [], []
    for bi in range(n_blocks):
        bk = jax.random.split(keys[2 + bi], inv_sublayers + 1)
        for gi in range(inv_sublayers):
            gk = jax.random.split(bk[gi], 4)
            w1, b1 = _linear_init(gk[0], 2 * H + 2, H)   # edge_mlp[0]
            w2, b2 = _linear_init(gk[1], H, H)           # edge_mlp[2]
            w3, b3 = _linear_init(gk[2], 2 * H, H)       # node_mlp[0]
            w4, b4 = _linear_init(gk[3], H, H)           # node_mlp[2]
            gclw.append(jnp.concatenate(
                [w1[:H], w1[H:2 * H], w2, w3[:H], w3[H:], w4], axis=0))
            gclb.append(jnp.concatenate(
                [b1, b2, b3, b4, w1[2 * H:2 * H + 1], w1[2 * H + 1:]], axis=0))
        ek = jax.random.split(bk[inv_sublayers], 3)
        wc1, bc1 = _linear_init(ek[0], 2 * H + 2, H)
        wc2, bc2 = _linear_init(ek[1], H, H)
        # final coord layer: Linear(hidden, 1, bias=False), xavier gain=0.001
        xav = 0.001 * math.sqrt(6.0 / (H + 1))
        wc3 = jax.random.uniform(ek[2], (H, 1), jnp.float32, minval=-xav, maxval=xav)
        wc3_pad = jnp.concatenate([wc3, jnp.zeros((H, H - 1), jnp.float32)], axis=1)
        eqw.append(jnp.concatenate([wc1[:H], wc1[H:2 * H], wc2, wc3_pad], axis=0))
        eqb.append(jnp.concatenate(
            [bc1, bc2, wc1[2 * H:2 * H + 1], wc1[2 * H + 1:]], axis=0))

    return dict(gclw=jnp.stack(gclw), gclb=jnp.stack(gclb),
                eqw=jnp.stack(eqw), eqb=jnp.stack(eqb),
                embp=embp, outp=outp)


WEIGHT_KEYS = ("gclw", "gclb", "eqw", "eqb", "embp", "outp")


def _wspec(shape):
    rank = len(shape)
    return pl.BlockSpec(tuple(shape), lambda g, _r=rank: (0,) * _r)


# ------------------------------------------------------------------
# Dynamics.forward (egnn_dynamics) — single fused pallas_call
# ------------------------------------------------------------------
def dynamics_forward(params, t, xh, node_mask, rgroup_mask, edge_mask, context):
    B, N, D = xh.shape
    nf_raw = D - N_DIMS
    keep = params["outp"].shape[1]

    # pack all per-node data into one slab -> 1 node DMA + 1 edge-mask DMA/step
    t_b = jnp.broadcast_to(jnp.asarray(t, jnp.float32).reshape(B, 1, 1), (B, N, 1))
    node_data = jnp.concatenate(
        [xh.astype(jnp.float32),
         node_mask.reshape(B, N, 1).astype(jnp.float32),
         rgroup_mask.reshape(B, N, 1).astype(jnp.float32),
         t_b,
         context.reshape(B, N, -1).astype(jnp.float32)], axis=-1)
    em = edge_mask.reshape(B, N, N, 1).astype(jnp.float32)

    bt = _pick_bt(B)
    grid = (B // bt,)
    ncols = node_data.shape[-1]

    kernel = make_kernel(
        n_blocks=N_LAYERS, inv_sublayers=INV_SUBLAYERS, bt=bt, n=N,
        ndim=N_DIMS, nf_raw=nf_raw, ctx_nf=CONTEXT_NF, hidden=HIDDEN,
        norm_factor=NORM_FACTOR)

    weights = [params[k] for k in WEIGHT_KEYS]

    out = pl.pallas_call(
        kernel,
        out_shape=jax.ShapeDtypeStruct((B * N, N_DIMS + keep), jnp.float32),
        grid=grid,
        in_specs=[pl.BlockSpec((bt, N, ncols), lambda g: (g, 0, 0)),
                  pl.BlockSpec((bt, N, N, 1), lambda g: (g, 0, 0, 0))]
                 + [_wspec(w.shape) for w in weights],
        out_specs=pl.BlockSpec((bt * N, N_DIMS + keep), lambda g: (g, 0)),
        compiler_params=pltpu.CompilerParams(
            dimension_semantics=("parallel",),          # grid split across TCs
            vmem_limit_bytes=32 * 1024 * 1024),          # safe on v5e/v6e/v7x
    )(node_data, em, *weights)

    return out.reshape(B, N, N_DIMS + keep)


if __name__ == "__main__":
    B, N = 4, 8
    key = jax.random.PRNGKey(0)
    k = jax.random.split(key, 8)

    params = init_params(k[0], NF, CONTEXT_NF, HIDDEN, N_LAYERS, INV_SUBLAYERS)

    xh = jax.random.normal(k[1], (B, N, N_DIMS + NF), jnp.float32)
    t = jax.random.uniform(k[2], (B,), jnp.float32)
    node_mask = (jax.random.uniform(k[3], (B, N, 1)) > 0.2).astype(jnp.float32)
    rgroup_mask = (jax.random.uniform(k[4], (B, N, 1)) > 0.5).astype(jnp.float32)
    edge_mask = (jax.random.uniform(k[5], (B * N * N, 1)) > 0.2).astype(jnp.float32)
    context = jax.random.normal(k[6], (B, N, CONTEXT_NF), jnp.float32)

    fwd = jax.jit(dynamics_forward)
    out = fwd(params, t, xh, node_mask, rgroup_mask, edge_mask, context)
    out = jax.block_until_ready(out)

    assert out.shape == (B, N, N_DIMS + NF), out.shape
    assert bool(jnp.all(jnp.isfinite(out)))
    print("KERNEL_OK")
</pallas_src>

<mosaic_0001>
module attributes {stable_mosaic.version = 11 : i64} {
  func.func @kernel(%arg0: i32, %arg1: memref<2x8x12xf32, #tpu.memory_space<vmem>>, %arg2: memref<2x8x8x1xf32, #tpu.memory_space<vmem>>, %arg3: memref<4x192x32xf32, #tpu.memory_space<vmem>>, %arg4: memref<4x6x32xf32, #tpu.memory_space<vmem>>, %arg5: memref<2x128x32xf32, #tpu.memory_space<vmem>>, %arg6: memref<2x4x32xf32, #tpu.memory_space<vmem>>, %arg7: memref<8x32xf32, #tpu.memory_space<vmem>>, %arg8: memref<33x4xf32, #tpu.memory_space<vmem>>, %arg9: memref<16x7xf32, #tpu.memory_space<vmem>>) attributes {dimension_semantics = [#tpu.dimension_semantics<parallel>], iteration_bounds = array<i64: 2>, scalar_prefetch = 0 : i64, scratch_operands = 0 : i64, tpu.core_type = #tpu.core_type<tc>, window_params = [{transform_indices = @transform_0, window_bounds = array<i64: 2, 8, 12>}, {transform_indices = @transform_1, window_bounds = array<i64: 2, 8, 8, 1>}, {pipeline_mode = #tpu.pipeline_mode<synchronous>, transform_indices = @transform_2, window_bounds = array<i64: 4, 192, 32>}, {pipeline_mode = #tpu.pipeline_mode<synchronous>, transform_indices = @transform_3, window_bounds = array<i64: 4, 6, 32>}, {pipeline_mode = #tpu.pipeline_mode<synchronous>, transform_indices = @transform_4, window_bounds = array<i64: 2, 128, 32>}, {pipeline_mode = #tpu.pipeline_mode<synchronous>, transform_indices = @transform_5, window_bounds = array<i64: 2, 4, 32>}, {pipeline_mode = #tpu.pipeline_mode<synchronous>, transform_indices = @transform_6, window_bounds = array<i64: 8, 32>}, {pipeline_mode = #tpu.pipeline_mode<synchronous>, transform_indices = @transform_7, window_bounds = array<i64: 33, 4>}, {transform_indices = @transform_8, window_bounds = array<i64: 16, 7>}]} {
    %c0 = arith.constant 0 : index
    %c0_0 = arith.constant 0 : index
    %c0_1 = arith.constant 0 : index
    %0 = vector.load %arg1[%c0, %c0_0, %c0_1] : memref<2x8x12xf32, #tpu.memory_space<vmem>>, vector<2x8x12xf32>
    %1 = vector.extract_strided_slice %0 {offsets = [0, 0, 7], sizes = [2, 8, 1], strides = [1, 1, 1]} : vector<2x8x12xf32> to vector<2x8x1xf32>
    %2 = vector.extract_strided_slice %0 {offsets = [0, 0, 8], sizes = [2, 8, 1], strides = [1, 1, 1]} : vector<2x8x12xf32> to vector<2x8x1xf32>
    %3 = vector.extract_strided_slice %0 {offsets = [0, 0, 0], sizes = [2, 8, 7], strides = [1, 1, 1]} : vector<2x8x12xf32> to vector<2x8x7xf32>
    %4 = vector.broadcast %1 : vector<2x8x1xf32> to vector<2x8x7xf32>
    %5 = arith.mulf %3, %4 : vector<2x8x7xf32>
    %6 = vector.extract_strided_slice %5 {offsets = [0, 0, 0], sizes = [2, 8, 3], strides = [1, 1, 1]} : vector<2x8x7xf32> to vector<2x8x3xf32>
    %7 = vector.extract_strided_slice %5 {offsets = [0, 0, 3], sizes = [2, 8, 4], strides = [1, 1, 1]} : vector<2x8x7xf32> to vector<2x8x4xf32>
    %8 = vector.extract_strided_slice %0 {offsets = [0, 0, 9], sizes = [2, 8, 3], strides = [1, 1, 1]} : vector<2x8x12xf32> to vector<2x8x3xf32>
    %c0_2 = arith.constant 0 : index
    %c0_3 = arith.constant 0 : index
    %9 = vector.load %arg7[%c0_2, %c0_3] : memref<8x32xf32, #tpu.memory_space<vmem>>, vector<8x32xf32>
    %10 = tpu.concatenate %7, %8 in 2 : vector<2x8x4xf32>, vector<2x8x3xf32> -> vector<2x8x7xf32>
    %11 = vector.shape_cast %10 : vector<2x8x7xf32> to vector<16x7xf32>
    %12 = vector.extract_strided_slice %9 {offsets = [0, 0], sizes = [7, 32], strides = [1, 1]} : vector<8x32xf32> to vector<7x32xf32>
    %cst = arith.constant dense<0.000000e+00> : vector<16x32xf32>
    %13 = tpu.matmul %11, %12, %cst {dimension_numbers = #tpu.dot_dimension_numbers<[1], [0], [0], [1], [0, 0, 1, 1], [], []>} : vector<16x7xf32>, vector<7x32xf32>, vector<16x32xf32> -> vector<16x32xf32>
    %14 = vector.extract_strided_slice %9 {offsets = [7, 0], sizes = [1, 32], strides = [1, 1]} : vector<8x32xf32> to vector<1x32xf32>
    %15 = vector.broadcast %14 : vector<1x32xf32> to vector<16x32xf32>
    %16 = arith.addf %13, %15 : vector<16x32xf32>
    %17 = vector.shape_cast %16 : vector<16x32xf32> to vector<2x8x32xf32>
    %c0_4 = arith.constant 0 : index
    %c0_5 = arith.constant 0 : index
    %c0_6 = arith.constant 0 : index
    %c0_7 = arith.constant 0 : index
    %18 = vector.load %arg2[%c0_4, %c0_5, %c0_6, %c0_7] : memref<2x8x8x1xf32, #tpu.memory_space<vmem>>, vector<2x8x8x1xf32>
    %19 = vector.shape_cast %6 : vector<2x8x3xf32> to vector<2x8x1x3xf32>
    %20 = vector.shape_cast %6 : vector<2x8x3xf32> to vector<2x1x8x3xf32>
    %21 = vector.broadcast %19 : vector<2x8x1x3xf32> to vector<2x8x8x3xf32>
    %22 = vector.broadcast %20 : vector<2x1x8x3xf32> to vector<2x8x8x3xf32>
    %23 = arith.subf %21, %22 : vector<2x8x8x3xf32>
    %24 = arith.mulf %23, %23 : vector<2x8x8x3xf32>
    %cst_8 = arith.constant dense<0.000000e+00> : vector<2x8x8xf32>
    %25 = vector.multi_reduction <add>, %24, %cst_8 [3] : vector<2x8x8x3xf32> to vector<2x8x8xf32>
    %26 = vector.shape_cast %25 : vector<2x8x8xf32> to vector<2x8x8x1xf32>
    %cst_9 = arith.constant 9.99999993E-9 : f32
    %27 = vector.broadcast %cst_9 : f32 to vector<2x8x8x1xf32>
    %28 = arith.addf %26, %27 : vector<2x8x8x1xf32>
    %29 = math.rsqrt %28 : vector<2x8x8x1xf32>
    %30 = vector.broadcast %29 : vector<2x8x8x1xf32> to vector<2x8x8x3xf32>
    %31 = arith.mulf %23, %30 : vector<2x8x8x3xf32>
    %c0_10 = arith.constant 0 : index
    %c0_11 = arith.constant 0 : index
    %c0_12 = arith.constant 0 : index
    %32 = vector.load %arg3[%c0_10, %c0_11, %c0_12] : memref<4x192x32xf32, #tpu.memory_space<vmem>>, vector<1x192x32xf32>
    %33 = vector.shape_cast %32 : vector<1x192x32xf32> to vector<192x32xf32>
    %c0_13 = arith.constant 0 : index
    %c0_14 = arith.constant 0 : index
    %c0_15 = arith.constant 0 : index
    %34 = vector.load %arg4[%c0_13, %c0_14, %c0_15] : memref<4x6x32xf32, #tpu.memory_space<vmem>>, vector<1x6x32xf32>
    %35 = vector.shape_cast %34 : vector<1x6x32xf32> to vector<6x32xf32>
    %36 = vector.extract_strided_slice %33 {offsets = [0, 0], sizes = [32, 32], strides = [1, 1]} : vector<192x32xf32> to vector<32x32xf32>
    %37 = vector.extract_strided_slice %33 {offsets = [32, 0], sizes = [32, 32], strides = [1, 1]} : vector<192x32xf32> to vector<32x32xf32>
    %38 = vector.extract_strided_slice %35 {offsets = [4, 0], sizes = [1, 32], strides = [1, 1]} : vector<6x32xf32> to vector<1x32xf32>
    %39 = vector.shape_cast %38 : vector<1x32xf32> to vector<1x1x1x32xf32>
    %40 = vector.extract_strided_slice %35 {offsets = [5, 0], sizes = [1, 32], strides = [1, 1]} : vector<6x32xf32> to vector<1x32xf32>
    %41 = vector.shape_cast %40 : vector<1x32xf32> to vector<1x1x1x32xf32>
    %42 = vector.extract_strided_slice %35 {offsets = [0, 0], sizes = [1, 32], strides = [1, 1]} : vector<6x32xf32> to vector<1x32xf32>
    %43 = vector.shape_cast %42 : vector<1x32xf32> to vector<1x1x1x32xf32>
    %44 = vector.shape_cast %17 : vector<2x8x32xf32> to vector<16x32xf32>
    %cst_16 = arith.constant dense<0.000000e+00> : vector<16x32xf32>
    %45 = tpu.matmul %44, %36, %cst_16 {dimension_numbers = #tpu.dot_dimension_numbers<[1], [0], [0], [1], [0, 0, 1, 1], [], []>} : vector<16x32xf32>, vector<32x32xf32>, vector<16x32xf32> -> vector<16x32xf32>
    %46 = vector.shape_cast %45 : vector<16x32xf32> to vector<2x8x32xf32>
    %cst_17 = arith.constant dense<0.000000e+00> : vector<16x32xf32>
    %47 = tpu.matmul %44, %37, %cst_17 {dimension_numbers = #tpu.dot_dimension_numbers<[1], [0], [0], [1], [0, 0, 1, 1], [], []>} : vector<16x32xf32>, vector<32x32xf32>, vector<16x32xf32> -> vector<16x32xf32>
    %48 = vector.shape_cast %47 : vector<16x32xf32> to vector<2x8x32xf32>
    %49 = vector.broadcast %26 : vector<2x8x8x1xf32> to vector<2x8x8x32xf32>
    %50 = vector.broadcast %39 : vector<1x1x1x32xf32> to vector<2x8x8x32xf32>
    %51 = arith.mulf %49, %50 : vector<2x8x8x32xf32>
    %52 = vector.broadcast %26 : vector<2x8x8x1xf32> to vector<2x8x8x32xf32>
    %53 = vector.broadcast %41 : vector<1x1x1x32xf32> to vector<2x8x8x32xf32>
    %54 = arith.mulf %52, %53 : vector<2x8x8x32xf32>
    %55 = arith.addf %51, %54 : vector<2x8x8x32xf32>
    %56 = vector.broadcast %43 : vector<1x1x1x32xf32> to vector<2x8x8x32xf32>
    %57 = arith.addf %55, %56 : vector<2x8x8x32xf32>
    %58 = vector.shape_cast %46 : vector<2x8x32xf32> to vector<2x8x1x32xf32>
    %59 = vector.shape_cast %48 : vector<2x8x32xf32> to vector<2x1x8x32xf32>
    %60 = vector.broadcast %58 : vector<2x8x1x32xf32> to vector<2x8x8x32xf32>
    %61 = vector.broadcast %59 : vector<2x1x8x32xf32> to vector<2x8x8x32xf32>
    %62 = arith.addf %60, %61 : vector<2x8x8x32xf32>
    %63 = arith.addf %62, %57 : vector<2x8x8x32xf32>
    %cst_18 = arith.constant 0.000000e+00 : f32
    %64 = vector.broadcast %cst_18 : f32 to vector<2x8x8x32xf32>
    %65 = arith.subf %64, %63 : vector<2x8x8x32xf32>
    %66 = math.exp %65 : vector<2x8x8x32xf32>
    %cst_19 = arith.constant 1.000000e+00 : f32
    %67 = vector.broadcast %cst_19 : f32 to vector<2x8x8x32xf32>
    %68 = arith.addf %67, %66 : vector<2x8x8x32xf32>
    %69 = tpu.reciprocal %68 {approx = true} : vector<2x8x8x32xf32> -> vector<2x8x8x32xf32>
    %70 = arith.mulf %63, %69 : vector<2x8x8x32xf32>
    %71 = vector.shape_cast %70 : vector<2x8x8x32xf32> to vector<128x32xf32>
    %72 = vector.extract_strided_slice %33 {offsets = [64, 0], sizes = [32, 32], strides = [1, 1]} : vector<192x32xf32> to vector<32x32xf32>
    %cst_20 = arith.constant dense<0.000000e+00> : vector<128x32xf32>
    %73 = tpu.matmul %71, %72, %cst_20 {dimension_numbers = #tpu.dot_dimension_numbers<[1], [0], [0], [1], [0, 0, 1, 1], [], []>} : vector<128x32xf32>, vector<32x32xf32>, vector<128x32xf32> -> vector<128x32xf32>
    %74 = vector.extract_strided_slice %35 {offsets = [1, 0], sizes = [1, 32], strides = [1, 1]} : vector<6x32xf32> to vector<1x32xf32>
    %75 = vector.broadcast %74 : vector<1x32xf32> to vector<128x32xf32>
    %76 = arith.addf %73, %75 : vector<128x32xf32>
    %cst_21 = arith.constant 0.000000e+00 : f32
    %77 = vector.broadcast %cst_21 : f32 to vector<128x32xf32>
    %78 = arith.subf %77, %76 : vector<128x32xf32>
    %79 = math.exp %78 : vector<128x32xf32>
    %cst_22 = arith.constant 1.000000e+00 : f32
    %80 = vector.broadcast %cst_22 : f32 to vector<128x32xf32>
    %81 = arith.addf %80, %79 : vector<128x32xf32>
    %82 = tpu.reciprocal %81 {approx = true} : vector<128x32xf32> -> vector<128x32xf32>
    %83 = arith.mulf %76, %82 : vector<128x32xf32>
    %84 = vector.shape_cast %83 : vector<128x32xf32> to vector<2x8x8x32xf32>
    %85 = vector.broadcast %18 : vector<2x8x8x1xf32> to vector<2x8x8x32xf32>
    %86 = arith.mulf %84, %85 : vector<2x8x8x32xf32>
    %cst_23 = arith.constant dense<0.000000e+00> : vector<2x8x32xf32>
    %87 = vector.multi_reduction <add>, %86, %cst_23 [2] : vector<2x8x8x32xf32> to vector<2x8x32xf32>
    %cst_24 = arith.constant 0.00999999977 : f32
    %88 = vector.broadcast %cst_24 : f32 to vector<2x8x32xf32>
    %89 = arith.mulf %87, %88 : vector<2x8x32xf32>
    %90 = vector.shape_cast %17 : vector<2x8x32xf32> to vector<16x32xf32>
    %91 = vector.extract_strided_slice %33 {offsets = [96, 0], sizes = [32, 32], strides = [1, 1]} : vector<192x32xf32> to vector<32x32xf32>
    %cst_25 = arith.constant dense<0.000000e+00> : vector<16x32xf32>
    %92 = tpu.matmul %90, %91, %cst_25 {dimension_numbers = #tpu.dot_dimension_numbers<[1], [0], [0], [1], [0, 0, 1, 1], [], []>} : vector<16x32xf32>, vector<32x32xf32>, vector<16x32xf32> -> vector<16x32xf32>
    %93 = vector.shape_cast %89 : vector<2x8x32xf32> to vector<16x32xf32>
    %94 = vector.extract_strided_slice %33 {offsets = [128, 0], sizes = [32, 32], strides = [1, 1]} : vector<192x32xf32> to vector<32x32xf32>
    %cst_26 = arith.constant dense<0.000000e+00> : vector<16x32xf32>
    %95 = tpu.matmul %93, %94, %cst_26 {dimension_numbers = #tpu.dot_dimension_numbers<[1], [0], [0], [1], [0, 0, 1, 1], [], []>} : vector<16x32xf32>, vector<32x32xf32>, vector<16x32xf32> -> vector<16x32xf32>
    %96 = arith.addf %92, %95 : vector<16x32xf32>
    %97 = vector.extract_strided_slice %35 {offsets = [2, 0], sizes = [1, 32], strides = [1, 1]} : vector<6x32xf32> to vector<1x32xf32>
    %98 = vector.broadcast %97 : vector<1x32xf32> to vector<16x32xf32>
    %99 = arith.addf %96, %98 : vector<16x32xf32>
    %cst_27 = arith.constant 0.000000e+00 : f32
    %100 = vector.broadcast %cst_27 : f32 to vector<16x32xf32>
    %101 = arith.subf %100, %99 : vector<16x32xf32>
    %102 = math.exp %101 : vector<16x32xf32>
    %cst_28 = arith.constant 1.000000e+00 : f32
    %103 = vector.broadcast %cst_28 : f32 to vector<16x32xf32>
    %104 = arith.addf %103, %102 : vector<16x32xf32>
    %105 = tpu.reciprocal %104 {approx = true} : vector<16x32xf32> -> vector<16x32xf32>
    %106 = arith.mulf %99, %105 : vector<16x32xf32>
    %107 = vector.extract_strided_slice %33 {offsets = [160, 0], sizes = [32, 32], strides = [1, 1]} : vector<192x32xf32> to vector<32x32xf32>
    %cst_29 = arith.constant dense<0.000000e+00> : vector<16x32xf32>
    %108 = tpu.matmul %106, %107, %cst_29 {dimension_numbers = #tpu.dot_dimension_numbers<[1], [0], [0], [1], [0, 0, 1, 1], [], []>} : vector<16x32xf32>, vector<32x32xf32>, vector<16x32xf32> -> vector<16x32xf32>
    %109 = vector.extract_strided_slice %35 {offsets = [3, 0], sizes = [1, 32], strides = [1, 1]} : vector<6x32xf32> to vector<1x32xf32>
    %110 = vector.broadcast %109 : vector<1x32xf32> to vector<16x32xf32>
    %111 = arith.addf %108, %110 : vector<16x32xf32>
    %112 = vector.shape_cast %111 : vector<16x32xf32> to vector<2x8x32xf32>
    %113 = arith.addf %17, %112 : vector<2x8x32xf32>
    %114 = vector.broadcast %1 : vector<2x8x1xf32> to vector<2x8x32xf32>
    %115 = arith.mulf %113, %114 : vector<2x8x32xf32>
    %c1 = arith.constant 1 : index
    %c0_30 = arith.constant 0 : index
    %c0_31 = arith.constant 0 : index
    %116 = vector.load %arg3[%c1, %c0_30, %c0_31] : memref<4x192x32xf32, #tpu.memory_space<vmem>>, vector<1x192x32xf32>
    %117 = vector.shape_cast %116 : vector<1x192x32xf32> to vector<192x32xf32>
    %c1_32 = arith.constant 1 : index
    %c0_33 = arith.constant 0 : index
    %c0_34 = arith.constant 0 : index
    %118 = vector.load %arg4[%c1_32, %c0_33, %c0_34] : memref<4x6x32xf32, #tpu.memory_space<vmem>>, vector<1x6x32xf32>
    %119 = vector.shape_cast %118 : vector<1x6x32xf32> to vector<6x32xf32>
    %120 = vector.extract_strided_slice %117 {offsets = [0, 0], sizes = [32, 32], strides = [1, 1]} : vector<192x32xf32> to vector<32x32xf32>
    %121 = vector.extract_strided_slice %117 {offsets = [32, 0], sizes = [32, 32], strides = [1, 1]} : vector<192x32xf32> to vector<32x32xf32>
    %122 = vector.extract_strided_slice %119 {offsets = [4, 0], sizes = [1, 32], strides = [1, 1]} : vector<6x32xf32> to vector<1x32xf32>
    %123 = vector.shape_cast %122 : vector<1x32xf32> to vector<1x1x1x32xf32>
    %124 = vector.extract_strided_slice %119 {offsets = [5, 0], sizes = [1, 32], strides = [1, 1]} : vector<6x32xf32> to vector<1x32xf32>
    %125 = vector.shape_cast %124 : vector<1x32xf32> to vector<1x1x1x32xf32>
    %126 = vector.extract_strided_slice %119 {offsets = [0, 0], sizes = [1, 32], strides = [1, 1]} : vector<6x32xf32> to vector<1x32xf32>
    %127 = vector.shape_cast %126 : vector<1x32xf32> to vector<1x1x1x32xf32>
    %128 = vector.shape_cast %115 : vector<2x8x32xf32> to vector<16x32xf32>
    %cst_35 = arith.constant dense<0.000000e+00> : vector<16x32xf32>
    %129 = tpu.matmul %128, %120, %cst_35 {dimension_numbers = #tpu.dot_dimension_numbers<[1], [0], [0], [1], [0, 0, 1, 1], [], []>} : vector<16x32xf32>, vector<32x32xf32>, vector<16x32xf32> -> vector<16x32xf32>
    %130 = vector.shape_cast %129 : vector<16x32xf32> to vector<2x8x32xf32>
    %cst_36 = arith.constant dense<0.000000e+00> : vector<16x32xf32>
    %131 = tpu.matmul %128, %121, %cst_36 {dimension_numbers = #tpu.dot_dimension_numbers<[1], [0], [0], [1], [0, 0, 1, 1], [], []>} : vector<16x32xf32>, vector<32x32xf32>, vector<16x32xf32> -> vector<16x32xf32>
    %132 = vector.shape_cast %131 : vector<16x32xf32> to vector<2x8x32xf32>
    %133 = vector.broadcast %26 : vector<2x8x8x1xf32> to vector<2x8x8x32xf32>
    %134 = vector.broadcast %123 : vector<1x1x1x32xf32> to vector<2x8x8x32xf32>
    %135 = arith.mulf %133, %134 : vector<2x8x8x32xf32>
    %136 = vector.broadcast %26 : vector<2x8x8x1xf32> to vector<2x8x8x32xf32>
    %137 = vector.broadcast %125 : vector<1x1x1x32xf32> to vector<2x8x8x32xf32>
    %138 = arith.mulf %136, %137 : vector<2x8x8x32xf32>
    %139 = arith.addf %135, %138 : vector<2x8x8x32xf32>
    %140 = vector.broadcast %127 : vector<1x1x1x32xf32> to vector<2x8x8x32xf32>
    %141 = arith.addf %139, %140 : vector<2x8x8x32xf32>
    %142 = vector.shape_cast %130 : vector<2x8x32xf32> to vector<2x8x1x32xf32>
    %143 = vector.shape_cast %132 : vector<2x8x32xf32> to vector<2x1x8x32xf32>
    %144 = vector.broadcast %142 : vector<2x8x1x32xf32> to vector<2x8x8x32xf32>
    %145 = vector.broadcast %143 : vector<2x1x8x32xf32> to vector<2x8x8x32xf32>
    %146 = arith.addf %144, %145 : vector<2x8x8x32xf32>
    %147 = arith.addf %146, %141 : vector<2x8x8x32xf32>
    %cst_37 = arith.constant 0.000000e+00 : f32
    %148 = vector.broadcast %cst_37 : f32 to vector<2x8x8x32xf32>
    %149 = arith.subf %148, %147 : vector<2x8x8x32xf32>
    %150 = math.exp %149 : vector<2x8x8x32xf32>
    %cst_38 = arith.constant 1.000000e+00 : f32
    %151 = vector.broadcast %cst_38 : f32 to vector<2x8x8x32xf32>
    %152 = arith.addf %151, %150 : vector<2x8x8x32xf32>
    %153 = tpu.reciprocal %152 {approx = true} : vector<2x8x8x32xf32> -> vector<2x8x8x32xf32>
    %154 = arith.mulf %147, %153 : vector<2x8x8x32xf32>
    %155 = vector.shape_cast %154 : vector<2x8x8x32xf32> to vector<128x32xf32>
    %156 = vector.extract_strided_slice %117 {offsets = [64, 0], sizes = [32, 32], strides = [1, 1]} : vector<192x32xf32> to vector<32x32xf32>
    %cst_39 = arith.constant dense<0.000000e+00> : vector<128x32xf32>
    %157 = tpu.matmul %155, %156, %cst_39 {dimension_numbers = #tpu.dot_dimension_numbers<[1], [0], [0], [1], [0, 0, 1, 1], [], []>} : vector<128x32xf32>, vector<32x32xf32>, vector<128x32xf32> -> vector<128x32xf32>
    %158 = vector.extract_strided_slice %119 {offsets = [1, 0], sizes = [1, 32], strides = [1, 1]} : vector<6x32xf32> to vector<1x32xf32>
    %159 = vector.broadcast %158 : vector<1x32xf32> to vector<128x32xf32>
    %160 = arith.addf %157, %159 : vector<128x32xf32>
    %cst_40 = arith.constant 0.000000e+00 : f32
    %161 = vector.broadcast %cst_40 : f32 to vector<128x32xf32>
    %162 = arith.subf %161, %160 : vector<128x32xf32>
    %163 = math.exp %162 : vector<128x32xf32>
    %cst_41 = arith.constant 1.000000e+00 : f32
    %164 = vector.broadcast %cst_41 : f32 to vector<128x32xf32>
    %165 = arith.addf %164, %163 : vector<128x32xf32>
    %166 = tpu.reciprocal %165 {approx = true} : vector<128x32xf32> -> vector<128x32xf32>
    %167 = arith.mulf %160, %166 : vector<128x32xf32>
    %168 = vector.shape_cast %167 : vector<128x32xf32> to vector<2x8x8x32xf32>
    %169 = vector.broadcast %18 : vector<2x8x8x1xf32> to vector<2x8x8x32xf32>
    %170 = arith.mulf %168, %169 : vector<2x8x8x32xf32>
    %cst_42 = arith.constant dense<0.000000e+00> : vector<2x8x32xf32>
    %171 = vector.multi_reduction <add>, %170, %cst_42 [2] : vector<2x8x8x32xf32> to vector<2x8x32xf32>
    %cst_43 = arith.constant 0.00999999977 : f32
    %172 = vector.broadcast %cst_43 : f32 to vector<2x8x32xf32>
    %173 = arith.mulf %171, %172 : vector<2x8x32xf32>
    %174 = vector.shape_cast %115 : vector<2x8x32xf32> to vector<16x32xf32>
    %175 = vector.extract_strided_slice %117 {offsets = [96, 0], sizes = [32, 32], strides = [1, 1]} : vector<192x32xf32> to vector<32x32xf32>
    %cst_44 = arith.constant dense<0.000000e+00> : vector<16x32xf32>
    %176 = tpu.matmul %174, %175, %cst_44 {dimension_numbers = #tpu.dot_dimension_numbers<[1], [0], [0], [1], [0, 0, 1, 1], [], []>} : vector<16x32xf32>, vector<32x32xf32>, vector<16x32xf32> -> vector<16x32xf32>
    %177 = vector.shape_cast %173 : vector<2x8x32xf32> to vector<16x32xf32>
    %178 = vector.extract_strided_slice %117 {offsets = [128, 0], sizes = [32, 32], strides = [1, 1]} : vector<192x32xf32> to vector<32x32xf32>
    %cst_45 = arith.constant dense<0.000000e+00> : vector<16x32xf32>
    %179 = tpu.matmul %177, %178, %cst_45 {dimension_numbers = #tpu.dot_dimension_numbers<[1], [0], [0], [1], [0, 0, 1, 1], [], []>} : vector<16x32xf32>, vector<32x32xf32>, vector<16x32xf32> -> vector<16x32xf32>
    %180 = arith.addf %176, %179 : vector<16x32xf32>
    %181 = vector.extract_strided_slice %119 {offsets = [2, 0], sizes = [1, 32], strides = [1, 1]} : vector<6x32xf32> to vector<1x32xf32>
    %182 = vector.broadcast %181 : vector<1x32xf32> to vector<16x32xf32>
    %183 = arith.addf %180, %182 : vector<16x32xf32>
    %cst_46 = arith.constant 0.000000e+00 : f32
    %184 = vector.broadcast %cst_46 : f32 to vector<16x32xf32>
    %185 = arith.subf %184, %183 : vector<16x32xf32>
    %186 = math.exp %185 : vector<16x32xf32>
    %cst_47 = arith.constant 1.000000e+00 : f32
    %187 = vector.broadcast %cst_47 : f32 to vector<16x32xf32>
    %188 = arith.addf %187, %186 : vector<16x32xf32>
    %189 = tpu.reciprocal %188 {approx = true} : vector<16x32xf32> -> vector<16x32xf32>
    %190 = arith.mulf %183, %189 : vector<16x32xf32>
    %191 = vector.extract_strided_slice %117 {offsets = [160, 0], sizes = [32, 32], strides = [1, 1]} : vector<192x32xf32> to vector<32x32xf32>
    %cst_48 = arith.constant dense<0.000000e+00> : vector<16x32xf32>
    %192 = tpu.matmul %190, %191, %cst_48 {dimension_numbers = #tpu.dot_dimension_numbers<[1], [0], [0], [1], [0, 0, 1, 1], [], []>} : vector<16x32xf32>, vector<32x32xf32>, vector<16x32xf32> -> vector<16x32xf32>
    %193 = vector.extract_strided_slice %119 {offsets = [3, 0], sizes = [1, 32], strides = [1, 1]} : vector<6x32xf32> to vector<1x32xf32>
    %194 = vector.broadcast %193 : vector<1x32xf32> to vector<16x32xf32>
    %195 = arith.addf %192, %194 : vector<16x32xf32>
    %196 = vector.shape_cast %195 : vector<16x32xf32> to vector<2x8x32xf32>
    %197 = arith.addf %115, %196 : vector<2x8x32xf32>
    %198 = vector.broadcast %1 : vector<2x8x1xf32> to vector<2x8x32xf32>
    %199 = arith.mulf %197, %198 : vector<2x8x32xf32>
    %c0_49 = arith.constant 0 : index
    %c0_50 = arith.constant 0 : index
    %c0_51 = arith.constant 0 : index
    %200 = vector.load %arg5[%c0_49, %c0_50, %c0_51] : memref<2x128x32xf32, #tpu.memory_space<vmem>>, vector<1x128x32xf32>
    %201 = vector.shape_cast %200 : vector<1x128x32xf32> to vector<128x32xf32>
    %c0_52 = arith.constant 0 : index
    %c0_53 = arith.constant 0 : index
    %c0_54 = arith.constant 0 : index
    %202 = vector.load %arg6[%c0_52, %c0_53, %c0_54] : memref<2x4x32xf32, #tpu.memory_space<vmem>>, vector<1x4x32xf32>
    %203 = vector.shape_cast %202 : vector<1x4x32xf32> to vector<4x32xf32>
    %204 = vector.extract_strided_slice %201 {offsets = [0, 0], sizes = [32, 32], strides = [1, 1]} : vector<128x32xf32> to vector<32x32xf32>
    %205 = vector.extract_strided_slice %201 {offsets = [32, 0], sizes = [32, 32], strides = [1, 1]} : vector<128x32xf32> to vector<32x32xf32>
    %206 = vector.extract_strided_slice %203 {offsets = [2, 0], sizes = [1, 32], strides = [1, 1]} : vector<4x32xf32> to vector<1x32xf32>
    %207 = vector.shape_cast %206 : vector<1x32xf32> to vector<1x1x1x32xf32>
    %208 = vector.extract_strided_slice %203 {offsets = [3, 0], sizes = [1, 32], strides = [1, 1]} : vector<4x32xf32> to vector<1x32xf32>
    %209 = vector.shape_cast %208 : vector<1x32xf32> to vector<1x1x1x32xf32>
    %210 = vector.extract_strided_slice %203 {offsets = [0, 0], sizes = [1, 32], strides = [1, 1]} : vector<4x32xf32> to vector<1x32xf32>
    %211 = vector.shape_cast %210 : vector<1x32xf32> to vector<1x1x1x32xf32>
    %212 = vector.shape_cast %199 : vector<2x8x32xf32> to vector<16x32xf32>
    %cst_55 = arith.constant dense<0.000000e+00> : vector<16x32xf32>
    %213 = tpu.matmul %212, %204, %cst_55 {dimension_numbers = #tpu.dot_dimension_numbers<[1], [0], [0], [1], [0, 0, 1, 1], [], []>} : vector<16x32xf32>, vector<32x32xf32>, vector<16x32xf32> -> vector<16x32xf32>
    %214 = vector.shape_cast %213 : vector<16x32xf32> to vector<2x8x32xf32>
    %cst_56 = arith.constant dense<0.000000e+00> : vector<16x32xf32>
    %215 = tpu.matmul %212, %205, %cst_56 {dimension_numbers = #tpu.dot_dimension_numbers<[1], [0], [0], [1], [0, 0, 1, 1], [], []>} : vector<16x32xf32>, vector<32x32xf32>, vector<16x32xf32> -> vector<16x32xf32>
    %216 = vector.shape_cast %215 : vector<16x32xf32> to vector<2x8x32xf32>
    %217 = vector.broadcast %26 : vector<2x8x8x1xf32> to vector<2x8x8x32xf32>
    %218 = vector.broadcast %207 : vector<1x1x1x32xf32> to vector<2x8x8x32xf32>
    %219 = arith.mulf %217, %218 : vector<2x8x8x32xf32>
    %220 = vector.broadcast %26 : vector<2x8x8x1xf32> to vector<2x8x8x32xf32>
    %221 = vector.broadcast %209 : vector<1x1x1x32xf32> to vector<2x8x8x32xf32>
    %222 = arith.mulf %220, %221 : vector<2x8x8x32xf32>
    %223 = arith.addf %219, %222 : vector<2x8x8x32xf32>
    %224 = vector.broadcast %211 : vector<1x1x1x32xf32> to vector<2x8x8x32xf32>
    %225 = arith.addf %223, %224 : vector<2x8x8x32xf32>
    %226 = vector.shape_cast %214 : vector<2x8x32xf32> to vector<2x8x1x32xf32>
    %227 = vector.shape_cast %216 : vector<2x8x32xf32> to vector<2x1x8x32xf32>
    %228 = vector.broadcast %226 : vector<2x8x1x32xf32> to vector<2x8x8x32xf32>
    %229 = vector.broadcast %227 : vector<2x1x8x32xf32> to vector<2x8x8x32xf32>
    %230 = arith.addf %228, %229 : vector<2x8x8x32xf32>
    %231 = arith.addf %230, %225 : vector<2x8x8x32xf32>
    %cst_57 = arith.constant 0.000000e+00 : f32
    %232 = vector.broadcast %cst_57 : f32 to vector<2x8x8x32xf32>
    %233 = arith.subf %232, %231 : vector<2x8x8x32xf32>
    %234 = math.exp %233 : vector<2x8x8x32xf32>
    %cst_58 = arith.constant 1.000000e+00 : f32
    %235 = vector.broadcast %cst_58 : f32 to vector<2x8x8x32xf32>
    %236 = arith.addf %235, %234 : vector<2x8x8x32xf32>
    %237 = tpu.reciprocal %236 {approx = true} : vector<2x8x8x32xf32> -> vector<2x8x8x32xf32>
    %238 = arith.mulf %231, %237 : vector<2x8x8x32xf32>
    %239 = vector.shape_cast %238 : vector<2x8x8x32xf32> to vector<128x32xf32>
    %240 = vector.extract_strided_slice %201 {offsets = [64, 0], sizes = [32, 32], strides = [1, 1]} : vector<128x32xf32> to vector<32x32xf32>
    %cst_59 = arith.constant dense<0.000000e+00> : vector<128x32xf32>
    %241 = tpu.matmul %239, %240, %cst_59 {dimension_numbers = #tpu.dot_dimension_numbers<[1], [0], [0], [1], [0, 0, 1, 1], [], []>} : vector<128x32xf32>, vector<32x32xf32>, vector<128x32xf32> -> vector<128x32xf32>
    %242 = vector.extract_strided_slice %203 {offsets = [1, 0], sizes = [1, 32], strides = [1, 1]} : vector<4x32xf32> to vector<1x32xf32>
    %243 = vector.broadcast %242 : vector<1x32xf32> to vector<128x32xf32>
    %244 = arith.addf %241, %243 : vector<128x32xf32>
    %cst_60 = arith.constant 0.000000e+00 : f32
    %245 = vector.broadcast %cst_60 : f32 to vector<128x32xf32>
    %246 = arith.subf %245, %244 : vector<128x32xf32>
    %247 = math.exp %246 : vector<128x32xf32>
    %cst_61 = arith.constant 1.000000e+00 : f32
    %248 = vector.broadcast %cst_61 : f32 to vector<128x32xf32>
    %249 = arith.addf %248, %247 : vector<128x32xf32>
    %250 = tpu.reciprocal %249 {approx = true} : vector<128x32xf32> -> vector<128x32xf32>
    %251 = arith.mulf %244, %250 : vector<128x32xf32>
    %252 = vector.extract_strided_slice %201 {offsets = [96, 0], sizes = [32, 32], strides = [1, 1]} : vector<128x32xf32> to vector<32x32xf32>
    %cst_62 = arith.constant dense<0.000000e+00> : vector<128x32xf32>
    %253 = tpu.matmul %251, %252, %cst_62 {dimension_numbers = #tpu.dot_dimension_numbers<[1], [0], [0], [1], [0, 0, 1, 1], [], []>} : vector<128x32xf32>, vector<32x32xf32>, vector<128x32xf32> -> vector<128x32xf32>
    %254 = vector.extract_strided_slice %253 {offsets = [0, 0], sizes = [128, 1], strides = [1, 1]} : vector<128x32xf32> to vector<128x1xf32>
    %255 = vector.shape_cast %254 : vector<128x1xf32> to vector<2x8x8x1xf32>
    %256 = vector.broadcast %255 : vector<2x8x8x1xf32> to vector<2x8x8x3xf32>
    %257 = arith.mulf %31, %256 : vector<2x8x8x3xf32>
    %258 = vector.broadcast %18 : vector<2x8x8x1xf32> to vector<2x8x8x3xf32>
    %259 = arith.mulf %257, %258 : vector<2x8x8x3xf32>
    %cst_63 = arith.constant dense<0.000000e+00> : vector<2x8x3xf32>
    %260 = vector.multi_reduction <add>, %259, %cst_63 [2] : vector<2x8x8x3xf32> to vector<2x8x3xf32>
    %cst_64 = arith.constant 0.00999999977 : f32
    %261 = vector.broadcast %cst_64 : f32 to vector<2x8x3xf32>
    %262 = arith.mulf %260, %261 : vector<2x8x3xf32>
    %263 = vector.broadcast %2 : vector<2x8x1xf32> to vector<2x8x3xf32>
    %264 = arith.mulf %262, %263 : vector<2x8x3xf32>
    %265 = arith.addf %6, %264 : vector<2x8x3xf32>
    %266 = vector.broadcast %1 : vector<2x8x1xf32> to vector<2x8x3xf32>
    %267 = arith.mulf %265, %266 : vector<2x8x3xf32>
    %268 = vector.broadcast %1 : vector<2x8x1xf32> to vector<2x8x32xf32>
    %269 = arith.mulf %199, %268 : vector<2x8x32xf32>
    %270 = vector.shape_cast %267 : vector<2x8x3xf32> to vector<2x8x1x3xf32>
    %271 = vector.shape_cast %267 : vector<2x8x3xf32> to vector<2x1x8x3xf32>
    %272 = vector.broadcast %270 : vector<2x8x1x3xf32> to vector<2x8x8x3xf32>
    %273 = vector.broadcast %271 : vector<2x1x8x3xf32> to vector<2x8x8x3xf32>
    %274 = arith.subf %272, %273 : vector<2x8x8x3xf32>
    %275 = arith.mulf %274, %274 : vector<2x8x8x3xf32>
    %cst_65 = arith.constant dense<0.000000e+00> : vector<2x8x8xf32>
    %276 = vector.multi_reduction <add>, %275, %cst_65 [3] : vector<2x8x8x3xf32> to vector<2x8x8xf32>
    %277 = vector.shape_cast %276 : vector<2x8x8xf32> to vector<2x8x8x1xf32>
    %cst_66 = arith.constant 9.99999993E-9 : f32
    %278 = vector.broadcast %cst_66 : f32 to vector<2x8x8x1xf32>
    %279 = arith.addf %277, %278 : vector<2x8x8x1xf32>
    %280 = math.rsqrt %279 : vector<2x8x8x1xf32>
    %281 = vector.broadcast %280 : vector<2x8x8x1xf32> to vector<2x8x8x3xf32>
    %282 = arith.mulf %274, %281 : vector<2x8x8x3xf32>
    %c2 = arith.constant 2 : index
    %c0_67 = arith.constant 0 : index
    %c0_68 = arith.constant 0 : index
    %283 = vector.load %arg3[%c2, %c0_67, %c0_68] : memref<4x192x32xf32, #tpu.memory_space<vmem>>, vector<1x192x32xf32>
    %284 = vector.shape_cast %283 : vector<1x192x32xf32> to vector<192x32xf32>
    %c2_69 = arith.constant 2 : index
    %c0_70 = arith.constant 0 : index
    %c0_71 = arith.constant 0 : index
    %285 = vector.load %arg4[%c2_69, %c0_70, %c0_71] : memref<4x6x32xf32, #tpu.memory_space<vmem>>, vector<1x6x32xf32>
    %286 = vector.shape_cast %285 : vector<1x6x32xf32> to vector<6x32xf32>
    %287 = vector.extract_strided_slice %284 {offsets = [0, 0], sizes = [32, 32], strides = [1, 1]} : vector<192x32xf32> to vector<32x32xf32>
    %288 = vector.extract_strided_slice %284 {offsets = [32, 0], sizes = [32, 32], strides = [1, 1]} : vector<192x32xf32> to vector<32x32xf32>
    %289 = vector.extract_strided_slice %286 {offsets = [4, 0], sizes = [1, 32], strides = [1, 1]} : vector<6x32xf32> to vector<1x32xf32>
    %290 = vector.shape_cast %289 : vector<1x32xf32> to vector<1x1x1x32xf32>
    %291 = vector.extract_strided_slice %286 {offsets = [5, 0], sizes = [1, 32], strides = [1, 1]} : vector<6x32xf32> to vector<1x32xf32>
    %292 = vector.shape_cast %291 : vector<1x32xf32> to vector<1x1x1x32xf32>
    %293 = vector.extract_strided_slice %286 {offsets = [0, 0], sizes = [1, 32], strides = [1, 1]} : vector<6x32xf32> to vector<1x32xf32>
    %294 = vector.shape_cast %293 : vector<1x32xf32> to vector<1x1x1x32xf32>
    %295 = vector.shape_cast %269 : vector<2x8x32xf32> to vector<16x32xf32>
    %cst_72 = arith.constant dense<0.000000e+00> : vector<16x32xf32>
    %296 = tpu.matmul %295, %287, %cst_72 {dimension_numbers = #tpu.dot_dimension_numbers<[1], [0], [0], [1], [0, 0, 1, 1], [], []>} : vector<16x32xf32>, vector<32x32xf32>, vector<16x32xf32> -> vector<16x32xf32>
    %297 = vector.shape_cast %296 : vector<16x32xf32> to vector<2x8x32xf32>
    %cst_73 = arith.constant dense<0.000000e+00> : vector<16x32xf32>
    %298 = tpu.matmul %295, %288, %cst_73 {dimension_numbers = #tpu.dot_dimension_numbers<[1], [0], [0], [1], [0, 0, 1, 1], [], []>} : vector<16x32xf32>, vector<32x32xf32>, vector<16x32xf32> -> vector<16x32xf32>
    %299 = vector.shape_cast %298 : vector<16x32xf32> to vector<2x8x32xf32>
    %300 = vector.broadcast %277 : vector<2x8x8x1xf32> to vector<2x8x8x32xf32>
    %301 = vector.broadcast %290 : vector<1x1x1x32xf32> to vector<2x8x8x32xf32>
    %302 = arith.mulf %300, %301 : vector<2x8x8x32xf32>
    %303 = vector.broadcast %26 : vector<2x8x8x1xf32> to vector<2x8x8x32xf32>
    %304 = vector.broadcast %292 : vector<1x1x1x32xf32> to vector<2x8x8x32xf32>
    %305 = arith.mulf %303, %304 : vector<2x8x8x32xf32>
    %306 = arith.addf %302, %305 : vector<2x8x8x32xf32>
    %307 = vector.broadcast %294 : vector<1x1x1x32xf32> to vector<2x8x8x32xf32>
    %308 = arith.addf %306, %307 : vector<2x8x8x32xf32>
    %309 = vector.shape_cast %297 : vector<2x8x32xf32> to vector<2x8x1x32xf32>
    %310 = vector.shape_cast %299 : vector<2x8x32xf32> to vector<2x1x8x32xf32>
    %311 = vector.broadcast %309 : vector<2x8x1x32xf32> to vector<2x8x8x32xf32>
    %312 = vector.broadcast %310 : vector<2x1x8x32xf32> to vector<2x8x8x32xf32>
    %313 = arith.addf %311, %312 : vector<2x8x8x32xf32>
    %314 = arith.addf %313, %308 : vector<2x8x8x32xf32>
    %cst_74 = arith.constant 0.000000e+00 : f32
    %315 = vector.broadcast %cst_74 : f32 to vector<2x8x8x32xf32>
    %316 = arith.subf %315, %314 : vector<2x8x8x32xf32>
    %317 = math.exp %316 : vector<2x8x8x32xf32>
    %cst_75 = arith.constant 1.000000e+00 : f32
    %318 = vector.broadcast %cst_75 : f32 to vector<2x8x8x32xf32>
    %319 = arith.addf %318, %317 : vector<2x8x8x32xf32>
    %320 = tpu.reciprocal %319 {approx = true} : vector<2x8x8x32xf32> -> vector<2x8x8x32xf32>
    %321 = arith.mulf %314, %320 : vector<2x8x8x32xf32>
    %322 = vector.shape_cast %321 : vector<2x8x8x32xf32> to vector<128x32xf32>
    %323 = vector.extract_strided_slice %284 {offsets = [64, 0], sizes = [32, 32], strides = [1, 1]} : vector<192x32xf32> to vector<32x32xf32>
    %cst_76 = arith.constant dense<0.000000e+00> : vector<128x32xf32>
    %324 = tpu.matmul %322, %323, %cst_76 {dimension_numbers = #tpu.dot_dimension_numbers<[1], [0], [0], [1], [0, 0, 1, 1], [], []>} : vector<128x32xf32>, vector<32x32xf32>, vector<128x32xf32> -> vector<128x32xf32>
    %325 = vector.extract_strided_slice %286 {offsets = [1, 0], sizes = [1, 32], strides = [1, 1]} : vector<6x32xf32> to vector<1x32xf32>
    %326 = vector.broadcast %325 : vector<1x32xf32> to vector<128x32xf32>
    %327 = arith.addf %324, %326 : vector<128x32xf32>
    %cst_77 = arith.constant 0.000000e+00 : f32
    %328 = vector.broadcast %cst_77 : f32 to vector<128x32xf32>
    %329 = arith.subf %328, %327 : vector<128x32xf32>
    %330 = math.exp %329 : vector<128x32xf32>
    %cst_78 = arith.constant 1.000000e+00 : f32
    %331 = vector.broadcast %cst_78 : f32 to vector<128x32xf32>
    %332 = arith.addf %331, %330 : vector<128x32xf32>
    %333 = tpu.reciprocal %332 {approx = true} : vector<128x32xf32> -> vector<128x32xf32>
    %334 = arith.mulf %327, %333 : vector<128x32xf32>
    %335 = vector.shape_cast %334 : vector<128x32xf32> to vector<2x8x8x32xf32>
    %336 = vector.broadcast %18 : vector<2x8x8x1xf32> to vector<2x8x8x32xf32>
    %337 = arith.mulf %335, %336 : vector<2x8x8x32xf32>
    %cst_79 = arith.constant dense<0.000000e+00> : vector<2x8x32xf32>
    %338 = vector.multi_reduction <add>, %337, %cst_79 [2] : vector<2x8x8x32xf32> to vector<2x8x32xf32>
    %cst_80 = arith.constant 0.00999999977 : f32
    %339 = vector.broadcast %cst_80 : f32 to vector<2x8x32xf32>
    %340 = arith.mulf %338, %339 : vector<2x8x32xf32>
    %341 = vector.shape_cast %269 : vector<2x8x32xf32> to vector<16x32xf32>
    %342 = vector.extract_strided_slice %284 {offsets = [96, 0], sizes = [32, 32], strides = [1, 1]} : vector<192x32xf32> to vector<32x32xf32>
    %cst_81 = arith.constant dense<0.000000e+00> : vector<16x32xf32>
    %343 = tpu.matmul %341, %342, %cst_81 {dimension_numbers = #tpu.dot_dimension_numbers<[1], [0], [0], [1], [0, 0, 1, 1], [], []>} : vector<16x32xf32>, vector<32x32xf32>, vector<16x32xf32> -> vector<16x32xf32>
    %344 = vector.shape_cast %340 : vector<2x8x32xf32> to vector<16x32xf32>
    %345 = vector.extract_strided_slice %284 {offsets = [128, 0], sizes = [32, 32], strides = [1, 1]} : vector<192x32xf32> to vector<32x32xf32>
    %cst_82 = arith.constant dense<0.000000e+00> : vector<16x32xf32>
    %346 = tpu.matmul %344, %345, %cst_82 {dimension_numbers = #tpu.dot_dimension_numbers<[1], [0], [0], [1], [0, 0, 1, 1], [], []>} : vector<16x32xf32>, vector<32x32xf32>, vector<16x32xf32> -> vector<16x32xf32>
    %347 = arith.addf %343, %346 : vector<16x32xf32>
    %348 = vector.extract_strided_slice %286 {offsets = [2, 0], sizes = [1, 32], strides = [1, 1]} : vector<6x32xf32> to vector<1x32xf32>
    %349 = vector.broadcast %348 : vector<1x32xf32> to vector<16x32xf32>
    %350 = arith.addf %347, %349 : vector<16x32xf32>
    %cst_83 = arith.constant 0.000000e+00 : f32
    %351 = vector.broadcast %cst_83 : f32 to vector<16x32xf32>
    %352 = arith.subf %351, %350 : vector<16x32xf32>
    %353 = math.exp %352 : vector<16x32xf32>
    %cst_84 = arith.constant 1.000000e+00 : f32
    %354 = vector.broadcast %cst_84 : f32 to vector<16x32xf32>
    %355 = arith.addf %354, %353 : vector<16x32xf32>
    %356 = tpu.reciprocal %355 {approx = true} : vector<16x32xf32> -> vector<16x32xf32>
    %357 = arith.mulf %350, %356 : vector<16x32xf32>
    %358 = vector.extract_strided_slice %284 {offsets = [160, 0], sizes = [32, 32], strides = [1, 1]} : vector<192x32xf32> to vector<32x32xf32>
    %cst_85 = arith.constant dense<0.000000e+00> : vector<16x32xf32>
    %359 = tpu.matmul %357, %358, %cst_85 {dimension_numbers = #tpu.dot_dimension_numbers<[1], [0], [0], [1], [0, 0, 1, 1], [], []>} : vector<16x32xf32>, vector<32x32xf32>, vector<16x32xf32> -> vector<16x32xf32>
    %360 = vector.extract_strided_slice %286 {offsets = [3, 0], sizes = [1, 32], strides = [1, 1]} : vector<6x32xf32> to vector<1x32xf32>
    %361 = vector.broadcast %360 : vector<1x32xf32> to vector<16x32xf32>
    %362 = arith.addf %359, %361 : vector<16x32xf32>
    %363 = vector.shape_cast %362 : vector<16x32xf32> to vector<2x8x32xf32>
    %364 = arith.addf %269, %363 : vector<2x8x32xf32>
    %365 = vector.broadcast %1 : vector<2x8x1xf32> to vector<2x8x32xf32>
    %366 = arith.mulf %364, %365 : vector<2x8x32xf32>
    %c3 = arith.constant 3 : index
    %c0_86 = arith.constant 0 : index
    %c0_87 = arith.constant 0 : index
    %367 = vector.load %arg3[%c3, %c0_86, %c0_87] : memref<4x192x32xf32, #tpu.memory_space<vmem>>, vector<1x192x32xf32>
    %368 = vector.shape_cast %367 : vector<1x192x32xf32> to vector<192x32xf32>
    %c3_88 = arith.constant 3 : index
    %c0_89 = arith.constant 0 : index
    %c0_90 = arith.constant 0 : index
    %369 = vector.load %arg4[%c3_88, %c0_89, %c0_90] : memref<4x6x32xf32, #tpu.memory_space<vmem>>, vector<1x6x32xf32>
    %370 = vector.shape_cast %369 : vector<1x6x32xf32> to vector<6x32xf32>
    %371 = vector.extract_strided_slice %368 {offsets = [0, 0], sizes = [32, 32], strides = [1, 1]} : vector<192x32xf32> to vector<32x32xf32>
    %372 = vector.extract_strided_slice %368 {offsets = [32, 0], sizes = [32, 32], strides = [1, 1]} : vector<192x32xf32> to vector<32x32xf32>
    %373 = vector.extract_strided_slice %370 {offsets = [4, 0], sizes = [1, 32], strides = [1, 1]} : vector<6x32xf32> to vector<1x32xf32>
    %374 = vector.shape_cast %373 : vector<1x32xf32> to vector<1x1x1x32xf32>
    %375 = vector.extract_strided_slice %370 {offsets = [5, 0], sizes = [1, 32], strides = [1, 1]} : vector<6x32xf32> to vector<1x32xf32>
    %376 = vector.shape_cast %375 : vector<1x32xf32> to vector<1x1x1x32xf32>
    %377 = vector.extract_strided_slice %370 {offsets = [0, 0], sizes = [1, 32], strides = [1, 1]} : vector<6x32xf32> to vector<1x32xf32>
    %378 = vector.shape_cast %377 : vector<1x32xf32> to vector<1x1x1x32xf32>
    %379 = vector.shape_cast %366 : vector<2x8x32xf32> to vector<16x32xf32>
    %cst_91 = arith.constant dense<0.000000e+00> : vector<16x32xf32>
    %380 = tpu.matmul %379, %371, %cst_91 {dimension_numbers = #tpu.dot_dimension_numbers<[1], [0], [0], [1], [0, 0, 1, 1], [], []>} : vector<16x32xf32>, vector<32x32xf32>, vector<16x32xf32> -> vector<16x32xf32>
    %381 = vector.shape_cast %380 : vector<16x32xf32> to vector<2x8x32xf32>
    %cst_92 = arith.constant dense<0.000000e+00> : vector<16x32xf32>
    %382 = tpu.matmul %379, %372, %cst_92 {dimension_numbers = #tpu.dot_dimension_numbers<[1], [0], [0], [1], [0, 0, 1, 1], [], []>} : vector<16x32xf32>, vector<32x32xf32>, vector<16x32xf32> -> vector<16x32xf32>
    %383 = vector.shape_cast %382 : vector<16x32xf32> to vector<2x8x32xf32>
    %384 = vector.broadcast %277 : vector<2x8x8x1xf32> to vector<2x8x8x32xf32>
    %385 = vector.broadcast %374 : vector<1x1x1x32xf32> to vector<2x8x8x32xf32>
    %386 = arith.mulf %384, %385 : vector<2x8x8x32xf32>
    %387 = vector.broadcast %26 : vector<2x8x8x1xf32> to vector<2x8x8x32xf32>
    %388 = vector.broadcast %376 : vector<1x1x1x32xf32> to vector<2x8x8x32xf32>
    %389 = arith.mulf %387, %388 : vector<2x8x8x32xf32>
    %390 = arith.addf %386, %389 : vector<2x8x8x32xf32>
    %391 = vector.broadcast %378 : vector<1x1x1x32xf32> to vector<2x8x8x32xf32>
    %392 = arith.addf %390, %391 : vector<2x8x8x32xf32>
    %393 = vector.shape_cast %381 : vector<2x8x32xf32> to vector<2x8x1x32xf32>
    %394 = vector.shape_cast %383 : vector<2x8x32xf32> to vector<2x1x8x32xf32>
    %395 = vector.broadcast %393 : vector<2x8x1x32xf32> to vector<2x8x8x32xf32>
    %396 = vector.broadcast %394 : vector<2x1x8x32xf32> to vector<2x8x8x32xf32>
    %397 = arith.addf %395, %396 : vector<2x8x8x32xf32>
    %398 = arith.addf %397, %392 : vector<2x8x8x32xf32>
    %cst_93 = arith.constant 0.000000e+00 : f32
    %399 = vector.broadcast %cst_93 : f32 to vector<2x8x8x32xf32>
    %400 = arith.subf %399, %398 : vector<2x8x8x32xf32>
    %401 = math.exp %400 : vector<2x8x8x32xf32>
    %cst_94 = arith.constant 1.000000e+00 : f32
    %402 = vector.broadcast %cst_94 : f32 to vector<2x8x8x32xf32>
    %403 = arith.addf %402, %401 : vector<2x8x8x32xf32>
    %404 = tpu.reciprocal %403 {approx = true} : vector<2x8x8x32xf32> -> vector<2x8x8x32xf32>
    %405 = arith.mulf %398, %404 : vector<2x8x8x32xf32>
    %406 = vector.shape_cast %405 : vector<2x8x8x32xf32> to vector<128x32xf32>
    %407 = vector.extract_strided_slice %368 {offsets = [64, 0], sizes = [32, 32], strides = [1, 1]} : vector<192x32xf32> to vector<32x32xf32>
    %cst_95 = arith.constant dense<0.000000e+00> : vector<128x32xf32>
    %408 = tpu.matmul %406, %407, %cst_95 {dimension_numbers = #tpu.dot_dimension_numbers<[1], [0], [0], [1], [0, 0, 1, 1], [], []>} : vector<128x32xf32>, vector<32x32xf32>, vector<128x32xf32> -> vector<128x32xf32>
    %409 = vector.extract_strided_slice %370 {offsets = [1, 0], sizes = [1, 32], strides = [1, 1]} : vector<6x32xf32> to vector<1x32xf32>
    %410 = vector.broadcast %409 : vector<1x32xf32> to vector<128x32xf32>
    %411 = arith.addf %408, %410 : vector<128x32xf32>
    %cst_96 = arith.constant 0.000000e+00 : f32
    %412 = vector.broadcast %cst_96 : f32 to vector<128x32xf32>
    %413 = arith.subf %412, %411 : vector<128x32xf32>
    %414 = math.exp %413 : vector<128x32xf32>
    %cst_97 = arith.constant 1.000000e+00 : f32
    %415 = vector.broadcast %cst_97 : f32 to vector<128x32xf32>
    %416 = arith.addf %415, %414 : vector<128x32xf32>
    %417 = tpu.reciprocal %416 {approx = true} : vector<128x32xf32> -> vector<128x32xf32>
    %418 = arith.mulf %411, %417 : vector<128x32xf32>
    %419 = vector.shape_cast %418 : vector<128x32xf32> to vector<2x8x8x32xf32>
    %420 = vector.broadcast %18 : vector<2x8x8x1xf32> to vector<2x8x8x32xf32>
    %421 = arith.mulf %419, %420 : vector<2x8x8x32xf32>
    %cst_98 = arith.constant dense<0.000000e+00> : vector<2x8x32xf32>
    %422 = vector.multi_reduction <add>, %421, %cst_98 [2] : vector<2x8x8x32xf32> to vector<2x8x32xf32>
    %cst_99 = arith.constant 0.00999999977 : f32
    %423 = vector.broadcast %cst_99 : f32 to vector<2x8x32xf32>
    %424 = arith.mulf %422, %423 : vector<2x8x32xf32>
    %425 = vector.shape_cast %366 : vector<2x8x32xf32> to vector<16x32xf32>
    %426 = vector.extract_strided_slice %368 {offsets = [96, 0], sizes = [32, 32], strides = [1, 1]} : vector<192x32xf32> to vector<32x32xf32>
    %cst_100 = arith.constant dense<0.000000e+00> : vector<16x32xf32>
    %427 = tpu.matmul %425, %426, %cst_100 {dimension_numbers = #tpu.dot_dimension_numbers<[1], [0], [0], [1], [0, 0, 1, 1], [], []>} : vector<16x32xf32>, vector<32x32xf32>, vector<16x32xf32> -> vector<16x32xf32>
    %428 = vector.shape_cast %424 : vector<2x8x32xf32> to vector<16x32xf32>
    %429 = vector.extract_strided_slice %368 {offsets = [128, 0], sizes = [32, 32], strides = [1, 1]} : vector<192x32xf32> to vector<32x32xf32>
    %cst_101 = arith.constant dense<0.000000e+00> : vector<16x32xf32>
    %430 = tpu.matmul %428, %429, %cst_101 {dimension_numbers = #tpu.dot_dimension_numbers<[1], [0], [0], [1], [0, 0, 1, 1], [], []>} : vector<16x32xf32>, vector<32x32xf32>, vector<16x32xf32> -> vector<16x32xf32>
    %431 = arith.addf %427, %430 : vector<16x32xf32>
    %432 = vector.extract_strided_slice %370 {offsets = [2, 0], sizes = [1, 32], strides = [1, 1]} : vector<6x32xf32> to vector<1x32xf32>
    %433 = vector.broadcast %432 : vector<1x32xf32> to vector<16x32xf32>
    %434 = arith.addf %431, %433 : vector<16x32xf32>
    %cst_102 = arith.constant 0.000000e+00 : f32
    %435 = vector.broadcast %cst_102 : f32 to vector<16x32xf32>
    %436 = arith.subf %435, %434 : vector<16x32xf32>
    %437 = math.exp %436 : vector<16x32xf32>
    %cst_103 = arith.constant 1.000000e+00 : f32
    %438 = vector.broadcast %cst_103 : f32 to vector<16x32xf32>
    %439 = arith.addf %438, %437 : vector<16x32xf32>
    %440 = tpu.reciprocal %439 {approx = true} : vector<16x32xf32> -> vector<16x32xf32>
    %441 = arith.mulf %434, %440 : vector<16x32xf32>
    %442 = vector.extract_strided_slice %368 {offsets = [160, 0], sizes = [32, 32], strides = [1, 1]} : vector<192x32xf32> to vector<32x32xf32>
    %cst_104 = arith.constant dense<0.000000e+00> : vector<16x32xf32>
    %443 = tpu.matmul %441, %442, %cst_104 {dimension_numbers = #tpu.dot_dimension_numbers<[1], [0], [0], [1], [0, 0, 1, 1], [], []>} : vector<16x32xf32>, vector<32x32xf32>, vector<16x32xf32> -> vector<16x32xf32>
    %444 = vector.extract_strided_slice %370 {offsets = [3, 0], sizes = [1, 32], strides = [1, 1]} : vector<6x32xf32> to vector<1x32xf32>
    %445 = vector.broadcast %444 : vector<1x32xf32> to vector<16x32xf32>
    %446 = arith.addf %443, %445 : vector<16x32xf32>
    %447 = vector.shape_cast %446 : vector<16x32xf32> to vector<2x8x32xf32>
    %448 = arith.addf %366, %447 : vector<2x8x32xf32>
    %449 = vector.broadcast %1 : vector<2x8x1xf32> to vector<2x8x32xf32>
    %450 = arith.mulf %448, %449 : vector<2x8x32xf32>
    %c1_105 = arith.constant 1 : index
    %c0_106 = arith.constant 0 : index
    %c0_107 = arith.constant 0 : index
    %451 = vector.load %arg5[%c1_105, %c0_106, %c0_107] : memref<2x128x32xf32, #tpu.memory_space<vmem>>, vector<1x128x32xf32>
    %452 = vector.shape_cast %451 : vector<1x128x32xf32> to vector<128x32xf32>
    %c1_108 = arith.constant 1 : index
    %c0_109 = arith.constant 0 : index
    %c0_110 = arith.constant 0 : index
    %453 = vector.load %arg6[%c1_108, %c0_109, %c0_110] : memref<2x4x32xf32, #tpu.memory_space<vmem>>, vector<1x4x32xf32>
    %454 = vector.shape_cast %453 : vector<1x4x32xf32> to vector<4x32xf32>
    %455 = vector.extract_strided_slice %452 {offsets = [0, 0], sizes = [32, 32], strides = [1, 1]} : vector<128x32xf32> to vector<32x32xf32>
    %456 = vector.extract_strided_slice %452 {offsets = [32, 0], sizes = [32, 32], strides = [1, 1]} : vector<128x32xf32> to vector<32x32xf32>
    %457 = vector.extract_strided_slice %454 {offsets = [2, 0], sizes = [1, 32], strides = [1, 1]} : vector<4x32xf32> to vector<1x32xf32>
    %458 = vector.shape_cast %457 : vector<1x32xf32> to vector<1x1x1x32xf32>
    %459 = vector.extract_strided_slice %454 {offsets = [3, 0], sizes = [1, 32], strides = [1, 1]} : vector<4x32xf32> to vector<1x32xf32>
    %460 = vector.shape_cast %459 : vector<1x32xf32> to vector<1x1x1x32xf32>
    %461 = vector.extract_strided_slice %454 {offsets = [0, 0], sizes = [1, 32], strides = [1, 1]} : vector<4x32xf32> to vector<1x32xf32>
    %462 = vector.shape_cast %461 : vector<1x32xf32> to vector<1x1x1x32xf32>
    %463 = vector.shape_cast %450 : vector<2x8x32xf32> to vector<16x32xf32>
    %cst_111 = arith.constant dense<0.000000e+00> : vector<16x32xf32>
    %464 = tpu.matmul %463, %455, %cst_111 {dimension_numbers = #tpu.dot_dimension_numbers<[1], [0], [0], [1], [0, 0, 1, 1], [], []>} : vector<16x32xf32>, vector<32x32xf32>, vector<16x32xf32> -> vector<16x32xf32>
    %465 = vector.shape_cast %464 : vector<16x32xf32> to vector<2x8x32xf32>
    %cst_112 = arith.constant dense<0.000000e+00> : vector<16x32xf32>
    %466 = tpu.matmul %463, %456, %cst_112 {dimension_numbers = #tpu.dot_dimension_numbers<[1], [0], [0], [1], [0, 0, 1, 1], [], []>} : vector<16x32xf32>, vector<32x32xf32>, vector<16x32xf32> -> vector<16x32xf32>
    %467 = vector.shape_cast %466 : vector<16x32xf32> to vector<2x8x32xf32>
    %468 = vector.broadcast %277 : vector<2x8x8x1xf32> to vector<2x8x8x32xf32>
    %469 = vector.broadcast %458 : vector<1x1x1x32xf32> to vector<2x8x8x32xf32>
    %470 = arith.mulf %468, %469 : vector<2x8x8x32xf32>
    %471 = vector.broadcast %26 : vector<2x8x8x1xf32> to vector<2x8x8x32xf32>
    %472 = vector.broadcast %460 : vector<1x1x1x32xf32> to vector<2x8x8x32xf32>
    %473 = arith.mulf %471, %472 : vector<2x8x8x32xf32>
    %474 = arith.addf %470, %473 : vector<2x8x8x32xf32>
    %475 = vector.broadcast %462 : vector<1x1x1x32xf32> to vector<2x8x8x32xf32>
    %476 = arith.addf %474, %475 : vector<2x8x8x32xf32>
    %477 = vector.shape_cast %465 : vector<2x8x32xf32> to vector<2x8x1x32xf32>
    %478 = vector.shape_cast %467 : vector<2x8x32xf32> to vector<2x1x8x32xf32>
    %479 = vector.broadcast %477 : vector<2x8x1x32xf32> to vector<2x8x8x32xf32>
    %480 = vector.broadcast %478 : vector<2x1x8x32xf32> to vector<2x8x8x32xf32>
    %481 = arith.addf %479, %480 : vector<2x8x8x32xf32>
    %482 = arith.addf %481, %476 : vector<2x8x8x32xf32>
    %cst_113 = arith.constant 0.000000e+00 : f32
    %483 = vector.broadcast %cst_113 : f32 to vector<2x8x8x32xf32>
    %484 = arith.subf %483, %482 : vector<2x8x8x32xf32>
    %485 = math.exp %484 : vector<2x8x8x32xf32>
    %cst_114 = arith.constant 1.000000e+00 : f32
    %486 = vector.broadcast %cst_114 : f32 to vector<2x8x8x32xf32>
    %487 = arith.addf %486, %485 : vector<2x8x8x32xf32>
    %488 = tpu.reciprocal %487 {approx = true} : vector<2x8x8x32xf32> -> vector<2x8x8x32xf32>
    %489 = arith.mulf %482, %488 : vector<2x8x8x32xf32>
    %490 = vector.shape_cast %489 : vector<2x8x8x32xf32> to vector<128x32xf32>
    %491 = vector.extract_strided_slice %452 {offsets = [64, 0], sizes = [32, 32], strides = [1, 1]} : vector<128x32xf32> to vector<32x32xf32>
    %cst_115 = arith.constant dense<0.000000e+00> : vector<128x32xf32>
    %492 = tpu.matmul %490, %491, %cst_115 {dimension_numbers = #tpu.dot_dimension_numbers<[1], [0], [0], [1], [0, 0, 1, 1], [], []>} : vector<128x32xf32>, vector<32x32xf32>, vector<128x32xf32> -> vector<128x32xf32>
    %493 = vector.extract_strided_slice %454 {offsets = [1, 0], sizes = [1, 32], strides = [1, 1]} : vector<4x32xf32> to vector<1x32xf32>
    %494 = vector.broadcast %493 : vector<1x32xf32> to vector<128x32xf32>
    %495 = arith.addf %492, %494 : vector<128x32xf32>
    %cst_116 = arith.constant 0.000000e+00 : f32
    %496 = vector.broadcast %cst_116 : f32 to vector<128x32xf32>
    %497 = arith.subf %496, %495 : vector<128x32xf32>
    %498 = math.exp %497 : vector<128x32xf32>
    %cst_117 = arith.constant 1.000000e+00 : f32
    %499 = vector.broadcast %cst_117 : f32 to vector<128x32xf32>
    %500 = arith.addf %499, %498 : vector<128x32xf32>
    %501 = tpu.reciprocal %500 {approx = true} : vector<128x32xf32> -> vector<128x32xf32>
    %502 = arith.mulf %495, %501 : vector<128x32xf32>
    %503 = vector.extract_strided_slice %452 {offsets = [96, 0], sizes = [32, 32], strides = [1, 1]} : vector<128x32xf32> to vector<32x32xf32>
    %cst_118 = arith.constant dense<0.000000e+00> : vector<128x32xf32>
    %504 = tpu.matmul %502, %503, %cst_118 {dimension_numbers = #tpu.dot_dimension_numbers<[1], [0], [0], [1], [0, 0, 1, 1], [], []>} : vector<128x32xf32>, vector<32x32xf32>, vector<128x32xf32> -> vector<128x32xf32>
    %505 = vector.extract_strided_slice %504 {offsets = [0, 0], sizes = [128, 1], strides = [1, 1]} : vector<128x32xf32> to vector<128x1xf32>
    %506 = vector.shape_cast %505 : vector<128x1xf32> to vector<2x8x8x1xf32>
    %507 = vector.broadcast %506 : vector<2x8x8x1xf32> to vector<2x8x8x3xf32>
    %508 = arith.mulf %282, %507 : vector<2x8x8x3xf32>
    %509 = vector.broadcast %18 : vector<2x8x8x1xf32> to vector<2x8x8x3xf32>
    %510 = arith.mulf %508, %509 : vector<2x8x8x3xf32>
    %cst_119 = arith.constant dense<0.000000e+00> : vector<2x8x3xf32>
    %511 = vector.multi_reduction <add>, %510, %cst_119 [2] : vector<2x8x8x3xf32> to vector<2x8x3xf32>
    %cst_120 = arith.constant 0.00999999977 : f32
    %512 = vector.broadcast %cst_120 : f32 to vector<2x8x3xf32>
    %513 = arith.mulf %511, %512 : vector<2x8x3xf32>
    %514 = vector.broadcast %2 : vector<2x8x1xf32> to vector<2x8x3xf32>
    %515 = arith.mulf %513, %514 : vector<2x8x3xf32>
    %516 = arith.addf %267, %515 : vector<2x8x3xf32>
    %517 = vector.broadcast %1 : vector<2x8x1xf32> to vector<2x8x3xf32>
    %518 = arith.mulf %516, %517 : vector<2x8x3xf32>
    %519 = vector.broadcast %1 : vector<2x8x1xf32> to vector<2x8x32xf32>
    %520 = arith.mulf %450, %519 : vector<2x8x32xf32>
    %c0_121 = arith.constant 0 : index
    %c0_122 = arith.constant 0 : index
    %521 = vector.load %arg8[%c0_121, %c0_122] : memref<33x4xf32, #tpu.memory_space<vmem>>, vector<33x4xf32>
    %522 = vector.shape_cast %1 : vector<2x8x1xf32> to vector<16x1xf32>
    %523 = vector.shape_cast %520 : vector<2x8x32xf32> to vector<16x32xf32>
    %524 = vector.extract_strided_slice %521 {offsets = [0, 0], sizes = [32, 4], strides = [1, 1]} : vector<33x4xf32> to vector<32x4xf32>
    %cst_123 = arith.constant dense<0.000000e+00> : vector<16x4xf32>
    %525 = tpu.matmul %523, %524, %cst_123 {dimension_numbers = #tpu.dot_dimension_numbers<[1], [0], [0], [1], [0, 0, 1, 1], [], []>} : vector<16x32xf32>, vector<32x4xf32>, vector<16x4xf32> -> vector<16x4xf32>
    %526 = vector.extract_strided_slice %521 {offsets = [32, 0], sizes = [1, 4], strides = [1, 1]} : vector<33x4xf32> to vector<1x4xf32>
    %527 = vector.broadcast %526 : vector<1x4xf32> to vector<16x4xf32>
    %528 = arith.addf %525, %527 : vector<16x4xf32>
    %529 = vector.broadcast %522 : vector<16x1xf32> to vector<16x4xf32>
    %530 = arith.mulf %528, %529 : vector<16x4xf32>
    %531 = arith.subf %518, %6 : vector<2x8x3xf32>
    %532 = vector.broadcast %1 : vector<2x8x1xf32> to vector<2x8x3xf32>
    %533 = arith.mulf %531, %532 : vector<2x8x3xf32>
    %534 = vector.shape_cast %533 : vector<2x8x3xf32> to vector<16x3xf32>
    %535 = tpu.concatenate %534, %530 in 1 : vector<16x3xf32>, vector<16x4xf32> -> vector<16x7xf32>
    %c0_124 = arith.constant 0 : index
    %c0_125 = arith.constant 0 : index
    %536 = vector.load %arg9[%c0_124, %c0_125] : memref<16x7xf32, #tpu.memory_space<vmem>>, vector<16x7xf32>
    tpu.vector_store %arg9[%c0_124, %c0_125], %535 {strides = array<i32>} : memref<16x7xf32, #tpu.memory_space<vmem>>, vector<16x7xf32>,
    return
  }
  func.func @transform_0(%arg0: i32) -> (i32, i32, i32) {
    %c0_i32 = arith.constant 0 : i32
    %c0_i32_0 = arith.constant 0 : i32
    %c0_i32_1 = arith.constant 0 : i32
    return %arg0, %c0_i32, %c0_i32_0 : i32, i32, i32
  }
  func.func @transform_1(%arg0: i32) -> (i32, i32, i32, i32) {
    %c0_i32 = arith.constant 0 : i32
    %c0_i32_0 = arith.constant 0 : i32
    %c0_i32_1 = arith.constant 0 : i32
    %c0_i32_2 = arith.constant 0 : i32
    return %arg0, %c0_i32, %c0_i32_0, %c0_i32_1 : i32, i32, i32, i32
  }
  func.func @transform_2(%arg0: i32) -> (i32, i32, i32) {
    %c0_i32 = arith.constant 0 : i32
    %c0_i32_0 = arith.constant 0 : i32
    %c0_i32_1 = arith.constant 0 : i32
    %c0_i32_2 = arith.constant 0 : i32
    return %c0_i32, %c0_i32_0, %c0_i32_1 : i32, i32, i32
  }
  func.func @transform_3(%arg0: i32) -> (i32, i32, i32) {
    %c0_i32 = arith.constant 0 : i32
    %c0_i32_0 = arith.constant 0 : i32
    %c0_i32_1 = arith.constant 0 : i32
    %c0_i32_2 = arith.constant 0 : i32
    return %c0_i32, %c0_i32_0, %c0_i32_1 : i32, i32, i32
  }
  func.func @transform_4(%arg0: i32) -> (i32, i32, i32) {
    %c0_i32 = arith.constant 0 : i32
    %c0_i32_0 = arith.constant 0 : i32
    %c0_i32_1 = arith.constant 0 : i32
    %c0_i32_2 = arith.constant 0 : i32
    return %c0_i32, %c0_i32_0, %c0_i32_1 : i32, i32, i32
  }
  func.func @transform_5(%arg0: i32) -> (i32, i32, i32) {
    %c0_i32 = arith.constant 0 : i32
    %c0_i32_0 = arith.constant 0 : i32
    %c0_i32_1 = arith.constant 0 : i32
    %c0_i32_2 = arith.constant 0 : i32
    return %c0_i32, %c0_i32_0, %c0_i32_1 : i32, i32, i32
  }
  func.func @transform_6(%arg0: i32) -> (i32, i32) {
    %c0_i32 = arith.constant 0 : i32
    %c0_i32_0 = arith.constant 0 : i32
    %c0_i32_1 = arith.constant 0 : i32
    return %c0_i32, %c0_i32_0 : i32, i32
  }
  func.func @transform_7(%arg0: i32) -> (i32, i32) {
    %c0_i32 = arith.constant 0 : i32
    %c0_i32_0 = arith.constant 0 : i32
    %c0_i32_1 = arith.constant 0 : i32
    return %c0_i32, %c0_i32_0 : i32, i32
  }
  func.func @transform_8(%arg0: i32) -> (i32, i32) {
    %c0_i32 = arith.constant 0 : i32
    %c0_i32_0 = arith.constant 0 : i32
    return %arg0, %c0_i32 : i32, i32
  }
}

</mosaic_0001>

<bundles_post_ra>
// kernel: dynamics_forward.1
= control target key start
LH: loop header
LB: loop body
LE: loop exit
PB: predicated region body
PF: predicated region fallthrough
CT: control target
= control target key end

     0   :  { %s11636_s27 = smov 0   ;;  %s15624_s0 = inlined_call_operand.vmem [shape: f32[4,8,12], index: 0, kind: input, shape index: {}]   ;;  %s15625_s1 = inlined_call_operand.vmem [shape: f32[4,8,8,1], index: 1, kind: input, shape index: {}]   ;;  %s15626_s2 = inlined_call_operand.vmem [shape: f32[4,192,32], index: 2, kind: input, shape index: {}]   ;;  %s15627_s3 = inlined_call_operand.vmem [shape: f32[4,6,32], index: 3, kind: input, shape index: {}]   ;;  %s15628_s4 = inlined_call_operand.vmem [shape: f32[2,128,32], index: 4, kind: input, shape index: {}]   ;;  %s15629_s5 = inlined_call_operand.vmem [shape: f32[2,4,32], index: 5, kind: input, shape index: {}]   ;;  %s15630_s6 = inlined_call_operand.vmem [shape: f32[8,32], index: 6, kind: input, shape index: {}]   ;;  %s15631_s7 = inlined_call_operand.vmem [shape: f32[33,4], index: 7, kind: input, shape index: {}]   ;;  %s15632_s8 = inlined_call_operand.vmem [shape: f32[32,7], index: 8, kind: output, shape index: {}]  }
   0x1 LB: > { %s9269_s28 = sadd.s32 4294967295, %s11582_s27   ;;  %p9273_p0 = scmp.ge.s32.totalorder %s11582_s27, 1  ;;  %s11582_s27 = sphi %s11636_s27, %s18_s27  }
   0x2   : > { %p275_p1 = scmp.lt.s32.totalorder %s11582_s27, 3 }
   0x4   : > { %p276_p2 = pnand %p9273_p0, %p275_p1 }
   0x6   : > { %279 = sbr.rel (%p276_p2) target bundleno = 6424 (0x1918), region = 52 }
   0xd   : > { %s9274_s29 = sshll.u32 %s9269_s28, 1  ;;  %v11584_v0 = vmov 7   ;;  %s11585_s12 = smov 123   ;;  %v11659_v3 = vld [vmem:[%s15630_s6] sm:$0xff]  ;;  %vm377_vm0 = vcmask 1046528   ;;  %v366_v8 = vlaneseq  ;;  %vm682_vm1 = vcmask 23552  }
   0xe   : > { %10694 = vset.pattern.permute.xlu0 %v11584_v0  ;;  %p316_p3 = scmp.lt.s32.totalorder %s9274_s29, 3  ;;  %9871 = vmatprep.subr.msk.mxu0 %vm377_vm0, %v11659_v3  ;;  %s11586_s15 = smov 125   ;;  %v11587_v9 = vmov 1966171168   ;;  %vm363_vm2 = vcmask 31744   ;;  %vm370_vm3 = vcmask 56320  }
   0xf   : > { %9872 = vmatpush3.msk.msra.mxu0 %vm377_vm0, %v11659_v3  ;;  %v474_v10 = vunpack.c.l.s4 %v11587_v9  ;;  %v11675_v11 = vshrl.u32 %v366_v8, 7  ;;  %vm804_vm4 = vcmask 261120   ;;  %vm1878_vm5 = vcmask 1041409   ;;  %s11590_s20 = smov 3  }
  0x10   : > { %s16267_s29 = smov (!%p316_p3, %s9274_s29), 3  ;;  %vm1880_vm6 = vcmask 1042434   ;;  %vm1882_vm7 = vcmask 1043459   ;;  %vm1884_vm8 = vcmask 1044484   ;;  %vm1886_vm9 = vcmask 1045509  }
  0x11   : > { %s9275_s30 = sshll.u32 %s16267_s29, 3  ;;  %v475_v12 = vunpack.c.0.s8 %v474_v10  ;;  %v11686_v17 = vsub.s32 0, %v11675_v11  ;;  %s9557_s9 = sshll.u32 %s16267_s29, 6  ;;  %vm1888_vm10 = vcmask 1046534   ;;  %vm1890_vm11 = vcmask 1047559  }
  0x12   : > { %s11652_s11 = scalar_lea.vmem %s15624_s0, %s9275_s30  ;;  %s12120_s13 = scalar_lea.vmem %s15625_s1, %s9557_s9 }
  0x13   : > { %v334_v1 = vld [vmem:[%s11652_s11] sm:$0xff]  ;;  %v335_v2 = vld [vmem:[%s11652_s11 + $0x8] sm:$0xff]  ;;  %v11678_v13 = vsub.s32 %v475_v12, %v11675_v11  ;;  %s332_s23 = scalar_lea.vmem %s15632_s8, %s9275_s30 }
  0x14   : > { %338 = vperm.xlu0 %10694, %v334_v1   ;;  %357 = vrot.lane.b32.xlu1 %v334_v1, %s11585_s12 }
  0x15   : > { %15833 = vst [vmem:[#allocation6_spill] sm:$0xff] %v11678_v13 }
  0x18   : > { %343 = vperm.xlu0 %10694, %v335_v2  }
  0x93   : > { %v11663_v4 = vpop.permute.xlu0 %338 }
  0x94   : > { %15829 = vst [vmem:[#allocation2_spill] sm:$0xff] %v11663_v4  ;;  %v11666_v5 = vmul.f32 %v11663_v4, %v334_v1 }
  0x96   : > { %15830 = vst [vmem:[#allocation3_spill] sm:$0xff] %v11666_v5  ;;  %351 = vrot.lane.b32.xlu1 %v11666_v5, %s11586_s15  ;;  %v479_v14 = vrot.slane %v11666_v5, %v11678_v13  ;;  %v472_v15 = vcombine.high %v11666_v5, %v11666_v5 }
  0x97   : > { %v11669_v6 = vpop.permute.xlu0 %343 }
  0x98   : > { %15831 = vst [vmem:[#allocation4_spill] sm:$0xff] %v11669_v6  ;;  %v11672_v7 = vmul.f32 %v11669_v6, %v335_v2  ;;  %v495_v16 = vrot.slane %v479_v14, %v11678_v13  ;;  %v487_v18 = vcombine.high %v479_v14, %v479_v14  ;;  %v486_v19 = vrot.slane %v472_v15, %v11678_v13 }
  0x9a   : > { %15832 = vst [vmem:[#allocation5_spill] sm:$0xff] %v11672_v7  ;;  %359 = vrot.lane.b32.xlu1 %v335_v2, %s11585_s12  ;;  %353 = vrot.lane.b32.xlu0 %v11672_v7, %s11586_s15  ;;  %v573_v20 = vrot.slane %v495_v16, %v11686_v17  ;;  %v517_v21 = vcombine.high %v495_v16, %v495_v16 }
  0x9b   : > { %v509_v22 = vrot.slane %v487_v18, %v11678_v13  ;;  %v502_v23 = vrot.slane %v486_v19, %v11678_v13  ;;  %v488_v24 = vcombine.high %v486_v19, %v486_v19  ;;  %v528_v34 = vrot.slane %v11672_v7, %v11678_v13 }
  0x9c   : > { %v11693_v25 = vsub.f32 %v573_v20, %v11666_v5  ;;  %v581_v26 = vrot.slane %v517_v21, %v11686_v17  ;;  %v521_v40 = vcombine.high %v11672_v7, %v11672_v7 }
  0x9d   : > { %v519_v27 = vcombine.high %v509_v22, %v509_v22  ;;  %v577_v28 = vrot.slane %v509_v22, %v11686_v17  ;;  %v516_v29 = vrot.slane %v488_v24, %v11678_v13  ;;  %v518_v30 = vcombine.high %v502_v23, %v502_v23 }
  0x9e   : > { %15834 = vst [vmem:[#allocation7_spill] sm:$0xff] %v11693_v25  ;;  %v666_v31 = vmul.f32 %v11693_v25, %v11693_v25  ;;  %v11701_v32 = vsub.f32 %v581_v26, %v11666_v5  ;;  %v589_v36 = vrot.slane %v502_v23, %v11686_v17  ;;  %v536_v44 = vcombine.high %v528_v34, %v528_v34 }
  0x9f   : > { %v585_v33 = vrot.slane %v519_v27, %v11686_v17  ;;  %v11707_v35 = vsub.f32 %v577_v28, %v11666_v5  ;;  %v593_v37 = vrot.slane %v516_v29, %v11686_v17  ;;  %v597_v38 = vrot.slane %v518_v30, %v11686_v17 }
  0xa0   : > { %15835 = vst [vmem:[#allocation8_spill] sm:$0xff] %v11701_v32  ;;  %v520_v39 = vcombine.high %v516_v29, %v516_v29  ;;  %v683_v41 = vsel %vm682_vm1, %v666_v31, 0.0  ;;  %v668_v42 = vmul.f32 %v11701_v32, %v11701_v32  ;;  %v11723_v46 = vsub.f32 %v589_v36, %v11666_v5 }
  0xa1   : > { %15836 = vst [vmem:[#allocation9_spill] sm:$0xff] %v11707_v35  ;;  %v11718_v43 = vsub.f32 %v585_v33, %v11666_v5  ;;  %v667_v45 = vmul.f32 %v11707_v35, %v11707_v35  ;;  %v544_v47 = vrot.slane %v528_v34, %v11678_v13  ;;  %v11727_v48 = vsub.f32 %v593_v37, %v11666_v5  ;;  %v471_v35 = vld [vmem:[%s12120_s13 + $0x78] sm:$0xff] }
  0xa2   : > { %15838 = vst [vmem:[#allocation11_spill] sm:$0xff] %v11723_v46  ;;  %v11730_v49 = vsub.f32 %v597_v38, %v11666_v5  ;;  %v601_v50 = vrot.slane %v520_v39, %v11686_v17  ;;  %v689_v51 = vsel %vm682_vm1, %v668_v42, 0.0  ;;  %v558_v53 = vrot.slane %v536_v44, %v11678_v13 }
  0xa3   : > { %15837 = vst [vmem:[#allocation10_spill] sm:$0xff] %v11718_v43  ;;  %15839 = vst [vmem:[#allocation12_spill] sm:$0xff] %v11727_v48  ;;  %v669_v52 = vmul.f32 %v11718_v43, %v11718_v43  ;;  %v535_v54 = vrot.slane %v521_v40, %v11678_v13  ;;  %v686_v55 = vsel %vm682_vm1, %v667_v45, 0.0  ;;  %v670_v56 = vmul.f32 %v11723_v46, %v11723_v46 }
  0xa4   : > { %15840 = vst [vmem:[#allocation13_spill] sm:$0xff] %v11730_v49  ;;  %v605_v57 = vrot.slane %v544_v47, %v11686_v17  ;;  %v566_v58 = vcombine.high %v544_v47, %v544_v47  ;;  %v671_v59 = vmul.f32 %v11727_v48, %v11727_v48  ;;  %v672_v60 = vmul.f32 %v11730_v49, %v11730_v49 }
  0xa5   : > { %v11747_v61 = vsub.f32 %v601_v50, %v11666_v5  ;;  %v692_v62 = vsel %vm682_vm1, %v669_v52, 0.0  ;;  %v609_v63 = vrot.slane %v558_v53, %v11686_v17  ;;  %v568_v0 = vcombine.high %v558_v53, %v558_v53 }
  0xa6   : > { %v537_v1 = vcombine.high %v535_v54, %v535_v54  ;;  %v695_v2 = vsel %vm682_vm1, %v670_v56, 0.0  ;;  %v11753_v8 = vsub.f32 %v605_v57, %v11672_v7  ;;  %v613_v9 = vrot.slane %v566_v58, %v11686_v17  ;;  %v779_v56 = vld [vmem:[%s15626_s2] sm:$0xff]  ;;  %v780_v57 = vld [vmem:[%s15626_s2 + $0x8] sm:$0xff] }
  0xa7   : > { %15841 = vst [vmem:[#allocation14_spill] sm:$0xff] %v11747_v61  ;;  %v551_v10 = vrot.slane %v535_v54, %v11678_v13  ;;  %v698_v12 = vsel %vm682_vm1, %v671_v59, 0.0  ;;  %v673_v14 = vmul.f32 %v11747_v61, %v11747_v61  ;;  %v701_v15 = vsel %vm682_vm1, %v672_v60, 0.0  ;;  %v783_v58 = vld [vmem:[%s15626_s2 + $0x20] sm:$0xff]  ;;  %v784_v60 = vld [vmem:[%s15626_s2 + $0x28] sm:$0xff] }
  0xa8   : > { %15842 = vst [vmem:[#allocation15_spill] sm:$0xff] %v11753_v8  ;;  %v11762_v16 = vsub.f32 %v609_v63, %v11672_v7  ;;  %v617_v18 = vrot.slane %v568_v0, %v11686_v17  ;;  %v565_v19 = vrot.slane %v537_v1, %v11678_v13  ;;  %v674_v20 = vmul.f32 %v11753_v8, %v11753_v8  ;;  %v358_v63 = vpop.permute.xlu1 %357 }
  0xa9   : > { %v11769_v21 = vsub.f32 %v613_v9, %v11672_v7  ;;  %v621_v22 = vrot.slane %v551_v10, %v11686_v17  ;;  %v567_v23 = vcombine.high %v551_v10, %v551_v10  ;;  %v704_v24 = vsel %vm682_vm1, %v673_v14, 0.0 }
  0xaa   : > { %15843 = vst [vmem:[#allocation16_spill] sm:$0xff] %v11762_v16  ;;  %v675_v26 = vmul.f32 %v11762_v16, %v11762_v16  ;;  %v11776_v27 = vsub.f32 %v617_v18, %v11672_v7  ;;  %v625_v28 = vrot.slane %v565_v19, %v11686_v17  ;;  %v569_v29 = vcombine.high %v565_v19, %v565_v19  ;;  %v9421_v18 = vld [vmem:[%s15627_s3 + $0x10] sm:$0x3f]  ;;  %v9472_v19 = vld [vmem:[%s15627_s3 + $0x18] sm:$0x3f] }
  0xab   : > { %15844 = vst [vmem:[#allocation17_spill] sm:$0xff] %v11769_v21  ;;  %v707_v30 = vsel %vm682_vm1, %v674_v20, 0.0  ;;  %v676_v31 = vmul.f32 %v11769_v21, %v11769_v21  ;;  %v11783_v33 = vsub.f32 %v621_v22, %v11672_v7  ;;  %v629_v34 = vrot.slane %v567_v23, %v11686_v17 }
  0xac   : > { %15845 = vst [vmem:[#allocation18_spill] sm:$0xff] %v11776_v27  ;;  %v710_v36 = vsel %vm682_vm1, %v675_v26, 0.0  ;;  %v677_v37 = vmul.f32 %v11776_v27, %v11776_v27  ;;  %v11790_v38 = vsub.f32 %v625_v28, %v11672_v7  ;;  %v633_v39 = vrot.slane %v569_v29, %v11686_v17 }
  0xad   : > { %15846 = vst [vmem:[#allocation19_spill] sm:$0xff] %v11783_v33  ;;  %v713_v40 = vsel %vm682_vm1, %v676_v31, 0.0  ;;  %v11797_v42 = vsub.f32 %v629_v34, %v11672_v7  ;;  %v10407_v59 = vpack.c.bf16 %v780_v57, %v779_v56  ;;  %v11831_v14 = vsub.s32 5, %v11675_v11 }
  0xae   : > { %15847 = vst [vmem:[#allocation20_spill] sm:$0xff] %v11790_v38  ;;  %v716_v44 = vsel %vm682_vm1, %v677_v37, 0.0  ;;  %v679_v45 = vmul.f32 %v11790_v38, %v11790_v38  ;;  %v11803_v47 = vsub.f32 %v633_v39, %v11672_v7 }
  0xaf   : > { %15848 = vst [vmem:[#allocation21_spill] sm:$0xff] %v11797_v42  ;;  %10408 = vmatprep.subr.bf16.mxu1 %v10407_v59  ;;  %v11849_v23 = vrot.slane %v9421_v18, %v11831_v14 }
  0xb0   : > { %15849 = vst [vmem:[#allocation22_spill] sm:$0xff] %v11803_v47  ;;  %v722_v52 = vsel %vm682_vm1, %v679_v45, 0.0  ;;  %v681_v53 = vmul.f32 %v11803_v47, %v11803_v47  ;;  %10410 = vmatpush3.bf16.msra.mxu1 %v10407_v59 }
  0xb1   : > { %15851 = vst [vmem:[#allocation24_spill] sm:$0xff] %v11849_v23 }
  0xb9   : > { %684 = vadd.xlane.f32.xlu0 %v683_v41  ;;  %v678_v41 = vmul.f32 %v11783_v33, %v11783_v33 }
  0xbb   : > { %v719_v50 = vsel %vm682_vm1, %v678_v41, 0.0 }
  0xbd   : > { %690 = vadd.xlane.f32.xlu0 %v689_v51  ;;  %v680_v51 = vmul.f32 %v11797_v42, %v11797_v42 }
  0xbe   : > { %687 = vadd.xlane.f32.xlu1 %v686_v55  ;;  %v728_v55 = vsel %vm682_vm1, %v681_v53, 0.0 }
  0xbf   : > { %v725_v54 = vsel %vm682_vm1, %v680_v51, 0.0 }
  0xc1   : > { %693 = vadd.xlane.f32.xlu0 %v692_v62  ;;  %v10415_v62 = vpack.c.bf16 %v784_v60, %v783_v58 }
  0xc2   : > { %696 = vadd.xlane.f32.xlu1 %v695_v2 }
  0xc3   : > { %10416 = vmatprep.subr.bf16.mxu0 %v10415_v62 }
  0xc5   : > { %699 = vadd.xlane.f32.xlu0 %v698_v12  ;;  %v11828_v12 = vsub.s32 4, %v11675_v11 }
  0xc6   : > { %702 = vadd.xlane.f32.xlu1 %v701_v15  ;;  %v9334_v15 = vld [vmem:[%s15627_s3 + $0x8] sm:$0x3f] }
  0xc7   : > { %15850 = vst [vmem:[#allocation23_spill] sm:$0xff] %v11828_v12  ;;  %v11843_v20 = vrot.slane %v9334_v15, %v11828_v12  ;;  %v11846_v22 = vrot.slane %v9334_v15, %v11831_v14 }
  0xc9   : > { %705 = vadd.xlane.f32.xlu0 %v704_v24  ;;  %v11852_v24 = vrot.slane %v9472_v19, %v11831_v14 }
  0xca   : > { %708 = vadd.xlane.f32.xlu1 %v707_v30 }
  0xcb   : > { %15852 = vst [vmem:[#allocation25_spill] sm:$0xff] %v11852_v24 }
  0xcd   : > { %711 = vadd.xlane.f32.xlu0 %v710_v36 }
  0xce   : > { %714 = vadd.xlane.f32.xlu1 %v713_v40 }
  0xd1   : > { %717 = vadd.xlane.f32.xlu0 %v716_v44 }
  0xd2   : > { %720 = vadd.xlane.f32.xlu1 %v719_v50 }
  0xd5   : > { %723 = vadd.xlane.f32.xlu0 %v722_v52 }
  0xd6   : > { %726 = vadd.xlane.f32.xlu1 %v725_v54 }
  0xd9   : > { %729 = vadd.xlane.f32.xlu0 %v728_v55 }
 0x108   : > { %v352_v0 = vpop.permute.xlu1 %351 }
 0x109   : > { %v364_v1 = vsel %vm363_vm2, %v352_v0, %v358_v63 }
 0x10a   : > { %9873 = vmatprep.mubr.msk.f32.mxu0 %vm370_vm3, %v364_v1 }
 0x10c   : > { %v360_v2 = vpop.permute.xlu1 %359  ;;  %v354_v9 = vpop.permute.xlu0 %353 }
 0x10d   : > { %v365_v10 = vsel %vm363_vm2, %v354_v9, %v360_v2 }
 0x10e   : > { %9874 = vmatmul.mubr.msk.f32.vlgmr.msra.gmra.mrb[0].mxu0 %vm370_vm3, %v365_v10 }
 0x10f   : > { %10418 = vmatpush3.bf16.msra.mxu0 %v10415_v62 }
 0x146   : > { %v11854_v26 = vpop.xlane.xlu0 %684 }
 0x147   : > { %15853 = vst [vmem:[#allocation26_spill] sm:$0xff] %v11854_v26  ;;  %v2347_v28 = vmul.f32 %v11843_v20, %v11854_v26  ;;  %v2367_v29 = vmul.f32 %v11846_v22, %v11854_v26  ;;  %v11862_v30 = vmul.f32 %v11849_v23, %v11854_v26  ;;  %v11868_v34 = vmul.f32 %v11852_v24, %v11854_v26 }
 0x149   : > { %15854 = vst [vmem:[#allocation27_spill] sm:$0xff] %v11862_v30  ;;  %v11864_v31 = vadd.f32 %v2367_v29, %v2347_v28  ;;  %15855 = vst [vmem:[#allocation28_spill] sm:$0xff] %v11868_v34  ;;  %v786_v30 = vld [vmem:[%s15626_s2 + $0x38] sm:$0xff] }
 0x14a   : > { %v11870_v36 = vpop.xlane.xlu0 %690 }
 0x14b   : > { %15856 = vst [vmem:[#allocation29_spill] sm:$0xff] %v11870_v36  ;;  %v11872_v37 = vpop.xlane.xlu1 %687  ;;  %v2349_v41 = vmul.f32 %v11843_v20, %v11870_v36  ;;  %v2369_v44 = vmul.f32 %v11846_v22, %v11870_v36 }
 0x14c   : > { %15857 = vst [vmem:[#allocation30_spill] sm:$0xff] %v11872_v37  ;;  %v2348_v39 = vmul.f32 %v11843_v20, %v11872_v37  ;;  %v2368_v40 = vmul.f32 %v11846_v22, %v11872_v37 }
 0x14d   : > { %v11888_v52 = vadd.f32 %v2369_v44, %v2349_v41 }
 0x14e   : > { %v11882_v45 = vpop.xlane.xlu0 %693  ;;  %v11884_v50 = vadd.f32 %v2368_v40, %v2348_v39 }
 0x14f   : > { %15858 = vst [vmem:[#allocation31_spill] sm:$0xff] %v11882_v45  ;;  %v11886_v51 = vpop.xlane.xlu1 %696  ;;  %15860 = vst [vmem:[#allocation33_spill] sm:$0xff] %v11888_v52  ;;  %v2350_v53 = vmul.f32 %v11843_v20, %v11882_v45  ;;  %v2370_v54 = vmul.f32 %v11846_v22, %v11882_v45 }
 0x150   : > { %15859 = vst [vmem:[#allocation32_spill] sm:$0xff] %v11886_v51  ;;  %v2351_v56 = vmul.f32 %v11843_v20, %v11886_v51  ;;  %v2371_v57 = vmul.f32 %v11846_v22, %v11886_v51 }
 0x151   : > { %v11902_v59 = vadd.f32 %v2370_v54, %v2350_v53 }
 0x152   : > { %v11894_v55 = vpop.xlane.xlu0 %699  ;;  %v11904_v60 = vadd.f32 %v2371_v57, %v2351_v56 }
 0x153   : > { %15861 = vst [vmem:[#allocation34_spill] sm:$0xff] %v11894_v55  ;;  %v11900_v58 = vpop.xlane.xlu1 %702  ;;  %15863 = vst [vmem:[#allocation36_spill] sm:$0xff] %v11902_v59  ;;  %v2352_v62 = vmul.f32 %v11843_v20, %v11894_v55  ;;  %v2372_v63 = vmul.f32 %v11846_v22, %v11894_v55 }
 0x154   : > { %15862 = vst [vmem:[#allocation35_spill] sm:$0xff] %v11900_v58  ;;  %15864 = vst [vmem:[#allocation37_spill] sm:$0xff] %v11904_v60  ;;  %v2353_v1 = vmul.f32 %v11843_v20, %v11900_v58  ;;  %v2373_v2 = vmul.f32 %v11846_v22, %v11900_v58 }
 0x155   : > { %v11918_v10 = vadd.f32 %v2372_v63, %v2352_v62 }
 0x156   : > { %v11910_v0 = vpop.xlane.xlu0 %705  ;;  %v11920_v15 = vadd.f32 %v2373_v2, %v2353_v1 }
 0x157   : > { %15865 = vst [vmem:[#allocation38_spill] sm:$0xff] %v11910_v0  ;;  %v11916_v9 = vpop.xlane.xlu1 %708  ;;  %15867 = vst [vmem:[#allocation40_spill] sm:$0xff] %v11918_v10  ;;  %v2354_v18 = vmul.f32 %v11843_v20, %v11910_v0  ;;  %v2374_v19 = vmul.f32 %v11846_v22, %v11910_v0 }
 0x158   : > { %15866 = vst [vmem:[#allocation39_spill] sm:$0xff] %v11916_v9  ;;  %15868 = vst [vmem:[#allocation41_spill] sm:$0xff] %v11920_v15  ;;  %v2355_v29 = vmul.f32 %v11843_v20, %v11916_v9  ;;  %v2375_v39 = vmul.f32 %v11846_v22, %v11916_v9 }
 0x159   : > { %v11934_v41 = vadd.f32 %v2374_v19, %v2354_v18 }
 0x15a   : > { %v11926_v28 = vpop.xlane.xlu0 %711  ;;  %v11936_v44 = vadd.f32 %v2375_v39, %v2355_v29 }
 0x15b   : > { %15869 = vst [vmem:[#allocation42_spill] sm:$0xff] %v11926_v28  ;;  %v11932_v40 = vpop.xlane.xlu1 %714  ;;  %15871 = vst [vmem:[#allocation44_spill] sm:$0xff] %v11934_v41  ;;  %v2356_v53 = vmul.f32 %v11843_v20, %v11926_v28  ;;  %v2376_v54 = vmul.f32 %v11846_v22, %v11926_v28 }
 0x15c   : > { %15870 = vst [vmem:[#allocation43_spill] sm:$0xff] %v11932_v40  ;;  %15872 = vst [vmem:[#allocation45_spill] sm:$0xff] %v11936_v44  ;;  %v2357_v57 = vmul.f32 %v11843_v20, %v11932_v40  ;;  %v2377_v62 = vmul.f32 %v11846_v22, %v11932_v40 }
 0x15d   : > { %v11950_v1 = vadd.f32 %v2376_v54, %v2356_v53  ;;  %v781_v53 = vld [vmem:[%s15626_s2 + $0x10] sm:$0xff]  ;;  %v782_v54 = vld [vmem:[%s15626_s2 + $0x18] sm:$0xff] }
 0x15e   : > { %v11942_v56 = vpop.xlane.xlu0 %717  ;;  %v11952_v2 = vadd.f32 %v2377_v62, %v2357_v57  ;;  %v785_v57 = vld [vmem:[%s15626_s2 + $0x30] sm:$0xff]  ;;  %v10411_v62 = vpack.c.bf16 %v782_v54, %v781_v53  ;;  %v11988_v54 = vmul.f32 %v11849_v23, %v11872_v37 }
 0x15f   : > { %15873 = vst [vmem:[#allocation46_spill] sm:$0xff] %v11942_v56  ;;  %v11948_v63 = vpop.xlane.xlu1 %720  ;;  %15875 = vst [vmem:[#allocation48_spill] sm:$0xff] %v11950_v1  ;;  %v2358_v18 = vmul.f32 %v11843_v20, %v11942_v56  ;;  %v2378_v19 = vmul.f32 %v11846_v22, %v11942_v56  ;;  %v10419_v7 = vpack.c.bf16 %v786_v30, %v785_v57 }
 0x160   : > { %15874 = vst [vmem:[#allocation47_spill] sm:$0xff] %v11948_v63  ;;  %15876 = vst [vmem:[#allocation49_spill] sm:$0xff] %v11952_v2  ;;  %v2359_v29 = vmul.f32 %v11843_v20, %v11948_v63  ;;  %v2379_v39 = vmul.f32 %v11846_v22, %v11948_v63  ;;  %10412 = vmatprep.subr.bf16.mxu1 %v10411_v62  ;;  %v11992_v30 = vmul.f32 %v11852_v24, %v11872_v37 }
 0x161   : > { %v11976_v42 = vadd.f32 %v2378_v19, %v2358_v18  ;;  %10420 = vmatprep.subr.bf16.mxu0 %v10419_v7  ;;  %10414 = vmatpush3.bf16.msra.mxu1 %v10411_v62  ;;  %15881 = vst [vmem:[#allocation54_spill] sm:$0xff] %v11988_v54  ;;  %v11996_v18 = vmul.f32 %v11849_v23, %v11870_v36 }
 0x162   : > { %v11962_v34 = vpop.xlane.xlu0 %723  ;;  %v11978_v5 = vadd.f32 %v2379_v39, %v2359_v29  ;;  %10422 = vmatpush3.bf16.msra.mxu0 %v10419_v7  ;;  %15882 = vst [vmem:[#allocation55_spill] sm:$0xff] %v11992_v30  ;;  %v12000_v19 = vmul.f32 %v11852_v24, %v11870_v36  ;;  %v12004_v7 = vmul.f32 %v11849_v23, %v11886_v51 }
 0x163   : > { %15877 = vst [vmem:[#allocation50_spill] sm:$0xff] %v11962_v34  ;;  %15878 = vst [vmem:[#allocation51_spill] sm:$0xff] %v11976_v42  ;;  %v2360_v38 = vmul.f32 %v11843_v20, %v11962_v34  ;;  %v2380_v47 = vmul.f32 %v11846_v22, %v11962_v34  ;;  %v12016_v29 = vmul.f32 %v11852_v24, %v11882_v45 }
 0x164   : > { %15879 = vst [vmem:[#allocation52_spill] sm:$0xff] %v11978_v5  ;;  %15883 = vst [vmem:[#allocation56_spill] sm:$0xff] %v11996_v18  ;;  %v12020_v39 = vmul.f32 %v11849_v23, %v11900_v58  ;;  %v12024_v57 = vmul.f32 %v11852_v24, %v11900_v58  ;;  %v12028_v62 = vmul.f32 %v11849_v23, %v11894_v55 }
 0x165   : > { %v11984_v53 = vadd.f32 %v2380_v47, %v2360_v38  ;;  %15884 = vst [vmem:[#allocation57_spill] sm:$0xff] %v12000_v19  ;;  %15885 = vst [vmem:[#allocation58_spill] sm:$0xff] %v12004_v7  ;;  %v12008_v38 = vmul.f32 %v11852_v24, %v11886_v51  ;;  %v12012_v47 = vmul.f32 %v11849_v23, %v11882_v45 }
 0x166   : > { %15888 = vst [vmem:[#allocation61_spill] sm:$0xff] %v12016_v29  ;;  %15889 = vst [vmem:[#allocation62_spill] sm:$0xff] %v12020_v39  ;;  %v12032_v7 = vmul.f32 %v11852_v24, %v11894_v55  ;;  %v12040_v18 = vmul.f32 %v11852_v24, %v11910_v0  ;;  %v12044_v39 = vmul.f32 %v11849_v23, %v11916_v9 }
 0x167   : > { %15880 = vst [vmem:[#allocation53_spill] sm:$0xff] %v11984_v53  ;;  %15886 = vst [vmem:[#allocation59_spill] sm:$0xff] %v12008_v38 }
 0x168   : > { %15887 = vst [vmem:[#allocation60_spill] sm:$0xff] %v12012_v47  ;;  %15890 = vst [vmem:[#allocation63_spill] sm:$0xff] %v12024_v57  ;;  %v12036_v47 = vmul.f32 %v11849_v23, %v11910_v0  ;;  %v12048_v57 = vmul.f32 %v11852_v24, %v11916_v9 }
 0x169   : > { %15891 = vst [vmem:[#allocation64_spill] sm:$0xff] %v12028_v62  ;;  %15892 = vst [vmem:[#allocation65_spill] sm:$0xff] %v12032_v7  ;;  %v12052_v62 = vmul.f32 %v11849_v23, %v11926_v28  ;;  %v12056_v7 = vmul.f32 %v11852_v24, %v11926_v28 }
 0x16a   : > { %15893 = vst [vmem:[#allocation66_spill] sm:$0xff] %v12036_v47  ;;  %15894 = vst [vmem:[#allocation67_spill] sm:$0xff] %v12040_v18  ;;  %v12060_v47 = vmul.f32 %v11849_v23, %v11932_v40  ;;  %v12064_v18 = vmul.f32 %v11852_v24, %v11932_v40 }
 0x16b   : > { %15895 = vst [vmem:[#allocation68_spill] sm:$0xff] %v12044_v39  ;;  %15896 = vst [vmem:[#allocation69_spill] sm:$0xff] %v12048_v57  ;;  %v12068_v39 = vmul.f32 %v11849_v23, %v11942_v56  ;;  %v12072_v57 = vmul.f32 %v11852_v24, %v11942_v56 }
 0x16c   : > { %15897 = vst [vmem:[#allocation70_spill] sm:$0xff] %v12052_v62  ;;  %15898 = vst [vmem:[#allocation71_spill] sm:$0xff] %v12056_v7  ;;  %v12076_v62 = vmul.f32 %v11849_v23, %v11948_v63  ;;  %v12080_v7 = vmul.f32 %v11852_v24, %v11948_v63 }
 0x16d   : > { %15899 = vst [vmem:[#allocation72_spill] sm:$0xff] %v12060_v47  ;;  %15900 = vst [vmem:[#allocation73_spill] sm:$0xff] %v12064_v18  ;;  %v12084_v47 = vmul.f32 %v11849_v23, %v11962_v34  ;;  %v12088_v18 = vmul.f32 %v11852_v24, %v11962_v34 }
 0x16e   : > { %15901 = vst [vmem:[#allocation74_spill] sm:$0xff] %v12068_v39  ;;  %15902 = vst [vmem:[#allocation75_spill] sm:$0xff] %v12072_v57  ;;  %v368_v39 = vsub.s32 7, %v11675_v11 }
 0x16f   : > { %15903 = vst [vmem:[#allocation76_spill] sm:$0xff] %v12076_v62  ;;  %15904 = vst [vmem:[#allocation77_spill] sm:$0xff] %v12080_v7  ;;  %v470_v7 = vld [vmem:[%s12120_s13 + $0x70] sm:$0xff] }
 0x170   : > { %15905 = vst [vmem:[#allocation78_spill] sm:$0xff] %v12084_v47  ;;  %15906 = vst [vmem:[#allocation79_spill] sm:$0xff] %v12088_v18  ;;  %v369_v57 = vrot.slane %v11659_v3, %v368_v39  ;;  %v787_v3 = vld [vmem:[%s15626_s2 + $0x40] sm:$0xff]  ;;  %v469_v47 = vld [vmem:[%s12120_s13 + $0x68] sm:$0xff] }
 0x171   : > { %v465_v18 = vld [vmem:[%s12120_s13 + $0x48] sm:$0xff] }
 0x1e1   : > { %v9875_v29 = vpop.f32.mrb[0].mxu0 }
 0x1e2   : > { %v447_v38 = vpop.f32.mrb[1].mxu0  ;;  %v12094_v19 = vadd.f32 %v9875_v29, %v369_v57  ;;  %v789_v29 = vld [vmem:[%s15626_s2 + $0x50] sm:$0xff] }
 0x1e3   : > { %v12092_v62 = vadd.f32 %v447_v38, %v369_v57  ;;  %v788_v38 = vld [vmem:[%s15626_s2 + $0x48] sm:$0xff]  ;;  %v790_v57 = vld [vmem:[%s15626_s2 + $0x58] sm:$0xff] }
 0x1e4   : > { %v10423_v39 = vpack.c.bf16 %v788_v38, %v787_v3  ;;  %v10427_v24 = vpack.c.bf16 %v790_v57, %v789_v29  ;;  %v456_v3 = vld [vmem:[%s12120_s13] sm:$0xff]  ;;  %v15642_v38 = vmov 0   ;;  %v457_v29 = vld [vmem:[%s12120_s13 + $0x8] sm:$0xff] }
 0x1e5   : > { %9884 = vmatprep.mubr.msk.f32.mxu1 %vm804_vm4, %v12092_v62  ;;  %9895 = vmatprep.mubr.msk.f32.mxu0 %vm804_vm4, %v12092_v62  ;;  %v464_v57 = vld [vmem:[%s12120_s13 + $0x40] sm:$0xff] }
 0x1e6   : > { %9885 = vmatmul.mubr.msk.f32.vlgmr.msra.gmra.mrb[0].mxu1 %vm804_vm4, %v12094_v19  ;;  %9896 = vmatmul.mubr.msk.f32.vlgmr.msra.gmra.mrb[2].mxu0 %vm804_vm4, %v12094_v19 }
 0x1e7   : > { %10424 = vmatprep.subr.bf16.mxu1 %v10423_v39  ;;  %10695 = vset.pattern.permute.xlu1 %v15642_v38 }
 0x1e8   : > { %10426 = vmatpush3.bf16.msra.mxu1 %v10423_v39  ;;  %10696 = vset.pattern.permute.xlu0 %v15642_v38  ;;  %v468_v39 = vld [vmem:[%s12120_s13 + $0x60] sm:$0xff]  ;;  %v459_v38 = vld [vmem:[%s12120_s13 + $0x18] sm:$0xff] }
 0x1e9   : > { %10428 = vmatprep.subr.bf16.mxu1 %v10427_v24  ;;  %1640 = vperm.xlu1 %10695, %v456_v3   ;;  %v466_v3 = vld [vmem:[%s12120_s13 + $0x50] sm:$0xff] }
 0x1ea   : > { %1645 = vperm.xlu0 %10696, %v457_v29   ;;  %v460_v29 = vld [vmem:[%s12120_s13 + $0x20] sm:$0xff] }
 0x1ec   : > { %10430 = vmatpush3.bf16.msra.mxu1 %v10427_v24  ;;  %v458_v24 = vld [vmem:[%s12120_s13 + $0x10] sm:$0xff] }
 0x1ed   : > { %1650 = vperm.xlu1 %10695, %v458_v24   ;;  %v467_v24 = vld [vmem:[%s12120_s13 + $0x58] sm:$0xff] }
 0x1ee   : > { %1700 = vperm.xlu0 %10696, %v468_v39   ;;  %v12139_v39 = vld [vmem:[%s15627_s3] sm:$0x3f] }
 0x1f1   : > { %1680 = vperm.xlu1 %10695, %v464_v57   ;;  %v461_v57 = vld [vmem:[%s12120_s13 + $0x28] sm:$0xff] }
 0x1f2   : > { %1705 = vperm.xlu0 %10696, %v469_v47   ;;  %v462_v47 = vld [vmem:[%s12120_s13 + $0x30] sm:$0xff] }
 0x1f5   : > { %1685 = vperm.xlu1 %10695, %v465_v18   ;;  %v12144_v18 = vrot.slane %v12139_v39, %v11828_v12 }
 0x1f6   : > { %1710 = vperm.xlu0 %10696, %v470_v7   ;;  %v12148_v7 = vrot.slane %v12139_v39, %v11831_v14 }
 0x1f7   : > { %v967_v23 = vmul.f32 %v12144_v18, %v11870_v36  ;;  %v968_v30 = vmul.f32 %v12144_v18, %v11882_v45  ;;  %v970_v21 = vmul.f32 %v12144_v18, %v11894_v55  ;;  %v971_v27 = vmul.f32 %v12144_v18, %v11900_v58 }
 0x1f8   : > { %v987_v14 = vmul.f32 %v12148_v7, %v11870_v36  ;;  %v988_v54 = vmul.f32 %v12148_v7, %v11882_v45  ;;  %v989_v12 = vmul.f32 %v12148_v7, %v11886_v51  ;;  %v990_v33 = vmul.f32 %v12148_v7, %v11894_v55 }
 0x1f9   : > { %1655 = vperm.xlu1 %10695, %v459_v38   ;;  %v965_v38 = vmul.f32 %v12144_v18, %v11854_v26  ;;  %v991_v16 = vmul.f32 %v12148_v7, %v11900_v58  ;;  %v972_v8 = vmul.f32 %v12144_v18, %v11910_v0  ;;  %v992_v61 = vmul.f32 %v12148_v7, %v11910_v0 }
 0x1fa   : > { %v973_v49 = vmul.f32 %v12144_v18, %v11916_v9  ;;  %v993_v48 = vmul.f32 %v12148_v7, %v11916_v9  ;;  %v974_v46 = vmul.f32 %v12144_v18, %v11926_v28  ;;  %v994_v32 = vmul.f32 %v12148_v7, %v11926_v28 }
 0x1fb   : > { %v975_v43 = vmul.f32 %v12144_v18, %v11932_v40  ;;  %v995_v25 = vmul.f32 %v12148_v7, %v11932_v40  ;;  %v12199_v58 = vrot.slane %v12139_v39, %v11686_v17  ;;  %v996_v9 = vmul.f32 %v12148_v7, %v11942_v56 }
 0x1fc   : > { %v1003_v28 = vadd.f32 %v987_v14, %v967_v23  ;;  %v997_v40 = vmul.f32 %v12148_v7, %v11948_v63  ;;  %v1004_v45 = vadd.f32 %v988_v54, %v968_v30  ;;  %v1007_v36 = vadd.f32 %v991_v16, %v971_v27  ;;  %v12218_v54 = vpop.xlane.xlu1 %726 }
 0x1fd   : > { %1690 = vperm.xlu1 %10695, %v466_v3   ;;  %v985_v3 = vmul.f32 %v12148_v7, %v11854_v26  ;;  %v1009_v26 = vadd.f32 %v993_v48, %v973_v49  ;;  %v1010_v53 = vadd.f32 %v994_v32, %v974_v46  ;;  %v1011_v5 = vadd.f32 %v995_v25, %v975_v43 }
 0x1fe   : > { %15907 = vst [vmem:[#allocation80_spill] sm:$0xff] %v12218_v54  ;;  %v12221_v16 = vadd.f32 %v12199_v58, %v1004_v45  ;;  %v12230_v32 = vadd.f32 %v12199_v58, %v1007_v36  ;;  %v12274_v30 = vmul.f32 %v12148_v7, %v12218_v54 }
 0x1ff   : > { %v1001_v0 = vadd.f32 %v985_v3, %v965_v38  ;;  %v1006_v3 = vadd.f32 %v990_v33, %v970_v21  ;;  %v12238_v49 = vadd.f32 %v12199_v58, %v1009_v26 }
 0x201   : > { %1660 = vperm.xlu1 %10695, %v460_v29   ;;  %v966_v29 = vmul.f32 %v12144_v18, %v11872_v37  ;;  %v12227_v25 = vadd.f32 %v12199_v58, %v1006_v3 }
 0x205   : > { %1695 = vperm.xlu1 %10695, %v467_v24   ;;  %v986_v24 = vmul.f32 %v12148_v7, %v11872_v37  ;;  %v1008_v37 = vadd.f32 %v992_v61, %v972_v8  ;;  %v12241_v61 = vadd.f32 %v12199_v58, %v1010_v53  ;;  %v12244_v8 = vadd.f32 %v12199_v58, %v1011_v5 }
 0x206   : > { %v12260_v5 = vmul.f32 %v12148_v7, %v11962_v34 }
 0x207   : > { %v1002_v55 = vadd.f32 %v986_v24, %v966_v29  ;;  %v12216_v29 = vadd.f32 %v12199_v58, %v1003_v28  ;;  %v12235_v48 = vadd.f32 %v12199_v58, %v1008_v37  ;;  %v12252_v37 = vmul.f32 %v12144_v18, %v11962_v34 }
 0x209   : > { %1665 = vperm.xlu1 %10695, %v461_v57   ;;  %v463_v57 = vld [vmem:[%s12120_s13 + $0x38] sm:$0xff]  ;;  %v12213_v23 = vadd.f32 %v12199_v58, %v1002_v55 }
 0x20d   : > { %1670 = vperm.xlu1 %10695, %v462_v47   ;;  %v969_v47 = vmul.f32 %v12144_v18, %v11886_v51  ;;  %v977_v51 = vmul.f32 %v12144_v18, %v11948_v63 }
 0x20f   : > { %v1005_v38 = vadd.f32 %v989_v12, %v969_v47  ;;  %v1013_v24 = vadd.f32 %v997_v40, %v977_v51 }
 0x211   : > { %1675 = vperm.xlu1 %10695, %v463_v57   ;;  %v976_v57 = vmul.f32 %v12144_v18, %v11942_v56  ;;  %v12210_v56 = vadd.f32 %v12199_v58, %v1001_v0  ;;  %v12256_v51 = vadd.f32 %v12199_v58, %v1013_v24 }
 0x213   : > { %v1012_v42 = vadd.f32 %v996_v9, %v976_v57  ;;  %v12268_v9 = vmul.f32 %v12144_v18, %v12218_v54 }
 0x215   : > { %1715 = vperm.xlu1 %10695, %v471_v35   ;;  %v12224_v35 = vadd.f32 %v12199_v58, %v1005_v38  ;;  %v12248_v36 = vadd.f32 %v12199_v58, %v1012_v42 }
 0x2b9   : > { %v9886_v43 = vpop.f32.mrb[0].mxu1  ;;  %v12232_v46 = vpop.f32.mrb[2].mxu0 }
 0x2ba   : > { %v1088_v21 = vcombine.high %v9886_v43, %v9886_v43  ;;  %v1095_v27 = vrot.slane %v9886_v43, %v11678_v13  ;;  %v877_v33 = vpop.f32.mrb[1].mxu1  ;;  %v952_v12 = vpop.f32.mrb[3].mxu0 }
 0x2bb   : > { %v1039_v26 = vcombine.high %v877_v33, %v877_v33  ;;  %v1046_v45 = vrot.slane %v877_v33, %v11678_v13 }
 0x2bc   : > { %v1102_v55 = vrot.slane %v1088_v21, %v11678_v13  ;;  %v1103_v0 = vcombine.high %v1095_v27, %v1095_v27  ;;  %v12264_v42 = vrot.slane %v1095_v27, %v11678_v13 }
 0x2bd   : > { %v1053_v28 = vrot.slane %v1039_v26, %v11678_v13  ;;  %v1054_v40 = vcombine.high %v1046_v45, %v1046_v45  ;;  %v1062_v53 = vrot.slane %v1046_v45, %v11678_v13 }
 0x2be   : > { %v1104_v14 = vcombine.high %v1102_v55, %v1102_v55  ;;  %v12277_v47 = vrot.slane %v1102_v55, %v11678_v13  ;;  %v1125_v57 = vrot.slane %v1103_v0, %v11678_v13  ;;  %v1133_v38 = vcombine.high %v12264_v42, %v12264_v42 }
 0x2bf   : > { %v1172_v3 = vrot.slane %v12264_v42, %v11686_v17  ;;  %v1055_v24 = vcombine.high %v1053_v28, %v1053_v28  ;;  %v1069_v43 = vrot.slane %v1053_v28, %v11678_v13  ;;  %v1076_v21 = vrot.slane %v1054_v40, %v11678_v13 }
 0x2c0   : > { %v12287_v27 = vrot.slane %v1104_v14, %v11678_v13  ;;  %v1134_v33 = vcombine.high %v12277_v47, %v12277_v47  ;;  %v1135_v26 = vcombine.high %v1125_v57, %v1125_v57  ;;  %v1176_v45 = vrot.slane %v1125_v57, %v11686_v17 }
 0x2c1   : > { %v1180_v55 = vrot.slane %v1133_v38, %v11686_v17  ;;  %v1188_v0 = vrot.slane %v12277_v47, %v11686_v17  ;;  %v1083_v42 = vrot.slane %v1055_v24, %v11678_v13  ;;  %v1084_v34 = vcombine.high %v1062_v53, %v1062_v53 }
 0x2c2   : > { %v1136_v28 = vcombine.high %v12287_v27, %v12287_v27  ;;  %v1184_v40 = vrot.slane %v1135_v26, %v11686_v17  ;;  %v1192_v14 = vrot.slane %v12287_v27, %v11686_v17  ;;  %v12302_v63 = vrot.slane %v1134_v33, %v11686_v17 }
 0x2c3   : > { %v1085_v57 = vcombine.high %v1069_v43, %v1069_v43  ;;  %v1086_v2 = vcombine.high %v1076_v21, %v1076_v21  ;;  %v1087_v38 = vcombine.high %v1083_v42, %v1083_v42  ;;  %v1140_v1 = vrot.slane %v1062_v53, %v11686_v17 }
 0x2c4   : > { %v12306_v47 = vrot.slane %v1136_v28, %v11686_v17  ;;  %v1144_v24 = vrot.slane %v1076_v21, %v11686_v17  ;;  %v1148_v13 = vrot.slane %v1084_v34, %v11686_v17  ;;  %v1156_v26 = vrot.slane %v1069_v43, %v11686_v17 }
 0x2c5   : > { %v1152_v44 = vrot.slane %v1086_v2, %v11686_v17  ;;  %v1160_v27 = vrot.slane %v1083_v42, %v11686_v17  ;;  %v1164_v33 = vrot.slane %v1085_v57, %v11686_v17  ;;  %v1168_v41 = vrot.slane %v1087_v38, %v11686_v17 }
 0x2c6   : > { %v1217_v15 = vadd.f32 %v1140_v1, %v952_v12  ;;  %v1218_v10 = vadd.f32 %v1144_v24, %v952_v12  ;;  %v1219_v53 = vadd.f32 %v1148_v13, %v952_v12  ;;  %v1221_v60 = vadd.f32 %v1156_v26, %v952_v12 }
 0x2c7   : > { %v1220_v28 = vadd.f32 %v1152_v44, %v952_v12  ;;  %v1222_v59 = vadd.f32 %v1160_v27, %v952_v12  ;;  %v1223_v52 = vadd.f32 %v1164_v33, %v952_v12  ;;  %v1224_v21 = vadd.f32 %v1168_v41, %v952_v12  ;;  %v12352_v33 = vpop.xlane.xlu0 %729 }
 0x2c8   : > { %v12316_v34 = vadd.f32 %v1217_v15, %v12210_v56  ;;  %v12319_v43 = vadd.f32 %v1218_v10, %v12213_v23  ;;  %v12322_v2 = vadd.f32 %v1219_v53, %v12216_v29  ;;  %v12325_v42 = vadd.f32 %v1221_v60, %v12224_v35  ;;  %15908 = vst [vmem:[#allocation81_spill] sm:$0xff] %v12352_v33 }
 0x2c9   : > { %v12328_v1 = vadd.f32 %v1220_v28, %v12221_v16  ;;  %v12331_v13 = vadd.f32 %v1222_v59, %v12227_v25  ;;  %v12334_v41 = vadd.f32 %v1223_v52, %v12230_v32  ;;  %v12337_v15 = vadd.f32 %v1224_v21, %v12235_v48 }
 0x2ca   : > { %v1249_v10 = vsub.f32 0.0, %v12316_v34  ;;  %v1250_v44 = vsub.f32 0.0, %v12319_v43  ;;  %v1251_v56 = vsub.f32 0.0, %v12322_v2  ;;  %v1253_v60 = vsub.f32 0.0, %v12325_v42 }
 0x2cb   : > { %v1252_v23 = vsub.f32 0.0, %v12328_v1  ;;  %v1254_v29 = vsub.f32 0.0, %v12331_v13  ;;  %v1255_v59 = vsub.f32 0.0, %v12334_v41  ;;  %v1256_v52 = vsub.f32 0.0, %v12337_v15 }
 0x2cc   : > { %v1265_v16 = vmul.f32 1.442695, %v1249_v10  ;;  %v1267_v35 = vmul.f32 1.442695, %v1250_v44  ;;  %v1269_v25 = vmul.f32 1.442695, %v1251_v56  ;;  %v1225_v32 = vadd.f32 %v12232_v46, %v1172_v3 }
 0x2cd   : > { %v1271_v48 = vmul.f32 1.442695, %v1252_v23  ;;  %v1273_v12 = vmul.f32 1.442695, %v1253_v60  ;;  %v1275_v57 = vmul.f32 1.442695, %v1254_v29  ;;  %v1226_v38 = vadd.f32 %v12232_v46, %v1176_v45 }
 0x2ce   : > { %10701 = vpow2.f32 %v1265_v16  ;;  %v1277_v24 = vmul.f32 1.442695, %v1255_v59  ;;  %v1279_v26 = vmul.f32 1.442695, %v1256_v52  ;;  %v12350_v27 = vadd.f32 %v1225_v32, %v12238_v49 }
 0x2cf   : > { %10703 = vpow2.f32 %v1267_v35  ;;  %v12355_v53 = vadd.f32 %v1226_v38, %v12241_v61  ;;  %v1227_v28 = vadd.f32 %v12232_v46, %v1180_v55  ;;  %v1228_v3 = vadd.f32 %v12232_v46, %v1184_v40 }
 0x2d0   : > { %10705 = vpow2.f32 %v1269_v25  ;;  %v1257_v21 = vsub.f32 0.0, %v12350_v27  ;;  %v1229_v45 = vadd.f32 %v12232_v46, %v1188_v0  ;;  %v1230_v10 = vadd.f32 %v12232_v46, %v1192_v14 }
 0x2d1   : > { %10707 = vpow2.f32 %v1271_v48  ;;  %v1258_v49 = vsub.f32 0.0, %v12355_v53  ;;  %v12364_v44 = vadd.f32 %v1227_v28, %v12244_v8  ;;  %v12367_v61 = vadd.f32 %v1228_v3, %v12248_v36 }
 0x2d2   : > { %10709 = vpow2.f32 %v1273_v12  ;;  %v1281_v55 = vmul.f32 1.442695, %v1257_v21  ;;  %v12370_v40 = vadd.f32 %v1229_v45, %v12256_v51  ;;  %v980_v56 = vmul.f32 %v12144_v18, %v12352_v33 }
 0x2d3   : > { %10711 = vpow2.f32 %v1275_v57  ;;  %v1283_v0 = vmul.f32 1.442695, %v1258_v49  ;;  %v1259_v14 = vsub.f32 0.0, %v12364_v44  ;;  %v1260_v60 = vsub.f32 0.0, %v12367_v61 }
 0x2d4   : > { %10713 = vpow2.f32 %v1277_v24  ;;  %v1261_v8 = vsub.f32 0.0, %v12370_v40  ;;  %v1231_v36 = vadd.f32 %v12232_v46, %v12302_v63  ;;  %v1000_v23 = vmul.f32 %v12148_v7, %v12352_v33 }
 0x2d5   : > { %10715 = vpow2.f32 %v1279_v26  ;;  %v1285_v51 = vmul.f32 1.442695, %v1259_v14  ;;  %v1287_v29 = vmul.f32 1.442695, %v1260_v60  ;;  %v1232_v18 = vadd.f32 %v12232_v46, %v12306_v47 }
 0x2d6   : > { %10717 = vpow2.f32 %v1281_v55  ;;  %v1289_v59 = vmul.f32 1.442695, %v1261_v8  ;;  %v1014_v52 = vadd.f32 %v12260_v5, %v12252_v37  ;;  %v1015_v16 = vadd.f32 %v12274_v30, %v12268_v9 }
 0x2d7   : > { %10719 = vpow2.f32 %v1283_v0  ;;  %v1016_v63 = vadd.f32 %v1000_v23, %v980_v56 }
 0x2d8   : > { %v10702_v35 = vpop.eup %10701  ;;  %10721 = vpow2.f32 %v1285_v51  ;;  %v1034_v46 = vadd.f32 %v12199_v58, %v1014_v52  ;;  %v1035_v37 = vadd.f32 %v12199_v58, %v1015_v16 }
 0x2d9   : > { %v10704_v25 = vpop.eup %10703  ;;  %v1297_v7 = vadd.f32 1.0, %v10702_v35  ;;  %10723 = vpow2.f32 %v1287_v29  ;;  %v1036_v30 = vadd.f32 %v12199_v58, %v1016_v63 }
 0x2da   : > { %v10706_v32 = vpop.eup %10705  ;;  %v1298_v48 = vadd.f32 1.0, %v10704_v25  ;;  %10725 = vpow2.f32 %v1289_v59  ;;  %v12389_v9 = vadd.f32 %v1230_v10, %v1034_v46  ;;  %v12392_v26 = vadd.f32 %v1231_v36, %v1035_v37 }
 0x2db   : > { %v10708_v47 = vpop.eup %10707  ;;  %10727 = vrcp.f32 %v1297_v7  ;;  %v1299_v12 = vadd.f32 1.0, %v10706_v32  ;;  %v12394_v21 = vadd.f32 %v1232_v18, %v1036_v30 }
 0x2dc   : > { %v10710_v5 = vpop.eup %10709  ;;  %10729 = vrcp.f32 %v1298_v48  ;;  %v1300_v57 = vadd.f32 1.0, %v10708_v47  ;;  %v1262_v56 = vsub.f32 0.0, %v12389_v9  ;;  %v1263_v58 = vsub.f32 0.0, %v12392_v26 }
 0x2dd   : > { %v10712_v38 = vpop.eup %10711  ;;  %10731 = vrcp.f32 %v1299_v12  ;;  %v1301_v24 = vadd.f32 1.0, %v10710_v5  ;;  %v1264_v8 = vsub.f32 0.0, %v12394_v21 }
 0x2de   : > { %v10714_v28 = vpop.eup %10713  ;;  %10733 = vrcp.f32 %v1300_v57  ;;  %v1302_v3 = vadd.f32 1.0, %v10712_v38  ;;  %v1291_v29 = vmul.f32 1.442695, %v1262_v56  ;;  %v1293_v59 = vmul.f32 1.442695, %v1263_v58 }
 0x2df   : > { %v10716_v45 = vpop.eup %10715  ;;  %10735 = vrcp.f32 %v1301_v24  ;;  %v1303_v49 = vadd.f32 1.0, %v10714_v28  ;;  %v1295_v35 = vmul.f32 1.442695, %v1264_v8 }
 0x2e0   : > { %v10718_v55 = vpop.eup %10717  ;;  %v1304_v0 = vadd.f32 1.0, %v10716_v45  ;;  %10737 = vrcp.f32 %v1302_v3 }
 0x2e1   : > { %v10720_v10 = vpop.eup %10719  ;;  %v1305_v60 = vadd.f32 1.0, %v10718_v55  ;;  %10739 = vrcp.f32 %v1303_v49 }
 0x2e2   : > { %v10722_v14 = vpop.eup %10721  ;;  %v1306_v23 = vadd.f32 1.0, %v10720_v10  ;;  %10741 = vrcp.f32 %v1304_v0 }
 0x2e3   : > { %v10724_v36 = vpop.eup %10723  ;;  %10743 = vrcp.f32 %v1305_v60  ;;  %v1307_v7 = vadd.f32 1.0, %v10722_v14 }
 0x2e4   : > { %v10726_v51 = vpop.eup %10725  ;;  %10745 = vrcp.f32 %v1306_v23  ;;  %v798_v23 = vld [vmem:[%s15626_s2 + $0x98] sm:$0xff] }
 0x2e5   : > { %v10728_v18 = vpop.eup %10727  ;;  %10747 = vpow2.f32 %v1291_v29  ;;  %v792_v29 = vld [vmem:[%s15626_s2 + $0x68] sm:$0xff] }
 0x2e6   : > { %v10730_v52 = vpop.eup %10729  ;;  %v1329_v16 = vmul.f32 %v10728_v18, %v12316_v34  ;;  %10749 = vpow2.f32 %v1293_v59  ;;  %v1308_v34 = vadd.f32 1.0, %v10724_v36  ;;  %v12452_v59 = vpop.permute.xlu1 %1640 }
 0x2e7   : > { %v10732_v63 = vpop.eup %10731  ;;  %v1330_v25 = vmul.f32 %v10730_v52, %v12319_v43  ;;  %10751 = vpow2.f32 %v1295_v35  ;;  %v1309_v43 = vadd.f32 1.0, %v10726_v51  ;;  %v791_v51 = vld [vmem:[%s15626_s2 + $0x60] sm:$0xff]  ;;  %15909 = vst [vmem:[#allocation82_spill] sm:$0xff] %v12452_v59  ;;  %v12455_v52 = vsub.s32 1, %v11675_v11 }
 0x2e8   : > { %v10734_v32 = vpop.eup %10733  ;;  %9906 = vmatprep.mubr.msk.f32.mxu1 %vm804_vm4, %v1329_v16  ;;  %v1331_v48 = vmul.f32 %v10732_v63, %v12322_v2  ;;  %10753 = vrcp.f32 %v1307_v7  ;;  %v12449_v18 = vpack.c.bf16 %v792_v29, %v791_v51 }
 0x2e9   : > { %v10736_v46 = vpop.eup %10735  ;;  %9907 = vmatmul.mubr.msk.f32.vlgmr.msra.gmra.mrb[2].mxu1 %vm804_vm4, %v1330_v25  ;;  %v1332_v47 = vmul.f32 %v10734_v32, %v12328_v1  ;;  %10755 = vrcp.f32 %v1308_v34  ;;  %15910 = vst [vmem:[#allocation83_spill] sm:$0xff] %v12455_v52  ;;  %v12461_v35 = vrot.slane %v12139_v39, %v12455_v52 }
 0x2ea   : > { %9909 = vmatprep.mubr.msk.f32.mxu1 %vm804_vm4, %v1331_v48  ;;  %v10738_v12 = vpop.eup %10737  ;;  %v1333_v37 = vmul.f32 %v10736_v46, %v12325_v42  ;;  %10757 = vrcp.f32 %v1309_v43  ;;  %v12457_v16 = vpop.permute.xlu1 %1650 }
 0x2eb   : > { %v10740_v5 = vpop.eup %10739  ;;  %v1334_v57 = vmul.f32 %v10738_v12, %v12331_v13  ;;  %15911 = vst [vmem:[#allocation84_spill] sm:$0xff] %v12457_v16 }
 0x2ec   : > { %v10742_v2 = vpop.eup %10741  ;;  %v1335_v38 = vmul.f32 %v10740_v5, %v12334_v41 }
 0x2ed   : > { %9910 = vmatmul.mubr.msk.f32.gmra.mrb[4].mxu1 %vm804_vm4, %v1332_v47  ;;  %v10744_v30 = vpop.eup %10743  ;;  %v1336_v28 = vmul.f32 %v10742_v2, %v12337_v15 }
 0x2ee   : > { %9912 = vmatprep.mubr.msk.f32.mxu1 %vm804_vm4, %v1333_v37  ;;  %v10746_v24 = vpop.eup %10745  ;;  %v1337_v49 = vmul.f32 %v10744_v30, %v12350_v27  ;;  %v12469_v48 = vpop.permute.xlu1 %1680 }
 0x2ef   : > { %v10748_v1 = vpop.eup %10747  ;;  %v1338_v41 = vmul.f32 %v10746_v24, %v12355_v53  ;;  %15912 = vst [vmem:[#allocation85_spill] sm:$0xff] %v12469_v48 }
 0x2f0   : > { %v10750_v42 = vpop.eup %10749  ;;  %v1310_v3 = vadd.f32 1.0, %v10748_v1 }
 0x2f1   : > { %9913 = vmatmul.mubr.msk.f32.gmra.mrb[6].mxu1 %vm804_vm4, %v1334_v57  ;;  %v10752_v45 = vpop.eup %10751  ;;  %v1311_v55 = vadd.f32 1.0, %v10750_v42 }
 0x2f2   : > { %9915 = vmatprep.mubr.msk.f32.mxu1 %vm804_vm4, %v1335_v38  ;;  %v10754_v56 = vpop.eup %10753  ;;  %10759 = vrcp.f32 %v1310_v3  ;;  %v1312_v13 = vadd.f32 1.0, %v10752_v45  ;;  %v12481_v38 = vpop.permute.xlu1 %1685 }
 0x2f3   : > { %10761 = vrcp.f32 %v1311_v55  ;;  %v10756_v10 = vpop.eup %10755  ;;  %v1339_v0 = vmul.f32 %v10754_v56, %v12364_v44  ;;  %15913 = vst [vmem:[#allocation86_spill] sm:$0xff] %v12481_v38 }
 0x2f4   : > { %10763 = vrcp.f32 %v1312_v13  ;;  %v10758_v15 = vpop.eup %10757  ;;  %v1340_v27 = vmul.f32 %v10756_v10, %v12367_v61  ;;  %v795_v61 = vld [vmem:[%s15626_s2 + $0x80] sm:$0xff] }
 0x2f5   : > { %9916 = vmatmul.mubr.msk.f32.gmra.mrb[8].mxu1 %vm804_vm4, %v1336_v28  ;;  %v1341_v58 = vmul.f32 %v10758_v15, %v12370_v40  ;;  %v796_v40 = vld [vmem:[%s15626_s2 + $0x88] sm:$0xff] }
 0x2f6   : > { %9918 = vmatprep.mubr.msk.f32.mxu1 %vm804_vm4, %v1337_v49  ;;  %v12497_v15 = vpop.permute.xlu1 %1655 }
 0x2f7   : > { %15914 = vst [vmem:[#allocation87_spill] sm:$0xff] %v12497_v15 }
 0x2f9   : > { %9919 = vmatmul.mubr.msk.f32.gmra.mrb[10].mxu1 %vm804_vm4, %v1338_v41 }
 0x2fa   : > { %9921 = vmatprep.mubr.msk.f32.mxu1 %vm804_vm4, %v1339_v0 }
 0x2fc   : > { %v10760_v14 = vpop.eup %10759 }
 0x2fd   : > { %9922 = vmatmul.mubr.msk.f32.gmra.mrb[12].mxu1 %vm804_vm4, %v1340_v27  ;;  %v10762_v60 = vpop.eup %10761  ;;  %v1342_v53 = vmul.f32 %v10760_v14, %v12389_v9  ;;  %v797_v9 = vld [vmem:[%s15626_s2 + $0x90] sm:$0xff] }
 0x2fe   : > { %9924 = vmatprep.mubr.msk.f32.mxu1 %vm804_vm4, %v1341_v58  ;;  %v10764_v8 = vpop.eup %10763  ;;  %v1343_v44 = vmul.f32 %v10762_v60, %v12392_v26  ;;  %v10431_v26 = vpack.c.bf16 %v796_v40, %v795_v61 }
 0x2ff   : > { %v1344_v36 = vmul.f32 %v10764_v8, %v12394_v21  ;;  %v10435_v21 = vpack.c.bf16 %v798_v23, %v797_v9 }
 0x300   : > { %10432 = vmatprep.subr.bf16.mxu0 %v10431_v26 }
 0x301   : > { %9925 = vmatmul.mubr.msk.f32.gmra.mrb[14].mxu1 %vm804_vm4, %v1342_v53  ;;  %10434 = vmatpush3.bf16.msra.mxu0 %v10431_v26 }
 0x302   : > { %9927 = vmatprep.mubr.msk.f32.mxu1 %vm804_vm4, %v1343_v44  ;;  %10436 = vmatprep.subr.bf16.mxu0 %v10435_v21 }
 0x305   : > { %9928 = vmatmul.mubr.msk.f32.gmra.mrb[16].mxu1 %vm804_vm4, %v1344_v36  ;;  %10438 = vmatpush3.bf16.msra.mxu0 %v10435_v21 }
 0x306   : > { %10440 = vmatprep.subr.bf16.mxu0 %v12449_v18 }
 0x3bc   : > { %v9908_v63 = vpop.f32.mrb[2].mxu1 }
 0x3bd   : > { %v12464_v25 = vadd.f32 %v9908_v63, %v12461_v35  ;;  %v1463_v7 = vpop.f32.mrb[3].mxu1  ;;  %v12509_v63 = vpop.permute.xlu1 %1690 }
 0x3be   : > { %v12467_v32 = vadd.f32 %v1463_v7, %v12461_v35  ;;  %15915 = vst [vmem:[#allocation88_spill] sm:$0xff] %v12509_v63 }
 0x3bf   : > { %v1543_v46 = vsub.f32 0.0, %v12464_v25 }
 0x3c0   : > { %v1542_v34 = vsub.f32 0.0, %v12467_v32  ;;  %v9911_v47 = vpop.f32.mrb[4].mxu1 }
 0x3c1   : > { %v1560_v43 = vmul.f32 1.442695, %v1543_v46  ;;  %v12474_v12 = vadd.f32 %v9911_v47, %v12461_v35  ;;  %v1473_v39 = vpop.f32.mrb[5].mxu1 }
 0x3c2   : > { %v1558_v37 = vmul.f32 1.442695, %v1542_v34  ;;  %v12477_v5 = vadd.f32 %v1473_v39, %v12461_v35 }
 0x3c3   : > { %10765 = vpow2.f32 %v1560_v43  ;;  %v1545_v2 = vsub.f32 0.0, %v12474_v12 }
 0x3c4   : > { %10767 = vpow2.f32 %v1558_v37  ;;  %v1544_v57 = vsub.f32 0.0, %v12477_v5  ;;  %v9914_v30 = vpop.f32.mrb[6].mxu1 }
 0x3c5   : > { %v1564_v24 = vmul.f32 1.442695, %v1545_v2  ;;  %v12484_v1 = vadd.f32 %v9914_v30, %v12461_v35  ;;  %v1483_v42 = vpop.f32.mrb[7].mxu1 }
 0x3c6   : > { %v1562_v28 = vmul.f32 1.442695, %v1544_v57  ;;  %v12487_v3 = vadd.f32 %v1483_v42, %v12461_v35 }
 0x3c7   : > { %10769 = vpow2.f32 %v1564_v24  ;;  %v1547_v45 = vsub.f32 0.0, %v12484_v1 }
 0x3c8   : > { %10771 = vpow2.f32 %v1562_v28  ;;  %v1546_v49 = vsub.f32 0.0, %v12487_v3  ;;  %v9917_v55 = vpop.f32.mrb[8].mxu1 }
 0x3c9   : > { %v1568_v56 = vmul.f32 1.442695, %v1547_v45  ;;  %v12492_v13 = vadd.f32 %v9917_v55, %v12461_v35  ;;  %v1493_v41 = vpop.f32.mrb[9].mxu1 }
 0x3ca   : > { %v1566_v10 = vmul.f32 1.442695, %v1546_v49  ;;  %v12495_v0 = vadd.f32 %v1493_v41, %v12461_v35 }
 0x3cb   : > { %10773 = vpow2.f32 %v1568_v56  ;;  %v1549_v27 = vsub.f32 0.0, %v12492_v13 }
 0x3cc   : > { %10775 = vpow2.f32 %v1566_v10  ;;  %v1548_v58 = vsub.f32 0.0, %v12495_v0  ;;  %v9920_v14 = vpop.f32.mrb[10].mxu1  ;;  %v12522_v10 = vpop.permute.xlu1 %1660 }
 0x3cd   : > { %v10766_v60 = vpop.eup %10765  ;;  %v1572_v53 = vmul.f32 1.442695, %v1549_v27  ;;  %v12502_v8 = vadd.f32 %v9920_v14, %v12461_v35  ;;  %v1503_v44 = vpop.f32.mrb[11].mxu1  ;;  %15916 = vst [vmem:[#allocation89_spill] sm:$0xff] %v12522_v10 }
 0x3ce   : > { %v10768_v36 = vpop.eup %10767  ;;  %v1591_v61 = vadd.f32 1.0, %v10766_v60  ;;  %v1570_v40 = vmul.f32 1.442695, %v1548_v58  ;;  %v12505_v9 = vadd.f32 %v1503_v44, %v12461_v35 }
 0x3cf   : > { %v1590_v26 = vadd.f32 1.0, %v10768_v36  ;;  %10777 = vpow2.f32 %v1572_v53  ;;  %v1551_v23 = vsub.f32 0.0, %v12502_v8 }
 0x3d0   : > { %10779 = vrcp.f32 %v1591_v61  ;;  %v1550_v21 = vsub.f32 0.0, %v12505_v9  ;;  %v9923_v51 = vpop.f32.mrb[12].mxu1 }
 0x3d1   : > { %v10770_v29 = vpop.eup %10769  ;;  %10781 = vrcp.f32 %v1590_v26  ;;  %v1576_v7 = vmul.f32 1.442695, %v1551_v23  ;;  %v12512_v46 = vadd.f32 %v9923_v51, %v12461_v35  ;;  %v1513_v34 = vpop.f32.mrb[13].mxu1 }
 0x3d2   : > { %v10772_v47 = vpop.eup %10771  ;;  %v1593_v43 = vadd.f32 1.0, %v10770_v29  ;;  %10783 = vpow2.f32 %v1570_v40  ;;  %v1574_v39 = vmul.f32 1.442695, %v1550_v21  ;;  %v12515_v37 = vadd.f32 %v1513_v34, %v12461_v35  ;;  %v12532_v21 = vpop.permute.xlu0 %1645 }
 0x3d3   : > { %v1592_v2 = vadd.f32 1.0, %v10772_v47  ;;  %10785 = vpow2.f32 %v1576_v7  ;;  %v1553_v57 = vsub.f32 0.0, %v12512_v46  ;;  %15917 = vst [vmem:[#allocation90_spill] sm:$0xff] %v12532_v21 }
 0x3d4   : > { %10787 = vrcp.f32 %v1593_v43  ;;  %v1552_v30 = vsub.f32 0.0, %v12515_v37  ;;  %v9926_v28 = vpop.f32.mrb[14].mxu1 }
 0x3d5   : > { %v10774_v24 = vpop.eup %10773  ;;  %10789 = vrcp.f32 %v1592_v2  ;;  %v1580_v42 = vmul.f32 1.442695, %v1553_v57  ;;  %v12520_v56 = vadd.f32 %v9926_v28, %v12461_v35  ;;  %v1523_v41 = vpop.f32.mrb[15].mxu1 }
 0x3d6   : > { %v10776_v45 = vpop.eup %10775  ;;  %v1595_v49 = vadd.f32 1.0, %v10774_v24  ;;  %10791 = vpow2.f32 %v1574_v39  ;;  %v1578_v55 = vmul.f32 1.442695, %v1552_v30  ;;  %v12525_v58 = vadd.f32 %v1523_v41, %v12461_v35  ;;  %v12539_v2 = vpop.permute.xlu1 %1695 }
 0x3d7   : > { %v1594_v27 = vadd.f32 1.0, %v10776_v45  ;;  %10793 = vpow2.f32 %v1580_v42  ;;  %v1555_v14 = vsub.f32 0.0, %v12520_v56  ;;  %15918 = vst [vmem:[#allocation91_spill] sm:$0xff] %v12539_v2 }
 0x3d8   : > { %10795 = vrcp.f32 %v1595_v49  ;;  %v1554_v53 = vsub.f32 0.0, %v12525_v58  ;;  %v9929_v44 = vpop.f32.mrb[16].mxu1 }
 0x3d9   : > { %v10778_v60 = vpop.eup %10777  ;;  %10797 = vrcp.f32 %v1594_v27  ;;  %v1584_v40 = vmul.f32 1.442695, %v1555_v14  ;;  %v12530_v26 = vadd.f32 %v9929_v44, %v12461_v35  ;;  %v1533_v23 = vpop.f32.mrb[17].mxu1 }
 0x3da   : > { %v10780_v36 = vpop.eup %10779  ;;  %v1597_v61 = vadd.f32 1.0, %v10778_v60  ;;  %10799 = vpow2.f32 %v1578_v55  ;;  %v1582_v7 = vmul.f32 1.442695, %v1554_v53  ;;  %v12536_v34 = vadd.f32 %v1533_v23, %v12461_v35 }
 0x3db   : > { %v10782_v51 = vpop.eup %10781  ;;  %v1623_v29 = vmul.f32 %v10780_v36, %v12464_v25  ;;  %v1557_v30 = vsub.f32 0.0, %v12530_v26 }
 0x3dc   : > { %v10784_v47 = vpop.eup %10783  ;;  %v1622_v43 = vmul.f32 %v10782_v51, %v12467_v32  ;;  %10801 = vrcp.f32 %v1597_v61  ;;  %v1556_v35 = vsub.f32 0.0, %v12536_v34 }
 0x3dd   : > { %v10786_v39 = vpop.eup %10785  ;;  %v1596_v57 = vadd.f32 1.0, %v10784_v47  ;;  %10803 = vpow2.f32 %v1584_v40  ;;  %v1719_v24 = vmul.f32 %v12532_v21, %v1623_v29  ;;  %v1588_v36 = vmul.f32 1.442695, %v1557_v30 }
 0x3de   : > { %v10788_v42 = vpop.eup %10787  ;;  %v1718_v25 = vmul.f32 %v12452_v59, %v1622_v43  ;;  %v1599_v28 = vadd.f32 1.0, %v10786_v39  ;;  %10805 = vpow2.f32 %v1582_v7  ;;  %v12552_v43 = vpop.permute.xlu1 %1665 }
 0x3df   : > { %v10790_v45 = vpop.eup %10789  ;;  %v1625_v32 = vmul.f32 %v10788_v42, %v12474_v12  ;;  %10807 = vrcp.f32 %v1596_v57  ;;  %v1741_v49 = vsel %vm804_vm4, %v1719_v24, 0.0  ;;  %v1586_v12 = vmul.f32 1.442695, %v1556_v35  ;;  %15919 = vst [vmem:[#allocation92_spill] sm:$0xff] %v12552_v43 }
 0x3e0   : > { %v10792_v55 = vpop.eup %10791  ;;  %v1734_v41 = vsel %vm804_vm4, %v1718_v25, 0.0  ;;  %v1624_v27 = vmul.f32 %v10790_v45, %v12477_v5  ;;  %10809 = vrcp.f32 %v1599_v28  ;;  %v1742_v51 = vrot.slane %v1741_v49, 4 }
 0x3e1   : > { %v10794_v14 = vpop.eup %10793  ;;  %v1735_v60 = vrot.slane %v1734_v41, 4  ;;  %v1721_v53 = vmul.f32 %v12497_v15, %v1625_v32  ;;  %v1598_v44 = vadd.f32 1.0, %v10792_v55 }
 0x3e2   : > { %v10796_v61 = vpop.eup %10795  ;;  %v1720_v40 = vmul.f32 %v12457_v16, %v1624_v27  ;;  %v1601_v23 = vadd.f32 1.0, %v10794_v14 }
 0x3e3   : > { %v10798_v29 = vpop.eup %10797  ;;  %v1736_v7 = vadd.f32 %v1735_v60, %v1734_v41  ;;  %v1755_v47 = vsel %vm804_vm4, %v1721_v53, 0.0  ;;  %v1627_v5 = vmul.f32 %v10796_v61, %v12484_v1  ;;  %10811 = vrcp.f32 %v1598_v44 }
 0x3e4   : > { %v10800_v39 = vpop.eup %10799  ;;  %v1756_v57 = vrot.slane %v1755_v47, 4  ;;  %v1748_v24 = vsel %vm804_vm4, %v1720_v40, 0.0  ;;  %v1626_v30 = vmul.f32 %v10798_v29, %v12487_v3  ;;  %10813 = vrcp.f32 %v1601_v23 }
 0x3e5   : > { %v1737_v42 = vrot.slane %v1736_v7, 2  ;;  %v1749_v25 = vrot.slane %v1748_v24, 4  ;;  %v1723_v28 = vmul.f32 %v12552_v43, %v1627_v5  ;;  %v1600_v35 = vadd.f32 1.0, %v10800_v39 }
 0x3e6   : > { %v10802_v45 = vpop.eup %10801  ;;  %v1757_v32 = vadd.f32 %v1756_v57, %v1755_v47  ;;  %v1722_v55 = vmul.f32 %v12522_v10, %v1626_v30  ;;  %10815 = vpow2.f32 %v1588_v36  ;;  %v12561_v47 = vpop.permute.xlu1 %1670  ;;  %v12563_v5 = vadd.f32 %v1742_v51, %v1741_v49 }
 0x3e7   : > { %v10804_v41 = vpop.eup %10803  ;;  %v1738_v1 = vadd.f32 %v1737_v42, %v1736_v7  ;;  %v1750_v27 = vadd.f32 %v1749_v25, %v1748_v24  ;;  %v1769_v14 = vsel %vm804_vm4, %v1723_v28, 0.0  ;;  %10817 = vpow2.f32 %v1586_v12  ;;  %15920 = vst [vmem:[#allocation93_spill] sm:$0xff] %v12561_v47 }
 0x3e8   : > { %v10806_v60 = vpop.eup %10805  ;;  %v1758_v53 = vrot.slane %v1757_v32, 2  ;;  %v1770_v3 = vrot.slane %v1769_v14, 4  ;;  %v1762_v44 = vsel %vm804_vm4, %v1722_v55, 0.0  ;;  %10819 = vrcp.f32 %v1600_v35 }
 0x3e9   : > { %v10808_v61 = vpop.eup %10807  ;;  %v1739_v40 = vrot.slane %v1738_v1, 1  ;;  %v1751_v23 = vrot.slane %v1750_v27, 2  ;;  %v1763_v29 = vrot.slane %v1762_v44, 4  ;;  %v1603_v12 = vadd.f32 1.0, %v10804_v41 }
 0x3ea   : > { %v10810_v36 = vpop.eup %10809  ;;  %v1759_v7 = vadd.f32 %v1758_v53, %v1757_v32  ;;  %v1771_v39 = vadd.f32 %v1770_v3, %v1769_v14  ;;  %v1628_v57 = vmul.f32 %v10808_v61, %v12495_v0  ;;  %v1629_v42 = vmul.f32 %v10802_v45, %v12492_v13  ;;  %v12573_v3 = vpop.permute.xlu1 %1675 }
 0x3eb   : > { %v1752_v24 = vadd.f32 %v1751_v23, %v1750_v27  ;;  %v1764_v30 = vadd.f32 %v1763_v29, %v1762_v44  ;;  %v1631_v25 = vmul.f32 %v10810_v36, %v12502_v8  ;;  %10821 = vrcp.f32 %v1603_v12  ;;  %15921 = vst [vmem:[#allocation94_spill] sm:$0xff] %v12573_v3 }
 0x3ec   : > { %v1760_v28 = vrot.slane %v1759_v7, 1  ;;  %v1772_v35 = vrot.slane %v1771_v39, 2  ;;  %v1724_v55 = vmul.f32 %v12561_v47, %v1628_v57  ;;  %v1740_v49 = vadd.f32 %v1739_v40, %v1738_v1 }
 0x3ed   : > { %v10812_v10 = vpop.eup %10811  ;;  %v1765_v51 = vrot.slane %v1764_v30, 2  ;;  %v1727_v32 = vmul.f32 %v12481_v38, %v1631_v25  ;;  %v1753_v53 = vrot.slane %v1752_v24, 1  ;;  %v1744_v13 = vrot.slane %v12563_v5, 2 }
 0x3ee   : > { %v10814_v14 = vpop.eup %10813  ;;  %v1776_v0 = vsel %vm804_vm4, %v1724_v55, 0.0  ;;  %v1630_v41 = vmul.f32 %v10812_v10, %v12505_v9  ;;  %v1761_v45 = vadd.f32 %v1760_v28, %v1759_v7  ;;  %v12576_v1 = vadd.f32 %v1772_v35, %v1771_v39 }
 0x3ef   : > { %v1766_v8 = vadd.f32 %v1765_v51, %v1764_v30  ;;  %v1777_v27 = vrot.slane %v1776_v0, 4  ;;  %v1797_v44 = vsel %vm804_vm4, %v1727_v32, 0.0  ;;  %v1725_v40 = vmul.f32 %v12573_v3, %v1629_v42  ;;  %v12587_v32 = vpop.permute.xlu0 %1700 }
 0x3f0   : > { %v10816_v61 = vpop.eup %10815  ;;  %v1798_v23 = vrot.slane %v1797_v44, 4  ;;  %v1726_v29 = vmul.f32 %v12469_v48, %v1630_v41  ;;  %v12580_v57 = vmul.f32 0.01, %v1740_v49  ;;  %v1633_v7 = vmul.f32 %v10814_v14, %v12512_v46  ;;  %15922 = vst [vmem:[#allocation95_spill] sm:$0xff] %v12587_v32 }
 0x3f1   : > { %v10818_v36 = vpop.eup %10817  ;;  %v1767_v9 = vrot.slane %v1766_v8, 1  ;;  %v1778_v10 = vadd.f32 %v1777_v27, %v1776_v0  ;;  %v1754_v30 = vadd.f32 %v1753_v53, %v1752_v24  ;;  %v1602_v55 = vadd.f32 1.0, %v10806_v60 }
 0x3f2   : > { %v10820_v12 = vpop.eup %10819  ;;  %v1799_v25 = vadd.f32 %v1798_v23, %v1797_v44  ;;  %v1790_v28 = vsel %vm804_vm4, %v1726_v29, 0.0  ;;  %v12584_v39 = vmul.f32 0.01, %v1761_v45  ;;  %v1729_v51 = vmul.f32 %v12539_v2, %v1633_v7 }
 0x3f3   : > { %v1779_v35 = vrot.slane %v1778_v10, 2  ;;  %v1791_v42 = vrot.slane %v1790_v28, 4  ;;  %v1774_v49 = vrot.slane %v12576_v1, 1  ;;  %v1632_v0 = vmul.f32 %v10820_v12, %v12515_v37 }
 0x3f4   : > { %v1800_v41 = vrot.slane %v1799_v25, 2  ;;  %10823 = vrcp.f32 %v1602_v55  ;;  %v1768_v46 = vadd.f32 %v1767_v9, %v1766_v8  ;;  %v1811_v53 = vsel %vm804_vm4, %v1729_v51, 0.0 }
 0x3f5   : > { %v1780_v24 = vadd.f32 %v1779_v35, %v1778_v10  ;;  %v1792_v14 = vadd.f32 %v1791_v42, %v1790_v28  ;;  %v10822_v60 = vpop.eup %10821  ;;  %v1812_v27 = vrot.slane %v1811_v53, 4  ;;  %v1728_v44 = vmul.f32 %v12509_v63, %v1632_v0  ;;  %v12596_v28 = vpop.permute.xlu0 %1705 }
 0x3f6   : > { %v1801_v45 = vadd.f32 %v1800_v41, %v1799_v25  ;;  %v1605_v23 = vadd.f32 1.0, %v10816_v61  ;;  %v1635_v2 = vmul.f32 %v10822_v60, %v12520_v56  ;;  %v1604_v48 = vadd.f32 1.0, %v10818_v36  ;;  %15923 = vst [vmem:[#allocation96_spill] sm:$0xff] %v12596_v28 }
 0x3f7   : > { %v1781_v29 = vrot.slane %v1780_v24, 1  ;;  %v1793_v7 = vrot.slane %v1792_v14, 2  ;;  %v1813_v12 = vadd.f32 %v1812_v27, %v1811_v53  ;;  %v1804_v8 = vsel %vm804_vm4, %v1728_v44, 0.0 }
 0x3f8   : > { %v1802_v37 = vrot.slane %v1801_v45, 1  ;;  %10825 = vrcp.f32 %v1605_v23  ;;  %v1805_v10 = vrot.slane %v1804_v8, 4  ;;  %v1745_v25 = vadd.f32 %v1744_v13, %v12563_v5 }
 0x3f9   : > { %v1794_v9 = vadd.f32 %v1793_v7, %v1792_v14  ;;  %10827 = vrcp.f32 %v1604_v48  ;;  %v1814_v55 = vrot.slane %v1813_v12, 2  ;;  %v1731_v35 = vmul.f32 %v12596_v28, %v1635_v2 }
 0x3fa   : > { %v1803_v61 = vadd.f32 %v1802_v37, %v1801_v45  ;;  %v1782_v42 = vadd.f32 %v1781_v29, %v1780_v24  ;;  %v1806_v36 = vadd.f32 %v1805_v10, %v1804_v8  ;;  %v1746_v51 = vrot.slane %v1745_v25, 1 }
 0x3fb   : > { %v1795_v56 = vrot.slane %v1794_v9, 1  ;;  %v1783_v41 = vsel %vm804_vm4, %v1725_v40, 0.0  ;;  %v1815_v14 = vadd.f32 %v1814_v55, %v1813_v12  ;;  %v1825_v48 = vsel %vm804_vm4, %v1731_v35, 0.0 }
 0x3fc   : > { %v1855_v0 = vmul.f32 0.01, %v1803_v61  ;;  %v1784_v53 = vrot.slane %v1783_v41, 4  ;;  %v1807_v13 = vrot.slane %v1806_v36, 2  ;;  %v1747_v60 = vadd.f32 %v1746_v51, %v1745_v25 }
 0x3fd   : > { %v1796_v5 = vadd.f32 %v1795_v56, %v1794_v9  ;;  %v1826_v45 = vrot.slane %v1825_v48, 4  ;;  %v1848_v2 = vmul.f32 0.01, %v1754_v30  ;;  %v1775_v24 = vadd.f32 %v1774_v49, %v12576_v1 }
 0x3fe   : > { %v10824_v27 = vpop.eup %10823  ;;  %v1816_v44 = vrot.slane %v1815_v14, 1  ;;  %v1785_v23 = vadd.f32 %v1784_v53, %v1783_v41  ;;  %v1808_v7 = vadd.f32 %v1807_v13, %v1806_v36  ;;  %v1847_v37 = vmul.f32 0.01, %v1747_v60 }
 0x3ff   : > { %v1854_v29 = vmul.f32 0.01, %v1796_v5  ;;  %v1634_v40 = vmul.f32 %v10824_v27, %v12525_v58  ;;  %v1850_v12 = vmul.f32 0.01, %v1768_v46  ;;  %v1827_v8 = vadd.f32 %v1826_v45, %v1825_v48  ;;  %v12612_v48 = vpop.permute.xlu1 %1715  ;;  %v12616_v45 = vpop.permute.xlu0 %1710 }
 0x400   : > { %v1786_v10 = vrot.slane %v1785_v23, 2  ;;  %v1852_v61 = vmul.f32 0.01, %v1782_v42  ;;  %v1809_v25 = vrot.slane %v1808_v7, 1  ;;  %v1879_v1 = vsel %vm1878_vm5, %v1847_v37, %v12580_v57  ;;  %15924 = vst [vmem:[#allocation97_spill] sm:$0xff] %v12612_v48  ;;  %15925 = vst [vmem:[#allocation98_spill] sm:$0xff] %v12616_v45 }
 0x401   : > { %v1892_v9 = vsel %vm1878_vm5, %v1855_v0, %v1854_v29  ;;  %v1730_v55 = vmul.f32 %v12587_v32, %v1634_v40  ;;  %v1817_v49 = vadd.f32 %v1816_v44, %v1815_v14  ;;  %v1828_v35 = vrot.slane %v1827_v8, 2 }
 0x402   : > { %v10826_v30 = vpop.eup %10825  ;;  %v1787_v56 = vadd.f32 %v1786_v10, %v1785_v23  ;;  %v1881_v58 = vsel %vm1880_vm6, %v1848_v2, %v1879_v1  ;;  %v1810_v51 = vadd.f32 %v1809_v25, %v1808_v7  ;;  %v1851_v0 = vmul.f32 0.01, %v1775_v24 }
 0x403   : > { %v10828_v36 = vpop.eup %10827  ;;  %v1637_v46 = vmul.f32 %v10826_v30, %v12530_v26  ;;  %v1818_v42 = vsel %vm804_vm4, %v1730_v55, 0.0  ;;  %v1883_v41 = vsel %vm1882_vm7, %v12584_v39, %v1881_v58  ;;  %v1829_v60 = vadd.f32 %v1828_v35, %v1827_v8 }
 0x404   : > { %v1636_v57 = vmul.f32 %v10828_v36, %v12536_v34  ;;  %v1819_v53 = vrot.slane %v1818_v42, 4  ;;  %v1788_v14 = vrot.slane %v1787_v56, 1  ;;  %v1856_v5 = vmul.f32 0.01, %v1810_v51 }
 0x405   : > { %v1733_v13 = vmul.f32 %v12612_v48, %v1637_v46  ;;  %v1885_v26 = vsel %vm1884_vm8, %v1850_v12, %v1883_v41  ;;  %v1857_v24 = vmul.f32 0.01, %v1817_v49  ;;  %v1830_v12 = vrot.slane %v1829_v60, 1 }
 0x406   : > { %v1820_v27 = vadd.f32 %v1819_v53, %v1818_v42  ;;  %v1732_v2 = vmul.f32 %v12616_v45, %v1636_v57  ;;  %v1789_v44 = vadd.f32 %v1788_v14, %v1787_v56  ;;  %v1887_v39 = vsel %vm1886_vm9, %v1851_v0, %v1885_v26 }
 0x407   : > { %v1893_v23 = vsel %vm1880_vm6, %v1856_v5, %v1892_v9  ;;  %v1839_v34 = vsel %vm804_vm4, %v1733_v13, 0.0  ;;  %v1889_v29 = vsel %vm1888_vm10, %v1852_v61, %v1887_v39  ;;  %v1831_v61 = vadd.f32 %v1830_v12, %v1829_v60  ;;  %v793_v13 = vld [vmem:[%s15626_s2 + $0x70] sm:$0xff]  ;;  %v794_v60 = vld [vmem:[%s15626_s2 + $0x78] sm:$0xff] }
 0x408   : > { %v1840_v7 = vrot.slane %v1839_v34, 4  ;;  %v1821_v40 = vrot.slane %v1820_v27, 2  ;;  %v1832_v37 = vsel %vm804_vm4, %v1732_v2, 0.0  ;;  %v1853_v8 = vmul.f32 0.01, %v1789_v44  ;;  %v9317_v12 = vld [vmem:[%s15626_s2 + $0xf8] sm:$0xff] }
 0x409   : > { %v1833_v10 = vrot.slane %v1832_v37, 4  ;;  %v1894_v25 = vsel %vm1882_vm7, %v1857_v24, %v1893_v23  ;;  %v1859_v0 = vmul.f32 0.01, %v1831_v61  ;;  %v10443_v44 = vpack.c.bf16 %v794_v60, %v793_v13  ;;  %v799_v24 = vld [vmem:[%s15626_s2 + $0xa0] sm:$0xff]  ;;  %v800_v23 = vld [vmem:[%s15626_s2 + $0xa8] sm:$0xff] }
 0x40a   : > { %v1841_v55 = vadd.f32 %v1840_v7, %v1839_v34  ;;  %v1822_v1 = vadd.f32 %v1821_v40, %v1820_v27  ;;  %v1891_v30 = vsel %vm1890_vm11, %v1853_v8, %v1889_v29  ;;  %v10447_v34 = vpack.c.bf16 %v800_v23, %v799_v24  ;;  %v802_v29 = vld [vmem:[%s15626_s2 + $0xb8] sm:$0xff]  ;;  %v9314_v40 = vld [vmem:[%s15626_s2 + $0xe0] sm:$0xff]  ;;  %v9316_v8 = vld [vmem:[%s15626_s2 + $0xf0] sm:$0xff] }
 0x40b   : > { %v1834_v49 = vadd.f32 %v1833_v10, %v1832_v37  ;;  %9938 = vmatprep.mubr.msk.f32.mxu0 %vm804_vm4, %v1891_v30  ;;  %v9315_v37 = vld [vmem:[%s15626_s2 + $0xe8] sm:$0xff]  ;;  %v9310_v13 = vld [vmem:[%s15626_s2 + $0xc0] sm:$0xff] }
 0x40c   : > { %v1842_v9 = vrot.slane %v1841_v55, 2  ;;  %v1823_v35 = vrot.slane %v1822_v1, 1  ;;  %v10463_v10 = vpack.c.bf16 %v9315_v37, %v9314_v40  ;;  %v9311_v60 = vld [vmem:[%s15626_s2 + $0xc8] sm:$0xff] }
 0x40d   : > { %v1835_v56 = vrot.slane %v1834_v49, 2 }
 0x40e   : > { %v1843_v58 = vadd.f32 %v1842_v9, %v1841_v55  ;;  %v1824_v36 = vadd.f32 %v1823_v35, %v1822_v1  ;;  %10464 = vmatprep.subr.bf16.mxu1 %v10463_v10  ;;  %v12669_v55 = vsub.s32 2, %v11675_v11  ;;  %v11565_v1 = vld [vmem:[%s15627_s3] sm:$0x3f] }
 0x40f   : > { %v1836_v51 = vadd.f32 %v1835_v56, %v1834_v49  ;;  %10466 = vmatpush3.bf16.msra.mxu1 %v10463_v10 }
 0x410   : > { %v1844_v46 = vrot.slane %v1843_v58, 1  ;;  %v1858_v42 = vmul.f32 0.01, %v1824_v36  ;;  %15926 = vst [vmem:[#allocation99_spill] sm:$0xff] %v12669_v55  ;;  %v2056_v30 = vrot.slane %v11565_v1, %v12669_v55 }
 0x411   : > { %v1837_v41 = vrot.slane %v1836_v51, 1 }
 0x412   : > { %v1845_v57 = vadd.f32 %v1844_v46, %v1843_v58  ;;  %v1895_v53 = vsel %vm1884_vm8, %v1858_v42, %v1894_v25  ;;  %v10467_v25 = vpack.c.bf16 %v9317_v12, %v9316_v8  ;;  %v9321_v12 = vld [vmem:[%s15626_s2 + $0x118] sm:$0xff] }
 0x413   : > { %v1838_v14 = vadd.f32 %v1837_v41, %v1836_v51  ;;  %v1896_v5 = vsel %vm1886_vm9, %v1859_v0, %v1895_v53 }
 0x414   : > { %v1861_v27 = vmul.f32 0.01, %v1845_v57  ;;  %10468 = vmatprep.subr.bf16.mxu1 %v10467_v25 }
 0x415   : > { %v1860_v26 = vmul.f32 0.01, %v1838_v14  ;;  %10470 = vmatpush3.bf16.msra.mxu1 %v10467_v25 }
 0x417   : > { %v1897_v2 = vsel %vm1888_vm10, %v1860_v26, %v1896_v5  ;;  %v9312_v26 = vld [vmem:[%s15626_s2 + $0xd0] sm:$0xff] }
 0x418   : > { %v1898_v39 = vsel %vm1890_vm11, %v1861_v27, %v1897_v2  ;;  %v10455_v27 = vpack.c.bf16 %v9311_v60, %v9310_v13  ;;  %v9313_v2 = vld [vmem:[%s15626_s2 + $0xd8] sm:$0xff]  ;;  %v15935_v13 = vld [vmem:[#allocation44_spill] sm:$0xff] }
 0x419   : > { %9939 = vmatmul.mubr.msk.f32.vlgmr.msra.gmra.mrb[4].mxu0 %vm804_vm4, %v1898_v39  ;;  %v12690_v39 = vsub.s32 3, %v11675_v11  ;;  %v9318_v11 = vld [vmem:[%s15626_s2 + $0x100] sm:$0xff] }
 0x41a   : > { %10442 = vmatpush3.bf16.msra.mxu0 %v12449_v18  ;;  %9949 = vmatprep.mubr.msk.f32.mxu0 %vm804_vm4, %v12092_v62  ;;  %v801_v18 = vld [vmem:[%s15626_s2 + $0xb0] sm:$0xff] }
 0x41b   : > { %10444 = vmatprep.subr.bf16.mxu0 %v10443_v44  ;;  %v10451_v7 = vpack.c.bf16 %v802_v29, %v801_v18  ;;  %15927 = vst [vmem:[#allocation100_spill] sm:$0xff] %v12690_v39  ;;  %v2074_v24 = vrot.slane %v11565_v1, %v12690_v39  ;;  %v12724_v1 = vld [vmem:[%s15627_s3 + $0x8] sm:$0x3f] }
 0x41e   : > { %10446 = vmatpush3.bf16.msra.mxu0 %v10443_v44  ;;  %v10459_v44 = vpack.c.bf16 %v9313_v2, %v9312_v26  ;;  %v15936_v26 = vld [vmem:[#allocation45_spill] sm:$0xff]  ;;  %v15937_v2 = vld [vmem:[#allocation48_spill] sm:$0xff] }
 0x41f   : > { %10448 = vmatprep.subr.bf16.mxu0 %v10447_v34 }
 0x421   : > { %9950 = vmatmul.mubr.msk.f32.vlgmr.msra.gmra.mrb[4].mxu0 %vm804_vm4, %v12094_v19 }
 0x422   : > { %10450 = vmatpush3.bf16.msra.mxu0 %v10447_v34 }
 0x423   : > { %10452 = vmatprep.subr.bf16.mxu0 %v10451_v7 }
 0x426   : > { %10454 = vmatpush3.bf16.msra.mxu0 %v10451_v7 }
 0x427   : > { %10456 = vmatprep.subr.bf16.mxu0 %v10455_v27 }
 0x4f4   : > { %v9951_v49 = vpop.f32.mrb[4].mxu0 }
 0x4f5   : > { %v2058_v9 = vadd.f32 %v9951_v49, %v2056_v30  ;;  %v2044_v35 = vpop.f32.mrb[5].mxu0  ;;  %v2361_v49 = vmul.f32 %v11843_v20, %v12218_v54 }
 0x4f6   : > { %v2057_v56 = vadd.f32 %v2056_v30, %v2044_v35  ;;  %v12728_v30 = vrot.slane %v12724_v1, %v11686_v17 }
 0x4f7   : > { %v2060_v61 = vsub.f32 0.0, %v2058_v9 }
 0x4f8   : > { %v2059_v58 = vsub.f32 0.0, %v2057_v56  ;;  %v12736_v35 = vadd.f32 %v12728_v30, %v11864_v31  ;;  %v12770_v60 = vadd.f32 %v12728_v30, %v15935_v13 }
 0x4f9   : > { %v2063_v36 = vmul.f32 1.442695, %v2060_v61  ;;  %v15930_v61 = vld [vmem:[#allocation33_spill] sm:$0xff] }
 0x4fa   : > { %v2061_v51 = vmul.f32 1.442695, %v2059_v58  ;;  %v12744_v58 = vadd.f32 %v12728_v30, %v15930_v61 }
 0x4fb   : > { %10829 = vpow2.f32 %v2063_v36  ;;  %v15931_v36 = vld [vmem:[#allocation36_spill] sm:$0xff] }
 0x4fc   : > { %10831 = vpow2.f32 %v2061_v51  ;;  %v12748_v51 = vadd.f32 %v12728_v30, %v15931_v36 }
 0x505   : > { %v10830_v46 = vpop.eup %10829 }
 0x506   : > { %v10832_v42 = vpop.eup %10831  ;;  %v2066_v41 = vadd.f32 1.0, %v10830_v46  ;;  %v15932_v46 = vld [vmem:[#allocation37_spill] sm:$0xff] }
 0x507   : > { %v2065_v0 = vadd.f32 1.0, %v10832_v42  ;;  %v12752_v42 = vadd.f32 %v12728_v30, %v15932_v46 }
 0x508   : > { %10833 = vrcp.f32 %v2066_v41  ;;  %v15933_v41 = vld [vmem:[#allocation40_spill] sm:$0xff] }
 0x509   : > { %10835 = vrcp.f32 %v2065_v0  ;;  %v12756_v31 = vadd.f32 %v12728_v30, %v15933_v41  ;;  %v15934_v0 = vld [vmem:[#allocation41_spill] sm:$0xff] }
 0x512   : > { %v10834_v57 = vpop.eup %10833 }
 0x513   : > { %v10836_v53 = vpop.eup %10835  ;;  %v2070_v5 = vmul.f32 %v10834_v57, %v2058_v9  ;;  %v2381_v9 = vmul.f32 %v11846_v22, %v12218_v54  ;;  %v2362_v57 = vmul.f32 %v11843_v20, %v12352_v33 }
 0x514   : > { %v2069_v14 = vmul.f32 %v10836_v53, %v2057_v56  ;;  %v12740_v56 = vadd.f32 %v12728_v30, %v11884_v50  ;;  %v12760_v50 = vadd.f32 %v12728_v30, %v15934_v0  ;;  %v2382_v53 = vmul.f32 %v11846_v22, %v12352_v33 }
 0x516   : > { %9960 = vmatprep.mubr.msk.f32.mxu0 %vm804_vm4, %v2069_v14  ;;  %v12802_v46 = vadd.f32 %v2382_v53, %v2362_v57 }
 0x517   : > { %9961 = vmatmul.mubr.msk.f32.vlgmr.msra.gmra.mrb[6].mxu0 %vm804_vm4, %v2070_v5 }
 0x518   : > { %10458 = vmatpush3.bf16.msra.mxu0 %v10455_v27  ;;  %v12774_v27 = vadd.f32 %v12728_v30, %v15936_v26 }
 0x519   : > { %10460 = vmatprep.subr.bf16.mxu0 %v10459_v44 }
 0x51c   : > { %10462 = vmatpush3.bf16.msra.mxu0 %v10459_v44  ;;  %v12778_v44 = vadd.f32 %v12728_v30, %v15937_v2 }
 0x5ea   : > { %v9962_v23 = vpop.f32.mrb[6].mxu0 }
 0x5eb   : > { %v2153_v18 = vadd.f32 %v9962_v23, %v2074_v24  ;;  %v2147_v34 = vpop.f32.mrb[7].mxu0  ;;  %v15938_v23 = vld [vmem:[#allocation6_spill] sm:$0xff] }
 0x5ec   : > { %v2148_v29 = vadd.f32 %v2147_v34, %v2074_v24  ;;  %v2397_v24 = vadd.f32 %v2381_v9, %v2361_v49 }
 0x5ed   : > { %v2157_v7 = vadd.f32 %v2153_v18, %v12094_v19  ;;  %v9319_v19 = vld [vmem:[%s15626_s2 + $0x108] sm:$0xff] }
 0x5ee   : > { %v2156_v40 = vadd.f32 %v2148_v29, %v12092_v62  ;;  %v9320_v62 = vld [vmem:[%s15626_s2 + $0x110] sm:$0xff]  ;;  %v10471_v10 = vpack.c.bf16 %v9319_v19, %v9318_v11  ;;  %v15939_v29 = vld [vmem:[#allocation49_spill] sm:$0xff]  ;;  %v12807_v13 = vadd.f32 %v12728_v30, %v2397_v24 }
 0x5ef   : > { %v12699_v8 = vmul.f32 %v2157_v7, %v11669_v6  ;;  %v10475_v25 = vpack.c.bf16 %v9321_v12, %v9320_v62  ;;  %v12783_v7 = vadd.f32 %v12728_v30, %v15939_v29 }
 0x5f0   : > { %v12696_v37 = vmul.f32 %v2156_v40, %v11663_v4  ;;  %10472 = vmatprep.subr.bf16.mxu0 %v10471_v10  ;;  %v15940_v40 = vld [vmem:[#allocation51_spill] sm:$0xff] }
 0x5f1   : > { %15929 = vst [vmem:[#allocation102_spill] sm:$0xff] %v12699_v8  ;;  %v12787_v11 = vadd.f32 %v12728_v30, %v15940_v40 }
 0x5f2   : > { %15928 = vst [vmem:[#allocation101_spill] sm:$0xff] %v12696_v37  ;;  %9971 = vmatprep.mubr.msk.f32.mxu0 %vm804_vm4, %v12696_v37  ;;  %9982 = vmatprep.mubr.msk.f32.mxu1 %vm804_vm4, %v12696_v37 }
 0x5f3   : > { %9972 = vmatmul.mubr.msk.f32.vlgmr.msra.gmra.mrb[8].mxu0 %vm804_vm4, %v12699_v8  ;;  %9983 = vmatmul.mubr.msk.f32.vlgmr.msra.gmra.mrb[18].mxu1 %vm804_vm4, %v12699_v8 }
 0x5f4   : > { %10474 = vmatpush3.bf16.msra.mxu0 %v10471_v10  ;;  %v15941_v10 = vld [vmem:[#allocation52_spill] sm:$0xff] }
 0x5f5   : > { %10476 = vmatprep.subr.bf16.mxu0 %v10475_v25  ;;  %v12792_v12 = vadd.f32 %v12728_v30, %v15941_v10 }
 0x5f8   : > { %10478 = vmatpush3.bf16.msra.mxu0 %v10475_v25  ;;  %v15942_v25 = vld [vmem:[#allocation53_spill] sm:$0xff] }
 0x5f9   : > { %v12796_v49 = vadd.f32 %v12728_v30, %v15942_v25 }
 0x6c6   : > { %v9973_v14 = vpop.f32.mrb[8].mxu0  ;;  %v12766_v5 = vpop.f32.mrb[18].mxu1 }
 0x6c7   : > { %v2470_v20 = vcombine.high %v9973_v14, %v9973_v14  ;;  %v2477_v18 = vrot.slane %v9973_v14, %v15938_v23  ;;  %v2259_v22 = vpop.f32.mrb[9].mxu0  ;;  %v2334_v34 = vpop.f32.mrb[19].mxu1 }
 0x6c8   : > { %v2421_v19 = vcombine.high %v2259_v22, %v2259_v22  ;;  %v2428_v62 = vrot.slane %v2259_v22, %v15938_v23 }
 0x6c9   : > { %v2484_v9 = vrot.slane %v2470_v20, %v15938_v23  ;;  %v2485_v61 = vcombine.high %v2477_v18, %v2477_v18  ;;  %v12800_v36 = vrot.slane %v2477_v18, %v15938_v23 }
 0x6ca   : > { %v2435_v41 = vrot.slane %v2421_v19, %v15938_v23  ;;  %v2436_v0 = vcombine.high %v2428_v62, %v2428_v62  ;;  %v2444_v14 = vrot.slane %v2428_v62, %v15938_v23 }
 0x6cb   : > { %v2486_v26 = vcombine.high %v2484_v9, %v2484_v9  ;;  %v12810_v2 = vrot.slane %v2484_v9, %v15938_v23  ;;  %v2507_v20 = vrot.slane %v2485_v61, %v15938_v23  ;;  %v2515_v18 = vcombine.high %v12800_v36, %v12800_v36 }
 0x6cc   : > { %v2554_v57 = vrot.slane %v12800_v36, %v11686_v17  ;;  %v2437_v53 = vcombine.high %v2435_v41, %v2435_v41  ;;  %v2451_v22 = vrot.slane %v2435_v41, %v15938_v23  ;;  %v2458_v29 = vrot.slane %v2436_v0, %v15938_v23 }
 0x6cd   : > { %v12820_v24 = vrot.slane %v2486_v26, %v15938_v23  ;;  %v2516_v40 = vcombine.high %v12810_v2, %v12810_v2  ;;  %v2517_v19 = vcombine.high %v2507_v20, %v2507_v20  ;;  %v2558_v62 = vrot.slane %v2507_v20, %v11686_v17 }
 0x6ce   : > { %v2562_v10 = vrot.slane %v2515_v18, %v11686_v17  ;;  %v2570_v25 = vrot.slane %v12810_v2, %v11686_v17  ;;  %v2465_v9 = vrot.slane %v2437_v53, %v15938_v23  ;;  %v2466_v61 = vcombine.high %v2444_v14, %v2444_v14 }
 0x6cf   : > { %v2518_v36 = vcombine.high %v12820_v24, %v12820_v24  ;;  %v2566_v41 = vrot.slane %v2517_v19, %v11686_v17  ;;  %v2574_v0 = vrot.slane %v12820_v24, %v11686_v17  ;;  %v12835_v26 = vrot.slane %v2516_v40, %v11686_v17 }
 0x6d0   : > { %v2467_v20 = vcombine.high %v2451_v22, %v2451_v22  ;;  %v2468_v33 = vcombine.high %v2458_v29, %v2458_v29  ;;  %v2469_v18 = vcombine.high %v2465_v9, %v2465_v9  ;;  %v2522_v54 = vrot.slane %v2444_v14, %v11686_v17 }
 0x6d1   : > { %v12839_v2 = vrot.slane %v2518_v36, %v11686_v17  ;;  %v2526_v53 = vrot.slane %v2458_v29, %v11686_v17  ;;  %v2530_v23 = vrot.slane %v2466_v61, %v11686_v17  ;;  %v2538_v19 = vrot.slane %v2451_v22, %v11686_v17 }
 0x6d2   : > { %v2534_v6 = vrot.slane %v2468_v33, %v11686_v17  ;;  %v2542_v24 = vrot.slane %v2465_v9, %v11686_v17  ;;  %v2546_v40 = vrot.slane %v2467_v20, %v11686_v17  ;;  %v2550_v4 = vrot.slane %v2469_v18, %v11686_v17 }
 0x6d3   : > { %v2599_v39 = vadd.f32 %v2522_v54, %v2334_v34  ;;  %v2600_v55 = vadd.f32 %v2526_v53, %v2334_v34  ;;  %v2601_v14 = vadd.f32 %v2530_v23, %v2334_v34  ;;  %v2603_v8 = vadd.f32 %v2538_v19, %v2334_v34 }
 0x6d4   : > { %v2602_v36 = vadd.f32 %v2534_v6, %v2334_v34  ;;  %v2604_v37 = vadd.f32 %v2542_v24, %v2334_v34  ;;  %v2605_v45 = vadd.f32 %v2546_v40, %v2334_v34  ;;  %v2606_v29 = vadd.f32 %v2550_v4, %v2334_v34 }
 0x6d5   : > { %v12849_v61 = vadd.f32 %v2599_v39, %v12736_v35  ;;  %v12852_v22 = vadd.f32 %v2600_v55, %v12740_v56  ;;  %v12855_v33 = vadd.f32 %v2601_v14, %v12744_v58  ;;  %v12858_v9 = vadd.f32 %v2603_v8, %v12752_v42 }
 0x6d6   : > { %v12861_v54 = vadd.f32 %v2602_v36, %v12748_v51  ;;  %v12864_v6 = vadd.f32 %v2604_v37, %v12756_v31  ;;  %v12867_v4 = vadd.f32 %v2605_v45, %v12760_v50  ;;  %v12870_v39 = vadd.f32 %v2606_v29, %v12770_v60 }
 0x6d7   : > { %v2631_v55 = vsub.f32 0.0, %v12849_v61  ;;  %v2632_v35 = vsub.f32 0.0, %v12852_v22  ;;  %v2633_v56 = vsub.f32 0.0, %v12855_v33  ;;  %v2635_v8 = vsub.f32 0.0, %v12858_v9 }
 0x6d8   : > { %v2634_v58 = vsub.f32 0.0, %v12861_v54  ;;  %v2636_v51 = vsub.f32 0.0, %v12864_v6  ;;  %v2637_v37 = vsub.f32 0.0, %v12867_v4  ;;  %v2638_v45 = vsub.f32 0.0, %v12870_v39 }
 0x6d9   : > { %v2647_v42 = vmul.f32 1.442695, %v2631_v55  ;;  %v2649_v31 = vmul.f32 1.442695, %v2632_v35  ;;  %v2651_v50 = vmul.f32 1.442695, %v2633_v56  ;;  %v2607_v60 = vadd.f32 %v12766_v5, %v2554_v57 }
 0x6da   : > { %v2653_v23 = vmul.f32 1.442695, %v2634_v58  ;;  %v2655_v34 = vmul.f32 1.442695, %v2635_v8  ;;  %v2657_v20 = vmul.f32 1.442695, %v2636_v51  ;;  %v2608_v18 = vadd.f32 %v12766_v5, %v2558_v62 }
 0x6db   : > { %10837 = vpow2.f32 %v2647_v42  ;;  %v2659_v53 = vmul.f32 1.442695, %v2637_v37  ;;  %v2661_v19 = vmul.f32 1.442695, %v2638_v45  ;;  %v12883_v24 = vadd.f32 %v2607_v60, %v12774_v27 }
 0x6dc   : > { %10839 = vpow2.f32 %v2649_v31  ;;  %v12886_v40 = vadd.f32 %v2608_v18, %v12778_v44  ;;  %v2609_v14 = vadd.f32 %v12766_v5, %v2562_v10  ;;  %v2610_v36 = vadd.f32 %v12766_v5, %v2566_v41 }
 0x6dd   : > { %10841 = vpow2.f32 %v2651_v50  ;;  %v2639_v57 = vsub.f32 0.0, %v12883_v24  ;;  %v2611_v29 = vadd.f32 %v12766_v5, %v2570_v25  ;;  %v2612_v62 = vadd.f32 %v12766_v5, %v2574_v0 }
 0x6de   : > { %10843 = vpow2.f32 %v2653_v23  ;;  %v2640_v55 = vsub.f32 0.0, %v12886_v40  ;;  %v12895_v27 = vadd.f32 %v2609_v14, %v12783_v7  ;;  %v12898_v44 = vadd.f32 %v2610_v36, %v12787_v11 }
 0x6df   : > { %10845 = vpow2.f32 %v2655_v34  ;;  %v2663_v10 = vmul.f32 1.442695, %v2639_v57  ;;  %v12901_v41 = vadd.f32 %v2611_v29, %v12792_v12  ;;  %v12904_v35 = vadd.f32 %v2612_v62, %v12796_v49 }
 0x6e0   : > { %10847 = vpow2.f32 %v2657_v20  ;;  %v2665_v25 = vmul.f32 1.442695, %v2640_v55  ;;  %v2641_v0 = vsub.f32 0.0, %v12895_v27  ;;  %v2642_v56 = vsub.f32 0.0, %v12898_v44 }
 0x6e1   : > { %10849 = vpow2.f32 %v2659_v53  ;;  %v2643_v7 = vsub.f32 0.0, %v12901_v41  ;;  %v2613_v11 = vadd.f32 %v12766_v5, %v12835_v26  ;;  %v2418_v8 = vadd.f32 %v12728_v30, %v12802_v46 }
 0x6e2   : > { %10851 = vpow2.f32 %v2661_v19  ;;  %v2667_v12 = vmul.f32 1.442695, %v2641_v0  ;;  %v2669_v58 = vmul.f32 1.442695, %v2642_v56  ;;  %v2614_v49 = vadd.f32 %v12766_v5, %v12839_v2 }
 0x6e3   : > { %10853 = vpow2.f32 %v2663_v10  ;;  %v2671_v51 = vmul.f32 1.442695, %v2643_v7  ;;  %v12916_v37 = vadd.f32 %v2613_v11, %v12807_v13  ;;  %v2644_v14 = vsub.f32 0.0, %v12904_v35 }
 0x6e4   : > { %10855 = vpow2.f32 %v2665_v25  ;;  %v12918_v45 = vadd.f32 %v2614_v49, %v2418_v8 }
 0x6e5   : > { %v10838_v42 = vpop.eup %10837  ;;  %10857 = vpow2.f32 %v2667_v12  ;;  %v2645_v29 = vsub.f32 0.0, %v12916_v37  ;;  %v2673_v7 = vmul.f32 1.442695, %v2644_v14 }
 0x6e6   : > { %v10840_v26 = vpop.eup %10839  ;;  %v2679_v31 = vadd.f32 1.0, %v10838_v42  ;;  %10859 = vpow2.f32 %v2669_v58  ;;  %v2646_v10 = vsub.f32 0.0, %v12918_v45 }
 0x6e7   : > { %v10842_v30 = vpop.eup %10841  ;;  %v2680_v46 = vadd.f32 1.0, %v10840_v26  ;;  %10861 = vpow2.f32 %v2671_v51  ;;  %v2675_v8 = vmul.f32 1.442695, %v2645_v29 }
 0x6e8   : > { %v10844_v50 = vpop.eup %10843  ;;  %10863 = vrcp.f32 %v2679_v31  ;;  %v2681_v60 = vadd.f32 1.0, %v10842_v30  ;;  %v2677_v49 = vmul.f32 1.442695, %v2646_v10 }
 0x6e9   : > { %v10846_v5 = vpop.eup %10845  ;;  %10865 = vrcp.f32 %v2680_v46  ;;  %v2682_v2 = vadd.f32 1.0, %v10844_v50 }
 0x6ea   : > { %v10848_v23 = vpop.eup %10847  ;;  %10867 = vrcp.f32 %v2681_v60  ;;  %v2683_v13 = vadd.f32 1.0, %v10846_v5 }
 0x6eb   : > { %v10850_v34 = vpop.eup %10849  ;;  %10869 = vrcp.f32 %v2682_v2  ;;  %v2684_v20 = vadd.f32 1.0, %v10848_v23 }
 0x6ec   : > { %v10852_v18 = vpop.eup %10851  ;;  %10871 = vrcp.f32 %v2683_v13  ;;  %v2685_v53 = vadd.f32 1.0, %v10850_v34 }
 0x6ed   : > { %v10854_v19 = vpop.eup %10853  ;;  %v2686_v57 = vadd.f32 1.0, %v10852_v18  ;;  %10873 = vrcp.f32 %v2684_v20 }
 0x6ee   : > { %v10856_v36 = vpop.eup %10855  ;;  %v2687_v55 = vadd.f32 1.0, %v10854_v19  ;;  %10875 = vrcp.f32 %v2685_v53 }
 0x6ef   : > { %v10858_v62 = vpop.eup %10857  ;;  %v2688_v0 = vadd.f32 1.0, %v10856_v36  ;;  %10877 = vrcp.f32 %v2686_v57 }
 0x6f0   : > { %v10860_v25 = vpop.eup %10859  ;;  %10879 = vrcp.f32 %v2687_v55  ;;  %v2689_v26 = vadd.f32 1.0, %v10858_v62 }
 0x6f1   : > { %v10862_v56 = vpop.eup %10861  ;;  %10881 = vrcp.f32 %v2688_v0 }
 0x6f2   : > { %v10864_v11 = vpop.eup %10863  ;;  %10883 = vpow2.f32 %v2673_v7  ;;  %v9329_v7 = vld [vmem:[%s15626_s2 + $0x158] sm:$0xff] }
 0x6f3   : > { %v10866_v12 = vpop.eup %10865  ;;  %v2711_v58 = vmul.f32 %v10864_v11, %v12849_v61  ;;  %10885 = vpow2.f32 %v2675_v8  ;;  %v2690_v61 = vadd.f32 1.0, %v10860_v25  ;;  %v9322_v11 = vld [vmem:[%s15626_s2 + $0x120] sm:$0xff]  ;;  %v9323_v8 = vld [vmem:[%s15626_s2 + $0x128] sm:$0xff] }
 0x6f4   : > { %v10868_v51 = vpop.eup %10867  ;;  %v2712_v42 = vmul.f32 %v10866_v12, %v12852_v22  ;;  %10887 = vpow2.f32 %v2677_v49  ;;  %v2691_v22 = vadd.f32 1.0, %v10862_v56  ;;  %v12973_v12 = vpack.c.bf16 %v9323_v8, %v9322_v11 }
 0x6f5   : > { %v10870_v31 = vpop.eup %10869  ;;  %9993 = vmatprep.mubr.msk.f32.mxu0 %vm804_vm4, %v2711_v58  ;;  %v2713_v30 = vmul.f32 %v10868_v51, %v12855_v33  ;;  %10889 = vrcp.f32 %v2689_v26  ;;  %v12978_v58 = vrot.slane %v12724_v1, %v12455_v52 }
 0x6f6   : > { %v10872_v46 = vpop.eup %10871  ;;  %9994 = vmatmul.mubr.msk.f32.vlgmr.msra.gmra.mrb[10].mxu0 %vm804_vm4, %v2712_v42  ;;  %v2714_v50 = vmul.f32 %v10870_v31, %v12861_v54  ;;  %10891 = vrcp.f32 %v2690_v61 }
 0x6f7   : > { %9996 = vmatprep.mubr.msk.f32.mxu0 %vm804_vm4, %v2713_v30  ;;  %v10874_v60 = vpop.eup %10873  ;;  %v2715_v5 = vmul.f32 %v10872_v46, %v12858_v9  ;;  %10893 = vrcp.f32 %v2691_v22 }
 0x6f8   : > { %v10876_v2 = vpop.eup %10875  ;;  %v2716_v23 = vmul.f32 %v10874_v60, %v12864_v6 }
 0x6f9   : > { %v10878_v33 = vpop.eup %10877  ;;  %v2717_v34 = vmul.f32 %v10876_v2, %v12867_v4 }
 0x6fa   : > { %9997 = vmatmul.mubr.msk.f32.gmra.mrb[12].mxu0 %vm804_vm4, %v2714_v50  ;;  %v10880_v13 = vpop.eup %10879  ;;  %v2718_v18 = vmul.f32 %v10878_v33, %v12870_v39 }
 0x6fb   : > { %9999 = vmatprep.mubr.msk.f32.mxu0 %vm804_vm4, %v2715_v5  ;;  %v10882_v20 = vpop.eup %10881  ;;  %v2719_v14 = vmul.f32 %v10880_v13, %v12883_v24 }
 0x6fc   : > { %v10884_v54 = vpop.eup %10883  ;;  %v2720_v4 = vmul.f32 %v10882_v20, %v12886_v40 }
 0x6fd   : > { %v10886_v9 = vpop.eup %10885  ;;  %v2692_v53 = vadd.f32 1.0, %v10884_v54 }
 0x6fe   : > { %10000 = vmatmul.mubr.msk.f32.gmra.mrb[14].mxu0 %vm804_vm4, %v2716_v23  ;;  %v10888_v19 = vpop.eup %10887  ;;  %v2693_v36 = vadd.f32 1.0, %v10886_v9 }
 0x6ff   : > { %10002 = vmatprep.mubr.msk.f32.mxu0 %vm804_vm4, %v2717_v34  ;;  %v10890_v57 = vpop.eup %10889  ;;  %10895 = vrcp.f32 %v2692_v53  ;;  %v2694_v6 = vadd.f32 1.0, %v10888_v19 }
 0x700   : > { %10897 = vrcp.f32 %v2693_v36  ;;  %v10892_v29 = vpop.eup %10891  ;;  %v2721_v62 = vmul.f32 %v10890_v57, %v12895_v27 }
 0x701   : > { %10899 = vrcp.f32 %v2694_v6  ;;  %v10894_v39 = vpop.eup %10893  ;;  %v2722_v24 = vmul.f32 %v10892_v29, %v12898_v44  ;;  %v9326_v44 = vld [vmem:[%s15626_s2 + $0x140] sm:$0xff] }
 0x702   : > { %10003 = vmatmul.mubr.msk.f32.gmra.mrb[16].mxu0 %vm804_vm4, %v2718_v18  ;;  %v2723_v55 = vmul.f32 %v10894_v39, %v12901_v41  ;;  %v9327_v41 = vld [vmem:[%s15626_s2 + $0x148] sm:$0xff] }
 0x703   : > { %10005 = vmatprep.mubr.msk.f32.mxu0 %vm804_vm4, %v2719_v14 }
 0x706   : > { %10006 = vmatmul.mubr.msk.f32.gmra.mrb[18].mxu0 %vm804_vm4, %v2720_v4 }
 0x707   : > { %10008 = vmatprep.mubr.msk.f32.mxu0 %vm804_vm4, %v2721_v62 }
 0x709   : > { %v10896_v10 = vpop.eup %10895 }
 0x70a   : > { %10009 = vmatmul.mubr.msk.f32.gmra.mrb[20].mxu0 %vm804_vm4, %v2722_v24  ;;  %v10898_v25 = vpop.eup %10897  ;;  %v2724_v40 = vmul.f32 %v10896_v10, %v12904_v35  ;;  %v9328_v35 = vld [vmem:[%s15626_s2 + $0x150] sm:$0xff] }
 0x70b   : > { %10011 = vmatprep.mubr.msk.f32.mxu0 %vm804_vm4, %v2723_v55  ;;  %v10900_v0 = vpop.eup %10899  ;;  %v2725_v27 = vmul.f32 %v10898_v25, %v12916_v37  ;;  %v10479_v37 = vpack.c.bf16 %v9327_v41, %v9326_v44 }
 0x70c   : > { %v2726_v56 = vmul.f32 %v10900_v0, %v12918_v45  ;;  %v10483_v45 = vpack.c.bf16 %v9329_v7, %v9328_v35 }
 0x70d   : > { %10480 = vmatprep.subr.bf16.mxu1 %v10479_v37 }
 0x70e   : > { %10012 = vmatmul.mubr.msk.f32.gmra.mrb[22].mxu0 %vm804_vm4, %v2724_v40  ;;  %10482 = vmatpush3.bf16.msra.mxu1 %v10479_v37 }
 0x70f   : > { %10014 = vmatprep.mubr.msk.f32.mxu0 %vm804_vm4, %v2725_v27  ;;  %10484 = vmatprep.subr.bf16.mxu1 %v10483_v45 }
 0x712   : > { %10015 = vmatmul.mubr.msk.f32.gmra.mrb[24].mxu0 %vm804_vm4, %v2726_v56  ;;  %10486 = vmatpush3.bf16.msra.mxu1 %v10483_v45 }
 0x713   : > { %10488 = vmatprep.subr.bf16.mxu1 %v12973_v12 }
 0x7c9   : > { %v9995_v49 = vpop.f32.mrb[10].mxu0 }
 0x7ca   : > { %v12981_v51 = vadd.f32 %v9995_v49, %v12978_v58  ;;  %v2845_v42 = vpop.f32.mrb[11].mxu0 }
 0x7cb   : > { %v12984_v26 = vadd.f32 %v2845_v42, %v12978_v58 }
 0x7cc   : > { %v2925_v31 = vsub.f32 0.0, %v12981_v51 }
 0x7cd   : > { %v2924_v30 = vsub.f32 0.0, %v12984_v26  ;;  %v9998_v46 = vpop.f32.mrb[12].mxu0 }
 0x7ce   : > { %v2942_v61 = vmul.f32 1.442695, %v2925_v31  ;;  %v12989_v50 = vadd.f32 %v9998_v46, %v12978_v58  ;;  %v2855_v22 = vpop.f32.mrb[13].mxu0 }
 0x7cf   : > { %v2940_v1 = vmul.f32 1.442695, %v2924_v30  ;;  %v12992_v60 = vadd.f32 %v2855_v22, %v12978_v58 }
 0x7d0   : > { %10901 = vpow2.f32 %v2942_v61  ;;  %v2927_v5 = vsub.f32 0.0, %v12989_v50 }
 0x7d1   : > { %10903 = vpow2.f32 %v2940_v1  ;;  %v2926_v2 = vsub.f32 0.0, %v12992_v60  ;;  %v10001_v33 = vpop.f32.mrb[14].mxu0 }
 0x7d2   : > { %v2946_v23 = vmul.f32 1.442695, %v2927_v5  ;;  %v12997_v13 = vadd.f32 %v10001_v33, %v12978_v58  ;;  %v2865_v34 = vpop.f32.mrb[15].mxu0 }
 0x7d3   : > { %v2944_v20 = vmul.f32 1.442695, %v2926_v2  ;;  %v13000_v54 = vadd.f32 %v2865_v34, %v12978_v58 }
 0x7d4   : > { %10905 = vpow2.f32 %v2946_v23  ;;  %v2929_v9 = vsub.f32 0.0, %v12997_v13 }
 0x7d5   : > { %10907 = vpow2.f32 %v2944_v20  ;;  %v2928_v18 = vsub.f32 0.0, %v13000_v54  ;;  %v10004_v53 = vpop.f32.mrb[16].mxu0 }
 0x7d6   : > { %v2950_v19 = vmul.f32 1.442695, %v2929_v9  ;;  %v13005_v14 = vadd.f32 %v10004_v53, %v12978_v58  ;;  %v2875_v36 = vpop.f32.mrb[17].mxu0 }
 0x7d7   : > { %v2948_v57 = vmul.f32 1.442695, %v2928_v18  ;;  %v13008_v6 = vadd.f32 %v2875_v36, %v12978_v58 }
 0x7d8   : > { %10909 = vpow2.f32 %v2950_v19  ;;  %v2931_v4 = vsub.f32 0.0, %v13005_v14 }
 0x7d9   : > { %10911 = vpow2.f32 %v2948_v57  ;;  %v2930_v29 = vsub.f32 0.0, %v13008_v6  ;;  %v10007_v62 = vpop.f32.mrb[18].mxu0 }
 0x7da   : > { %v10902_v39 = vpop.eup %10901  ;;  %v2954_v24 = vmul.f32 1.442695, %v2931_v4  ;;  %v13013_v55 = vadd.f32 %v10007_v62, %v12978_v58  ;;  %v2885_v10 = vpop.f32.mrb[19].mxu0 }
 0x7db   : > { %v10904_v25 = vpop.eup %10903  ;;  %v2973_v40 = vadd.f32 1.0, %v10902_v39  ;;  %v2952_v0 = vmul.f32 1.442695, %v2930_v29  ;;  %v13016_v27 = vadd.f32 %v2885_v10, %v12978_v58 }
 0x7dc   : > { %v2972_v56 = vadd.f32 1.0, %v10904_v25  ;;  %10913 = vpow2.f32 %v2954_v24  ;;  %v2933_v44 = vsub.f32 0.0, %v13013_v55 }
 0x7dd   : > { %10915 = vrcp.f32 %v2973_v40  ;;  %v2932_v41 = vsub.f32 0.0, %v13016_v27  ;;  %v10010_v35 = vpop.f32.mrb[20].mxu0 }
 0x7de   : > { %v10906_v37 = vpop.eup %10905  ;;  %10917 = vrcp.f32 %v2972_v56  ;;  %v2958_v7 = vmul.f32 1.442695, %v2933_v44  ;;  %v13021_v45 = vadd.f32 %v10010_v35, %v12978_v58  ;;  %v2895_v11 = vpop.f32.mrb[21].mxu0 }
 0x7df   : > { %v10908_v8 = vpop.eup %10907  ;;  %v2975_v49 = vadd.f32 1.0, %v10906_v37  ;;  %10919 = vpow2.f32 %v2952_v0  ;;  %v2956_v42 = vmul.f32 1.442695, %v2932_v41  ;;  %v13024_v31 = vadd.f32 %v2895_v11, %v12978_v58 }
 0x7e0   : > { %v2974_v30 = vadd.f32 1.0, %v10908_v8  ;;  %10921 = vpow2.f32 %v2958_v7  ;;  %v2935_v46 = vsub.f32 0.0, %v13021_v45 }
 0x7e1   : > { %10923 = vrcp.f32 %v2975_v49  ;;  %v2934_v61 = vsub.f32 0.0, %v13024_v31  ;;  %v10013_v5 = vpop.f32.mrb[22].mxu0 }
 0x7e2   : > { %v10910_v22 = vpop.eup %10909  ;;  %10925 = vrcp.f32 %v2974_v30  ;;  %v2962_v1 = vmul.f32 1.442695, %v2935_v46  ;;  %v13029_v23 = vadd.f32 %v10013_v5, %v12978_v58  ;;  %v2905_v34 = vpop.f32.mrb[23].mxu0 }
 0x7e3   : > { %v10912_v2 = vpop.eup %10911  ;;  %v2977_v33 = vadd.f32 1.0, %v10910_v22  ;;  %10927 = vpow2.f32 %v2956_v42  ;;  %v2960_v9 = vmul.f32 1.442695, %v2934_v61  ;;  %v13032_v18 = vadd.f32 %v2905_v34, %v12978_v58 }
 0x7e4   : > { %v2976_v20 = vadd.f32 1.0, %v10912_v2  ;;  %10929 = vpow2.f32 %v2962_v1  ;;  %v2937_v53 = vsub.f32 0.0, %v13029_v23 }
 0x7e5   : > { %10931 = vrcp.f32 %v2977_v33  ;;  %v2936_v36 = vsub.f32 0.0, %v13032_v18  ;;  %v10016_v57 = vpop.f32.mrb[24].mxu0 }
 0x7e6   : > { %v10914_v19 = vpop.eup %10913  ;;  %10933 = vrcp.f32 %v2976_v20  ;;  %v2966_v62 = vmul.f32 1.442695, %v2937_v53  ;;  %v13037_v39 = vadd.f32 %v10016_v57, %v12978_v58  ;;  %v2915_v24 = vpop.f32.mrb[25].mxu0 }
 0x7e7   : > { %v10916_v4 = vpop.eup %10915  ;;  %v2979_v29 = vadd.f32 1.0, %v10914_v19  ;;  %10935 = vpow2.f32 %v2960_v9  ;;  %v2964_v40 = vmul.f32 1.442695, %v2936_v36  ;;  %v13041_v0 = vadd.f32 %v2915_v24, %v12978_v58 }
 0x7e8   : > { %v10918_v10 = vpop.eup %10917  ;;  %v3005_v25 = vmul.f32 %v10916_v4, %v12981_v51  ;;  %v2939_v41 = vsub.f32 0.0, %v13037_v39 }
 0x7e9   : > { %v10920_v56 = vpop.eup %10919  ;;  %v3004_v44 = vmul.f32 %v10918_v10, %v12984_v26  ;;  %10937 = vrcp.f32 %v2979_v29  ;;  %v2938_v11 = vsub.f32 0.0, %v13041_v0 }
 0x7ea   : > { %v10922_v35 = vpop.eup %10921  ;;  %v3021_v37 = vmul.f32 %v3005_v25, %v12532_v21  ;;  %v2978_v7 = vadd.f32 1.0, %v10920_v56  ;;  %10939 = vpow2.f32 %v2966_v62  ;;  %v2970_v58 = vmul.f32 1.442695, %v2939_v41 }
 0x7eb   : > { %v10924_v8 = vpop.eup %10923  ;;  %v3020_v51 = vmul.f32 %v3004_v44, %v12452_v59  ;;  %v2981_v49 = vadd.f32 1.0, %v10922_v35  ;;  %10941 = vpow2.f32 %v2964_v40  ;;  %v2968_v5 = vmul.f32 1.442695, %v2938_v11 }
 0x7ec   : > { %v10926_v42 = vpop.eup %10925  ;;  %v3043_v30 = vsel %vm804_vm4, %v3021_v37, 0.0  ;;  %v3007_v26 = vmul.f32 %v10924_v8, %v12989_v50  ;;  %10943 = vrcp.f32 %v2978_v7  ;;  %v15943_v7 = vld [vmem:[#allocation89_spill] sm:$0xff] }
 0x7ed   : > { %v10928_v46 = vpop.eup %10927  ;;  %v3044_v61 = vrot.slane %v3043_v30, 4  ;;  %v3036_v22 = vsel %vm804_vm4, %v3020_v51, 0.0  ;;  %v3006_v1 = vmul.f32 %v10926_v42, %v12992_v60  ;;  %10945 = vrcp.f32 %v2981_v49 }
 0x7ee   : > { %v10930_v2 = vpop.eup %10929  ;;  %v3037_v33 = vrot.slane %v3036_v22, 4  ;;  %v3023_v34 = vmul.f32 %v3007_v26, %v12497_v15  ;;  %v2980_v20 = vadd.f32 1.0, %v10928_v46  ;;  %10947 = vpow2.f32 %v2970_v58 }
 0x7ef   : > { %v10932_v9 = vpop.eup %10931  ;;  %v3045_v53 = vadd.f32 %v3044_v61, %v3043_v30  ;;  %v3022_v19 = vmul.f32 %v3006_v1, %v12457_v16  ;;  %v2983_v36 = vadd.f32 1.0, %v10930_v2 }
 0x7f0   : > { %v10934_v50 = vpop.eup %10933  ;;  %v3038_v57 = vadd.f32 %v3037_v33, %v3036_v22  ;;  %v3057_v4 = vsel %vm804_vm4, %v3023_v34, 0.0  ;;  %v3009_v29 = vmul.f32 %v10932_v9, %v12997_v13  ;;  %10949 = vrcp.f32 %v2980_v20 }
 0x7f1   : > { %v3046_v60 = vrot.slane %v3045_v53, 2  ;;  %v3058_v62 = vrot.slane %v3057_v4, 4  ;;  %v3050_v24 = vsel %vm804_vm4, %v3022_v19, 0.0  ;;  %v3008_v10 = vmul.f32 %v10934_v50, %v13000_v54  ;;  %v10936_v25 = vpop.eup %10935 }
 0x7f2   : > { %v3039_v40 = vrot.slane %v3038_v57, 2  ;;  %v3051_v56 = vrot.slane %v3050_v24, 4  ;;  %v3025_v44 = vmul.f32 %v3009_v29, %v12552_v43  ;;  %10951 = vrcp.f32 %v2983_v36 }
 0x7f3   : > { %v10938_v41 = vpop.eup %10937  ;;  %v3047_v35 = vadd.f32 %v3046_v60, %v3045_v53  ;;  %v3059_v37 = vadd.f32 %v3058_v62, %v3057_v4  ;;  %v3024_v11 = vmul.f32 %v3008_v10, %v15943_v7  ;;  %10953 = vpow2.f32 %v2968_v5 }
 0x7f4   : > { %v13060_v13 = vpop.eup %10939  ;;  %v3040_v8 = vadd.f32 %v3039_v40, %v3038_v57  ;;  %v3052_v51 = vadd.f32 %v3051_v56, %v3050_v24  ;;  %v3071_v49 = vsel %vm804_vm4, %v3025_v44, 0.0  ;;  %v3011_v54 = vmul.f32 %v10938_v41, %v13005_v14 }
 0x7f5   : > { %v10942_v58 = vpop.eup %10941  ;;  %v3048_v42 = vrot.slane %v3047_v35, 1  ;;  %v3060_v30 = vrot.slane %v3059_v37, 2  ;;  %v3072_v26 = vrot.slane %v3071_v49, 4  ;;  %v3064_v46 = vsel %vm804_vm4, %v3024_v11, 0.0 }
 0x7f6   : > { %v10944_v61 = vpop.eup %10943  ;;  %v3041_v22 = vrot.slane %v3040_v8, 1  ;;  %v3053_v1 = vrot.slane %v3052_v51, 2  ;;  %v3065_v2 = vrot.slane %v3064_v46, 4  ;;  %v3027_v5 = vmul.f32 %v3011_v54, %v12573_v3 }
 0x7f7   : > { %v3049_v33 = vadd.f32 %v3048_v42, %v3047_v35  ;;  %v3061_v34 = vadd.f32 %v3060_v30, %v3059_v37  ;;  %v3073_v20 = vadd.f32 %v3072_v26, %v3071_v49  ;;  %v3010_v9 = vmul.f32 %v10944_v61, %v13008_v6  ;;  %v10946_v53 = vpop.eup %10945 }
 0x7f8   : > { %v3042_v19 = vadd.f32 %v3041_v22, %v3040_v8  ;;  %v3054_v14 = vadd.f32 %v3053_v1, %v3052_v51  ;;  %v3066_v36 = vadd.f32 %v3065_v2, %v3064_v46  ;;  %v3085_v50 = vsel %vm804_vm4, %v3027_v5, 0.0  ;;  %v10948_v57 = vpop.eup %10947 }
 0x7f9   : > { %v3149_v4 = vmul.f32 0.01, %v3049_v33  ;;  %v3062_v29 = vrot.slane %v3061_v34, 1  ;;  %v3074_v60 = vrot.slane %v3073_v20, 2  ;;  %v3086_v62 = vrot.slane %v3085_v50, 4 }
 0x7fa   : > { %v10950_v24 = vpop.eup %10949  ;;  %v3148_v10 = vmul.f32 0.01, %v3042_v19  ;;  %v3055_v40 = vrot.slane %v3054_v14, 1  ;;  %v3067_v56 = vrot.slane %v3066_v36, 2  ;;  %v3026_v44 = vmul.f32 %v3010_v9, %v12561_v47 }
 0x7fb   : > { %v3075_v41 = vadd.f32 %v3074_v60, %v3073_v20  ;;  %v3087_v35 = vadd.f32 %v3086_v62, %v3085_v50  ;;  %v3013_v6 = vmul.f32 %v10946_v53, %v13013_v55  ;;  %v2982_v37 = vadd.f32 1.0, %v10936_v25  ;;  %v15944_v53 = vld [vmem:[#allocation85_spill] sm:$0xff] }
 0x7fc   : > { %v10952_v11 = vpop.eup %10951  ;;  %v3180_v8 = vsel %vm1878_vm5, %v3149_v4, %v3148_v10  ;;  %v3056_v51 = vadd.f32 %v3055_v40, %v3054_v14  ;;  %v3068_v49 = vadd.f32 %v3067_v56, %v3066_v36  ;;  %v3078_v54 = vsel %vm804_vm4, %v3026_v44, 0.0 }
 0x7fd   : > { %v10954_v42 = vpop.eup %10953  ;;  %v3076_v30 = vrot.slane %v3075_v41, 1  ;;  %v3088_v26 = vrot.slane %v3087_v35, 2  ;;  %v3079_v46 = vrot.slane %v3078_v54, 4  ;;  %v3063_v61 = vadd.f32 %v3062_v29, %v3061_v34  ;;  %v15945_v34 = vld [vmem:[#allocation91_spill] sm:$0xff] }
 0x7fe   : > { %v3069_v22 = vrot.slane %v3068_v49, 1  ;;  %v3029_v1 = vmul.f32 %v3013_v6, %v12481_v38  ;;  %v3012_v2 = vmul.f32 %v10950_v24, %v13016_v27  ;;  %v3150_v5 = vmul.f32 0.01, %v3056_v51  ;;  %v15965_v38 = vld [vmem:[#allocation47_spill] sm:$0xff] }
 0x7ff   : > { %v3077_v55 = vadd.f32 %v3076_v30, %v3075_v41  ;;  %v3080_v25 = vadd.f32 %v3079_v46, %v3078_v54  ;;  %v3015_v33 = vmul.f32 %v10952_v11, %v13021_v45  ;;  %10955 = vrcp.f32 %v2982_v37 }
 0x800   : > { %v3070_v20 = vadd.f32 %v3069_v22, %v3068_v49  ;;  %v3099_v9 = vsel %vm804_vm4, %v3029_v1, 0.0  ;;  %v3028_v19 = vmul.f32 %v3012_v2, %v15944_v53  ;;  %v3089_v14 = vadd.f32 %v3088_v26, %v3087_v35 }
 0x801   : > { %v3081_v36 = vrot.slane %v3080_v25, 2  ;;  %v3100_v50 = vrot.slane %v3099_v9, 4  ;;  %v3031_v4 = vmul.f32 %v3015_v33, %v15945_v34  ;;  %v2985_v27 = vadd.f32 1.0, %v13060_v13 }
 0x802   : > { %v3152_v29 = vmul.f32 0.01, %v3070_v20  ;;  %v3092_v60 = vsel %vm804_vm4, %v3028_v19, 0.0  ;;  %v2984_v62 = vadd.f32 1.0, %v10942_v58  ;;  %v2987_v44 = vadd.f32 1.0, %v10948_v57 }
 0x803   : > { %v3082_v24 = vadd.f32 %v3081_v36, %v3080_v25  ;;  %v3101_v10 = vadd.f32 %v3100_v50, %v3099_v9  ;;  %v3093_v45 = vrot.slane %v3092_v60, 4  ;;  %v3113_v40 = vsel %vm804_vm4, %v3031_v4, 0.0 }
 0x804   : > { %v3114_v56 = vrot.slane %v3113_v40, 4  ;;  %10957 = vrcp.f32 %v2985_v27  ;;  %v2986_v41 = vadd.f32 1.0, %v10954_v42  ;;  %v3151_v11 = vmul.f32 0.01, %v3063_v61 }
 0x805   : > { %v3083_v35 = vrot.slane %v3082_v24, 1  ;;  %v3102_v6 = vrot.slane %v3101_v10, 2  ;;  %v3094_v37 = vadd.f32 %v3093_v45, %v3092_v60  ;;  %10959 = vrcp.f32 %v2984_v62 }
 0x806   : > { %10961 = vrcp.f32 %v2987_v44  ;;  %v3090_v51 = vrot.slane %v3089_v14, 1  ;;  %v3181_v49 = vsel %vm1880_vm6, %v3150_v5, %v3180_v8  ;;  %v3153_v30 = vmul.f32 0.01, %v3077_v55 }
 0x807   : > { %v3103_v13 = vadd.f32 %v3102_v6, %v3101_v10  ;;  %v3095_v58 = vrot.slane %v3094_v37, 2  ;;  %10963 = vrcp.f32 %v2986_v41  ;;  %v3084_v54 = vadd.f32 %v3083_v35, %v3082_v24 }
 0x808   : > { %v3115_v26 = vadd.f32 %v3114_v56, %v3113_v40  ;;  %v3091_v46 = vadd.f32 %v3090_v51, %v3089_v14  ;;  %v3182_v22 = vsel %vm1882_vm7, %v3151_v11, %v3181_v49 }
 0x809   : > { %v3104_v57 = vrot.slane %v3103_v13, 1  ;;  %v3096_v42 = vadd.f32 %v3095_v58, %v3094_v37  ;;  %v3154_v1 = vmul.f32 0.01, %v3084_v54  ;;  %v3183_v2 = vsel %vm1884_vm8, %v3152_v29, %v3182_v22  ;;  %v10956_v25 = vpop.eup %10955 }
 0x80a   : > { %v3155_v61 = vmul.f32 0.01, %v3091_v46  ;;  %v3184_v33 = vsel %vm1886_vm9, %v3153_v30, %v3183_v2  ;;  %v3014_v5 = vmul.f32 %v10956_v25, %v13024_v31  ;;  %v3116_v36 = vrot.slane %v3115_v26, 2 }
 0x80b   : > { %v3105_v20 = vadd.f32 %v3104_v57, %v3103_v13  ;;  %v3097_v8 = vrot.slane %v3096_v42, 1  ;;  %v3185_v9 = vsel %vm1888_vm10, %v3154_v1, %v3184_v33  ;;  %v15946_v13 = vld [vmem:[#allocation98_spill] sm:$0xff] }
 0x80c   : > { %v3186_v55 = vsel %vm1890_vm11, %v3155_v61, %v3185_v9  ;;  %v3030_v50 = vmul.f32 %v3014_v5, %v12509_v63  ;;  %v3117_v56 = vadd.f32 %v3116_v36, %v3115_v26 }
 0x80d   : > { %v3157_v19 = vmul.f32 0.01, %v3105_v20  ;;  %v3098_v14 = vadd.f32 %v3097_v8, %v3096_v42  ;;  %10025 = vmatprep.mubr.msk.f32.mxu1 %vm804_vm4, %v3186_v55 }
 0x80e   : > { %v10958_v4 = vpop.eup %10957  ;;  %v3106_v27 = vsel %vm804_vm4, %v3030_v50, 0.0  ;;  %v3118_v54 = vrot.slane %v3117_v56, 1 }
 0x80f   : > { %v10960_v29 = vpop.eup %10959  ;;  %v3156_v60 = vmul.f32 0.01, %v3098_v14  ;;  %v3017_v62 = vmul.f32 %v10958_v4, %v13029_v23  ;;  %v3107_v31 = vrot.slane %v3106_v27, 4 }
 0x810   : > { %v10962_v24 = vpop.eup %10961  ;;  %v3016_v10 = vmul.f32 %v10960_v29, %v13032_v18  ;;  %v3119_v61 = vadd.f32 %v3118_v54, %v3117_v56  ;;  %v15947_v54 = vld [vmem:[#allocation101_spill] sm:$0xff] }
 0x811   : > { %v10964_v45 = vpop.eup %10963  ;;  %v3187_v40 = vsel %vm1878_vm5, %v3157_v19, %v3156_v60  ;;  %v3033_v44 = vmul.f32 %v3017_v62, %v12596_v28  ;;  %v3019_v41 = vmul.f32 %v10962_v24, %v13037_v39  ;;  %v3108_v35 = vadd.f32 %v3107_v31, %v3106_v27  ;;  %v15964_v28 = vld [vmem:[#allocation46_spill] sm:$0xff] }
 0x812   : > { %v3032_v6 = vmul.f32 %v3016_v10, %v12587_v32  ;;  %v3018_v37 = vmul.f32 %v10964_v45, %v13041_v0  ;;  %v3159_v4 = vmul.f32 0.01, %v3119_v61 }
 0x813   : > { %v3127_v11 = vsel %vm804_vm4, %v3033_v44, 0.0  ;;  %v3035_v23 = vmul.f32 %v3019_v41, %v12612_v48  ;;  %v3109_v51 = vrot.slane %v3108_v35, 2 }
 0x814   : > { %v3128_v49 = vrot.slane %v3127_v11, 4  ;;  %v3120_v18 = vsel %vm804_vm4, %v3032_v6, 0.0  ;;  %v3034_v58 = vmul.f32 %v3018_v37, %v15946_v13  ;;  %v9324_v6 = vld [vmem:[%s15626_s2 + $0x130] sm:$0xff]  ;;  %v9325_v37 = vld [vmem:[%s15626_s2 + $0x138] sm:$0xff] }
 0x815   : > { %v3121_v30 = vrot.slane %v3120_v18, 4  ;;  %v3141_v26 = vsel %vm804_vm4, %v3035_v23, 0.0  ;;  %v3110_v39 = vadd.f32 %v3109_v51, %v3108_v35 }
 0x816   : > { %v3129_v46 = vadd.f32 %v3128_v49, %v3127_v11  ;;  %v3142_v22 = vrot.slane %v3141_v26, 4  ;;  %v3134_v57 = vsel %vm804_vm4, %v3034_v58, 0.0 }
 0x817   : > { %v3122_v0 = vadd.f32 %v3121_v30, %v3120_v18  ;;  %v3135_v42 = vrot.slane %v3134_v57, 4  ;;  %v3111_v1 = vrot.slane %v3110_v39, 1  ;;  %v10491_v18 = vpack.c.bf16 %v9325_v37, %v9324_v6  ;;  %v15948_v30 = vld [vmem:[#allocation102_spill] sm:$0xff]  ;;  %v3458_v6 = vld [vmem:[%s15628_s4 + $0x18] sm:$0xff] }
 0x818   : > { %v3130_v2 = vrot.slane %v3129_v46, 2  ;;  %v3143_v25 = vadd.f32 %v3142_v22, %v3141_v26  ;;  %v9330_v26 = vld [vmem:[%s15626_s2 + $0x160] sm:$0xff]  ;;  %v9333_v22 = vld [vmem:[%s15626_s2 + $0x178] sm:$0xff] }
 0x819   : > { %v3123_v33 = vrot.slane %v3122_v0, 2  ;;  %v3136_v20 = vadd.f32 %v3135_v42, %v3134_v57  ;;  %v3112_v8 = vadd.f32 %v3111_v1, %v3110_v39  ;;  %v9331_v39 = vld [vmem:[%s15626_s2 + $0x168] sm:$0xff]  ;;  %v3461_v1 = vld [vmem:[%s15628_s4 + $0x30] sm:$0xff] }
 0x81a   : > { %v3131_v5 = vadd.f32 %v3130_v2, %v3129_v46  ;;  %v3144_v9 = vrot.slane %v3143_v25, 2  ;;  %v10495_v46 = vpack.c.bf16 %v9331_v39, %v9330_v26  ;;  %v3460_v42 = vld [vmem:[%s15628_s4 + $0x28] sm:$0xff]  ;;  %v15951_v39 = vld [vmem:[#allocation2_spill] sm:$0xff] }
 0x81b   : > { %v3124_v55 = vadd.f32 %v3123_v33, %v3122_v0  ;;  %v3137_v19 = vrot.slane %v3136_v20, 2  ;;  %v3158_v14 = vmul.f32 0.01, %v3112_v8  ;;  %v3459_v0 = vld [vmem:[%s15628_s4 + $0x20] sm:$0xff]  ;;  %v11567_v33 = vld [vmem:[%s15627_s3 + $0x8] sm:$0x3f] }
 0x81c   : > { %v3132_v36 = vrot.slane %v3131_v5, 1  ;;  %v3145_v50 = vadd.f32 %v3144_v9, %v3143_v25  ;;  %v10511_v2 = vpack.c.bf16 %v3460_v42, %v3459_v0  ;;  %v3462_v25 = vld [vmem:[%s15628_s4 + $0x38] sm:$0xff] }
 0x81d   : > { %v3125_v29 = vrot.slane %v3124_v55, 1  ;;  %v3138_v60 = vadd.f32 %v3137_v19, %v3136_v20  ;;  %v3188_v27 = vsel %vm1880_vm6, %v3158_v14, %v3187_v40  ;;  %v10515_v61 = vpack.c.bf16 %v3462_v25, %v3461_v1  ;;  %v15949_v20 = vld [vmem:[#allocation99_spill] sm:$0xff]  ;;  %v3466_v42 = vld [vmem:[%s15628_s4 + $0x58] sm:$0xff] }
 0x81e   : > { %v3133_v62 = vadd.f32 %v3132_v36, %v3131_v5  ;;  %v3146_v24 = vrot.slane %v3145_v50, 1  ;;  %v3189_v45 = vsel %vm1882_vm7, %v3159_v4, %v3188_v27  ;;  %10512 = vmatprep.subr.bf16.mxu0 %v10511_v2  ;;  %v3351_v8 = vrot.slane %v11567_v33, %v15949_v20  ;;  %v9398_v25 = vld [vmem:[%s15626_s2 + $0x188] sm:$0xff] }
 0x81f   : > { %v3126_v31 = vadd.f32 %v3125_v29, %v3124_v55  ;;  %v3139_v10 = vrot.slane %v3138_v60, 1  ;;  %10514 = vmatpush3.bf16.msra.mxu0 %v10511_v2  ;;  %v9397_v2 = vld [vmem:[%s15626_s2 + $0x180] sm:$0xff] }
 0x820   : > { %v3147_v56 = vadd.f32 %v3146_v24, %v3145_v50  ;;  %v3161_v35 = vmul.f32 0.01, %v3133_v62  ;;  %10516 = vmatprep.subr.bf16.mxu0 %v10515_v61 }
 0x821   : > { %v3160_v44 = vmul.f32 0.01, %v3126_v31  ;;  %v3140_v41 = vadd.f32 %v3139_v10, %v3138_v60 }
 0x822   : > { %v3163_v23 = vmul.f32 0.01, %v3147_v56  ;;  %v3455_v56 = vld [vmem:[%s15628_s4] sm:$0xff] }
 0x823   : > { %v3162_v11 = vmul.f32 0.01, %v3140_v41  ;;  %v3190_v40 = vsel %vm1884_vm8, %v3160_v44, %v3189_v45  ;;  %10518 = vmatpush3.bf16.msra.mxu0 %v10515_v61  ;;  %v3456_v44 = vld [vmem:[%s15628_s4 + $0x8] sm:$0xff]  ;;  %v3457_v41 = vld [vmem:[%s15628_s4 + $0x10] sm:$0xff]  ;;  %v13199_v61 = vpack.c.bf16 %v9398_v25, %v9397_v2 }
 0x824   : > { %v3191_v51 = vsel %vm1886_vm9, %v3161_v35, %v3190_v40  ;;  %v10503_v35 = vpack.c.bf16 %v3456_v44, %v3455_v56  ;;  %v10507_v37 = vpack.c.bf16 %v3458_v6, %v3457_v41  ;;  %v15958_v41 = vld [vmem:[#allocation34_spill] sm:$0xff] }
 0x825   : > { %v3192_v49 = vsel %vm1888_vm10, %v3162_v11, %v3191_v51  ;;  %v15950_v11 = vld [vmem:[#allocation100_spill] sm:$0xff] }
 0x826   : > { %v3193_v58 = vsel %vm1890_vm11, %v3163_v23, %v3192_v49  ;;  %v3369_v40 = vrot.slane %v11567_v33, %v15950_v11  ;;  %v13205_v33 = vld [vmem:[%s15629_s5] sm:$0xf] }
 0x827   : > { %10026 = vmatmul.mubr.msk.f32.vlgmr.msra.gmra.mrb[20].mxu1 %vm804_vm4, %v3193_v58 }
 0x828   : > { %10490 = vmatpush3.bf16.msra.mxu1 %v12973_v12  ;;  %10036 = vmatprep.mubr.msk.f32.mxu1 %vm804_vm4, %v15947_v54  ;;  %v9332_v12 = vld [vmem:[%s15626_s2 + $0x170] sm:$0xff] }
 0x829   : > { %10492 = vmatprep.subr.bf16.mxu1 %v10491_v18  ;;  %v10499_v57 = vpack.c.bf16 %v9333_v22, %v9332_v12 }
 0x82c   : > { %10494 = vmatpush3.bf16.msra.mxu1 %v10491_v18 }
 0x82d   : > { %10496 = vmatprep.subr.bf16.mxu1 %v10495_v46 }
 0x82f   : > { %10037 = vmatmul.mubr.msk.f32.vlgmr.msra.gmra.mrb[20].mxu1 %vm804_vm4, %v15948_v30 }
 0x830   : > { %10498 = vmatpush3.bf16.msra.mxu1 %v10495_v46  ;;  %v15952_v46 = vld [vmem:[#allocation4_spill] sm:$0xff] }
 0x831   : > { %10500 = vmatprep.subr.bf16.mxu1 %v10499_v57 }
 0x834   : > { %10502 = vmatpush3.bf16.msra.mxu1 %v10499_v57  ;;  %v3465_v57 = vld [vmem:[%s15628_s4 + $0x50] sm:$0xff] }
 0x835   : > { %10504 = vmatprep.subr.bf16.mxu1 %v10503_v35  ;;  %v10523_v1 = vpack.c.bf16 %v3466_v42, %v3465_v57  ;;  %v15963_v42 = vld [vmem:[#allocation43_spill] sm:$0xff] }
 0x902   : > { %v10038_v5 = vpop.f32.mrb[20].mxu1 }
 0x903   : > { %v3353_v9 = vadd.f32 %v10038_v5, %v3351_v8  ;;  %v3339_v55 = vpop.f32.mrb[21].mxu1  ;;  %v13213_v5 = vrot.slane %v13205_v33, %v15950_v11 }
 0x904   : > { %v3352_v19 = vadd.f32 %v3351_v8, %v3339_v55  ;;  %v13209_v8 = vrot.slane %v13205_v33, %v15949_v20 }
 0x905   : > { %v3355_v14 = vsub.f32 0.0, %v3353_v9  ;;  %v3657_v6 = vmul.f32 %v13213_v5, %v15958_v41  ;;  %v3662_v2 = vmul.f32 %v13213_v5, %v15963_v42  ;;  %v3663_v63 = vmul.f32 %v13213_v5, %v15964_v28 }
 0x906   : > { %v3354_v36 = vsub.f32 0.0, %v3352_v19  ;;  %v3643_v48 = vmul.f32 %v13209_v8, %v15964_v28  ;;  %v3644_v53 = vmul.f32 %v13209_v8, %v15965_v38  ;;  %v3664_v3 = vmul.f32 %v13213_v5, %v15965_v38 }
 0x907   : > { %v3358_v50 = vmul.f32 1.442695, %v3355_v14  ;;  %v13221_v14 = vrot.slane %v13205_v33, %v11686_v17 }
 0x908   : > { %v3356_v4 = vmul.f32 1.442695, %v3354_v36 }
 0x909   : > { %10965 = vpow2.f32 %v3358_v50  ;;  %v15954_v50 = vld [vmem:[#allocation30_spill] sm:$0xff] }
 0x90a   : > { %10967 = vpow2.f32 %v3356_v4  ;;  %v3633_v4 = vmul.f32 %v13209_v8, %v15954_v50 }
 0x913   : > { %v10966_v29 = vpop.eup %10965 }
 0x914   : > { %v10968_v60 = vpop.eup %10967  ;;  %v3361_v27 = vadd.f32 1.0, %v10966_v29  ;;  %v3653_v29 = vmul.f32 %v13213_v5, %v15954_v50 }
 0x915   : > { %v3360_v62 = vadd.f32 1.0, %v10968_v60  ;;  %v15955_v60 = vld [vmem:[#allocation29_spill] sm:$0xff] }
 0x916   : > { %10969 = vrcp.f32 %v3361_v27  ;;  %v3634_v27 = vmul.f32 %v13209_v8, %v15955_v60  ;;  %v3669_v25 = vadd.f32 %v3653_v29, %v3633_v4 }
 0x917   : > { %10971 = vrcp.f32 %v3360_v62  ;;  %v3654_v62 = vmul.f32 %v13213_v5, %v15955_v60 }
 0x920   : > { %v10970_v24 = vpop.eup %10969 }
 0x921   : > { %v10972_v31 = vpop.eup %10971  ;;  %v3365_v45 = vmul.f32 %v10970_v24, %v3353_v9  ;;  %v15953_v9 = vld [vmem:[#allocation26_spill] sm:$0xff]  ;;  %v15956_v24 = vld [vmem:[#allocation31_spill] sm:$0xff] }
 0x922   : > { %v3364_v10 = vmul.f32 %v10972_v31, %v3352_v19  ;;  %v3632_v55 = vmul.f32 %v13209_v8, %v15953_v9  ;;  %v3652_v19 = vmul.f32 %v13213_v5, %v15953_v9  ;;  %v3635_v31 = vmul.f32 %v13209_v8, %v15956_v24 }
 0x924   : > { %10047 = vmatprep.mubr.msk.f32.mxu1 %vm804_vm4, %v3364_v10  ;;  %v3668_v36 = vadd.f32 %v3652_v19, %v3632_v55  ;;  %v3655_v10 = vmul.f32 %v13213_v5, %v15956_v24  ;;  %v3670_v55 = vadd.f32 %v3654_v62, %v3634_v27  ;;  %v15966_v27 = vld [vmem:[#allocation50_spill] sm:$0xff] }
 0x925   : > { %10048 = vmatmul.mubr.msk.f32.vlgmr.msra.gmra.mrb[22].mxu1 %vm804_vm4, %v3365_v45  ;;  %v15957_v45 = vld [vmem:[#allocation32_spill] sm:$0xff]  ;;  %v3645_v62 = vmul.f32 %v13209_v8, %v15966_v27 }
 0x926   : > { %10506 = vmatpush3.bf16.msra.mxu1 %v10503_v35  ;;  %v3636_v56 = vmul.f32 %v13209_v8, %v15957_v45  ;;  %v3656_v44 = vmul.f32 %v13213_v5, %v15957_v45  ;;  %v3637_v35 = vmul.f32 %v13209_v8, %v15958_v41  ;;  %v3671_v19 = vadd.f32 %v3655_v10, %v3635_v31 }
 0x927   : > { %10508 = vmatprep.subr.bf16.mxu1 %v10507_v37  ;;  %v3665_v31 = vmul.f32 %v13213_v5, %v15966_v27  ;;  %v13276_v10 = vadd.f32 %v13221_v14, %v3668_v36 }
 0x928   : > { %v3672_v20 = vadd.f32 %v3656_v44, %v3636_v56  ;;  %v3673_v11 = vadd.f32 %v3657_v6, %v3637_v35  ;;  %v13279_v56 = vadd.f32 %v13221_v14, %v3669_v25  ;;  %v13282_v44 = vadd.f32 %v13221_v14, %v3670_v55 }
 0x929   : > { %v13285_v35 = vadd.f32 %v13221_v14, %v3671_v19  ;;  %v15969_v19 = vld [vmem:[#allocation81_spill] sm:$0xff] }
 0x92a   : > { %10510 = vmatpush3.bf16.msra.mxu1 %v10507_v37  ;;  %v15959_v37 = vld [vmem:[#allocation35_spill] sm:$0xff]  ;;  %v13288_v6 = vadd.f32 %v13221_v14, %v3672_v20 }
 0x9f8   : > { %v10049_v23 = vpop.f32.mrb[22].mxu1 }
 0x9f9   : > { %v3448_v51 = vadd.f32 %v10049_v23, %v3369_v40  ;;  %v3442_v49 = vpop.f32.mrb[23].mxu1  ;;  %v3658_v23 = vmul.f32 %v13213_v5, %v15959_v37 }
 0x9fa   : > { %v3443_v18 = vadd.f32 %v3442_v49, %v3369_v40  ;;  %v3638_v40 = vmul.f32 %v13209_v8, %v15959_v37 }
 0x9fb   : > { %v3452_v58 = vadd.f32 %v3448_v51, %v15948_v30  ;;  %v3464_v30 = vld [vmem:[%s15628_s4 + $0x48] sm:$0xff]  ;;  %v15960_v51 = vld [vmem:[#allocation38_spill] sm:$0xff] }
 0x9fc   : > { %v3451_v26 = vadd.f32 %v3443_v18, %v15947_v54  ;;  %v3463_v54 = vld [vmem:[%s15628_s4 + $0x40] sm:$0xff]  ;;  %v3639_v49 = vmul.f32 %v13209_v8, %v15960_v51  ;;  %v3659_v18 = vmul.f32 %v13213_v5, %v15960_v51  ;;  %v3674_v13 = vadd.f32 %v3658_v23, %v3638_v40 }
 0x9fd   : > { %v13171_v22 = vmul.f32 %v3452_v58, %v15952_v46  ;;  %v10519_v0 = vpack.c.bf16 %v3464_v30, %v3463_v54  ;;  %v15961_v58 = vld [vmem:[#allocation39_spill] sm:$0xff]  ;;  %v15962_v30 = vld [vmem:[#allocation42_spill] sm:$0xff]  ;;  %v3679_v40 = vadd.f32 %v3663_v63, %v3643_v48  ;;  %v13291_v23 = vadd.f32 %v13221_v14, %v3673_v11 }
 0x9fe   : > { %v13168_v12 = vmul.f32 %v3451_v26, %v15951_v39  ;;  %v3640_v26 = vmul.f32 %v13209_v8, %v15961_v58  ;;  %v3660_v54 = vmul.f32 %v13213_v5, %v15961_v58  ;;  %v3641_v57 = vmul.f32 %v13209_v8, %v15962_v30 }
 0x9ff   : > { %10520 = vmatprep.subr.bf16.mxu1 %v10519_v0  ;;  %v3675_v32 = vadd.f32 %v3659_v18, %v3639_v49  ;;  %v13294_v49 = vadd.f32 %v13221_v14, %v3674_v13  ;;  %v3680_v18 = vadd.f32 %v3664_v3, %v3644_v53  ;;  %v3681_v48 = vadd.f32 %v3665_v31, %v3645_v62  ;;  %v15967_v13 = vld [vmem:[#allocation6_spill] sm:$0xff] }
 0xa00   : > { %10058 = vmatprep.mubr.msk.f32.mxu1 %vm804_vm4, %v13168_v12  ;;  %10069 = vmatprep.mubr.msk.f32.mxu0 %vm804_vm4, %v13168_v12  ;;  %v3676_v34 = vadd.f32 %v3660_v54, %v3640_v26  ;;  %v13321_v55 = vadd.f32 %v13221_v14, %v3679_v40 }
 0xa01   : > { %10059 = vmatmul.mubr.msk.f32.vlgmr.msra.gmra.mrb[24].mxu1 %vm804_vm4, %v13171_v22  ;;  %10070 = vmatmul.mubr.msk.f32.vlgmr.msra.gmra.mrb[26].mxu0 %vm804_vm4, %v13171_v22  ;;  %v13297_v36 = vadd.f32 %v13221_v14, %v3675_v32  ;;  %v13337_v40 = vadd.f32 %v13221_v14, %v3681_v48 }
 0xa02   : > { %10522 = vmatpush3.bf16.msra.mxu1 %v10519_v0  ;;  %v3661_v0 = vmul.f32 %v13213_v5, %v15962_v30 }
 0xa03   : > { %10524 = vmatprep.subr.bf16.mxu1 %v10523_v1 }
 0xa04   : > { %v3677_v4 = vadd.f32 %v3661_v0, %v3641_v57  ;;  %v13302_v57 = vadd.f32 %v13221_v14, %v3676_v34 }
 0xa06   : > { %10526 = vmatpush3.bf16.msra.mxu1 %v10523_v1  ;;  %v3642_v1 = vmul.f32 %v13209_v8, %v15963_v42  ;;  %v13305_v20 = vadd.f32 %v13221_v14, %v3677_v4  ;;  %v13325_v4 = vmul.f32 %v13209_v8, %v15969_v19 }
 0xa07   : > { %10536 = vmatprep.subr.bf16.mxu1 %v13199_v61 }
 0xa08   : > { %v3678_v29 = vadd.f32 %v3662_v2, %v3642_v1  ;;  %v15968_v2 = vld [vmem:[#allocation80_spill] sm:$0xff] }
 0xa09   : > { %v13313_v3 = vmul.f32 %v13209_v8, %v15968_v2  ;;  %v13317_v53 = vmul.f32 %v13213_v5, %v15968_v2 }
 0xa0a   : > { %v13308_v63 = vadd.f32 %v13221_v14, %v3678_v29 }
 0xad4   : > { %v10060_v26 = vpop.f32.mrb[24].mxu1  ;;  %v13299_v54 = vpop.f32.mrb[26].mxu0 }
 0xad5   : > { %v3755_v11 = vcombine.high %v10060_v26, %v10060_v26  ;;  %v3762_v0 = vrot.slane %v10060_v26, %v15967_v13  ;;  %v3544_v1 = vpop.f32.mrb[25].mxu1  ;;  %v3619_v32 = vpop.f32.mrb[27].mxu0  ;;  %v13332_v26 = vadd.f32 %v13221_v14, %v3680_v18 }
 0xad6   : > { %v3706_v34 = vcombine.high %v3544_v1, %v3544_v1  ;;  %v3713_v25 = vrot.slane %v3544_v1, %v15967_v13 }
 0xad7   : > { %v3769_v29 = vrot.slane %v3755_v11, %v15967_v13  ;;  %v3770_v62 = vcombine.high %v3762_v0, %v3762_v0  ;;  %v13329_v31 = vrot.slane %v3762_v0, %v15967_v13 }
 0xad8   : > { %v3720_v47 = vrot.slane %v3706_v34, %v15967_v13  ;;  %v3721_v43 = vcombine.high %v3713_v25, %v3713_v25  ;;  %v3729_v1 = vrot.slane %v3713_v25, %v15967_v13 }
 0xad9   : > { %v3771_v7 = vcombine.high %v3769_v29, %v3769_v29  ;;  %v13340_v8 = vrot.slane %v3769_v29, %v15967_v13  ;;  %v3792_v11 = vrot.slane %v3770_v62, %v15967_v13  ;;  %v3800_v0 = vcombine.high %v13329_v31, %v13329_v31 }
 0xada   : > { %v3839_v18 = vrot.slane %v13329_v31, %v11686_v17  ;;  %v3722_v16 = vcombine.high %v3720_v47, %v3720_v47  ;;  %v3736_v34 = vrot.slane %v3720_v47, %v15967_v13  ;;  %v3743_v25 = vrot.slane %v3721_v43, %v15967_v13 }
 0xadb   : > { %v13350_v48 = vrot.slane %v3771_v7, %v15967_v13  ;;  %v3801_v29 = vcombine.high %v13340_v8, %v13340_v8  ;;  %v3802_v15 = vcombine.high %v3792_v11, %v3792_v11  ;;  %v3843_v62 = vrot.slane %v3792_v11, %v11686_v17 }
 0xadc   : > { %v3847_v59 = vrot.slane %v3800_v0, %v11686_v17  ;;  %v3855_v2 = vrot.slane %v13340_v8, %v11686_v17  ;;  %v3750_v31 = vrot.slane %v3722_v16, %v15967_v13  ;;  %v3751_v21 = vcombine.high %v3729_v1, %v3729_v1 }
 0xadd   : > { %v3803_v43 = vcombine.high %v13350_v48, %v13350_v48  ;;  %v3851_v47 = vrot.slane %v3802_v15, %v11686_v17  ;;  %v3859_v7 = vrot.slane %v13350_v48, %v11686_v17  ;;  %v13365_v27 = vrot.slane %v3801_v29, %v11686_v17 }
 0xade   : > { %v3752_v11 = vcombine.high %v3736_v34, %v3736_v34  ;;  %v3753_v42 = vcombine.high %v3743_v25, %v3743_v25  ;;  %v3754_v0 = vcombine.high %v3750_v31, %v3750_v31  ;;  %v3807_v38 = vrot.slane %v3729_v1, %v11686_v17 }
 0xadf   : > { %v13369_v8 = vrot.slane %v3803_v43, %v11686_v17  ;;  %v3811_v16 = vrot.slane %v3743_v25, %v11686_v17  ;;  %v3815_v28 = vrot.slane %v3751_v21, %v11686_v17  ;;  %v3823_v15 = vrot.slane %v3736_v34, %v11686_v17 }
 0xae0   : > { %v3819_v30 = vrot.slane %v3753_v42, %v11686_v17  ;;  %v3827_v48 = vrot.slane %v3750_v31, %v11686_v17  ;;  %v3831_v29 = vrot.slane %v3752_v11, %v11686_v17  ;;  %v3835_v58 = vrot.slane %v3754_v0, %v11686_v17 }
 0xae1   : > { %v3884_v51 = vadd.f32 %v3807_v38, %v3619_v32  ;;  %v3885_v37 = vadd.f32 %v3811_v16, %v3619_v32  ;;  %v3886_v1 = vadd.f32 %v3815_v28, %v3619_v32  ;;  %v3888_v41 = vadd.f32 %v3823_v15, %v3619_v32 }
 0xae2   : > { %v3887_v43 = vadd.f32 %v3819_v30, %v3619_v32  ;;  %v3889_v45 = vadd.f32 %v3827_v48, %v3619_v32  ;;  %v3890_v60 = vadd.f32 %v3831_v29, %v3619_v32  ;;  %v3891_v25 = vadd.f32 %v3835_v58, %v3619_v32 }
 0xae3   : > { %v13379_v21 = vadd.f32 %v3884_v51, %v13276_v10  ;;  %v13382_v34 = vadd.f32 %v3885_v37, %v13279_v56  ;;  %v13385_v42 = vadd.f32 %v3886_v1, %v13282_v44  ;;  %v13388_v31 = vadd.f32 %v3888_v41, %v13288_v6 }
 0xae4   : > { %v13391_v38 = vadd.f32 %v3887_v43, %v13285_v35  ;;  %v13394_v28 = vadd.f32 %v3889_v45, %v13291_v23  ;;  %v13397_v58 = vadd.f32 %v3890_v60, %v13294_v49  ;;  %v13400_v51 = vadd.f32 %v3891_v25, %v13297_v36 }
 0xae5   : > { %v3916_v37 = vsub.f32 0.0, %v13379_v21  ;;  %v3917_v30 = vsub.f32 0.0, %v13382_v34  ;;  %v3918_v10 = vsub.f32 0.0, %v13385_v42  ;;  %v3920_v41 = vsub.f32 0.0, %v13388_v31 }
 0xae6   : > { %v3919_v56 = vsub.f32 0.0, %v13391_v38  ;;  %v3921_v44 = vsub.f32 0.0, %v13394_v28  ;;  %v3922_v45 = vsub.f32 0.0, %v13397_v58  ;;  %v3923_v60 = vsub.f32 0.0, %v13400_v51 }
 0xae7   : > { %v3932_v35 = vmul.f32 1.442695, %v3916_v37  ;;  %v3934_v6 = vmul.f32 1.442695, %v3917_v30  ;;  %v3936_v23 = vmul.f32 1.442695, %v3918_v10  ;;  %v3892_v49 = vadd.f32 %v13299_v54, %v3839_v18 }
 0xae8   : > { %v3938_v36 = vmul.f32 1.442695, %v3919_v56  ;;  %v3940_v32 = vmul.f32 1.442695, %v3920_v41  ;;  %v3942_v11 = vmul.f32 1.442695, %v3921_v44  ;;  %v3893_v0 = vadd.f32 %v13299_v54, %v3843_v62 }
 0xae9   : > { %10973 = vpow2.f32 %v3932_v35  ;;  %v3944_v16 = vmul.f32 1.442695, %v3922_v45  ;;  %v3946_v15 = vmul.f32 1.442695, %v3923_v60  ;;  %v13413_v48 = vadd.f32 %v3892_v49, %v13302_v57 }
 0xaea   : > { %10975 = vpow2.f32 %v3934_v6  ;;  %v13416_v29 = vadd.f32 %v3893_v0, %v13305_v20  ;;  %v3894_v1 = vadd.f32 %v13299_v54, %v3847_v59  ;;  %v3895_v43 = vadd.f32 %v13299_v54, %v3851_v47 }
 0xaeb   : > { %10977 = vpow2.f32 %v3936_v23  ;;  %v3924_v18 = vsub.f32 0.0, %v13413_v48  ;;  %v3896_v25 = vadd.f32 %v13299_v54, %v3855_v2  ;;  %v3897_v62 = vadd.f32 %v13299_v54, %v3859_v7 }
 0xaec   : > { %10979 = vpow2.f32 %v3938_v36  ;;  %v3925_v37 = vsub.f32 0.0, %v13416_v29  ;;  %v13425_v57 = vadd.f32 %v3894_v1, %v13308_v63  ;;  %v13428_v20 = vadd.f32 %v3895_v43, %v13321_v55 }
 0xaed   : > { %10981 = vpow2.f32 %v3940_v32  ;;  %v3948_v59 = vmul.f32 1.442695, %v3924_v18  ;;  %v13431_v47 = vadd.f32 %v3896_v25, %v13332_v26  ;;  %v13434_v30 = vadd.f32 %v3897_v62, %v13337_v40 }
 0xaee   : > { %10983 = vpow2.f32 %v3942_v11  ;;  %v3950_v2 = vmul.f32 1.442695, %v3925_v37  ;;  %v3926_v7 = vsub.f32 0.0, %v13425_v57  ;;  %v3927_v10 = vsub.f32 0.0, %v13428_v20 }
 0xaef   : > { %10985 = vpow2.f32 %v3944_v16  ;;  %v3928_v63 = vsub.f32 0.0, %v13431_v47  ;;  %v3898_v55 = vadd.f32 %v13299_v54, %v13365_v27  ;;  %v3667_v41 = vmul.f32 %v13213_v5, %v15969_v19 }
 0xaf0   : > { %10987 = vpow2.f32 %v3946_v15  ;;  %v3952_v26 = vmul.f32 1.442695, %v3926_v7  ;;  %v3954_v56 = vmul.f32 1.442695, %v3927_v10  ;;  %v3899_v40 = vadd.f32 %v13299_v54, %v13369_v8 }
 0xaf1   : > { %10989 = vpow2.f32 %v3948_v59  ;;  %v3956_v44 = vmul.f32 1.442695, %v3928_v63  ;;  %v3682_v45 = vadd.f32 %v13317_v53, %v13313_v3  ;;  %v3683_v35 = vadd.f32 %v3667_v41, %v13325_v4 }
 0xaf2   : > { %10991 = vpow2.f32 %v3950_v2  ;;  %v3929_v25 = vsub.f32 0.0, %v13434_v30 }
 0xaf3   : > { %v10974_v60 = vpop.eup %10973  ;;  %10993 = vpow2.f32 %v3952_v26  ;;  %v3702_v54 = vadd.f32 %v13221_v14, %v3682_v45  ;;  %v3703_v3 = vadd.f32 %v13221_v14, %v3683_v35  ;;  %v9399_v26 = vld [vmem:[%s15626_s2 + $0x190] sm:$0xff] }
 0xaf4   : > { %v10976_v27 = vpop.eup %10975  ;;  %v3964_v6 = vadd.f32 1.0, %v10974_v60  ;;  %10995 = vpow2.f32 %v3954_v56  ;;  %v3958_v41 = vmul.f32 1.442695, %v3929_v25  ;;  %v9400_v56 = vld [vmem:[%s15626_s2 + $0x198] sm:$0xff] }
 0xaf5   : > { %v10978_v5 = vpop.eup %10977  ;;  %v3965_v23 = vadd.f32 1.0, %v10976_v27  ;;  %10997 = vpow2.f32 %v3956_v44  ;;  %v13450_v4 = vadd.f32 %v3898_v55, %v3702_v54  ;;  %v13452_v15 = vadd.f32 %v3899_v40, %v3703_v3 }
 0xaf6   : > { %v10980_v49 = vpop.eup %10979  ;;  %10999 = vrcp.f32 %v3964_v6  ;;  %v3966_v36 = vadd.f32 1.0, %v10978_v5 }
 0xaf7   : > { %v10982_v8 = vpop.eup %10981  ;;  %11001 = vrcp.f32 %v3965_v23  ;;  %v3967_v32 = vadd.f32 1.0, %v10980_v49  ;;  %v3930_v14 = vsub.f32 0.0, %v13450_v4  ;;  %v3931_v7 = vsub.f32 0.0, %v13452_v15 }
 0xaf8   : > { %v10984_v53 = vpop.eup %10983  ;;  %11003 = vrcp.f32 %v3966_v36  ;;  %v3968_v11 = vadd.f32 1.0, %v10982_v8  ;;  %v10539_v23 = vpack.c.bf16 %v9400_v56, %v9399_v26  ;;  %v9401_v26 = vld [vmem:[%s15626_s2 + $0x1a0] sm:$0xff]  ;;  %v9402_v56 = vld [vmem:[%s15626_s2 + $0x1a8] sm:$0xff] }
 0xaf9   : > { %v10986_v0 = vpop.eup %10985  ;;  %11005 = vrcp.f32 %v3967_v32  ;;  %v3969_v16 = vadd.f32 1.0, %v10984_v53  ;;  %v3960_v44 = vmul.f32 1.442695, %v3930_v14  ;;  %v3962_v35 = vmul.f32 1.442695, %v3931_v7 }
 0xafa   : > { %v10988_v1 = vpop.eup %10987  ;;  %11007 = vrcp.f32 %v3968_v11  ;;  %v3970_v43 = vadd.f32 1.0, %v10986_v0 }
 0xafb   : > { %v10990_v18 = vpop.eup %10989  ;;  %v3971_v37 = vadd.f32 1.0, %v10988_v1  ;;  %11009 = vrcp.f32 %v3969_v16 }
 0xafc   : > { %v10992_v62 = vpop.eup %10991  ;;  %v3972_v2 = vadd.f32 1.0, %v10990_v18  ;;  %11011 = vrcp.f32 %v3970_v43 }
 0xafd   : > { %v10994_v59 = vpop.eup %10993  ;;  %v3973_v63 = vadd.f32 1.0, %v10992_v62  ;;  %11013 = vrcp.f32 %v3971_v37 }
 0xafe   : > { %v10996_v10 = vpop.eup %10995  ;;  %11015 = vrcp.f32 %v3972_v2  ;;  %v3974_v5 = vadd.f32 1.0, %v10994_v59 }
 0xaff   : > { %v10998_v55 = vpop.eup %10997  ;;  %11017 = vrcp.f32 %v3973_v63 }
 0xb00   : > { %v11000_v40 = vpop.eup %10999  ;;  %11019 = vpow2.f32 %v3958_v41  ;;  %v3976_v8 = vadd.f32 1.0, %v10998_v55 }
 0xb01   : > { %v11002_v45 = vpop.eup %11001  ;;  %v3996_v60 = vmul.f32 %v11000_v40, %v13379_v21  ;;  %11021 = vpow2.f32 %v3960_v44  ;;  %v3975_v21 = vadd.f32 1.0, %v10996_v10  ;;  %v13526_v40 = vpack.c.bf16 %v9402_v56, %v9401_v26 }
 0xb02   : > { %v11004_v27 = vpop.eup %11003  ;;  %v3997_v6 = vmul.f32 %v11002_v45, %v13382_v34  ;;  %11023 = vpow2.f32 %v3962_v35  ;;  %v13531_v44 = vrot.slane %v13205_v33, %v12455_v52 }
 0xb03   : > { %v11006_v49 = vpop.eup %11005  ;;  %10080 = vmatprep.mubr.msk.f32.mxu1 %vm804_vm4, %v3996_v60  ;;  %v3998_v36 = vmul.f32 %v11004_v27, %v13385_v42  ;;  %11025 = vrcp.f32 %v3974_v5 }
 0xb04   : > { %v11008_v54 = vpop.eup %11007  ;;  %10081 = vmatmul.mubr.msk.f32.vlgmr.msra.gmra.mrb[26].mxu1 %vm804_vm4, %v3997_v6  ;;  %v3999_v34 = vmul.f32 %v11006_v49, %v13391_v38  ;;  %11027 = vrcp.f32 %v3975_v21 }
 0xb05   : > { %10083 = vmatprep.mubr.msk.f32.mxu1 %vm804_vm4, %v3998_v36  ;;  %10538 = vmatpush3.bf16.msra.mxu1 %v13199_v61  ;;  %v11010_v32 = vpop.eup %11009  ;;  %v4000_v3 = vmul.f32 %v11008_v54, %v13388_v31  ;;  %11029 = vrcp.f32 %v3976_v8 }
 0xb06   : > { %10540 = vmatprep.subr.bf16.mxu1 %v10539_v23  ;;  %v11012_v42 = vpop.eup %11011  ;;  %v4001_v11 = vmul.f32 %v11010_v32, %v13394_v28 }
 0xb07   : > { %v11014_v53 = vpop.eup %11013  ;;  %v4002_v38 = vmul.f32 %v11012_v42, %v13397_v58 }
 0xb08   : > { %10084 = vmatmul.mubr.msk.f32.gmra.mrb[28].mxu1 %vm804_vm4, %v3999_v34  ;;  %v11016_v61 = vpop.eup %11015  ;;  %v4003_v1 = vmul.f32 %v11014_v53, %v13400_v51 }
 0xb09   : > { %10086 = vmatprep.mubr.msk.f32.mxu1 %vm804_vm4, %v4000_v3  ;;  %10542 = vmatpush3.bf16.msra.mxu1 %v10539_v23  ;;  %v11018_v0 = vpop.eup %11017  ;;  %v4004_v25 = vmul.f32 %v11016_v61, %v13413_v48 }
 0xb0a   : > { %v11020_v16 = vpop.eup %11019  ;;  %v4005_v58 = vmul.f32 %v11018_v0, %v13416_v29 }
 0xb0b   : > { %v11022_v31 = vpop.eup %11021  ;;  %v3977_v43 = vadd.f32 1.0, %v11020_v16 }
 0xb0c   : > { %10087 = vmatmul.mubr.msk.f32.gmra.mrb[30].mxu1 %vm804_vm4, %v4001_v11  ;;  %v11024_v18 = vpop.eup %11023  ;;  %v3978_v62 = vadd.f32 1.0, %v11022_v31 }
 0xb0d   : > { %10089 = vmatprep.mubr.msk.f32.mxu1 %vm804_vm4, %v4002_v38  ;;  %v11026_v37 = vpop.eup %11025  ;;  %11031 = vrcp.f32 %v3977_v43  ;;  %v3979_v28 = vadd.f32 1.0, %v11024_v18 }
 0xb0e   : > { %11033 = vrcp.f32 %v3978_v62  ;;  %v11028_v14 = vpop.eup %11027  ;;  %v4006_v59 = vmul.f32 %v11026_v37, %v13425_v57 }
 0xb0f   : > { %11035 = vrcp.f32 %v3979_v28  ;;  %v11030_v51 = vpop.eup %11029  ;;  %v4007_v48 = vmul.f32 %v11028_v14, %v13428_v20  ;;  %v13497_v20 = vmul.f32 %v13168_v12, %v15951_v39  ;;  %v3468_v12 = vld [vmem:[%s15628_s4 + $0x68] sm:$0xff] }
 0xb10   : > { %10090 = vmatmul.mubr.msk.f32.gmra.mrb[32].mxu1 %vm804_vm4, %v4003_v1  ;;  %v4008_v2 = vmul.f32 %v11030_v51, %v13431_v47  ;;  %v13504_v47 = vmul.f32 %v13171_v22, %v15952_v46  ;;  %v3470_v22 = vld [vmem:[%s15628_s4 + $0x78] sm:$0xff] }
 0xb11   : > { %10092 = vmatprep.mubr.msk.f32.mxu1 %vm804_vm4, %v4004_v25  ;;  %15970 = vst [vmem:[#allocation33_spill] sm:$0xff] %v13497_v20 }
 0xb12   : > { %15971 = vst [vmem:[#allocation36_spill] sm:$0xff] %v13504_v47 }
 0xb14   : > { %10093 = vmatmul.mubr.msk.f32.gmra.mrb[34].mxu1 %vm804_vm4, %v4005_v58 }
 0xb15   : > { %10095 = vmatprep.mubr.msk.f32.mxu1 %vm804_vm4, %v4006_v59 }
 0xb17   : > { %v11032_v7 = vpop.eup %11031 }
 0xb18   : > { %10096 = vmatmul.mubr.msk.f32.gmra.mrb[36].mxu1 %vm804_vm4, %v4007_v48  ;;  %v11034_v10 = vpop.eup %11033  ;;  %v4009_v29 = vmul.f32 %v11032_v7, %v13434_v30  ;;  %v3467_v30 = vld [vmem:[%s15628_s4 + $0x60] sm:$0xff] }
 0xb19   : > { %10098 = vmatprep.mubr.msk.f32.mxu1 %vm804_vm4, %v4008_v2  ;;  %v11036_v63 = vpop.eup %11035  ;;  %v4010_v57 = vmul.f32 %v11034_v10, %v13450_v4  ;;  %v10527_v4 = vpack.c.bf16 %v3468_v12, %v3467_v30 }
 0xb1a   : > { %v4011_v55 = vmul.f32 %v11036_v63, %v13452_v15  ;;  %v3469_v15 = vld [vmem:[%s15628_s4 + $0x70] sm:$0xff] }
 0xb1b   : > { %10528 = vmatprep.subr.bf16.mxu0 %v10527_v4  ;;  %v10531_v41 = vpack.c.bf16 %v3470_v22, %v3469_v15 }
 0xb1c   : > { %10099 = vmatmul.mubr.msk.f32.gmra.mrb[38].mxu1 %vm804_vm4, %v4009_v29  ;;  %10530 = vmatpush3.bf16.msra.mxu0 %v10527_v4 }
 0xb1d   : > { %10101 = vmatprep.mubr.msk.f32.mxu1 %vm804_vm4, %v4010_v57  ;;  %10532 = vmatprep.subr.bf16.mxu0 %v10531_v41 }
 0xb20   : > { %10102 = vmatmul.mubr.msk.f32.gmra.mrb[40].mxu1 %vm804_vm4, %v4011_v55  ;;  %10534 = vmatpush3.bf16.msra.mxu0 %v10531_v41 }
 0xb21   : > { %10144 = vmatprep.mubr.msk.f32.mxu1 %vm804_vm4, %v13497_v20  ;;  %10544 = vmatprep.subr.bf16.mxu0 %v13526_v40 }
 0xb24   : > { %10145 = vmatmul.mubr.msk.f32.vlgmr.msra.gmra.mrb[42].mxu1 %vm804_vm4, %v13504_v47 }
 0xbd7   : > { %v10082_v45 = vpop.f32.mrb[26].mxu1 }
 0xbd8   : > { %v13534_v60 = vadd.f32 %v10082_v45, %v13531_v44  ;;  %v4130_v35 = vpop.f32.mrb[27].mxu1 }
 0xbd9   : > { %v13537_v27 = vadd.f32 %v4130_v35, %v13531_v44 }
 0xbda   : > { %v4210_v6 = vsub.f32 0.0, %v13534_v60 }
 0xbdb   : > { %v4209_v5 = vsub.f32 0.0, %v13537_v27  ;;  %v10085_v23 = vpop.f32.mrb[28].mxu1 }
 0xbdc   : > { %v4227_v49 = vmul.f32 1.442695, %v4210_v6  ;;  %v13542_v36 = vadd.f32 %v10085_v23, %v13531_v44  ;;  %v4140_v54 = vpop.f32.mrb[29].mxu1 }
 0xbdd   : > { %v4225_v33 = vmul.f32 1.442695, %v4209_v5  ;;  %v13545_v21 = vadd.f32 %v4140_v54, %v13531_v44 }
 0xbde   : > { %11037 = vpow2.f32 %v4227_v49  ;;  %v4212_v34 = vsub.f32 0.0, %v13542_v36 }
 0xbdf   : > { %11039 = vpow2.f32 %v4225_v33  ;;  %v4211_v8 = vsub.f32 0.0, %v13545_v21  ;;  %v10088_v32 = vpop.f32.mrb[30].mxu1 }
 0xbe0   : > { %v4231_v3 = vmul.f32 1.442695, %v4212_v34  ;;  %v13550_v42 = vadd.f32 %v10088_v32, %v13531_v44  ;;  %v4150_v53 = vpop.f32.mrb[31].mxu1 }
 0xbe1   : > { %v4229_v11 = vmul.f32 1.442695, %v4211_v8  ;;  %v13553_v61 = vadd.f32 %v4150_v53, %v13531_v44 }
 0xbe2   : > { %11041 = vpow2.f32 %v4231_v3  ;;  %v4214_v38 = vsub.f32 0.0, %v13550_v42 }
 0xbe3   : > { %11043 = vpow2.f32 %v4229_v11  ;;  %v4213_v0 = vsub.f32 0.0, %v13553_v61  ;;  %v10091_v16 = vpop.f32.mrb[32].mxu1 }
 0xbe4   : > { %v4235_v31 = vmul.f32 1.442695, %v4214_v38  ;;  %v13558_v1 = vadd.f32 %v10091_v16, %v13531_v44  ;;  %v4160_v43 = vpop.f32.mrb[33].mxu1 }
 0xbe5   : > { %v4233_v18 = vmul.f32 1.442695, %v4213_v0  ;;  %v13561_v25 = vadd.f32 %v4160_v43, %v13531_v44  ;;  %v9404_v43 = vld [vmem:[%s15626_s2 + $0x1b8] sm:$0xff] }
 0xbe6   : > { %11045 = vpow2.f32 %v4235_v31  ;;  %v4216_v62 = vsub.f32 0.0, %v13558_v1  ;;  %v9403_v31 = vld [vmem:[%s15626_s2 + $0x1b0] sm:$0xff] }
 0xbe7   : > { %11047 = vpow2.f32 %v4233_v18  ;;  %v4215_v37 = vsub.f32 0.0, %v13561_v25  ;;  %v10094_v28 = vpop.f32.mrb[34].mxu1 }
 0xbe8   : > { %v11038_v58 = vpop.eup %11037  ;;  %v4239_v14 = vmul.f32 1.442695, %v4216_v62  ;;  %v13566_v59 = vadd.f32 %v10094_v28, %v13531_v44  ;;  %v4170_v51 = vpop.f32.mrb[35].mxu1 }
 0xbe9   : > { %v11040_v48 = vpop.eup %11039  ;;  %v4258_v2 = vadd.f32 1.0, %v11038_v58  ;;  %v4237_v7 = vmul.f32 1.442695, %v4215_v37  ;;  %v13569_v10 = vadd.f32 %v4170_v51, %v13531_v44 }
 0xbea   : > { %v4257_v29 = vadd.f32 1.0, %v11040_v48  ;;  %11049 = vpow2.f32 %v4239_v14  ;;  %v4218_v63 = vsub.f32 0.0, %v13566_v59 }
 0xbeb   : > { %11051 = vrcp.f32 %v4258_v2  ;;  %v4217_v57 = vsub.f32 0.0, %v13569_v10  ;;  %v10097_v55 = vpop.f32.mrb[36].mxu1 }
 0xbec   : > { %v11042_v30 = vpop.eup %11041  ;;  %11053 = vrcp.f32 %v4257_v29  ;;  %v4243_v12 = vmul.f32 1.442695, %v4218_v63  ;;  %v13574_v4 = vadd.f32 %v10097_v55, %v13531_v44  ;;  %v4180_v15 = vpop.f32.mrb[37].mxu1  ;;  %v10547_v63 = vpack.c.bf16 %v9404_v43, %v9403_v31 }
 0xbed   : > { %v11044_v22 = vpop.eup %11043  ;;  %v4260_v41 = vadd.f32 1.0, %v11042_v30  ;;  %11055 = vpow2.f32 %v4237_v7  ;;  %v4241_v26 = vmul.f32 1.442695, %v4217_v57  ;;  %v13577_v56 = vadd.f32 %v4180_v15, %v13531_v44 }
 0xbee   : > { %v4259_v45 = vadd.f32 1.0, %v11044_v22  ;;  %11057 = vpow2.f32 %v4243_v12  ;;  %v4220_v35 = vsub.f32 0.0, %v13574_v4 }
 0xbef   : > { %11059 = vrcp.f32 %v4260_v41  ;;  %v4219_v6 = vsub.f32 0.0, %v13577_v56  ;;  %v10100_v49 = vpop.f32.mrb[38].mxu1 }
 0xbf0   : > { %v11046_v5 = vpop.eup %11045  ;;  %11061 = vrcp.f32 %v4259_v45  ;;  %v4247_v23 = vmul.f32 1.442695, %v4220_v35  ;;  %v13582_v8 = vadd.f32 %v10100_v49, %v13531_v44  ;;  %v4190_v32 = vpop.f32.mrb[39].mxu1 }
 0xbf1   : > { %v11048_v54 = vpop.eup %11047  ;;  %v4262_v33 = vadd.f32 1.0, %v11046_v5  ;;  %11063 = vpow2.f32 %v4241_v26  ;;  %v4245_v34 = vmul.f32 1.442695, %v4219_v6  ;;  %v13585_v53 = vadd.f32 %v4190_v32, %v13531_v44 }
 0xbf2   : > { %v4261_v3 = vadd.f32 1.0, %v11048_v54  ;;  %11065 = vpow2.f32 %v4247_v23  ;;  %v4222_v11 = vsub.f32 0.0, %v13582_v8 }
 0xbf3   : > { %11067 = vrcp.f32 %v4262_v33  ;;  %v4221_v0 = vsub.f32 0.0, %v13585_v53  ;;  %v10103_v16 = vpop.f32.mrb[40].mxu1 }
 0xbf4   : > { %v11050_v38 = vpop.eup %11049  ;;  %11069 = vrcp.f32 %v4261_v3  ;;  %v4251_v37 = vmul.f32 1.442695, %v4222_v11  ;;  %v13596_v28 = vadd.f32 %v10103_v16, %v13531_v44  ;;  %v4200_v58 = vpop.f32.mrb[41].mxu1 }
 0xbf5   : > { %v11052_v18 = vpop.eup %11051  ;;  %v4264_v62 = vadd.f32 1.0, %v11050_v38  ;;  %11071 = vpow2.f32 %v4245_v34  ;;  %v4249_v51 = vmul.f32 1.442695, %v4221_v0  ;;  %v13599_v48 = vadd.f32 %v4200_v58, %v13531_v44 }
 0xbf6   : > { %v11054_v14 = vpop.eup %11053  ;;  %v4224_v29 = vsub.f32 0.0, %v13596_v28  ;;  %v4290_v55 = vmul.f32 %v11052_v18, %v13534_v60 }
 0xbf7   : > { %v11056_v2 = vpop.eup %11055  ;;  %v4289_v7 = vmul.f32 %v11054_v14, %v13537_v27  ;;  %11073 = vrcp.f32 %v4264_v62  ;;  %v4223_v12 = vsub.f32 0.0, %v13599_v48  ;;  %v13605_v15 = vpop.f32.mrb[42].mxu1 }
 0xbf8   : > { %v11058_v57 = vpop.eup %11057  ;;  %v4263_v30 = vadd.f32 1.0, %v11056_v2  ;;  %11075 = vpow2.f32 %v4251_v37  ;;  %v4255_v44 = vmul.f32 1.442695, %v4224_v29  ;;  %v13607_v26 = vpop.f32.mrb[43].mxu1 }
 0xbf9   : > { %v11060_v22 = vpop.eup %11059  ;;  %v4266_v41 = vadd.f32 1.0, %v11058_v57  ;;  %11077 = vpow2.f32 %v4249_v51  ;;  %10112 = vmatprep.mubr.msk.f32.mxu0 %vm804_vm4, %v4289_v7  ;;  %v4253_v45 = vmul.f32 1.442695, %v4223_v12 }
 0xbfa   : > { %v11062_v27 = vpop.eup %11061  ;;  %11079 = vrcp.f32 %v4263_v30  ;;  %10113 = vmatmul.mubr.msk.f32.vlgmr.msra.gmra.mrb[28].mxu0 %vm804_vm4, %v4290_v55  ;;  %v4292_v5 = vmul.f32 %v11060_v22, %v13542_v36  ;;  %v5460_v22 = vcombine.high %v13605_v15, %v13605_v15 }
 0xbfb   : > { %v11064_v60 = vpop.eup %11063  ;;  %v4291_v35 = vmul.f32 %v11062_v27, %v13545_v21  ;;  %11081 = vrcp.f32 %v4266_v41  ;;  %10546 = vmatpush3.bf16.msra.mxu0 %v13526_v40  ;;  %v5411_v41 = vcombine.high %v13607_v26, %v13607_v26 }
 0xbfc   : > { %v11066_v6 = vpop.eup %11065  ;;  %v4265_v23 = vadd.f32 1.0, %v11064_v60  ;;  %11083 = vpow2.f32 %v4255_v44  ;;  %10548 = vmatprep.subr.bf16.mxu0 %v10547_v63  ;;  %v5474_v60 = vrot.slane %v5460_v22, %v15967_v13 }
 0xbfd   : > { %v11068_v49 = vpop.eup %11067  ;;  %v4268_v54 = vadd.f32 1.0, %v11066_v6  ;;  %11085 = vpow2.f32 %v4253_v45  ;;  %10115 = vmatprep.mubr.msk.f32.mxu0 %vm804_vm4, %v4291_v35  ;;  %v5467_v45 = vrot.slane %v13605_v15, %v15967_v13  ;;  %v5418_v35 = vrot.slane %v13607_v26, %v15967_v13 }
 0xbfe   : > { %v11070_v33 = vpop.eup %11069  ;;  %11087 = vrcp.f32 %v4265_v23  ;;  %10116 = vmatmul.mubr.msk.f32.gmra.mrb[30].mxu0 %vm804_vm4, %v4292_v5  ;;  %v4294_v40 = vmul.f32 %v11068_v49, %v13550_v42  ;;  %v5425_v6 = vrot.slane %v5411_v41, %v15967_v13  ;;  %v5490_v26 = vrot.slane %v5474_v60, %v15967_v13 }
 0xbff   : > { %v11072_v34 = vpop.eup %11071  ;;  %v4293_v21 = vmul.f32 %v11070_v33, %v13553_v61  ;;  %10550 = vmatpush3.bf16.msra.mxu0 %v10547_v63  ;;  %11089 = vrcp.f32 %v4268_v54  ;;  %v5475_v49 = vcombine.high %v5467_v45, %v5467_v45  ;;  %v5476_v54 = vcombine.high %v5474_v60, %v5474_v60 }
 0xc00   : > { %v4267_v32 = vadd.f32 1.0, %v11072_v34  ;;  %v11589_v33 = vmov 8   ;;  %v5426_v34 = vcombine.high %v5418_v35, %v5418_v35  ;;  %v5427_v15 = vcombine.high %v5425_v6, %v5425_v6 }
 0xc01   : > { %v11074_v36 = vpop.eup %11073  ;;  %10118 = vmatprep.mubr.msk.f32.mxu0 %vm804_vm4, %v4293_v21  ;;  %v11568_v21 = vld [vmem:[%s11652_s11] sm:$0xff] }
 0xc02   : > { %v11076_v3 = vpop.eup %11075  ;;  %11091 = vrcp.f32 %v4267_v32  ;;  %10119 = vmatmul.mubr.msk.f32.gmra.mrb[32].mxu0 %vm804_vm4, %v4294_v40  ;;  %v4296_v42 = vmul.f32 %v11074_v36, %v13558_v1  ;;  %v5483_v32 = vrot.slane %v5467_v45, %v15967_v13 }
 0xc03   : > { %v11078_v11 = vpop.eup %11077  ;;  %v4270_v38 = vadd.f32 1.0, %v11076_v3  ;;  %v5497_v3 = vrot.slane %v5475_v49, %v15967_v13 }
 0xc04   : > { %v11080_v0 = vpop.eup %11079  ;;  %v4269_v16 = vadd.f32 1.0, %v11078_v11  ;;  %v5504_v11 = vrot.slane %v5476_v54, %v15967_v13 }
 0xc05   : > { %v11082_v31 = vpop.eup %11081  ;;  %v4295_v43 = vmul.f32 %v11080_v0, %v13561_v25  ;;  %11093 = vrcp.f32 %v4270_v38  ;;  %v5434_v38 = vrot.slane %v5418_v35, %v15967_v13  ;;  %v5448_v0 = vrot.slane %v5426_v34, %v15967_v13 }
 0xc06   : > { %v11084_v61 = vpop.eup %11083  ;;  %11095 = vrcp.f32 %v4269_v16  ;;  %v4298_v51 = vmul.f32 %v11082_v31, %v13566_v59  ;;  %v15972_v16 = vmov 0   ;;  %v5441_v31 = vrot.slane %v5425_v6, %v15967_v13 }
 0xc07   : > { %v11086_v18 = vpop.eup %11085  ;;  %v4272_v62 = vadd.f32 1.0, %v11084_v61  ;;  %10121 = vmatprep.mubr.msk.f32.mxu0 %vm804_vm4, %v4295_v43  ;;  %v5455_v43 = vrot.slane %v5427_v15, %v15967_v13 }
 0xc08   : > { %v11088_v37 = vpop.eup %11087  ;;  %v4271_v58 = vadd.f32 1.0, %v11086_v18  ;;  %10122 = vmatmul.mubr.msk.f32.gmra.mrb[34].mxu0 %vm804_vm4, %v4296_v42  ;;  %v5505_v42 = vcombine.high %v5483_v32, %v5483_v32 }
 0xc09   : > { %v4297_v14 = vmul.f32 %v11088_v37, %v13569_v10  ;;  %11097 = vrcp.f32 %v4272_v62  ;;  %v11090_v25 = vpop.eup %11089  ;;  %v5506_v62 = vcombine.high %v5490_v26, %v5490_v26  ;;  %v5507_v37 = vcombine.high %v5497_v3, %v5497_v3 }
 0xc0a   : > { %11099 = vrcp.f32 %v4271_v58  ;;  %v4300_v7 = vmul.f32 %v11090_v25, %v13574_v4  ;;  %v5508_v58 = vcombine.high %v5504_v11, %v5504_v11  ;;  %v5457_v25 = vcombine.high %v5441_v31, %v5441_v31 }
 0xc0b   : > { %10124 = vmatprep.mubr.msk.f32.mxu0 %vm804_vm4, %v4297_v14  ;;  %v5456_v14 = vcombine.high %v5434_v38, %v5434_v38 }
 0xc0c   : > { %v11092_v2 = vpop.eup %11091  ;;  %10125 = vmatmul.mubr.msk.f32.gmra.mrb[36].mxu0 %vm804_vm4, %v4298_v51  ;;  %v5458_v51 = vcombine.high %v5448_v0, %v5448_v0  ;;  %v5536_v22 = vrot.slane %v5457_v25, %v11686_v17 }
 0xc0d   : > { %v4299_v1 = vmul.f32 %v11092_v2, %v13577_v56  ;;  %v5459_v2 = vcombine.high %v5455_v43, %v5455_v43 }
 0xc0f   : > { %v11094_v29 = vpop.eup %11093  ;;  %10127 = vmatprep.mubr.msk.f32.mxu0 %vm804_vm4, %v4299_v1  ;;  %v5540_v41 = vrot.slane %v5459_v2, %v11686_v17  ;;  %v15991_v2 = vld [vmem:[#allocation42_spill] sm:$0xff] }
 0xc10   : > { %v11096_v63 = vpop.eup %11095  ;;  %10128 = vmatmul.mubr.msk.f32.gmra.mrb[38].mxu0 %vm804_vm4, %v4300_v7  ;;  %v4302_v59 = vmul.f32 %v11094_v29, %v13582_v8  ;;  %v5544_v7 = vrot.slane %v5483_v32, %v11686_v17  ;;  %v5548_v29 = vrot.slane %v5497_v3, %v11686_v17 }
 0xc11   : > { %v4301_v10 = vmul.f32 %v11096_v63, %v13585_v53  ;;  %v5552_v63 = vrot.slane %v5505_v42, %v11686_v17  ;;  %v15986_v42 = vld [vmem:[#allocation32_spill] sm:$0xff] }
 0xc13   : > { %v11098_v57 = vpop.eup %11097  ;;  %10130 = vmatprep.mubr.msk.f32.mxu0 %vm804_vm4, %v4301_v10  ;;  %v5560_v10 = vrot.slane %v5490_v26, %v11686_v17 }
 0xc14   : > { %v11100_v55 = vpop.eup %11099  ;;  %10131 = vmatmul.mubr.msk.f32.gmra.mrb[40].mxu0 %vm804_vm4, %v4302_v59  ;;  %v4304_v4 = vmul.f32 %v11098_v57, %v13596_v28  ;;  %v5556_v57 = vrot.slane %v5507_v37, %v11686_v17 }
 0xc15   : > { %v4303_v56 = vmul.f32 %v11100_v55, %v13599_v48  ;;  %v5564_v55 = vrot.slane %v5504_v11, %v11686_v17  ;;  %v11569_v11 = vld [vmem:[%s11652_s11 + $0x8] sm:$0xff] }
 0xc17   : > { %10133 = vmatprep.mubr.msk.f32.mxu0 %vm804_vm4, %v4303_v56  ;;  %v5568_v56 = vrot.slane %v5506_v62, %v11686_v17  ;;  %v15987_v62 = vld [vmem:[#allocation34_spill] sm:$0xff] }
 0xc18   : > { %10134 = vmatmul.mubr.msk.f32.gmra.mrb[42].mxu0 %vm804_vm4, %v4304_v4  ;;  %v5572_v4 = vrot.slane %v5508_v58, %v11686_v17  ;;  %v736_v37 = vadd.f32 1e-08, %v15987_v62 }
 0xc19   : > { %10155 = vmatprep.mubr.msk.f32.mxu0 %vm804_vm4, %v13497_v20 }
 0xc1c   : > { %10156 = vmatmul.mubr.msk.f32.vlgmr.msra.gmra.mrb[44].mxu0 %vm804_vm4, %v13504_v47 }
 0xccd   : > { %v10114_v8 = vpop.f32.mrb[28].mxu0 }
 0xcce   : > { %4505 = vperm.xlu0 %10696, %v10114_v8   ;;  %v4419_v53 = vpop.f32.mrb[29].mxu0  ;;  %v5512_v8 = vrot.slane %v5434_v38, %v11686_v17  ;;  %v732_v38 = vadd.f32 1e-08, %v15954_v50 }
 0xcd0   : > { %11101 = vrsqrt.f32 %v732_v38  ;;  %v15998_v38 = vld [vmem:[#allocation7_spill] sm:$0xff] }
 0xcd1   : > { %v10117_v30 = vpop.f32.mrb[30].mxu0 }
 0xcd2   : > { %4500 = vperm.xlu0 %10696, %v4419_v53   ;;  %4515 = vperm.xlu1 %10695, %v10117_v30   ;;  %v4429_v12 = vpop.f32.mrb[31].mxu0  ;;  %v5516_v53 = vrot.slane %v5448_v0, %v11686_v17  ;;  %v5520_v30 = vrot.slane %v5456_v14, %v11686_v17  ;;  %v731_v0 = vadd.f32 1e-08, %v15953_v9  ;;  %v15989_v14 = vld [vmem:[#allocation38_spill] sm:$0xff] }
 0xcd4   : > { %11103 = vrsqrt.f32 %v731_v0 }
 0xcd5   : > { %v10120_v48 = vpop.f32.mrb[32].mxu0 }
 0xcd6   : > { %4510 = vperm.xlu1 %10695, %v4429_v12   ;;  %v4439_v28 = vpop.f32.mrb[33].mxu0  ;;  %v5524_v12 = vrot.slane %v5458_v51, %v11686_v17  ;;  %v15990_v51 = vld [vmem:[#allocation39_spill] sm:$0xff] }
 0xcd7   : > { %4520 = vperm.xlu0 %10696, %v4439_v28   ;;  %v5532_v28 = vrot.slane %v5455_v43, %v11686_v17  ;;  %v15985_v43 = vld [vmem:[#allocation29_spill] sm:$0xff]  ;;  %v739_v25 = vadd.f32 1e-08, %v15990_v51 }
 0xcda   : > { %4525 = vperm.xlu1 %10695, %v10120_v48   ;;  %v5528_v48 = vrot.slane %v5441_v31, %v11686_v17  ;;  %v734_v31 = vadd.f32 1e-08, %v15956_v24 }
 0xcdb   : > { %v10123_v44 = vpop.f32.mrb[34].mxu0 }
 0xcdc   : > { %v4449_v27 = vpop.f32.mrb[35].mxu0  ;;  %11105 = vrsqrt.f32 %v734_v31  ;;  %v15999_v31 = vld [vmem:[#allocation10_spill] sm:$0xff] }
 0xcdd   : > { %4530 = vperm.xlu0 %10696, %v4449_v27  }
 0xcde   : > { %4535 = vperm.xlu1 %10695, %v10123_v44  }
 0xcdf   : > { %v10126_v5 = vpop.f32.mrb[36].mxu0 }
 0xce0   : > { %v4459_v23 = vpop.f32.mrb[37].mxu0 }
 0xce1   : > { %10697 = vset.pattern.permute.xlu0 %v11589_v33 }
 0xce2   : > { %4739 = vperm.xlu0 %10697, %v11568_v21   ;;  %4540 = vperm.xlu1 %10695, %v4459_v23  }
 0xce3   : > { %v10129_v40 = vpop.f32.mrb[38].mxu0 }
 0xce4   : > { %v4469_v36 = vpop.f32.mrb[39].mxu0 }
 0xce6   : > { %10698 = vset.pattern.permute.xlu0 %v15972_v16  ;;  %4555 = vperm.xlu1 %10695, %v10129_v40  }
 0xce7   : > { %4545 = vperm.xlu0 %10698, %v10126_v5   ;;  %v10132_v61 = vpop.f32.mrb[40].mxu0 }
 0xce8   : > { %v4479_v18 = vpop.f32.mrb[41].mxu0 }
 0xcea   : > { %4550 = vperm.xlu1 %10695, %v4469_v36  }
 0xceb   : > { %4560 = vperm.xlu0 %10698, %v4479_v18   ;;  %v10135_v1 = vpop.f32.mrb[42].mxu0  ;;  %v735_v18 = vadd.f32 1e-08, %v15986_v42 }
 0xcec   : > { %v4489_v59 = vpop.f32.mrb[43].mxu0 }
 0xcee   : > { %4565 = vperm.xlu1 %10695, %v10132_v61   ;;  %v733_v61 = vadd.f32 1e-08, %v15985_v43 }
 0xcef   : > { %4575 = vperm.xlu0 %10698, %v10135_v1   ;;  %v10157_v44 = vpop.f32.mrb[44].mxu0  ;;  %v740_v1 = vadd.f32 1e-08, %v15991_v2 }
 0xcf0   : > { %v5324_v27 = vpop.f32.mrb[45].mxu0  ;;  %v13681_v45 = vadd.f32 %v10157_v44, %v5544_v7  ;;  %v13683_v60 = vadd.f32 %v10157_v44, %v5548_v29  ;;  %v13685_v35 = vadd.f32 %v10157_v44, %v5552_v63  ;;  %v13687_v6 = vadd.f32 %v10157_v44, %v5556_v57  ;;  %v15992_v7 = vld [vmem:[#allocation46_spill] sm:$0xff]  ;;  %v11102_v63 = vpop.eup %11101  ;;  %v15994_v57 = vld [vmem:[#allocation43_spill] sm:$0xff] }
 0xcf1   : > { %v13689_v5 = vadd.f32 %v5516_v53, %v5324_v27  ;;  %v13691_v23 = vadd.f32 %v5512_v8, %v5324_v27  ;;  %v13693_v49 = vadd.f32 %v5520_v30, %v5324_v27  ;;  %v13695_v54 = vadd.f32 %v5524_v12, %v5324_v27  ;;  %v15995_v8 = vld [vmem:[#allocation9_spill] sm:$0xff] }
 0xcf2   : > { %15973 = vst [vmem:[#allocation37_spill] sm:$0xff] %v13681_v45  ;;  %15974 = vst [vmem:[#allocation40_spill] sm:$0xff] %v13683_v60  ;;  %4570 = vperm.xlu1 %10695, %v4489_v59   ;;  %v13697_v34 = vadd.f32 %v5528_v48, %v5324_v27  ;;  %v13699_v21 = vadd.f32 %v5532_v28, %v5324_v27  ;;  %v13701_v15 = vadd.f32 %v5536_v22, %v5324_v27  ;;  %v15996_v28 = vld [vmem:[#allocation50_spill] sm:$0xff] }
 0xcf3   : > { %15975 = vst [vmem:[#allocation41_spill] sm:$0xff] %v13685_v35  ;;  %15976 = vst [vmem:[#allocation44_spill] sm:$0xff] %v13687_v6  ;;  %v13703_v40 = vadd.f32 %v5540_v41, %v5324_v27  ;;  %v13705_v32 = vadd.f32 %v10157_v44, %v5560_v10  ;;  %v13707_v36 = vadd.f32 %v10157_v44, %v5564_v55  ;;  %11107 = vrsqrt.f32 %v733_v61  ;;  %v15993_v10 = vld [vmem:[#allocation47_spill] sm:$0xff]  ;;  %v15997_v27 = vld [vmem:[#allocation90_spill] sm:$0xff] }
 0xcf4   : > { %15977 = vst [vmem:[#allocation45_spill] sm:$0xff] %v13697_v34  ;;  %15978 = vst [vmem:[#allocation48_spill] sm:$0xff] %v13699_v21  ;;  %v13709_v26 = vadd.f32 %v10157_v44, %v5568_v56  ;;  %v13711_v3 = vadd.f32 %v10157_v44, %v5572_v4  ;;  %11109 = vrsqrt.f32 %v735_v18  ;;  %v742_v29 = vadd.f32 1e-08, %v15992_v7  ;;  %v11104_v4 = vpop.eup %11103  ;;  %v16012_v35 = vld [vmem:[#allocation18_spill] sm:$0xff] }
 0xcf5   : > { %15979 = vst [vmem:[#allocation49_spill] sm:$0xff] %v13701_v15  ;;  %15980 = vst [vmem:[#allocation51_spill] sm:$0xff] %v13703_v40  ;;  %11111 = vrsqrt.f32 %v736_v37  ;;  %v743_v59 = vadd.f32 1e-08, %v15993_v10  ;;  %v741_v55 = vadd.f32 1e-08, %v15994_v57  ;;  %v764_v53 = vmul.f32 %v11102_v63, %v15995_v8  ;;  %v11106_v30 = vpop.eup %11105 }
 0xcf6   : > { %15981 = vst [vmem:[#allocation52_spill] sm:$0xff] %v13705_v32  ;;  %15982 = vst [vmem:[#allocation53_spill] sm:$0xff] %v13707_v36  ;;  %10699 = vset.pattern.permute.xlu1 %v11589_v33  ;;  %v15988_v33 = vld [vmem:[#allocation35_spill] sm:$0xff]  ;;  %v746_v56 = vadd.f32 1e-08, %v15969_v19  ;;  %v763_v0 = vmul.f32 %v11104_v4, %v15998_v38  ;;  %v766_v61 = vmul.f32 %v11106_v30, %v15999_v31  ;;  %v16003_v38 = vld [vmem:[#allocation8_spill] sm:$0xff] }
 0xcf7   : > { %15983 = vst [vmem:[#allocation101_spill] sm:$0xff] %v13709_v26  ;;  %15984 = vst [vmem:[#allocation102_spill] sm:$0xff] %v13711_v3  ;;  %4742 = vperm.xlu1 %10699, %v11569_v11   ;;  %v737_v58 = vadd.f32 1e-08, %v15988_v33  ;;  %v744_v22 = vadd.f32 1e-08, %v15996_v28 }
 0xcf8   : > { %v16005_v3 = vld [vmem:[#allocation12_spill] sm:$0xff] }
 0xcf9   : > { %11113 = vrsqrt.f32 %v737_v58 }
 0xcfb   : > { %10700 = vset.pattern.permute.xlu1 %v15972_v16  ;;  %v738_v16 = vadd.f32 1e-08, %v15989_v14 }
 0xcfd   : > { %11115 = vrsqrt.f32 %v738_v16  ;;  %v11108_v41 = vpop.eup %11107  ;;  %v16000_v16 = vld [vmem:[#allocation80_spill] sm:$0xff] }
 0xcfe   : > { %11117 = vrsqrt.f32 %v739_v25  ;;  %v11110_v44 = vpop.eup %11109  ;;  %v745_v25 = vadd.f32 1e-08, %v16000_v16  ;;  %v765_v30 = vmul.f32 %v11108_v41, %v16003_v38 }
 0xcff   : > { %11119 = vrsqrt.f32 %v740_v1  ;;  %v11112_v18 = vpop.eup %11111 }
 0xd00   : > { %11121 = vrsqrt.f32 %v742_v29  ;;  %v768_v26 = vmul.f32 %v11112_v18, %v16005_v3  ;;  %v16009_v18 = vld [vmem:[#allocation15_spill] sm:$0xff] }
 0xd01   : > { %11123 = vrsqrt.f32 %v743_v59 }
 0xd02   : > { %11125 = vrsqrt.f32 %v741_v55 }
 0xd03   : > { %11127 = vrsqrt.f32 %v746_v56  ;;  %v11114_v1 = vpop.eup %11113 }
 0xd04   : > { %11129 = vrsqrt.f32 %v744_v22 }
 0xd05   : > { %11131 = vrsqrt.f32 %v745_v25 }
 0xd07   : > { %v11116_v55 = vpop.eup %11115 }
 0xd08   : > { %v11118_v8 = vpop.eup %11117 }
 0xd09   : > { %v11120_v31 = vpop.eup %11119  ;;  %v13748_v25 = vmul.f32 %v11118_v8, %v16009_v18 }
 0xd4d   : > { %v4506_v12 = vpop.permute.xlu0 %4505 }
 0xd4e   : > { %v4579_v48 = vmul.f32 %v4506_v12, %v764_v53  ;;  %v16001_v53 = vld [vmem:[#allocation82_spill] sm:$0xff] }
 0xd50   : > { %v4595_v11 = vmul.f32 %v4579_v48, %v15997_v27  ;;  %v16002_v48 = vld [vmem:[#allocation87_spill] sm:$0xff] }
 0xd51   : > { %v4501_v37 = vpop.permute.xlu0 %4500  ;;  %v4516_v58 = vpop.permute.xlu1 %4515  ;;  %v16004_v27 = vld [vmem:[#allocation11_spill] sm:$0xff] }
 0xd52   : > { %v4617_v29 = vsel %vm682_vm1, %v4595_v11, 0.0  ;;  %v4578_v63 = vmul.f32 %v4501_v37, %v763_v0  ;;  %v4581_v59 = vmul.f32 %v4516_v58, %v766_v61  ;;  %v767_v52 = vmul.f32 %v11110_v44, %v16004_v27  ;;  %v11122_v11 = vpop.eup %11121  ;;  %v16006_v58 = vld [vmem:[#allocation13_spill] sm:$0xff]  ;;  %v16008_v27 = vld [vmem:[#allocation14_spill] sm:$0xff] }
 0xd53   : > { %v4618_v56 = vrot.slane %v4617_v29, 4  ;;  %v770_v3 = vmul.f32 %v11116_v55, %v16008_v27  ;;  %v16013_v55 = vld [vmem:[#allocation19_spill] sm:$0xff] }
 0xd54   : > { %v4594_v12 = vmul.f32 %v4578_v63, %v16001_v53  ;;  %v4597_v4 = vmul.f32 %v4581_v59, %v16002_v48  ;;  %v769_v63 = vmul.f32 %v11114_v1, %v16006_v58  ;;  %v11124_v59 = vpop.eup %11123  ;;  %v16007_v53 = vld [vmem:[#allocation84_spill] sm:$0xff]  ;;  %v16011_v58 = vld [vmem:[#allocation89_spill] sm:$0xff] }
 0xd55   : > { %v4619_v47 = vadd.f32 %v4618_v56, %v4617_v29  ;;  %v4511_v20 = vpop.permute.xlu1 %4510  ;;  %v11126_v56 = vpop.eup %11125  ;;  %v13759_v27 = vmul.f32 %v11124_v59, %v16013_v55 }
 0xd56   : > { %v4610_v22 = vsel %vm682_vm1, %v4594_v12, 0.0  ;;  %v4631_v0 = vsel %vm682_vm1, %v4597_v4, 0.0  ;;  %v4580_v61 = vmul.f32 %v4511_v20, %v765_v30  ;;  %v4521_v37 = vpop.permute.xlu0 %4520  ;;  %v16010_v12 = vld [vmem:[#allocation16_spill] sm:$0xff]  ;;  %v11128_v20 = vpop.eup %11127 }
 0xd57   : > { %v4620_v48 = vrot.slane %v4619_v47, 2  ;;  %v4611_v41 = vrot.slane %v4610_v22, 4  ;;  %v4632_v38 = vrot.slane %v4631_v0, 4  ;;  %v4582_v29 = vmul.f32 %v4521_v37, %v767_v52 }
 0xd58   : > { %v4596_v44 = vmul.f32 %v4580_v61, %v16007_v53  ;;  %v13751_v36 = vmul.f32 %v11120_v31, %v16010_v12  ;;  %v13756_v61 = vmul.f32 %v11122_v11, %v16012_v35  ;;  %v11130_v53 = vpop.eup %11129 }
 0xd59   : > { %v4621_v4 = vadd.f32 %v4620_v48, %v4619_v47  ;;  %v4612_v30 = vadd.f32 %v4611_v41, %v4610_v22  ;;  %v4633_v1 = vadd.f32 %v4632_v38, %v4631_v0  ;;  %v4598_v32 = vmul.f32 %v4582_v29, %v16011_v58  ;;  %v4526_v6 = vpop.permute.xlu1 %4525  ;;  %v16014_v48 = vld [vmem:[#allocation92_spill] sm:$0xff]  ;;  %v16015_v41 = vld [vmem:[#allocation17_spill] sm:$0xff] }
 0xd5a   : > { %v4624_v52 = vsel %vm682_vm1, %v4596_v44, 0.0  ;;  %v4583_v37 = vmul.f32 %v4526_v6, %v768_v26  ;;  %v13764_v38 = vmul.f32 %v11126_v56, %v16015_v41  ;;  %v16016_v6 = vld [vmem:[#allocation22_spill] sm:$0xff]  ;;  %v16017_v56 = vld [vmem:[#allocation20_spill] sm:$0xff] }
 0xd5b   : > { %v4622_v8 = vrot.slane %v4621_v4, 1  ;;  %v4613_v18 = vrot.slane %v4612_v30, 2  ;;  %v4634_v31 = vrot.slane %v4633_v1, 2  ;;  %v4625_v12 = vrot.slane %v4624_v52, 4 }
 0xd5c   : > { %v4638_v47 = vsel %vm682_vm1, %v4598_v32, 0.0  ;;  %v4599_v22 = vmul.f32 %v4583_v37, %v16014_v48  ;;  %v4531_v0 = vpop.permute.xlu0 %4530  ;;  %v13767_v26 = vmul.f32 %v11128_v20, %v16016_v6  ;;  %v13770_v32 = vpop.eup %11131  ;;  %v13773_v41 = vmul.f32 %v11130_v53, %v16017_v56 }
 0xd5d   : > { %v4623_v35 = vadd.f32 %v4622_v8, %v4621_v4  ;;  %v4614_v11 = vadd.f32 %v4613_v18, %v4612_v30  ;;  %v4635_v59 = vadd.f32 %v4634_v31, %v4633_v1  ;;  %v4626_v29 = vadd.f32 %v4625_v12, %v4624_v52  ;;  %v4536_v44 = vpop.permute.xlu1 %4535  ;;  %v16018_v4 = vld [vmem:[#allocation93_spill] sm:$0xff]  ;;  %v16019_v1 = vld [vmem:[#allocation94_spill] sm:$0xff] }
 0xd5e   : > { %v4639_v55 = vrot.slane %v4638_v47, 4  ;;  %v4645_v58 = vsel %vm682_vm1, %v4599_v22, 0.0  ;;  %v4584_v60 = vmul.f32 %v4531_v0, %v769_v63  ;;  %v4585_v45 = vmul.f32 %v4536_v44, %v770_v3 }
 0xd5f   : > { %v4615_v37 = vrot.slane %v4614_v11, 1  ;;  %v4636_v48 = vrot.slane %v4635_v59, 1  ;;  %v4627_v40 = vrot.slane %v4626_v29, 2  ;;  %v4646_v6 = vrot.slane %v4645_v58, 4 }
 0xd60   : > { %v4640_v20 = vadd.f32 %v4639_v55, %v4638_v47  ;;  %v4600_v30 = vmul.f32 %v4584_v60, %v16018_v4  ;;  %v4601_v52 = vmul.f32 %v4585_v45, %v16019_v1  ;;  %v4723_v8 = vmul.f32 0.01, %v4623_v35 }
 0xd61   : > { %v4616_v18 = vadd.f32 %v4615_v37, %v4614_v11  ;;  %v4637_v31 = vadd.f32 %v4636_v48, %v4635_v59  ;;  %v4628_v12 = vadd.f32 %v4627_v40, %v4626_v29  ;;  %v13777_v63 = vpop.permute.xlu0 %4739  ;;  %v4541_v3 = vpop.permute.xlu1 %4540  ;;  %v4647_v0 = vadd.f32 %v4646_v6, %v4645_v58 }
 0xd62   : > { %16020 = vst [vmem:[#allocation26_spill] sm:$0xff] %v13777_v63  ;;  %v4641_v22 = vrot.slane %v4640_v20, 2  ;;  %v4652_v44 = vsel %vm682_vm1, %v4600_v30, 0.0  ;;  %v4659_v53 = vsel %vm682_vm1, %v4601_v52, 0.0  ;;  %v15760_v11 = vrot.slane %v13777_v63, 2 }
 0xd63   : > { %v4722_v56 = vmul.f32 0.01, %v4616_v18  ;;  %v4725_v47 = vmul.f32 0.01, %v4637_v31  ;;  %v4629_v55 = vrot.slane %v4628_v12, 1  ;;  %v4653_v15 = vrot.slane %v4652_v44, 4 }
 0xd64   : > { %v4642_v60 = vadd.f32 %v4641_v22, %v4640_v20  ;;  %v4648_v4 = vrot.slane %v4647_v0, 2  ;;  %v4660_v45 = vrot.slane %v4659_v53, 4  ;;  %v16022_v20 = vrot.slane %v13777_v63, 3 }
 0xd65   : > { %v4630_v48 = vadd.f32 %v4629_v55, %v4628_v12  ;;  %v4654_v40 = vadd.f32 %v4653_v15, %v4652_v44  ;;  %v4556_v58 = vpop.permute.xlu1 %4555  ;;  %v4774_v59 = vmul.f32 %v13777_v63, %v4722_v56 }
 0xd66   : > { %v4643_v29 = vrot.slane %v4642_v60, 1  ;;  %v4649_v37 = vadd.f32 %v4648_v4, %v4647_v0  ;;  %v4661_v6 = vadd.f32 %v4660_v45, %v4659_v53  ;;  %v4546_v52 = vpop.permute.xlu0 %4545  ;;  %v16021_v4 = vrot.slane %v13777_v63, 1 }
 0xd67   : > { %v4724_v18 = vmul.f32 0.01, %v4630_v48  ;;  %v4655_v31 = vrot.slane %v4654_v40, 2  ;;  %v4777_v22 = vmul.f32 %v16022_v20, %v4725_v47  ;;  %v4587_v47 = vmul.f32 %v4546_v52, %v13751_v36 }
 0xd68   : > { %v4644_v35 = vadd.f32 %v4643_v29, %v4642_v60  ;;  %v4650_v12 = vrot.slane %v4649_v37, 1  ;;  %v4662_v15 = vrot.slane %v4661_v6, 2  ;;  %v4775_v0 = vmul.f32 %v16021_v4, %v4723_v8 }
 0xd69   : > { %v4656_v55 = vadd.f32 %v4655_v31, %v4654_v40  ;;  %v4776_v53 = vmul.f32 %v15760_v11, %v4724_v18  ;;  %v4551_v60 = vpop.permute.xlu1 %4550  ;;  %v4586_v40 = vmul.f32 %v4541_v3, %v13748_v25  ;;  %v16023_v8 = vrot.slane %v13777_v63, 4 }
 0xd6a   : > { %v4726_v45 = vmul.f32 0.01, %v4644_v35  ;;  %v4651_v48 = vadd.f32 %v4650_v12, %v4649_v37  ;;  %v4663_v30 = vadd.f32 %v4662_v15, %v4661_v6  ;;  %v4806_v1 = vrot.slane %v4775_v0, 7  ;;  %v4561_v31 = vpop.permute.xlu0 %4560  ;;  %v16024_v37 = vld [vmem:[#allocation85_spill] sm:$0xff] }
 0xd6b   : > { %v4657_v29 = vrot.slane %v4656_v55, 1  ;;  %v4808_v21 = vrot.slane %v4776_v53, 6  ;;  %v4810_v34 = vrot.slane %v4777_v22, 5  ;;  %v4602_v6 = vmul.f32 %v4586_v40, %v16024_v37  ;;  %v16026_v22 = vld [vmem:[#allocation86_spill] sm:$0xff] }
 0xd6c   : > { %v4727_v56 = vmul.f32 0.01, %v4651_v48  ;;  %v4664_v44 = vrot.slane %v4663_v30, 1  ;;  %v4778_v4 = vmul.f32 %v16023_v8, %v4726_v45  ;;  %v4807_v35 = vsel %vm1878_vm5, %v4806_v1, %v4774_v59 }
 0xd6d   : > { %v4658_v18 = vadd.f32 %v4657_v29, %v4656_v55  ;;  %v16025_v12 = vrot.slane %v13777_v63, 5  ;;  %v4809_v25 = vsel %vm1880_vm6, %v4808_v21, %v4807_v35  ;;  %v4666_v45 = vsel %vm682_vm1, %v4602_v6, 0.0  ;;  %v4566_v36 = vpop.permute.xlu1 %4565 }
 0xd6e   : > { %v4665_v20 = vadd.f32 %v4664_v44, %v4663_v30  ;;  %v4812_v3 = vrot.slane %v4778_v4, 4  ;;  %v4811_v53 = vsel %vm1882_vm7, %v4810_v34, %v4809_v25  ;;  %v4603_v55 = vmul.f32 %v4587_v47, %v16026_v22  ;;  %v4576_v34 = vpop.permute.xlu0 %4575  ;;  %v16029_v47 = vld [vmem:[#allocation91_spill] sm:$0xff] }
 0xd6f   : > { %v4779_v15 = vmul.f32 %v16025_v12, %v4727_v56  ;;  %v4728_v0 = vmul.f32 0.01, %v4658_v18  ;;  %v4667_v29 = vrot.slane %v4666_v45, 4  ;;  %v16027_v30 = vrot.slane %v13777_v63, 6  ;;  %v16030_v12 = vld [vmem:[#allocation95_spill] sm:$0xff] }
 0xd70   : > { %v4729_v48 = vmul.f32 0.01, %v4665_v20  ;;  %v4813_v1 = vsel %vm1884_vm8, %v4812_v3, %v4811_v53  ;;  %v4673_v44 = vsel %vm682_vm1, %v4603_v55, 0.0  ;;  %v4589_v21 = vmul.f32 %v4556_v58, %v13756_v61 }
 0xd71   : > { %v4814_v59 = vrot.slane %v4779_v15, 3  ;;  %v4780_v52 = vmul.f32 %v16027_v30, %v4728_v0  ;;  %v4590_v40 = vmul.f32 %v4561_v31, %v13759_v27  ;;  %v16028_v56 = vrot.slane %v13777_v63, 7  ;;  %v4571_v30 = vpop.permute.xlu1 %4570 }
 0xd72   : > { %v4668_v18 = vadd.f32 %v4667_v29, %v4666_v45  ;;  %v4674_v35 = vrot.slane %v4673_v44, 4  ;;  %v4605_v20 = vmul.f32 %v4589_v21, %v16029_v47  ;;  %v4588_v25 = vmul.f32 %v4551_v60, %v13764_v38  ;;  %v16031_v45 = vld [vmem:[#allocation88_spill] sm:$0xff]  ;;  %v16032_v38 = vld [vmem:[#allocation3_spill] sm:$0xff] }
 0xd73   : > { %v4781_v8 = vmul.f32 %v16028_v56, %v4729_v48  ;;  %v4815_v4 = vsel %vm1886_vm9, %v4814_v59, %v4813_v1  ;;  %v4816_v6 = vrot.slane %v4780_v52, 2  ;;  %v4606_v15 = vmul.f32 %v4590_v40, %v16030_v12 }
 0xd74   : > { %v4669_v0 = vrot.slane %v4668_v18, 2  ;;  %v4675_v61 = vadd.f32 %v4674_v35, %v4673_v44  ;;  %v4593_v27 = vmul.f32 %v4576_v34, %v13767_v26  ;;  %v4687_v31 = vsel %vm682_vm1, %v4605_v20, 0.0  ;;  %v16033_v26 = vld [vmem:[#allocation97_spill] sm:$0xff] }
 0xd75   : > { %v4818_v3 = vrot.slane %v4781_v8, 1  ;;  %v4817_v58 = vsel %vm1888_vm10, %v4816_v6, %v4815_v4  ;;  %v4694_v53 = vsel %vm682_vm1, %v4606_v15, 0.0  ;;  %v4604_v55 = vmul.f32 %v4588_v25, %v16031_v45 }
 0xd76   : > { %v4670_v1 = vadd.f32 %v4669_v0, %v4668_v18  ;;  %v4676_v59 = vrot.slane %v4675_v61, 2  ;;  %v4688_v29 = vrot.slane %v4687_v31, 4  ;;  %v4695_v52 = vrot.slane %v4694_v53, 4  ;;  %v16034_v18 = vld [vmem:[#allocation21_spill] sm:$0xff] }
 0xd77   : > { %v4819_v48 = vsel %vm1890_vm11, %v4818_v3, %v4817_v58  ;;  %v4680_v44 = vsel %vm682_vm1, %v4604_v55, 0.0  ;;  %v4609_v21 = vmul.f32 %v4593_v27, %v16033_v26  ;;  %v4591_v6 = vmul.f32 %v4566_v36, %v13773_v41  ;;  %v16036_v55 = vld [vmem:[#allocation96_spill] sm:$0xff] }
 0xd78   : > { %v4836_v60 = vadd.f32 %v4819_v48, %v16032_v38  ;;  %v4671_v40 = vrot.slane %v4670_v1, 1  ;;  %v4677_v34 = vadd.f32 %v4676_v59, %v4675_v61  ;;  %v4689_v56 = vadd.f32 %v4688_v29, %v4687_v31 }
 0xd79   : > { %v4681_v8 = vrot.slane %v4680_v44, 4  ;;  %v4696_v4 = vadd.f32 %v4695_v52, %v4694_v53  ;;  %v4715_v35 = vsel %vm682_vm1, %v4609_v21, 0.0  ;;  %v777_v20 = vmul.f32 %v13770_v32, %v16034_v18  ;;  %v13836_v52 = vpop.permute.xlu1 %4742 }
 0xd7a   : > { %v13833_v15 = vmul.f32 %v4836_v60, %v15951_v39  ;;  %v4678_v25 = vrot.slane %v4677_v34, 1  ;;  %v4690_v3 = vrot.slane %v4689_v56, 2  ;;  %v4716_v27 = vrot.slane %v4715_v35, 4  ;;  %16037 = vst [vmem:[#allocation31_spill] sm:$0xff] %v13836_v52  ;;  %v16038_v60 = vld [vmem:[#allocation98_spill] sm:$0xff] }
 0xd7b   : > { %v4682_v0 = vadd.f32 %v4681_v8, %v4680_v44  ;;  %v4697_v58 = vrot.slane %v4696_v4, 2  ;;  %v4607_v61 = vmul.f32 %v4591_v6, %v16036_v55  ;;  %v4592_v31 = vmul.f32 %v4571_v30, %v777_v20 }
 0xd7c   : > { %16035 = vst [vmem:[#allocation30_spill] sm:$0xff] %v13833_v15  ;;  %v4672_v48 = vadd.f32 %v4671_v40, %v4670_v1  ;;  %v4679_v53 = vadd.f32 %v4678_v25, %v4677_v34  ;;  %v4691_v59 = vadd.f32 %v4690_v3, %v4689_v56  ;;  %v4717_v36 = vadd.f32 %v4716_v27, %v4715_v35 }
 0xd7d   : > { %v4683_v29 = vrot.slane %v4682_v0, 2  ;;  %v4698_v41 = vadd.f32 %v4697_v58, %v4696_v4  ;;  %v4701_v32 = vsel %vm682_vm1, %v4607_v61, 0.0  ;;  %v4608_v21 = vmul.f32 %v4592_v31, %v16038_v60 }
 0xd7e   : > { %v4731_v18 = vmul.f32 0.01, %v4679_v53  ;;  %v4692_v11 = vrot.slane %v4691_v59, 1  ;;  %v4702_v8 = vrot.slane %v4701_v32, 4  ;;  %v4718_v63 = vrot.slane %v4717_v36, 2 }
 0xd7f   : > { %v4684_v44 = vadd.f32 %v4683_v29, %v4682_v0  ;;  %v4699_v38 = vrot.slane %v4698_v41, 1  ;;  %v4708_v30 = vsel %vm682_vm1, %v4608_v21, 0.0  ;;  %v15769_v1 = vrot.slane %v13836_v52, 1 }
 0xd80   : > { %v4693_v40 = vadd.f32 %v4692_v11, %v4691_v59  ;;  %v4703_v56 = vadd.f32 %v4702_v8, %v4701_v32  ;;  %v4709_v6 = vrot.slane %v4708_v30, 4  ;;  %v4719_v35 = vadd.f32 %v4718_v63, %v4717_v36 }
 0xd81   : > { %v4685_v34 = vrot.slane %v4684_v44, 1  ;;  %v4700_v4 = vadd.f32 %v4699_v38, %v4698_v41  ;;  %v15766_v20 = vrot.slane %v13836_v52, 2  ;;  %v15768_v25 = vrot.slane %v13836_v52, 3 }
 0xd82   : > { %v4733_v3 = vmul.f32 0.01, %v4693_v40  ;;  %v4704_v0 = vrot.slane %v4703_v56, 2  ;;  %v4710_v27 = vadd.f32 %v4709_v6, %v4708_v30  ;;  %v4730_v61 = vmul.f32 0.01, %v4672_v48 }
 0xd83   : > { %v4686_v58 = vadd.f32 %v4685_v34, %v4684_v44  ;;  %v4734_v31 = vmul.f32 0.01, %v4700_v4  ;;  %v4720_v53 = vrot.slane %v4719_v35, 1  ;;  %v15765_v29 = vrot.slane %v13836_v52, 4 }
 0xd84   : > { %v4705_v11 = vadd.f32 %v4704_v0, %v4703_v56  ;;  %v4711_v59 = vrot.slane %v4710_v27, 2  ;;  %v15767_v32 = vrot.slane %v13836_v52, 5  ;;  %v15763_v63 = vrot.slane %v13836_v52, 7 }
 0xd85   : > { %v4732_v21 = vmul.f32 0.01, %v4686_v58  ;;  %v4721_v38 = vadd.f32 %v4720_v53, %v4719_v35  ;;  %v4782_v41 = vmul.f32 %v13836_v52, %v4730_v61  ;;  %v4783_v36 = vmul.f32 %v15769_v1, %v4731_v18 }
 0xd86   : > { %v4706_v44 = vrot.slane %v4705_v11, 1  ;;  %v4712_v8 = vadd.f32 %v4711_v59, %v4710_v27  ;;  %v4785_v30 = vmul.f32 %v15768_v25, %v4733_v3  ;;  %v4786_v34 = vmul.f32 %v15765_v29, %v4734_v31 }
 0xd87   : > { %v4784_v48 = vmul.f32 %v15766_v20, %v4732_v21  ;;  %v4737_v40 = vmul.f32 0.01, %v4721_v38  ;;  %v4820_v56 = vrot.slane %v4783_v36, 7  ;;  %v4851_v6 = vrot.slane %v13833_v15, %v15967_v13 }
 0xd88   : > { %v4707_v4 = vadd.f32 %v4706_v44, %v4705_v11  ;;  %v4713_v35 = vrot.slane %v4712_v8, 1  ;;  %v15764_v18 = vrot.slane %v13836_v52, 6  ;;  %v4824_v27 = vrot.slane %v4785_v30, 5  ;;  %v16064_v52 = vld [vmem:[#allocation28_spill] sm:$0xff] }
 0xd89   : > { %v4822_v58 = vrot.slane %v4784_v48, 6  ;;  %v4821_v0 = vsel %vm1878_vm5, %v4820_v56, %v4782_v41  ;;  %v4826_v61 = vrot.slane %v4786_v34, 4  ;;  %v4867_v53 = vrot.slane %v4851_v6, %v15967_v13 }
 0xd8a   : > { %v4735_v3 = vmul.f32 0.01, %v4707_v4  ;;  %v4714_v21 = vadd.f32 %v4713_v35, %v4712_v8  ;;  %v4859_v31 = vcombine.high %v4851_v6, %v4851_v6  ;;  %v4789_v38 = vmul.f32 %v15763_v63, %v4737_v40 }
 0xd8b   : > { %v4823_v59 = vsel %vm1880_vm6, %v4822_v58, %v4821_v0  ;;  %v4945_v36 = vrot.slane %v4867_v53, %v11686_v17  ;;  %v4889_v44 = vcombine.high %v4867_v53, %v4867_v53  ;;  %v4844_v40 = vcombine.high %v13833_v15, %v13833_v15 }
 0xd8c   : > { %v4825_v11 = vsel %vm1882_vm7, %v4824_v27, %v4823_v59  ;;  %v4736_v48 = vmul.f32 0.01, %v4714_v21  ;;  %v4787_v41 = vmul.f32 %v15767_v32, %v4735_v3  ;;  %v4881_v34 = vrot.slane %v4859_v31, %v15967_v13 }
 0xd8d   : > { %v4827_v30 = vsel %vm1884_vm8, %v4826_v61, %v4825_v11  ;;  %v13871_v8 = vsub.f32 %v4945_v36, %v13833_v15  ;;  %v4953_v56 = vrot.slane %v4889_v44, %v11686_v17  ;;  %v4832_v0 = vrot.slane %v4789_v38, 1 }
 0xd8e   : > { %v4788_v6 = vmul.f32 %v15764_v18, %v4736_v48  ;;  %v4828_v4 = vrot.slane %v4787_v41, 3  ;;  %v4949_v35 = vrot.slane %v4881_v34, %v11686_v17  ;;  %v4891_v58 = vcombine.high %v4881_v34, %v4881_v34 }
 0xd8f   : > { %16039 = vst [vmem:[#allocation29_spill] sm:$0xff] %v13871_v8  ;;  %v5038_v27 = vmul.f32 %v13871_v8, %v13871_v8  ;;  %v13882_v61 = vsub.f32 %v4953_v56, %v13833_v15  ;;  %v4858_v53 = vrot.slane %v4844_v40, %v15967_v13 }
 0xd90   : > { %v4829_v3 = vsel %vm1886_vm9, %v4828_v4, %v4827_v30  ;;  %v4830_v21 = vrot.slane %v4788_v6, 2  ;;  %v13887_v59 = vsub.f32 %v4949_v35, %v13833_v15  ;;  %v4957_v31 = vrot.slane %v4891_v58, %v11686_v17  ;;  %v16043_v6 = vld [vmem:[#allocation5_spill] sm:$0xff] }
 0xd91   : > { %16040 = vst [vmem:[#allocation32_spill] sm:$0xff] %v13882_v61  ;;  %v5054_v11 = vsel %vm682_vm1, %v5038_v27, 0.0  ;;  %v5040_v38 = vmul.f32 %v13882_v61, %v13882_v61  ;;  %v4874_v36 = vrot.slane %v4858_v53, %v15967_v13  ;;  %v4860_v44 = vcombine.high %v4858_v53, %v4858_v53 }
 0xd92   : > { %16041 = vst [vmem:[#allocation34_spill] sm:$0xff] %v13887_v59  ;;  %v4831_v48 = vsel %vm1888_vm10, %v4830_v21, %v4829_v3  ;;  %5055 = vadd.xlane.f32.xlu0 %v5054_v11  ;;  %v5039_v41 = vmul.f32 %v13887_v59, %v13887_v59  ;;  %v13898_v30 = vsub.f32 %v4957_v31, %v13833_v15  ;;  %v16090_v59 = vld [vmem:[#allocation65_spill] sm:$0xff] }
 0xd93   : > { %v4833_v34 = vsel %vm1890_vm11, %v4832_v0, %v4831_v48  ;;  %v4961_v56 = vrot.slane %v4874_v36, %v11686_v17  ;;  %v4890_v40 = vcombine.high %v4874_v36, %v4874_v36  ;;  %v4888_v58 = vrot.slane %v4860_v44, %v15967_v13 }
 0xd94   : > { %16042 = vst [vmem:[#allocation35_spill] sm:$0xff] %v13898_v30  ;;  %v4837_v4 = vadd.f32 %v4833_v34, %v16043_v6  ;;  %v5057_v35 = vsel %vm682_vm1, %v5039_v41, 0.0  ;;  %v5060_v27 = vsel %vm682_vm1, %v5040_v38, 0.0  ;;  %v5041_v3 = vmul.f32 %v13898_v30, %v13898_v30 }
 0xd95   : > { %5058 = vadd.xlane.f32.xlu1 %v5057_v35  ;;  %v13907_v53 = vsub.f32 %v4961_v56, %v13833_v15  ;;  %v4969_v0 = vrot.slane %v4890_v40, %v11686_v17  ;;  %v4965_v31 = vrot.slane %v4888_v58, %v11686_v17  ;;  %v4892_v11 = vcombine.high %v4888_v58, %v4888_v58 }
 0xd96   : > { %v13913_v21 = vmul.f32 %v4837_v4, %v15952_v46  ;;  %5061 = vadd.xlane.f32.xlu0 %v5060_v27  ;;  %v5063_v40 = vsel %vm682_vm1, %v5041_v3, 0.0 }
 0xd97   : > { %16044 = vst [vmem:[#allocation38_spill] sm:$0xff] %v13907_v53  ;;  %v5042_v36 = vmul.f32 %v13907_v53, %v13907_v53  ;;  %v13919_v38 = vsub.f32 %v4969_v0, %v13833_v15  ;;  %v13922_v44 = vsub.f32 %v4965_v31, %v13833_v15  ;;  %v4973_v48 = vrot.slane %v4892_v11, %v11686_v17 }
 0xd98   : > { %16045 = vst [vmem:[#allocation39_spill] sm:$0xff] %v13913_v21  ;;  %v4900_v41 = vrot.slane %v13913_v21, %v15967_v13  ;;  %v4893_v34 = vcombine.high %v13913_v21, %v13913_v21 }
 0xd99   : > { %16046 = vst [vmem:[#allocation42_spill] sm:$0xff] %v13919_v38  ;;  %16047 = vst [vmem:[#allocation46_spill] sm:$0xff] %v13922_v44  ;;  %v5066_v56 = vsel %vm682_vm1, %v5042_v36, 0.0  ;;  %v5044_v4 = vmul.f32 %v13919_v38, %v13919_v38  ;;  %v5043_v35 = vmul.f32 %v13922_v44, %v13922_v44  ;;  %v13936_v58 = vsub.f32 %v4973_v48, %v13833_v15  ;;  %v16077_v44 = vld [vmem:[#allocation59_spill] sm:$0xff] }
 0xd9a   : > { %5067 = vadd.xlane.f32.xlu1 %v5066_v56  ;;  %5064 = vadd.xlane.f32.xlu0 %v5063_v40  ;;  %v4916_v27 = vrot.slane %v4900_v41, %v15967_v13  ;;  %v4908_v0 = vcombine.high %v4900_v41, %v4900_v41  ;;  %v4907_v31 = vrot.slane %v4893_v34, %v15967_v13 }
 0xd9b   : > { %16048 = vst [vmem:[#allocation47_spill] sm:$0xff] %v13936_v58  ;;  %v5072_v11 = vsel %vm682_vm1, %v5044_v4, 0.0  ;;  %v5045_v3 = vmul.f32 %v13936_v58, %v13936_v58  ;;  %v5069_v40 = vsel %vm682_vm1, %v5043_v35, 0.0 }
 0xd9c   : > { %v4977_v36 = vrot.slane %v4916_v27, %v11686_v17  ;;  %v4938_v56 = vcombine.high %v4916_v27, %v4916_v27  ;;  %v4930_v63 = vrot.slane %v4908_v0, %v15967_v13  ;;  %v4923_v48 = vrot.slane %v4907_v31, %v15967_v13 }
 0xd9d   : > { %v4909_v18 = vcombine.high %v4907_v31, %v4907_v31  ;;  %v5075_v35 = vsel %vm682_vm1, %v5045_v3, 0.0 }
 0xd9e   : > { %5073 = vadd.xlane.f32.xlu1 %v5072_v11  ;;  %5070 = vadd.xlane.f32.xlu0 %v5069_v40  ;;  %v13948_v41 = vsub.f32 %v4977_v36, %v13913_v21  ;;  %v4985_v34 = vrot.slane %v4938_v56, %v11686_v17  ;;  %v4981_v4 = vrot.slane %v4930_v63, %v11686_v17 }
 0xd9f   : > { %v4940_v29 = vcombine.high %v4930_v63, %v4930_v63  ;;  %v4993_v20 = vrot.slane %v4923_v48, %v11686_v17  ;;  %v4937_v27 = vrot.slane %v4909_v18, %v15967_v13  ;;  %v4939_v11 = vcombine.high %v4923_v48, %v4923_v48 }
 0xda0   : > { %16049 = vst [vmem:[#allocation43_spill] sm:$0xff] %v13948_v41  ;;  %v5046_v0 = vmul.f32 %v13948_v41, %v13948_v41  ;;  %v13958_v31 = vsub.f32 %v4985_v34, %v13913_v21  ;;  %v13961_v36 = vsub.f32 %v4981_v4, %v13913_v21 }
 0xda1   : > { %v4989_v56 = vrot.slane %v4940_v29, %v11686_v17  ;;  %v13965_v63 = vsub.f32 %v4993_v20, %v13913_v21  ;;  %v4997_v40 = vrot.slane %v4937_v27, %v11686_v17  ;;  %v5001_v34 = vrot.slane %v4939_v11, %v11686_v17 }
 0xda2   : > { %16050 = vst [vmem:[#allocation9_spill] sm:$0xff] %v13958_v31  ;;  %16051 = vst [vmem:[#allocation50_spill] sm:$0xff] %v13961_v36  ;;  %5076 = vadd.xlane.f32.xlu0 %v5075_v35  ;;  %v5078_v18 = vsel %vm682_vm1, %v5046_v0, 0.0  ;;  %v5048_v3 = vmul.f32 %v13958_v31, %v13958_v31  ;;  %v4941_v32 = vcombine.high %v4937_v27, %v4937_v27 }
 0xda3   : > { %16052 = vst [vmem:[#allocation7_spill] sm:$0xff] %v13965_v63  ;;  %5079 = vadd.xlane.f32.xlu1 %v5078_v18  ;;  %v5047_v48 = vmul.f32 %v13961_v36, %v13961_v36  ;;  %v13975_v29 = vsub.f32 %v4989_v56, %v13913_v21  ;;  %v13981_v35 = vsub.f32 %v4997_v40, %v13913_v21 }
 0xda4   : > { %v5005_v0 = vrot.slane %v4941_v32, %v11686_v17  ;;  %v5084_v27 = vsel %vm682_vm1, %v5048_v3, 0.0  ;;  %v5050_v11 = vmul.f32 %v13965_v63, %v13965_v63  ;;  %v13988_v18 = vsub.f32 %v5001_v34, %v13913_v21 }
 0xda5   : > { %16053 = vst [vmem:[#allocation10_spill] sm:$0xff] %v13975_v29  ;;  %v5081_v20 = vsel %vm682_vm1, %v5047_v48, 0.0  ;;  %v5049_v4 = vmul.f32 %v13975_v29, %v13975_v29  ;;  %16054 = vst [vmem:[#allocation8_spill] sm:$0xff] %v13981_v35  ;;  %v5051_v48 = vmul.f32 %v13981_v35, %v13981_v35 }
 0xda6   : > { %5082 = vadd.xlane.f32.xlu0 %v5081_v20  ;;  %16055 = vst [vmem:[#allocation11_spill] sm:$0xff] %v13988_v18  ;;  %v13994_v40 = vsub.f32 %v5005_v0, %v13913_v21  ;;  %v5090_v32 = vsel %vm682_vm1, %v5050_v11, 0.0  ;;  %v5052_v3 = vmul.f32 %v13988_v18, %v13988_v18  ;;  %v9405_v0 = vld [vmem:[%s15626_s2 + $0x1c0] sm:$0xff]  ;;  %v9406_v11 = vld [vmem:[%s15626_s2 + $0x1c8] sm:$0xff] }
 0xda7   : > { %5085 = vadd.xlane.f32.xlu1 %v5084_v27  ;;  %v5087_v56 = vsel %vm682_vm1, %v5049_v4, 0.0  ;;  %v5093_v20 = vsel %vm682_vm1, %v5051_v48, 0.0  ;;  %v9407_v48 = vld [vmem:[%s15626_s2 + $0x1d0] sm:$0xff] }
 0xda8   : > { %16056 = vst [vmem:[#allocation12_spill] sm:$0xff] %v13994_v40  ;;  %v5053_v34 = vmul.f32 %v13994_v40, %v13994_v40  ;;  %v5096_v4 = vsel %vm682_vm1, %v5052_v3, 0.0 }
 0xdaa   : > { %5088 = vadd.xlane.f32.xlu0 %v5087_v56  ;;  %v5099_v27 = vsel %vm682_vm1, %v5053_v34, 0.0  ;;  %v10551_v56 = vpack.c.bf16 %v9406_v11, %v9405_v0  ;;  %v16057_v34 = vld [vmem:[#allocation100_spill] sm:$0xff] }
 0xdab   : > { %5091 = vadd.xlane.f32.xlu1 %v5090_v32  ;;  %v9408_v32 = vld [vmem:[%s15626_s2 + $0x1d8] sm:$0xff]  ;;  %v14028_v11 = vld [vmem:[%s15627_s3 + $0x10] sm:$0x3f] }
 0xdac   : > { %10552 = vmatprep.subr.bf16.mxu1 %v10551_v56  ;;  %v10555_v3 = vpack.c.bf16 %v9408_v32, %v9407_v48  ;;  %v11571_v32 = vld [vmem:[%s15627_s3 + $0x18] sm:$0x3f]  ;;  %v14046_v1 = vrot.slane %v14028_v11, %v11686_v17 }
 0xdad   : > { %10554 = vmatpush3.bf16.msra.mxu1 %v10551_v56  ;;  %v16061_v56 = vld [vmem:[#allocation23_spill] sm:$0xff] }
 0xdae   : > { %5094 = vadd.xlane.f32.xlu0 %v5093_v20  ;;  %10556 = vmatprep.subr.bf16.mxu1 %v10555_v3  ;;  %v9515_v20 = vld [vmem:[%s15629_s5 + $0x4] sm:$0xf]  ;;  %v14032_v48 = vrot.slane %v14028_v11, %v16061_v56 }
 0xdaf   : > { %5097 = vadd.xlane.f32.xlu1 %v5096_v4  ;;  %v14020_v4 = vrot.slane %v9515_v20, %v16057_v34 }
 0xdb1   : > { %10558 = vmatpush3.bf16.msra.mxu1 %v10555_v3  ;;  %16058 = vst [vmem:[#allocation13_spill] sm:$0xff] %v14020_v4  ;;  %v14038_v3 = vrot.slane %v11571_v32, %v16061_v56  ;;  %v16063_v56 = vld [vmem:[#allocation27_spill] sm:$0xff]  ;;  %v7940_v58 = vmul.f32 %v14020_v4, %v15954_v50  ;;  %v7941_v50 = vmul.f32 %v14020_v4, %v15985_v43 }
 0xdb2   : > { %5100 = vadd.xlane.f32.xlu0 %v5099_v27  ;;  %v16059_v27 = vld [vmem:[#allocation99_spill] sm:$0xff] }
 0xdb3   : > { %v14023_v0 = vrot.slane %v9515_v20, %v16059_v27  ;;  %v7939_v20 = vmul.f32 %v14020_v4, %v15953_v9 }
 0xdb5   : > { %16060 = vst [vmem:[#allocation14_spill] sm:$0xff] %v14023_v0 }
 0xe1f   : > { %v14042_v25 = vpop.xlane.xlu0 %5055 }
 0xe20   : > { %16062 = vst [vmem:[#allocation15_spill] sm:$0xff] %v14042_v25  ;;  %v5337_v6 = vmul.f32 %v14032_v48, %v14042_v25  ;;  %v6632_v21 = vmul.f32 %v14038_v3, %v14042_v25  ;;  %v7919_v15 = vmul.f32 %v14023_v0, %v14042_v25 }
 0xe22   : > { %v5373_v32 = vadd.f32 %v16063_v56, %v5337_v6  ;;  %v14056_v40 = vadd.f32 %v16064_v52, %v6632_v21  ;;  %v14058_v9 = vadd.f32 %v7939_v20, %v7919_v15  ;;  %v14060_v18 = vpop.xlane.xlu1 %5058  ;;  %v16068_v15 = vld [vmem:[#allocation54_spill] sm:$0xff]  ;;  %v16069_v20 = vld [vmem:[#allocation55_spill] sm:$0xff] }
 0xe23   : > { %16066 = vst [vmem:[#allocation18_spill] sm:$0xff] %v14060_v18  ;;  %v5338_v63 = vmul.f32 %v14032_v48, %v14060_v18  ;;  %v6633_v31 = vmul.f32 %v14038_v3, %v14060_v18  ;;  %v7920_v35 = vmul.f32 %v14023_v0, %v14060_v18  ;;  %v14070_v6 = vpop.xlane.xlu0 %5061 }
 0xe24   : > { %16065 = vst [vmem:[#allocation16_spill] sm:$0xff] %v14058_v9  ;;  %16067 = vst [vmem:[#allocation19_spill] sm:$0xff] %v14070_v6  ;;  %v5393_v52 = vadd.f32 %v14046_v1, %v5373_v32  ;;  %v6634_v29 = vmul.f32 %v14038_v3, %v14070_v6  ;;  %v7921_v36 = vmul.f32 %v14023_v0, %v14070_v6 }
 0xe25   : > { %v5374_v21 = vadd.f32 %v16068_v15, %v5338_v63  ;;  %v14075_v56 = vadd.f32 %v16069_v20, %v6633_v31  ;;  %v14077_v41 = vadd.f32 %v7940_v58, %v7920_v35  ;;  %v16074_v58 = vld [vmem:[#allocation57_spill] sm:$0xff]  ;;  %v7943_v15 = vmul.f32 %v14020_v4, %v15986_v42 }
 0xe26   : > { %v14091_v31 = vadd.f32 %v13691_v23, %v5393_v52  ;;  %v14094_v63 = vadd.f32 %v16074_v58, %v6634_v29  ;;  %v14096_v35 = vadd.f32 %v7941_v50, %v7921_v36  ;;  %v7942_v36 = vmul.f32 %v14020_v4, %v15956_v24  ;;  %v16082_v50 = vld [vmem:[#allocation61_spill] sm:$0xff] }
 0xe27   : > { %16070 = vst [vmem:[#allocation17_spill] sm:$0xff] %v14075_v56  ;;  %16071 = vst [vmem:[#allocation22_spill] sm:$0xff] %v14077_v41  ;;  %v5394_v38 = vadd.f32 %v14046_v1, %v5374_v21  ;;  %v14086_v53 = vpop.xlane.xlu1 %5067  ;;  %v14088_v32 = vpop.xlane.xlu0 %5064  ;;  %v7945_v24 = vmul.f32 %v14020_v4, %v15988_v33 }
 0xe28   : > { %16072 = vst [vmem:[#allocation20_spill] sm:$0xff] %v14086_v53  ;;  %16073 = vst [vmem:[#allocation21_spill] sm:$0xff] %v14088_v32  ;;  %v6636_v21 = vmul.f32 %v14038_v3, %v14086_v53  ;;  %v7923_v20 = vmul.f32 %v14023_v0, %v14086_v53  ;;  %v7922_v42 = vmul.f32 %v14023_v0, %v14088_v32 }
 0xe29   : > { %16075 = vst [vmem:[#allocation99_spill] sm:$0xff] %v14094_v63  ;;  %16076 = vst [vmem:[#allocation23_spill] sm:$0xff] %v14096_v35  ;;  %v14099_v43 = vadd.f32 %v13689_v5, %v5394_v38  ;;  %v6635_v5 = vmul.f32 %v14038_v3, %v14088_v32 }
 0xe2a   : > { %v14108_v23 = vadd.f32 %v16077_v44, %v6636_v21  ;;  %v14110_v52 = vadd.f32 %v7943_v15, %v7923_v20  ;;  %v14125_v44 = vadd.f32 %v7942_v36, %v7922_v42  ;;  %v16085_v20 = vld [vmem:[#allocation63_spill] sm:$0xff] }
 0xe2b   : > { %v14118_v38 = vpop.xlane.xlu1 %5073  ;;  %v14120_v29 = vpop.xlane.xlu0 %5070  ;;  %v14123_v58 = vadd.f32 %v16082_v50, %v6635_v5  ;;  %v7944_v5 = vmul.f32 %v14020_v4, %v15987_v62  ;;  %v5622_v33 = vsub.f32 0.0, %v14099_v43  ;;  %v7946_v62 = vmul.f32 %v14020_v4, %v15989_v14 }
 0xe2c   : > { %16078 = vst [vmem:[#allocation27_spill] sm:$0xff] %v14108_v23  ;;  %16079 = vst [vmem:[#allocation28_spill] sm:$0xff] %v14110_v52  ;;  %v6638_v15 = vmul.f32 %v14038_v3, %v14118_v38  ;;  %v7925_v21 = vmul.f32 %v14023_v0, %v14118_v38  ;;  %v6637_v36 = vmul.f32 %v14038_v3, %v14120_v29 }
 0xe2d   : > { %16080 = vst [vmem:[#allocation54_spill] sm:$0xff] %v14118_v38  ;;  %16081 = vst [vmem:[#allocation55_spill] sm:$0xff] %v14120_v29  ;;  %v7924_v42 = vmul.f32 %v14023_v0, %v14120_v29  ;;  %v5639_v18 = vmul.f32 1.442695, %v5622_v33 }
 0xe2e   : > { %16083 = vst [vmem:[#allocation57_spill] sm:$0xff] %v14123_v58  ;;  %16084 = vst [vmem:[#allocation59_spill] sm:$0xff] %v14125_v44  ;;  %v14134_v61 = vadd.f32 %v16085_v20, %v6638_v15  ;;  %v14136_v30 = vadd.f32 %v7945_v24, %v7925_v21  ;;  %v14150_v15 = vadd.f32 %v16090_v59, %v6637_v36 }
 0xe2f   : > { %v14144_v50 = vpop.xlane.xlu0 %5076  ;;  %v14152_v24 = vadd.f32 %v7944_v5, %v7924_v42  ;;  %v7947_v59 = vmul.f32 %v14020_v4, %v15990_v51  ;;  %v16098_v42 = vld [vmem:[#allocation69_spill] sm:$0xff]  ;;  %11133 = vpow2.f32 %v5639_v18  ;;  %v7949_v18 = vmul.f32 %v14020_v4, %v15994_v57 }
 0xe30   : > { %16086 = vst [vmem:[#allocation61_spill] sm:$0xff] %v14134_v61  ;;  %16087 = vst [vmem:[#allocation63_spill] sm:$0xff] %v14136_v30  ;;  %v14147_v8 = vpop.xlane.xlu1 %5079  ;;  %v6639_v21 = vmul.f32 %v14038_v3, %v14144_v50  ;;  %v7926_v20 = vmul.f32 %v14023_v0, %v14144_v50  ;;  %v16094_v30 = vld [vmem:[#allocation67_spill] sm:$0xff]  ;;  %v5340_v57 = vmul.f32 %v14032_v48, %v14088_v32 }
 0xe31   : > { %16088 = vst [vmem:[#allocation103_spill] sm:$0xff] %v14144_v50  ;;  %16089 = vst [vmem:[#allocation104_spill] sm:$0xff] %v14147_v8  ;;  %v6640_v14 = vmul.f32 %v14038_v3, %v14147_v8  ;;  %v7927_v5 = vmul.f32 %v14023_v0, %v14147_v8  ;;  %v5344_v32 = vmul.f32 %v14032_v48, %v14144_v50  ;;  %v16117_v50 = vld [vmem:[#allocation62_spill] sm:$0xff] }
 0xe32   : > { %16091 = vst [vmem:[#allocation65_spill] sm:$0xff] %v14150_v15  ;;  %16092 = vst [vmem:[#allocation105_spill] sm:$0xff] %v14152_v24  ;;  %v14163_v44 = vadd.f32 %v16094_v30, %v6639_v21  ;;  %v14165_v52 = vadd.f32 %v7946_v62, %v7926_v20  ;;  %v7948_v30 = vmul.f32 %v14020_v4, %v15991_v2  ;;  %v16102_v20 = vld [vmem:[#allocation71_spill] sm:$0xff] }
 0xe33   : > { %v14160_v25 = vpop.xlane.xlu0 %5082  ;;  %v14176_v24 = vadd.f32 %v16098_v42, %v6640_v14  ;;  %v14178_v33 = vadd.f32 %v7947_v59, %v7927_v5  ;;  %v5339_v59 = vmul.f32 %v14032_v48, %v14070_v6  ;;  %v7950_v5 = vmul.f32 %v14020_v4, %v15992_v7 }
 0xe34   : > { %16093 = vst [vmem:[#allocation106_spill] sm:$0xff] %v14160_v25  ;;  %16095 = vst [vmem:[#allocation67_spill] sm:$0xff] %v14163_v44  ;;  %v14173_v36 = vpop.xlane.xlu1 %5085  ;;  %v6641_v51 = vmul.f32 %v14038_v3, %v14160_v25  ;;  %v7928_v62 = vmul.f32 %v14023_v0, %v14160_v25  ;;  %v7951_v42 = vmul.f32 %v14020_v4, %v15993_v10 }
 0xe35   : > { %16096 = vst [vmem:[#allocation107_spill] sm:$0xff] %v14165_v52  ;;  %16097 = vst [vmem:[#allocation108_spill] sm:$0xff] %v14173_v36  ;;  %v6642_v2 = vmul.f32 %v14038_v3, %v14173_v36  ;;  %v7929_v14 = vmul.f32 %v14023_v0, %v14173_v36 }
 0xe36   : > { %16099 = vst [vmem:[#allocation69_spill] sm:$0xff] %v14176_v24  ;;  %16100 = vst [vmem:[#allocation109_spill] sm:$0xff] %v14178_v33  ;;  %v14189_v52 = vadd.f32 %v16102_v20, %v6641_v51  ;;  %v14191_v35 = vadd.f32 %v7948_v30, %v7928_v62  ;;  %v5341_v51 = vmul.f32 %v14032_v48, %v14086_v53  ;;  %v16106_v62 = vld [vmem:[#allocation73_spill] sm:$0xff]  ;;  %v16109_v33 = vld [vmem:[#allocation56_spill] sm:$0xff] }
 0xe37   : > { %v14186_v21 = vpop.xlane.xlu0 %5088  ;;  %v14212_v20 = vadd.f32 %v16106_v62, %v6642_v2  ;;  %v14214_v6 = vadd.f32 %v7949_v18, %v7929_v14  ;;  %v7952_v53 = vmul.f32 %v14020_v4, %v15996_v28  ;;  %v5375_v41 = vadd.f32 %v16109_v33, %v5339_v59  ;;  %v16111_v18 = vld [vmem:[#allocation24_spill] sm:$0xff]  ;;  %v16115_v59 = vld [vmem:[#allocation58_spill] sm:$0xff] }
 0xe38   : > { %16101 = vst [vmem:[#allocation110_spill] sm:$0xff] %v14186_v21  ;;  %16103 = vst [vmem:[#allocation71_spill] sm:$0xff] %v14189_v52  ;;  %v14205_v30 = vpop.xlane.xlu1 %5091  ;;  %v6643_v7 = vmul.f32 %v14038_v3, %v14186_v21  ;;  %v7930_v10 = vmul.f32 %v14023_v0, %v14186_v21  ;;  %v5342_v2 = vmul.f32 %v14032_v48, %v14120_v29  ;;  %v16116_v4 = vld [vmem:[#allocation60_spill] sm:$0xff] }
 0xe39   : > { %16104 = vst [vmem:[#allocation111_spill] sm:$0xff] %v14191_v35  ;;  %16105 = vst [vmem:[#allocation112_spill] sm:$0xff] %v14205_v30  ;;  %v5343_v35 = vmul.f32 %v14032_v48, %v14118_v38  ;;  %v5371_v14 = vmul.f32 %v16111_v18, %v16000_v16  ;;  %v5372_v38 = vmul.f32 %v16111_v18, %v15969_v19  ;;  %v11134_v52 = vpop.eup %11133 }
 0xe3a   : > { %16107 = vst [vmem:[#allocation73_spill] sm:$0xff] %v14212_v20  ;;  %16108 = vst [vmem:[#allocation113_spill] sm:$0xff] %v14214_v6  ;;  %v16112_v6 = vld [vmem:[#allocation75_spill] sm:$0xff]  ;;  %v14238_v28 = vadd.f32 %v7950_v5, %v7930_v10  ;;  %v6644_v33 = vmul.f32 %v14038_v3, %v14205_v30  ;;  %v5377_v29 = vadd.f32 %v16115_v59, %v5341_v51 }
 0xe3b   : > { %v14227_v62 = vpop.xlane.xlu0 %5094  ;;  %v14236_v9 = vadd.f32 %v16112_v6, %v6643_v7  ;;  %v5376_v13 = vadd.f32 %v16116_v4, %v5340_v57  ;;  %v5345_v20 = vmul.f32 %v14032_v48, %v14147_v8  ;;  %v7931_v18 = vmul.f32 %v14023_v0, %v14205_v30  ;;  %v16118_v7 = vld [vmem:[#allocation77_spill] sm:$0xff] }
 0xe3c   : > { %16110 = vst [vmem:[#allocation56_spill] sm:$0xff] %v14227_v62  ;;  %16114 = vst [vmem:[#allocation75_spill] sm:$0xff] %v14238_v28  ;;  %v5379_v24 = vadd.f32 %v16117_v50, %v5343_v35  ;;  %v5346_v6 = vmul.f32 %v14032_v48, %v14160_v25  ;;  %v5347_v5 = vmul.f32 %v14032_v48, %v14173_v36  ;;  %v14256_v51 = vpop.xlane.xlu1 %5097  ;;  %v16122_v50 = vld [vmem:[#allocation64_spill] sm:$0xff]  ;;  %v16123_v25 = vld [vmem:[#allocation66_spill] sm:$0xff]  ;;  %v5670_v28 = vadd.f32 1.0, %v11134_v52 }
 0xe3d   : > { %16113 = vst [vmem:[#allocation24_spill] sm:$0xff] %v14236_v9  ;;  %v14254_v10 = vadd.f32 %v16118_v7, %v6644_v33  ;;  %16120 = vst [vmem:[#allocation60_spill] sm:$0xff] %v14256_v51  ;;  %v5348_v4 = vmul.f32 %v14032_v48, %v14186_v21  ;;  %v5349_v57 = vmul.f32 %v14032_v48, %v14205_v30  ;;  %v16124_v21 = vld [vmem:[#allocation68_spill] sm:$0xff]  ;;  %v16125_v9 = vld [vmem:[#allocation79_spill] sm:$0xff] }
 0xe3e   : > { %v14262_v59 = vadd.f32 %v7951_v42, %v7931_v18  ;;  %v6645_v35 = vmul.f32 %v14038_v3, %v14227_v62  ;;  %v5378_v8 = vadd.f32 %v16122_v50, %v5342_v2  ;;  %v5380_v36 = vadd.f32 %v16123_v25, %v5344_v32  ;;  %v16128_v25 = vld [vmem:[#allocation70_spill] sm:$0xff]  ;;  %v16129_v50 = vld [vmem:[#allocation72_spill] sm:$0xff] }
 0xe3f   : > { %16119 = vst [vmem:[#allocation58_spill] sm:$0xff] %v14254_v10  ;;  %v5350_v33 = vmul.f32 %v14032_v48, %v14227_v62  ;;  %v7932_v7 = vmul.f32 %v14023_v0, %v14227_v62  ;;  %v5381_v10 = vadd.f32 %v16124_v21, %v5345_v20  ;;  %v5351_v42 = vmul.f32 %v14032_v48, %v14256_v51  ;;  %v14278_v18 = vpop.xlane.xlu0 %5100  ;;  %v16131_v20 = vld [vmem:[#allocation74_spill] sm:$0xff] }
 0xe40   : > { %16121 = vst [vmem:[#allocation62_spill] sm:$0xff] %v14262_v59  ;;  %v14274_v30 = vadd.f32 %v16125_v9, %v6645_v35  ;;  %16127 = vst [vmem:[#allocation64_spill] sm:$0xff] %v14278_v18  ;;  %v5395_v2 = vadd.f32 %v14046_v1, %v5375_v41  ;;  %v5382_v32 = vadd.f32 %v16128_v25, %v5346_v6  ;;  %v16132_v35 = vld [vmem:[#allocation76_spill] sm:$0xff]  ;;  %11135 = vrcp.f32 %v5670_v28 }
 0xe41   : > { %v5383_v59 = vadd.f32 %v16129_v50, %v5347_v5  ;;  %v14283_v44 = vadd.f32 %v7952_v53, %v7932_v7  ;;  %v5397_v52 = vadd.f32 %v14046_v1, %v5377_v29  ;;  %v5396_v21 = vadd.f32 %v14046_v1, %v5376_v13  ;;  %v16135_v7 = vld [vmem:[#allocation48_spill] sm:$0xff]  ;;  %v16138_v50 = vld [vmem:[#allocation37_spill] sm:$0xff] }
 0xe42   : > { %16126 = vst [vmem:[#allocation77_spill] sm:$0xff] %v14274_v30  ;;  %v5384_v9 = vadd.f32 %v16131_v20, %v5348_v4  ;;  %v5385_v62 = vadd.f32 %v16132_v35, %v5349_v57  ;;  %v5399_v0 = vadd.f32 %v14046_v1, %v5379_v24  ;;  %v16133_v30 = vld [vmem:[#allocation78_spill] sm:$0xff]  ;;  %v5387_v61 = vadd.f32 %v5371_v14, %v5351_v42  ;;  %v16134_v57 = vld [vmem:[#allocation45_spill] sm:$0xff]  ;;  %v16139_v35 = vld [vmem:[#allocation40_spill] sm:$0xff] }
 0xe43   : > { %16130 = vst [vmem:[#allocation66_spill] sm:$0xff] %v14283_v44  ;;  %v5386_v15 = vadd.f32 %v16133_v30, %v5350_v33  ;;  %v5352_v41 = vmul.f32 %v14032_v48, %v14278_v18  ;;  %v5398_v53 = vadd.f32 %v14046_v1, %v5378_v8  ;;  %v5400_v6 = vadd.f32 %v14046_v1, %v5380_v36  ;;  %v16136_v42 = vld [vmem:[#allocation49_spill] sm:$0xff]  ;;  %v16150_v44 = vld [vmem:[#allocation84_spill] sm:$0xff] }
 0xe44   : > { %v5401_v29 = vadd.f32 %v14046_v1, %v5381_v10  ;;  %v5402_v13 = vadd.f32 %v14046_v1, %v5382_v32  ;;  %v5403_v5 = vadd.f32 %v14046_v1, %v5383_v59  ;;  %v5621_v24 = vsub.f32 0.0, %v14091_v31 }
 0xe45   : > { %v5388_v4 = vadd.f32 %v5372_v38, %v5352_v41  ;;  %v5404_v30 = vadd.f32 %v14046_v1, %v5384_v9  ;;  %v5405_v14 = vadd.f32 %v14046_v1, %v5385_v62  ;;  %v14302_v48 = vadd.f32 %v13693_v49, %v5395_v2 }
 0xe46   : > { %v14305_v8 = vadd.f32 %v13695_v54, %v5396_v21  ;;  %v5406_v36 = vadd.f32 %v14046_v1, %v5386_v15  ;;  %v5407_v28 = vadd.f32 %v14046_v1, %v5387_v61  ;;  %v5637_v10 = vmul.f32 1.442695, %v5621_v24  ;;  %v16137_v61 = vld [vmem:[#allocation51_spill] sm:$0xff] }
 0xe47   : > { %v14310_v59 = vadd.f32 %v16134_v57, %v5397_v52  ;;  %v5408_v38 = vadd.f32 %v14046_v1, %v5388_v4  ;;  %v5623_v33 = vsub.f32 0.0, %v14302_v48  ;;  %v14316_v49 = vadd.f32 %v16135_v7, %v5398_v53  ;;  %v16141_v7 = vld [vmem:[#allocation44_spill] sm:$0xff] }
 0xe48   : > { %v5624_v62 = vsub.f32 0.0, %v14305_v8  ;;  %11137 = vpow2.f32 %v5637_v10  ;;  %v14320_v15 = vadd.f32 %v16136_v42, %v5399_v0  ;;  %v14323_v2 = vadd.f32 %v16137_v61, %v5400_v6  ;;  %v16140_v6 = vld [vmem:[#allocation41_spill] sm:$0xff]  ;;  %v16142_v42 = vld [vmem:[#allocation52_spill] sm:$0xff] }
 0xe49   : > { %v5625_v54 = vsub.f32 0.0, %v14310_v59  ;;  %v5641_v25 = vmul.f32 1.442695, %v5623_v33  ;;  %v5626_v1 = vsub.f32 0.0, %v14316_v49  ;;  %v14327_v52 = vadd.f32 %v16138_v50, %v5401_v29  ;;  %v16144_v50 = vld [vmem:[#allocation101_spill] sm:$0xff] }
 0xe4a   : > { %v5643_v32 = vmul.f32 1.442695, %v5624_v62  ;;  %v5627_v20 = vsub.f32 0.0, %v14320_v15  ;;  %v5628_v9 = vsub.f32 0.0, %v14323_v2  ;;  %v14332_v41 = vadd.f32 %v16139_v35, %v5402_v13  ;;  %v11136_v57 = vpop.eup %11135 }
 0xe4b   : > { %v5645_v21 = vmul.f32 1.442695, %v5625_v54  ;;  %11139 = vpow2.f32 %v5641_v25  ;;  %v5647_v0 = vmul.f32 1.442695, %v5626_v1  ;;  %v5629_v53 = vsub.f32 0.0, %v14327_v52 }
 0xe4c   : > { %v14336_v4 = vadd.f32 %v16140_v6, %v5403_v5  ;;  %11141 = vpow2.f32 %v5643_v32  ;;  %v5649_v24 = vmul.f32 1.442695, %v5627_v20  ;;  %v5651_v10 = vmul.f32 1.442695, %v5628_v9  ;;  %v16143_v5 = vld [vmem:[#allocation53_spill] sm:$0xff]  ;;  %v16145_v9 = vld [vmem:[#allocation102_spill] sm:$0xff] }
 0xe4d   : > { %v5630_v29 = vsub.f32 0.0, %v14332_v41  ;;  %11143 = vpow2.f32 %v5645_v21  ;;  %v5653_v33 = vmul.f32 1.442695, %v5629_v53  ;;  %v14341_v13 = vadd.f32 %v16141_v7, %v5404_v30 }
 0xe4e   : > { %v5631_v62 = vsub.f32 0.0, %v14336_v4  ;;  %11145 = vpow2.f32 %v5647_v0  ;;  %v14344_v61 = vadd.f32 %v16142_v42, %v5405_v14  ;;  %v14347_v25 = vadd.f32 %v16143_v5, %v5406_v36 }
 0xe4f   : > { %v5655_v54 = vmul.f32 1.442695, %v5630_v29  ;;  %11147 = vpow2.f32 %v5649_v24  ;;  %v5632_v1 = vsub.f32 0.0, %v14341_v13  ;;  %v14351_v21 = vadd.f32 %v16144_v50, %v5407_v28 }
 0xe50   : > { %v5657_v32 = vmul.f32 1.442695, %v5631_v62  ;;  %11149 = vpow2.f32 %v5651_v10  ;;  %v5633_v20 = vsub.f32 0.0, %v14344_v61  ;;  %v5634_v30 = vsub.f32 0.0, %v14347_v25 }
 0xe51   : > { %v14356_v35 = vadd.f32 %v16145_v9, %v5408_v38  ;;  %11151 = vpow2.f32 %v5653_v33  ;;  %v5659_v14 = vmul.f32 1.442695, %v5632_v1 }
 0xe52   : > { %v11138_v0 = vpop.eup %11137  ;;  %11153 = vpow2.f32 %v5655_v54  ;;  %v5661_v36 = vmul.f32 1.442695, %v5633_v20  ;;  %v5663_v6 = vmul.f32 1.442695, %v5634_v30 }
 0xe53   : > { %v5669_v53 = vadd.f32 1.0, %v11138_v0  ;;  %11155 = vpow2.f32 %v5657_v32  ;;  %v5635_v32 = vsub.f32 0.0, %v14351_v21  ;;  %v5636_v0 = vsub.f32 0.0, %v14356_v35 }
 0xe54   : > { %11157 = vpow2.f32 %v5659_v14 }
 0xe55   : > { %v11140_v24 = vpop.eup %11139  ;;  %11159 = vrcp.f32 %v5669_v53  ;;  %v5665_v53 = vmul.f32 1.442695, %v5635_v32 }
 0xe56   : > { %v11142_v28 = vpop.eup %11141  ;;  %v5671_v10 = vadd.f32 1.0, %v11140_v24  ;;  %11161 = vpow2.f32 %v5661_v36  ;;  %v5702_v24 = vmul.f32 %v11136_v57, %v14099_v43 }
 0xe57   : > { %v11144_v29 = vpop.eup %11143  ;;  %v5672_v62 = vadd.f32 1.0, %v11142_v28  ;;  %11163 = vpow2.f32 %v5663_v6 }
 0xe58   : > { %v11146_v7 = vpop.eup %11145  ;;  %11165 = vrcp.f32 %v5671_v10  ;;  %v5673_v38 = vadd.f32 1.0, %v11144_v29 }
 0xe59   : > { %v11148_v33 = vpop.eup %11147  ;;  %11167 = vrcp.f32 %v5672_v62  ;;  %v5674_v42 = vadd.f32 1.0, %v11146_v7  ;;  %v5667_v7 = vmul.f32 1.442695, %v5636_v0 }
 0xe5a   : > { %v11150_v54 = vpop.eup %11149  ;;  %11169 = vrcp.f32 %v5673_v38  ;;  %v5675_v5 = vadd.f32 1.0, %v11148_v33 }
 0xe5b   : > { %v11152_v1 = vpop.eup %11151  ;;  %11171 = vrcp.f32 %v5674_v42  ;;  %v5676_v50 = vadd.f32 1.0, %v11150_v54 }
 0xe5c   : > { %v11154_v20 = vpop.eup %11153  ;;  %v5677_v30 = vadd.f32 1.0, %v11152_v1  ;;  %11173 = vrcp.f32 %v5675_v5 }
 0xe5d   : > { %v11156_v9 = vpop.eup %11155  ;;  %v5678_v14 = vadd.f32 1.0, %v11154_v20  ;;  %11175 = vrcp.f32 %v5676_v50 }
 0xe5e   : > { %v11158_v36 = vpop.eup %11157  ;;  %11177 = vrcp.f32 %v5677_v30  ;;  %v5679_v28 = vadd.f32 1.0, %v11156_v9 }
 0xe5f   : > { %v11160_v6 = vpop.eup %11159  ;;  %11179 = vrcp.f32 %v5678_v14  ;;  %v5680_v33 = vadd.f32 1.0, %v11158_v36 }
 0xe60   : > { %v11162_v10 = vpop.eup %11161  ;;  %v5701_v29 = vmul.f32 %v11160_v6, %v14091_v31  ;;  %11181 = vpow2.f32 %v5665_v53 }
 0xe61   : > { %v11164_v62 = vpop.eup %11163  ;;  %11183 = vrcp.f32 %v5679_v28  ;;  %v5681_v43 = vadd.f32 1.0, %v11162_v10 }
 0xe62   : > { %v11166_v38 = vpop.eup %11165  ;;  %10166 = vmatprep.mubr.msk.f32.mxu1 %vm804_vm4, %v5701_v29  ;;  %11185 = vpow2.f32 %v5667_v7  ;;  %v5682_v1 = vadd.f32 1.0, %v11164_v62 }
 0xe63   : > { %v11168_v42 = vpop.eup %11167  ;;  %10167 = vmatmul.mubr.msk.f32.vlgmr.msra.gmra.mrb[44].mxu1 %vm804_vm4, %v5702_v24  ;;  %v5703_v54 = vmul.f32 %v11166_v38, %v14302_v48  ;;  %11187 = vrcp.f32 %v5680_v33 }
 0xe64   : > { %v11170_v57 = vpop.eup %11169  ;;  %v5704_v5 = vmul.f32 %v11168_v42, %v14305_v8  ;;  %11189 = vrcp.f32 %v5681_v43  ;;  %v9409_v42 = vld [vmem:[%s15626_s2 + $0x1e0] sm:$0xff] }
 0xe65   : > { %v11172_v32 = vpop.eup %11171  ;;  %10169 = vmatprep.mubr.msk.f32.mxu1 %vm804_vm4, %v5703_v54  ;;  %v5705_v31 = vmul.f32 %v11170_v57, %v14310_v59  ;;  %11191 = vrcp.f32 %v5682_v1  ;;  %v9410_v54 = vld [vmem:[%s15626_s2 + $0x1e8] sm:$0xff] }
 0xe66   : > { %v11174_v50 = vpop.eup %11173  ;;  %v5706_v20 = vmul.f32 %v11172_v32, %v14316_v49  ;;  %v14410_v43 = vpack.c.bf16 %v9410_v54, %v9409_v42  ;;  %v16146_v57 = vld [vmem:[#allocation83_spill] sm:$0xff] }
 0xe67   : > { %10170 = vmatmul.mubr.msk.f32.gmra.mrb[46].mxu1 %vm804_vm4, %v5704_v5  ;;  %v11176_v48 = vpop.eup %11175  ;;  %v5707_v8 = vmul.f32 %v11174_v50, %v14320_v15  ;;  %v14415_v5 = vrot.slane %v14028_v11, %v16146_v57 }
 0xe68   : > { %10172 = vmatprep.mubr.msk.f32.mxu1 %vm804_vm4, %v5705_v31  ;;  %v11178_v30 = vpop.eup %11177  ;;  %v5708_v59 = vmul.f32 %v11176_v48, %v14323_v2 }
 0xe69   : > { %v11180_v9 = vpop.eup %11179  ;;  %v5709_v0 = vmul.f32 %v11178_v30, %v14327_v52 }
 0xe6a   : > { %v11182_v14 = vpop.eup %11181  ;;  %v5710_v6 = vmul.f32 %v11180_v9, %v14332_v41 }
 0xe6b   : > { %10173 = vmatmul.mubr.msk.f32.gmra.mrb[48].mxu1 %vm804_vm4, %v5706_v20  ;;  %v11184_v36 = vpop.eup %11183  ;;  %v5683_v49 = vadd.f32 1.0, %v11182_v14 }
 0xe6c   : > { %10175 = vmatprep.mubr.msk.f32.mxu1 %vm804_vm4, %v5707_v8  ;;  %v11186_v53 = vpop.eup %11185  ;;  %v5711_v24 = vmul.f32 %v11184_v36, %v14336_v4 }
 0xe6d   : > { %11193 = vrcp.f32 %v5683_v49  ;;  %v11188_v15 = vpop.eup %11187  ;;  %v5684_v28 = vadd.f32 1.0, %v11186_v53 }
 0xe6e   : > { %v11190_v2 = vpop.eup %11189  ;;  %v5712_v52 = vmul.f32 %v11188_v15, %v14341_v13 }
 0xe6f   : > { %10176 = vmatmul.mubr.msk.f32.gmra.mrb[50].mxu1 %vm804_vm4, %v5708_v59  ;;  %11195 = vrcp.f32 %v5684_v28  ;;  %v11192_v10 = vpop.eup %11191  ;;  %v5713_v29 = vmul.f32 %v11190_v2, %v14344_v61  ;;  %v9413_v61 = vld [vmem:[%s15626_s2 + $0x200] sm:$0xff] }
 0xe70   : > { %10178 = vmatprep.mubr.msk.f32.mxu1 %vm804_vm4, %v5709_v0  ;;  %v5714_v41 = vmul.f32 %v11192_v10, %v14347_v25  ;;  %v9414_v25 = vld [vmem:[%s15626_s2 + $0x208] sm:$0xff] }
 0xe71   : > { %v10559_v38 = vpack.c.bf16 %v9414_v25, %v9413_v61 }
 0xe73   : > { %10179 = vmatmul.mubr.msk.f32.gmra.mrb[52].mxu1 %vm804_vm4, %v5710_v6  ;;  %10560 = vmatprep.subr.bf16.mxu0 %v10559_v38 }
 0xe74   : > { %10181 = vmatprep.mubr.msk.f32.mxu1 %vm804_vm4, %v5711_v24  ;;  %10562 = vmatpush3.bf16.msra.mxu0 %v10559_v38 }
 0xe77   : > { %10182 = vmatmul.mubr.msk.f32.gmra.mrb[54].mxu1 %vm804_vm4, %v5712_v52  ;;  %v11194_v62 = vpop.eup %11193 }
 0xe78   : > { %10184 = vmatprep.mubr.msk.f32.mxu1 %vm804_vm4, %v5713_v29  ;;  %v5715_v4 = vmul.f32 %v11194_v62, %v14351_v21  ;;  %v9415_v21 = vld [vmem:[%s15626_s2 + $0x210] sm:$0xff] }
 0xe79   : > { %v11196_v7 = vpop.eup %11195 }
 0xe7a   : > { %v5716_v13 = vmul.f32 %v11196_v7, %v14356_v35  ;;  %v9416_v35 = vld [vmem:[%s15626_s2 + $0x218] sm:$0xff] }
 0xe7b   : > { %10185 = vmatmul.mubr.msk.f32.gmra.mrb[56].mxu1 %vm804_vm4, %v5714_v41  ;;  %v10563_v33 = vpack.c.bf16 %v9416_v35, %v9415_v21 }
 0xe7c   : > { %10187 = vmatprep.mubr.msk.f32.mxu1 %vm804_vm4, %v5715_v4 }
 0xe7d   : > { %10564 = vmatprep.subr.bf16.mxu0 %v10563_v33 }
 0xe7e   : > { %10566 = vmatpush3.bf16.msra.mxu0 %v10563_v33 }
 0xe7f   : > { %10188 = vmatmul.mubr.msk.f32.gmra.mrb[58].mxu1 %vm804_vm4, %v5716_v13  ;;  %10568 = vmatprep.subr.bf16.mxu0 %v14410_v43 }
 0xf36   : > { %v10168_v32 = vpop.f32.mrb[44].mxu1 }
 0xf37   : > { %v14418_v31 = vadd.f32 %v10168_v32, %v14415_v5  ;;  %v5835_v1 = vpop.f32.mrb[45].mxu1 }
 0xf38   : > { %v14421_v50 = vadd.f32 %v5835_v1, %v14415_v5 }
 0xf39   : > { %v5915_v20 = vsub.f32 0.0, %v14418_v31 }
 0xf3a   : > { %v5914_v48 = vsub.f32 0.0, %v14421_v50  ;;  %v10171_v30 = vpop.f32.mrb[46].mxu1 }
 0xf3b   : > { %v5932_v8 = vmul.f32 1.442695, %v5915_v20  ;;  %v14426_v9 = vadd.f32 %v10171_v30, %v14415_v5  ;;  %v5845_v59 = vpop.f32.mrb[47].mxu1 }
 0xf3c   : > { %v5930_v11 = vmul.f32 1.442695, %v5914_v48  ;;  %v14429_v14 = vadd.f32 %v5845_v59, %v14415_v5 }
 0xf3d   : > { %11197 = vpow2.f32 %v5932_v8  ;;  %v5917_v0 = vsub.f32 0.0, %v14426_v9 }
 0xf3e   : > { %11199 = vpow2.f32 %v5930_v11  ;;  %v5916_v36 = vsub.f32 0.0, %v14429_v14  ;;  %v10174_v49 = vpop.f32.mrb[48].mxu1 }
 0xf3f   : > { %v5936_v53 = vmul.f32 1.442695, %v5917_v0  ;;  %v14434_v6 = vadd.f32 %v10174_v49, %v14415_v5  ;;  %v5855_v15 = vpop.f32.mrb[49].mxu1 }
 0xf40   : > { %v5934_v24 = vmul.f32 1.442695, %v5916_v36  ;;  %v14437_v28 = vadd.f32 %v5855_v15, %v14415_v5 }
 0xf41   : > { %11201 = vpow2.f32 %v5936_v53  ;;  %v5919_v2 = vsub.f32 0.0, %v14434_v6 }
 0xf42   : > { %11203 = vpow2.f32 %v5934_v24  ;;  %v5918_v52 = vsub.f32 0.0, %v14437_v28  ;;  %v10177_v10 = vpop.f32.mrb[50].mxu1 }
 0xf43   : > { %v5940_v29 = vmul.f32 1.442695, %v5919_v2  ;;  %v14442_v41 = vadd.f32 %v10177_v10, %v14415_v5  ;;  %v5865_v62 = vpop.f32.mrb[51].mxu1 }
 0xf44   : > { %v5938_v4 = vmul.f32 1.442695, %v5918_v52  ;;  %v14445_v7 = vadd.f32 %v5865_v62, %v14415_v5 }
 0xf45   : > { %11205 = vpow2.f32 %v5940_v29  ;;  %v5921_v13 = vsub.f32 0.0, %v14442_v41 }
 0xf46   : > { %11207 = vpow2.f32 %v5938_v4  ;;  %v5920_v61 = vsub.f32 0.0, %v14445_v7  ;;  %v10180_v25 = vpop.f32.mrb[52].mxu1 }
 0xf47   : > { %v11198_v38 = vpop.eup %11197  ;;  %v5944_v21 = vmul.f32 1.442695, %v5921_v13  ;;  %v14450_v35 = vadd.f32 %v10180_v25, %v14415_v5  ;;  %v5875_v33 = vpop.f32.mrb[53].mxu1 }
 0xf48   : > { %v11200_v42 = vpop.eup %11199  ;;  %v5963_v54 = vadd.f32 1.0, %v11198_v38  ;;  %v5942_v32 = vmul.f32 1.442695, %v5920_v61  ;;  %v14453_v1 = vadd.f32 %v5875_v33, %v14415_v5 }
 0xf49   : > { %v5962_v20 = vadd.f32 1.0, %v11200_v42  ;;  %11209 = vpow2.f32 %v5944_v21  ;;  %v5923_v48 = vsub.f32 0.0, %v14450_v35 }
 0xf4a   : > { %11211 = vrcp.f32 %v5963_v54  ;;  %v5922_v30 = vsub.f32 0.0, %v14453_v1  ;;  %v10183_v8 = vpop.f32.mrb[54].mxu1 }
 0xf4b   : > { %v11202_v59 = vpop.eup %11201  ;;  %11213 = vrcp.f32 %v5962_v20  ;;  %v5948_v11 = vmul.f32 1.442695, %v5923_v48  ;;  %v14458_v0 = vadd.f32 %v10183_v8, %v14415_v5  ;;  %v5885_v36 = vpop.f32.mrb[55].mxu1 }
 0xf4c   : > { %v11204_v49 = vpop.eup %11203  ;;  %v5965_v53 = vadd.f32 1.0, %v11202_v59  ;;  %11215 = vpow2.f32 %v5942_v32  ;;  %v5946_v15 = vmul.f32 1.442695, %v5922_v30  ;;  %v14461_v24 = vadd.f32 %v5885_v36, %v14415_v5 }
 0xf4d   : > { %v5964_v2 = vadd.f32 1.0, %v11204_v49  ;;  %11217 = vpow2.f32 %v5948_v11  ;;  %v5925_v52 = vsub.f32 0.0, %v14458_v0 }
 0xf4e   : > { %11219 = vrcp.f32 %v5965_v53  ;;  %v5924_v10 = vsub.f32 0.0, %v14461_v24  ;;  %v10186_v29 = vpop.f32.mrb[56].mxu1 }
 0xf4f   : > { %v11206_v62 = vpop.eup %11205  ;;  %11221 = vrcp.f32 %v5964_v2  ;;  %v5952_v4 = vmul.f32 1.442695, %v5925_v52  ;;  %v14466_v13 = vadd.f32 %v10186_v29, %v14415_v5  ;;  %v5895_v61 = vpop.f32.mrb[57].mxu1 }
 0xf50   : > { %v11208_v25 = vpop.eup %11207  ;;  %v5967_v38 = vadd.f32 1.0, %v11206_v62  ;;  %11223 = vpow2.f32 %v5946_v15  ;;  %v14469_v21 = vadd.f32 %v5895_v61, %v14415_v5  ;;  %v5950_v42 = vmul.f32 1.442695, %v5924_v10  ;;  %v16147_v61 = vld [vmem:[#allocation90_spill] sm:$0xff] }
 0xf51   : > { %v5966_v33 = vadd.f32 1.0, %v11208_v25  ;;  %11225 = vpow2.f32 %v5952_v4  ;;  %v5927_v54 = vsub.f32 0.0, %v14466_v13 }
 0xf52   : > { %11227 = vrcp.f32 %v5967_v38  ;;  %v5926_v32 = vsub.f32 0.0, %v14469_v21  ;;  %v10189_v20 = vpop.f32.mrb[58].mxu1 }
 0xf53   : > { %v11210_v48 = vpop.eup %11209  ;;  %11229 = vrcp.f32 %v5966_v33  ;;  %v5956_v30 = vmul.f32 1.442695, %v5927_v54  ;;  %v14474_v8 = vadd.f32 %v10189_v20, %v14415_v5  ;;  %v5905_v59 = vpop.f32.mrb[59].mxu1 }
 0xf54   : > { %v11212_v11 = vpop.eup %11211  ;;  %v5969_v36 = vadd.f32 1.0, %v11210_v48  ;;  %v5954_v49 = vmul.f32 1.442695, %v5926_v32  ;;  %v14477_v53 = vadd.f32 %v5905_v59, %v14415_v5  ;;  %11231 = vpow2.f32 %v5950_v42  ;;  %v16148_v5 = vld [vmem:[#allocation82_spill] sm:$0xff] }
 0xf55   : > { %v11214_v15 = vpop.eup %11213  ;;  %v5995_v2 = vmul.f32 %v11212_v11, %v14418_v31  ;;  %v5929_v52 = vsub.f32 0.0, %v14474_v8 }
 0xf56   : > { %v11216_v10 = vpop.eup %11215  ;;  %v5994_v29 = vmul.f32 %v11214_v15, %v14421_v50  ;;  %11233 = vrcp.f32 %v5969_v36  ;;  %v5928_v62 = vsub.f32 0.0, %v14477_v53 }
 0xf57   : > { %v11218_v4 = vpop.eup %11217  ;;  %v6011_v25 = vmul.f32 %v5995_v2, %v16147_v61  ;;  %v5968_v38 = vadd.f32 1.0, %v11216_v10  ;;  %11235 = vpow2.f32 %v5956_v30  ;;  %v5960_v31 = vmul.f32 1.442695, %v5929_v52  ;;  %v16149_v10 = vld [vmem:[#allocation87_spill] sm:$0xff] }
 0xf58   : > { %v11220_v33 = vpop.eup %11219  ;;  %v6010_v54 = vmul.f32 %v5994_v29, %v16148_v5  ;;  %v5971_v32 = vadd.f32 1.0, %v11218_v4  ;;  %11237 = vpow2.f32 %v5954_v49  ;;  %v5958_v15 = vmul.f32 1.442695, %v5928_v62 }
 0xf59   : > { %v11222_v42 = vpop.eup %11221  ;;  %v6033_v20 = vsel %vm804_vm4, %v6011_v25, 0.0  ;;  %v5997_v48 = vmul.f32 %v11220_v33, %v14426_v9  ;;  %11239 = vrcp.f32 %v5968_v38 }
 0xf5a   : > { %v11224_v50 = vpop.eup %11223  ;;  %v6034_v59 = vrot.slane %v6033_v20, 4  ;;  %v6026_v11 = vsel %vm804_vm4, %v6010_v54, 0.0  ;;  %v5996_v36 = vmul.f32 %v11222_v42, %v14429_v14  ;;  %11241 = vrcp.f32 %v5971_v32 }
 0xf5b   : > { %v11226_v30 = vpop.eup %11225  ;;  %v6027_v2 = vrot.slane %v6026_v11, 4  ;;  %v6013_v29 = vmul.f32 %v5997_v48, %v16149_v10  ;;  %v5970_v49 = vadd.f32 1.0, %v11224_v50  ;;  %11243 = vpow2.f32 %v5960_v31 }
 0xf5c   : > { %v11228_v52 = vpop.eup %11227  ;;  %v6035_v4 = vadd.f32 %v6034_v59, %v6033_v20  ;;  %v6012_v25 = vmul.f32 %v5996_v36, %v16150_v44  ;;  %v5973_v5 = vadd.f32 1.0, %v11226_v30  ;;  %v16151_v59 = vld [vmem:[#allocation92_spill] sm:$0xff] }
 0xf5d   : > { %v11230_v9 = vpop.eup %11229  ;;  %v6028_v38 = vadd.f32 %v6027_v2, %v6026_v11  ;;  %v6047_v33 = vsel %vm804_vm4, %v6013_v29, 0.0  ;;  %v5999_v54 = vmul.f32 %v11228_v52, %v14434_v6  ;;  %11245 = vrcp.f32 %v5970_v49  ;;  %v16152_v2 = vld [vmem:[#allocation89_spill] sm:$0xff] }
 0xf5e   : > { %v6036_v14 = vrot.slane %v6035_v4, 2  ;;  %v6048_v62 = vrot.slane %v6047_v33, 4  ;;  %v6040_v42 = vsel %vm804_vm4, %v6012_v25, 0.0  ;;  %v5998_v32 = vmul.f32 %v11230_v9, %v14437_v28  ;;  %v11232_v48 = vpop.eup %11231 }
 0xf5f   : > { %v6029_v50 = vrot.slane %v6028_v38, 2  ;;  %v6041_v20 = vrot.slane %v6040_v42, 4  ;;  %v6015_v36 = vmul.f32 %v5999_v54, %v16151_v59  ;;  %11247 = vrcp.f32 %v5973_v5 }
 0xf60   : > { %v11234_v31 = vpop.eup %11233  ;;  %v6037_v30 = vadd.f32 %v6036_v14, %v6035_v4  ;;  %v6049_v11 = vadd.f32 %v6048_v62, %v6047_v33  ;;  %v6014_v29 = vmul.f32 %v5998_v32, %v16152_v2  ;;  %11249 = vpow2.f32 %v5958_v15  ;;  %v16153_v62 = vld [vmem:[#allocation94_spill] sm:$0xff] }
 0xf61   : > { %v14497_v6 = vpop.eup %11235  ;;  %v6030_v49 = vadd.f32 %v6029_v50, %v6028_v38  ;;  %v6042_v52 = vadd.f32 %v6041_v20, %v6040_v42  ;;  %v6061_v25 = vsel %vm804_vm4, %v6015_v36, 0.0  ;;  %v6001_v28 = vmul.f32 %v11234_v31, %v14442_v41 }
 0xf62   : > { %v11238_v9 = vpop.eup %11237  ;;  %v6038_v44 = vrot.slane %v6037_v30, 1  ;;  %v6050_v10 = vrot.slane %v6049_v11, 2  ;;  %v6062_v61 = vrot.slane %v6061_v25, 4  ;;  %v6054_v5 = vsel %vm804_vm4, %v6014_v29, 0.0 }
 0xf63   : > { %v11240_v54 = vpop.eup %11239  ;;  %v6031_v4 = vrot.slane %v6030_v49, 1  ;;  %v6043_v33 = vrot.slane %v6042_v52, 2  ;;  %v6055_v14 = vrot.slane %v6054_v5, 4  ;;  %v6017_v15 = vmul.f32 %v6001_v28, %v16153_v62 }
 0xf64   : > { %v6039_v32 = vadd.f32 %v6038_v44, %v6037_v30  ;;  %v6051_v2 = vadd.f32 %v6050_v10, %v6049_v11  ;;  %v6063_v38 = vadd.f32 %v6062_v61, %v6061_v25  ;;  %v6000_v42 = vmul.f32 %v11240_v54, %v14445_v7  ;;  %v11242_v50 = vpop.eup %11241  ;;  %v16154_v44 = vld [vmem:[#allocation93_spill] sm:$0xff] }
 0xf65   : > { %v6032_v20 = vadd.f32 %v6031_v4, %v6030_v49  ;;  %v6044_v41 = vadd.f32 %v6043_v33, %v6042_v52  ;;  %v6056_v36 = vadd.f32 %v6055_v14, %v6054_v5  ;;  %v6075_v31 = vsel %vm804_vm4, %v6017_v15, 0.0  ;;  %v11244_v59 = vpop.eup %11243 }
 0xf66   : > { %v6139_v57 = vmul.f32 0.01, %v6039_v32  ;;  %v6052_v29 = vrot.slane %v6051_v2, 1  ;;  %v6064_v18 = vrot.slane %v6063_v38, 2  ;;  %v6076_v58 = vrot.slane %v6075_v31, 4 }
 0xf67   : > { %v11246_v23 = vpop.eup %11245  ;;  %v6138_v63 = vmul.f32 0.01, %v6032_v20  ;;  %v6045_v56 = vrot.slane %v6044_v41, 1  ;;  %v6057_v28 = vrot.slane %v6056_v36, 2  ;;  %v6016_v10 = vmul.f32 %v6000_v42, %v16154_v44 }
 0xf68   : > { %v6065_v61 = vadd.f32 %v6064_v18, %v6063_v38  ;;  %v6077_v30 = vadd.f32 %v6076_v58, %v6075_v31  ;;  %v6003_v7 = vmul.f32 %v11242_v50, %v14450_v35  ;;  %v5972_v11 = vadd.f32 1.0, %v11232_v48 }
 0xf69   : > { %v11248_v49 = vpop.eup %11247  ;;  %v6170_v52 = vsel %vm1878_vm5, %v6139_v57, %v6138_v63  ;;  %v6046_v25 = vadd.f32 %v6045_v56, %v6044_v41  ;;  %v6058_v5 = vadd.f32 %v6057_v28, %v6056_v36  ;;  %v6068_v54 = vsel %vm804_vm4, %v6016_v10, 0.0 }
 0xf6a   : > { %v11250_v4 = vpop.eup %11249  ;;  %v6066_v33 = vrot.slane %v6065_v61, 1  ;;  %v6078_v14 = vrot.slane %v6077_v30, 2  ;;  %v6069_v15 = vrot.slane %v6068_v54, 4  ;;  %v6053_v32 = vadd.f32 %v6052_v29, %v6051_v2 }
 0xf6b   : > { %v6059_v20 = vrot.slane %v6058_v5, 1  ;;  %v6019_v42 = vmul.f32 %v6003_v7, %v16026_v22  ;;  %v6002_v58 = vmul.f32 %v11246_v23, %v14453_v1  ;;  %v6140_v18 = vmul.f32 0.01, %v6046_v25 }
 0xf6c   : > { %v6067_v35 = vadd.f32 %v6066_v33, %v6065_v61  ;;  %v6070_v48 = vadd.f32 %v6069_v15, %v6068_v54  ;;  %v6005_v38 = vmul.f32 %v11248_v49, %v14458_v0  ;;  %11251 = vrcp.f32 %v5972_v11 }
 0xf6d   : > { %v6060_v63 = vadd.f32 %v6059_v20, %v6058_v5  ;;  %v6089_v56 = vsel %vm804_vm4, %v6019_v42, 0.0  ;;  %v6018_v57 = vmul.f32 %v6002_v58, %v16024_v37  ;;  %v6079_v50 = vadd.f32 %v6078_v14, %v6077_v30 }
 0xf6e   : > { %v6071_v41 = vrot.slane %v6070_v48, 2  ;;  %v6090_v36 = vrot.slane %v6089_v56, 4  ;;  %v6021_v2 = vmul.f32 %v6005_v38, %v16029_v47  ;;  %v5975_v23 = vadd.f32 1.0, %v14497_v6 }
 0xf6f   : > { %v6142_v31 = vmul.f32 0.01, %v6060_v63  ;;  %v6082_v29 = vsel %vm804_vm4, %v6018_v57, 0.0  ;;  %v5974_v1 = vadd.f32 1.0, %v11238_v9  ;;  %v5977_v49 = vadd.f32 1.0, %v11244_v59 }
 0xf70   : > { %v6072_v28 = vadd.f32 %v6071_v41, %v6070_v48  ;;  %v6091_v10 = vadd.f32 %v6090_v36, %v6089_v56  ;;  %v6083_v0 = vrot.slane %v6082_v29, 4  ;;  %v6103_v61 = vsel %vm804_vm4, %v6021_v2, 0.0 }
 0xf71   : > { %v6104_v7 = vrot.slane %v6103_v61, 4  ;;  %11253 = vrcp.f32 %v5975_v23  ;;  %v5976_v11 = vadd.f32 1.0, %v11250_v4  ;;  %v6141_v54 = vmul.f32 0.01, %v6053_v32 }
 0xf72   : > { %v6073_v30 = vrot.slane %v6072_v28, 1  ;;  %v6092_v25 = vrot.slane %v6091_v10, 2  ;;  %v6084_v5 = vadd.f32 %v6083_v0, %v6082_v29  ;;  %11255 = vrcp.f32 %v5974_v1 }
 0xf73   : > { %11257 = vrcp.f32 %v5977_v49  ;;  %v6080_v33 = vrot.slane %v6079_v50, 1  ;;  %v6171_v14 = vsel %vm1880_vm6, %v6140_v18, %v6170_v52  ;;  %v6143_v20 = vmul.f32 0.01, %v6067_v35 }
 0xf74   : > { %v6093_v6 = vadd.f32 %v6092_v25, %v6091_v10  ;;  %v6085_v9 = vrot.slane %v6084_v5, 2  ;;  %11259 = vrcp.f32 %v5976_v11  ;;  %v6074_v15 = vadd.f32 %v6073_v30, %v6072_v28 }
 0xf75   : > { %v6105_v42 = vadd.f32 %v6104_v7, %v6103_v61  ;;  %v6081_v58 = vadd.f32 %v6080_v33, %v6079_v50  ;;  %v6172_v48 = vsel %vm1882_vm7, %v6141_v54, %v6171_v14 }
 0xf76   : > { %v6094_v59 = vrot.slane %v6093_v6, 1  ;;  %v6086_v4 = vadd.f32 %v6085_v9, %v6084_v5  ;;  %v6144_v38 = vmul.f32 0.01, %v6074_v15  ;;  %v6173_v63 = vsel %vm1884_vm8, %v6142_v31, %v6172_v48  ;;  %v11252_v56 = vpop.eup %11251 }
 0xf77   : > { %v6145_v32 = vmul.f32 0.01, %v6081_v58  ;;  %v6174_v57 = vsel %vm1886_vm9, %v6143_v20, %v6173_v63  ;;  %v6004_v18 = vmul.f32 %v11252_v56, %v14461_v24  ;;  %v6106_v29 = vrot.slane %v6105_v42, 2 }
 0xf78   : > { %v6095_v41 = vadd.f32 %v6094_v59, %v6093_v6  ;;  %v6087_v52 = vrot.slane %v6086_v4, 1  ;;  %v6175_v36 = vsel %vm1888_vm10, %v6144_v38, %v6174_v57 }
 0xf79   : > { %v6176_v35 = vsel %vm1890_vm11, %v6145_v32, %v6175_v36  ;;  %v6020_v23 = vmul.f32 %v6004_v18, %v16031_v45  ;;  %v6107_v30 = vadd.f32 %v6106_v29, %v6105_v42 }
 0xf7a   : > { %v6147_v50 = vmul.f32 0.01, %v6095_v41  ;;  %v6088_v2 = vadd.f32 %v6087_v52, %v6086_v4  ;;  %10198 = vmatprep.mubr.msk.f32.mxu0 %vm804_vm4, %v6176_v35 }
 0xf7b   : > { %v11254_v31 = vpop.eup %11253  ;;  %v6096_v10 = vsel %vm804_vm4, %v6020_v23, 0.0  ;;  %v6108_v42 = vrot.slane %v6107_v30, 1 }
 0xf7c   : > { %v11256_v1 = vpop.eup %11255  ;;  %v6146_v28 = vmul.f32 0.01, %v6088_v2  ;;  %v6007_v0 = vmul.f32 %v11254_v31, %v14466_v13  ;;  %v6097_v24 = vrot.slane %v6096_v10, 4 }
 0xf7d   : > { %v11258_v61 = vpop.eup %11257  ;;  %v6006_v7 = vmul.f32 %v11256_v1, %v14469_v21  ;;  %v6109_v41 = vadd.f32 %v6108_v42, %v6107_v30 }
 0xf7e   : > { %v11260_v49 = vpop.eup %11259  ;;  %v6177_v11 = vsel %vm1878_vm5, %v6147_v50, %v6146_v28  ;;  %v6023_v25 = vmul.f32 %v6007_v0, %v16036_v55  ;;  %v6009_v5 = vmul.f32 %v11258_v61, %v14474_v8  ;;  %v6098_v54 = vadd.f32 %v6097_v24, %v6096_v10 }
 0xf7f   : > { %v6022_v33 = vmul.f32 %v6006_v7, %v16030_v12  ;;  %v6008_v14 = vmul.f32 %v11260_v49, %v14477_v53  ;;  %v6149_v28 = vmul.f32 0.01, %v6109_v41 }
 0xf80   : > { %v6117_v6 = vsel %vm804_vm4, %v6023_v25, 0.0  ;;  %v6025_v13 = vmul.f32 %v6009_v5, %v16033_v26  ;;  %v6099_v9 = vrot.slane %v6098_v54, 2 }
 0xf81   : > { %v6118_v15 = vrot.slane %v6117_v6, 4  ;;  %v6110_v21 = vsel %vm804_vm4, %v6022_v33, 0.0  ;;  %v6024_v20 = vmul.f32 %v6008_v14, %v16038_v60 }
 0xf82   : > { %v6111_v58 = vrot.slane %v6110_v21, 4  ;;  %v6131_v48 = vsel %vm804_vm4, %v6025_v13, 0.0  ;;  %v6100_v8 = vadd.f32 %v6099_v9, %v6098_v54  ;;  %v9412_v13 = vld [vmem:[%s15626_s2 + $0x1f8] sm:$0xff] }
 0xf83   : > { %v6119_v59 = vadd.f32 %v6118_v15, %v6117_v6  ;;  %v6132_v4 = vrot.slane %v6131_v48, 4  ;;  %v6124_v38 = vsel %vm804_vm4, %v6024_v20, 0.0  ;;  %v9411_v6 = vld [vmem:[%s15626_s2 + $0x1f0] sm:$0xff] }
 0xf84   : > { %v6112_v53 = vadd.f32 %v6111_v58, %v6110_v21  ;;  %v6125_v63 = vrot.slane %v6124_v38, 4  ;;  %v6101_v56 = vrot.slane %v6100_v8, 1  ;;  %v10571_v42 = vpack.c.bf16 %v9412_v13, %v9411_v6  ;;  %v9450_v6 = vld [vmem:[%s15626_s2 + $0x250] sm:$0xff]  ;;  %v9451_v13 = vld [vmem:[%s15626_s2 + $0x258] sm:$0xff] }
 0xf85   : > { %v6120_v32 = vrot.slane %v6119_v59, 2  ;;  %v6133_v57 = vadd.f32 %v6132_v4, %v6131_v48  ;;  %v16155_v48 = vld [vmem:[#allocation33_spill] sm:$0xff]  ;;  %v9418_v4 = vld [vmem:[%s15626_s2 + $0x228] sm:$0xff] }
 0xf86   : > { %v6113_v52 = vrot.slane %v6112_v53, 2  ;;  %v6126_v18 = vadd.f32 %v6125_v63, %v6124_v38  ;;  %v6102_v36 = vadd.f32 %v6101_v56, %v6100_v8  ;;  %v16156_v8 = vld [vmem:[#allocation36_spill] sm:$0xff]  ;;  %v9452_v56 = vld [vmem:[%s15626_s2 + $0x260] sm:$0xff] }
 0xf87   : > { %v6121_v35 = vadd.f32 %v6120_v32, %v6119_v59  ;;  %v6134_v50 = vrot.slane %v6133_v57, 2  ;;  %v9417_v59 = vld [vmem:[%s15626_s2 + $0x220] sm:$0xff]  ;;  %v9453_v32 = vld [vmem:[%s15626_s2 + $0x268] sm:$0xff] }
 0xf88   : > { %v6114_v2 = vadd.f32 %v6113_v52, %v6112_v53  ;;  %v6127_v29 = vrot.slane %v6126_v18, 2  ;;  %v6148_v23 = vmul.f32 0.01, %v6102_v36  ;;  %v10575_v38 = vpack.c.bf16 %v9418_v4, %v9417_v59  ;;  %v9420_v53 = vld [vmem:[%s15626_s2 + $0x238] sm:$0xff]  ;;  %v11572_v36 = vld [vmem:[%s15627_s3 + $0x10] sm:$0x3f] }
 0xf89   : > { %v6122_v31 = vrot.slane %v6121_v35, 1  ;;  %v6135_v1 = vadd.f32 %v6134_v50, %v6133_v57  ;;  %v9454_v57 = vld [vmem:[%s15626_s2 + $0x270] sm:$0xff]  ;;  %v10591_v41 = vpack.c.bf16 %v9453_v32, %v9452_v56  ;;  %v9455_v52 = vld [vmem:[%s15626_s2 + $0x278] sm:$0xff] }
 0xf8a   : > { %v6115_v10 = vrot.slane %v6114_v2, 1  ;;  %v6128_v0 = vadd.f32 %v6127_v29, %v6126_v18  ;;  %v6178_v61 = vsel %vm1880_vm6, %v6148_v23, %v6177_v11  ;;  %v10595_v18 = vpack.c.bf16 %v9455_v52, %v9454_v57  ;;  %v14633_v32 = vld [vmem:[%s15627_s3 + $0x18] sm:$0x3f] }
 0xf8b   : > { %v6123_v24 = vadd.f32 %v6122_v31, %v6121_v35  ;;  %v6136_v7 = vrot.slane %v6135_v1, 1  ;;  %v6179_v30 = vsel %vm1882_vm7, %v6149_v28, %v6178_v61  ;;  %10592 = vmatprep.subr.bf16.mxu1 %v10591_v41  ;;  %v6341_v35 = vrot.slane %v11572_v36, %v16059_v27  ;;  %v16157_v52 = vld [vmem:[#allocation25_spill] sm:$0xff] }
 0xf8c   : > { %v6116_v49 = vadd.f32 %v6115_v10, %v6114_v2  ;;  %v6129_v25 = vrot.slane %v6128_v0, 1  ;;  %10594 = vmatpush3.bf16.msra.mxu1 %v10591_v41  ;;  %v14637_v57 = vrot.slane %v14633_v32, %v11686_v17  ;;  %v6646_v41 = vmul.f32 %v14038_v3, %v14256_v51 }
 0xf8d   : > { %v6137_v5 = vadd.f32 %v6136_v7, %v6135_v1  ;;  %v6151_v14 = vmul.f32 0.01, %v6123_v24  ;;  %10596 = vmatprep.subr.bf16.mxu1 %v10595_v18 }
 0xf8e   : > { %v6150_v54 = vmul.f32 0.01, %v6116_v49  ;;  %v6130_v33 = vadd.f32 %v6129_v25, %v6128_v0 }
 0xf8f   : > { %v6153_v15 = vmul.f32 0.01, %v6137_v5 }
 0xf90   : > { %v6152_v9 = vmul.f32 0.01, %v6130_v33  ;;  %v6180_v11 = vsel %vm1884_vm8, %v6150_v54, %v6179_v30  ;;  %10598 = vmatpush3.bf16.msra.mxu1 %v10595_v18  ;;  %v9448_v54 = vld [vmem:[%s15626_s2 + $0x240] sm:$0xff]  ;;  %v9449_v33 = vld [vmem:[%s15626_s2 + $0x248] sm:$0xff]  ;;  %v6666_v18 = vmul.f32 %v16157_v52, %v16000_v16 }
 0xf91   : > { %v6181_v21 = vsel %vm1886_vm9, %v6151_v14, %v6180_v11  ;;  %v10583_v14 = vpack.c.bf16 %v9449_v33, %v9448_v54  ;;  %v6359_v11 = vrot.slane %v11572_v36, %v16057_v34  ;;  %v6667_v36 = vmul.f32 %v16157_v52, %v15969_v19  ;;  %v16166_v54 = vld [vmem:[#allocation71_spill] sm:$0xff] }
 0xf92   : > { %v6182_v20 = vsel %vm1888_vm10, %v6152_v9, %v6181_v21  ;;  %v10587_v9 = vpack.c.bf16 %v9451_v13, %v9450_v6  ;;  %v14683_v33 = vadd.f32 %v14637_v57, %v16166_v54 }
 0xf93   : > { %v6183_v58 = vsel %vm1890_vm11, %v6153_v15, %v6182_v20 }
 0xf94   : > { %10199 = vmatmul.mubr.msk.f32.vlgmr.msra.gmra.mrb[46].mxu0 %vm804_vm4, %v6183_v58 }
 0xf95   : > { %10570 = vmatpush3.bf16.msra.mxu0 %v14410_v43  ;;  %10209 = vmatprep.mubr.msk.f32.mxu0 %vm804_vm4, %v16155_v48  ;;  %v9419_v43 = vld [vmem:[%s15626_s2 + $0x230] sm:$0xff] }
 0xf96   : > { %10572 = vmatprep.subr.bf16.mxu0 %v10571_v42  ;;  %v10579_v63 = vpack.c.bf16 %v9420_v53, %v9419_v43  ;;  %v9458_v43 = vld [vmem:[%s15626_s2 + $0x290] sm:$0xff] }
 0xf99   : > { %10574 = vmatpush3.bf16.msra.mxu0 %v10571_v42 }
 0xf9a   : > { %10576 = vmatprep.subr.bf16.mxu0 %v10575_v38 }
 0xf9c   : > { %10210 = vmatmul.mubr.msk.f32.vlgmr.msra.gmra.mrb[46].mxu0 %vm804_vm4, %v16156_v8 }
 0xf9d   : > { %10578 = vmatpush3.bf16.msra.mxu0 %v10575_v38 }
 0xf9e   : > { %10580 = vmatprep.subr.bf16.mxu0 %v10579_v63 }
 0xfa1   : > { %10582 = vmatpush3.bf16.msra.mxu0 %v10579_v63  ;;  %v9459_v63 = vld [vmem:[%s15626_s2 + $0x298] sm:$0xff] }
 0xfa2   : > { %10584 = vmatprep.subr.bf16.mxu0 %v10583_v14  ;;  %v10603_v56 = vpack.c.bf16 %v9459_v63, %v9458_v43  ;;  %v16171_v43 = vld [vmem:[#allocation58_spill] sm:$0xff] }
0x106f   : > { %v10211_v50 = vpop.f32.mrb[46].mxu0 }
0x1070   : > { %v6343_v2 = vadd.f32 %v10211_v50, %v6341_v35  ;;  %v6329_v29 = vpop.f32.mrb[47].mxu0  ;;  %v16158_v50 = vld [vmem:[#allocation17_spill] sm:$0xff] }
0x1071   : > { %v6342_v23 = vadd.f32 %v6341_v35, %v6329_v29  ;;  %v14647_v35 = vadd.f32 %v14637_v57, %v14056_v40  ;;  %v16159_v29 = vld [vmem:[#allocation99_spill] sm:$0xff] }
0x1072   : > { %v6345_v31 = vsub.f32 0.0, %v6343_v2 }
0x1073   : > { %v6344_v1 = vsub.f32 0.0, %v6342_v23 }
0x1074   : > { %v6348_v28 = vmul.f32 1.442695, %v6345_v31  ;;  %v16160_v31 = vld [vmem:[#allocation27_spill] sm:$0xff] }
0x1075   : > { %v6346_v10 = vmul.f32 1.442695, %v6344_v1  ;;  %v14659_v1 = vadd.f32 %v14637_v57, %v16160_v31 }
0x1076   : > { %11261 = vpow2.f32 %v6348_v28  ;;  %v16161_v28 = vld [vmem:[#allocation57_spill] sm:$0xff] }
0x1077   : > { %11263 = vpow2.f32 %v6346_v10  ;;  %v14663_v10 = vadd.f32 %v14637_v57, %v16161_v28 }
0x1080   : > { %v11262_v0 = vpop.eup %11261 }
0x1081   : > { %v11264_v61 = vpop.eup %11263  ;;  %v6351_v24 = vadd.f32 1.0, %v11262_v0  ;;  %v16162_v0 = vld [vmem:[#allocation61_spill] sm:$0xff] }
0x1082   : > { %v6350_v7 = vadd.f32 1.0, %v11264_v61  ;;  %v14667_v40 = vadd.f32 %v14637_v57, %v16162_v0  ;;  %v16163_v61 = vld [vmem:[#allocation65_spill] sm:$0xff] }
0x1083   : > { %11265 = vrcp.f32 %v6351_v24  ;;  %v14671_v24 = vadd.f32 %v14637_v57, %v16163_v61 }
0x1084   : > { %11267 = vrcp.f32 %v6350_v7  ;;  %v6682_v7 = vadd.f32 %v6666_v18, %v6646_v41 }
0x1086   : > { %v14708_v52 = vadd.f32 %v14637_v57, %v6682_v7 }
0x108d   : > { %v11266_v49 = vpop.eup %11265 }
0x108e   : > { %v11268_v25 = vpop.eup %11267  ;;  %v6355_v5 = vmul.f32 %v11266_v49, %v6343_v2  ;;  %v14651_v2 = vadd.f32 %v14637_v57, %v16158_v50  ;;  %v16164_v49 = vld [vmem:[#allocation67_spill] sm:$0xff] }
0x108f   : > { %v6354_v30 = vmul.f32 %v11268_v25, %v6342_v23  ;;  %v14655_v23 = vadd.f32 %v14637_v57, %v16159_v29  ;;  %v14675_v25 = vadd.f32 %v14637_v57, %v16164_v49 }
0x1091   : > { %10220 = vmatprep.mubr.msk.f32.mxu0 %vm804_vm4, %v6354_v30  ;;  %v16165_v30 = vld [vmem:[#allocation69_spill] sm:$0xff] }
0x1092   : > { %10221 = vmatmul.mubr.msk.f32.vlgmr.msra.gmra.mrb[48].mxu0 %vm804_vm4, %v6355_v5  ;;  %v14679_v5 = vadd.f32 %v14637_v57, %v16165_v30 }
0x1093   : > { %10586 = vmatpush3.bf16.msra.mxu0 %v10583_v14  ;;  %v16167_v14 = vld [vmem:[#allocation64_spill] sm:$0xff] }
0x1094   : > { %10588 = vmatprep.subr.bf16.mxu0 %v10587_v9  ;;  %v6647_v6 = vmul.f32 %v14038_v3, %v16167_v14  ;;  %v16172_v3 = vld [vmem:[#allocation77_spill] sm:$0xff] }
0x1095   : > { %v14704_v63 = vadd.f32 %v14637_v57, %v16172_v3 }
0x1096   : > { %v14714_v31 = vadd.f32 %v6667_v36, %v6647_v6 }
0x1097   : > { %10590 = vmatpush3.bf16.msra.mxu0 %v10587_v9 }
0x1165   : > { %v10222_v15 = vpop.f32.mrb[48].mxu0 }
0x1166   : > { %v6438_v21 = vadd.f32 %v10222_v15, %v6359_v11  ;;  %v6432_v20 = vpop.f32.mrb[49].mxu0 }
0x1167   : > { %v6433_v42 = vadd.f32 %v6432_v20, %v6359_v11  ;;  %v16168_v11 = vld [vmem:[#allocation73_spill] sm:$0xff] }
0x1168   : > { %v6442_v58 = vadd.f32 %v6438_v21, %v16156_v8  ;;  %v9457_v8 = vld [vmem:[%s15626_s2 + $0x288] sm:$0xff]  ;;  %v14691_v15 = vadd.f32 %v14637_v57, %v16168_v11  ;;  %v16169_v21 = vld [vmem:[#allocation24_spill] sm:$0xff] }
0x1169   : > { %v6441_v59 = vadd.f32 %v6433_v42, %v16155_v48  ;;  %v9456_v48 = vld [vmem:[%s15626_s2 + $0x280] sm:$0xff]  ;;  %v14695_v20 = vadd.f32 %v14637_v57, %v16169_v21 }
0x116a   : > { %v14608_v38 = vmul.f32 %v6442_v58, %v15952_v46  ;;  %v10599_v53 = vpack.c.bf16 %v9457_v8, %v9456_v48  ;;  %v16170_v58 = vld [vmem:[#allocation6_spill] sm:$0xff] }
0x116b   : > { %v14605_v4 = vmul.f32 %v6441_v59, %v15951_v39 }
0x116c   : > { %10600 = vmatprep.subr.bf16.mxu0 %v10599_v53 }
0x116d   : > { %10231 = vmatprep.mubr.msk.f32.mxu0 %vm804_vm4, %v14605_v4  ;;  %10242 = vmatprep.mubr.msk.f32.mxu1 %vm804_vm4, %v14605_v4 }
0x116e   : > { %10232 = vmatmul.mubr.msk.f32.vlgmr.msra.gmra.mrb[50].mxu0 %vm804_vm4, %v14608_v38  ;;  %10243 = vmatmul.mubr.msk.f32.vlgmr.msra.gmra.mrb[60].mxu1 %vm804_vm4, %v14608_v38 }
0x116f   : > { %10602 = vmatpush3.bf16.msra.mxu0 %v10599_v53  ;;  %v14700_v53 = vadd.f32 %v14637_v57, %v16171_v43 }
0x1170   : > { %10604 = vmatprep.subr.bf16.mxu0 %v10603_v56 }
0x1173   : > { %10606 = vmatpush3.bf16.msra.mxu0 %v10603_v56 }
0x1241   : > { %v10233_v13 = vpop.f32.mrb[50].mxu0  ;;  %v14687_v9 = vpop.f32.mrb[60].mxu1 }
0x1242   : > { %v6755_v42 = vcombine.high %v10233_v13, %v10233_v13  ;;  %v6762_v59 = vrot.slane %v10233_v13, %v16170_v58  ;;  %v6544_v48 = vpop.f32.mrb[51].mxu0  ;;  %v6619_v8 = vpop.f32.mrb[61].mxu1 }
0x1243   : > { %v6706_v56 = vcombine.high %v6544_v48, %v6544_v48  ;;  %v6713_v41 = vrot.slane %v6544_v48, %v16170_v58 }
0x1244   : > { %v6769_v18 = vrot.slane %v6755_v42, %v16170_v58  ;;  %v6770_v50 = vcombine.high %v6762_v59, %v6762_v59  ;;  %v14712_v29 = vrot.slane %v6762_v59, %v16170_v58 }
0x1245   : > { %v6720_v28 = vrot.slane %v6706_v56, %v16170_v58  ;;  %v6721_v0 = vcombine.high %v6713_v41, %v6713_v41  ;;  %v6729_v61 = vrot.slane %v6713_v41, %v16170_v58 }
0x1246   : > { %v6771_v49 = vcombine.high %v6769_v18, %v6769_v18  ;;  %v14719_v30 = vrot.slane %v6769_v18, %v16170_v58  ;;  %v6792_v7 = vrot.slane %v6770_v50, %v16170_v58  ;;  %v6800_v54 = vcombine.high %v14712_v29, %v14712_v29 }
0x1247   : > { %v6839_v13 = vrot.slane %v14712_v29, %v11686_v17  ;;  %v6722_v11 = vcombine.high %v6720_v28, %v6720_v28  ;;  %v6736_v36 = vrot.slane %v6720_v28, %v16170_v58  ;;  %v6743_v6 = vrot.slane %v6721_v0, %v16170_v58 }
0x1248   : > { %v14729_v21 = vrot.slane %v6771_v49, %v16170_v58  ;;  %v6801_v42 = vcombine.high %v14719_v30, %v14719_v30  ;;  %v6802_v59 = vcombine.high %v6792_v7, %v6792_v7  ;;  %v6843_v48 = vrot.slane %v6792_v7, %v11686_v17 }
0x1249   : > { %v6847_v43 = vrot.slane %v6800_v54, %v11686_v17  ;;  %v6855_v3 = vrot.slane %v14719_v30, %v11686_v17  ;;  %v6750_v56 = vrot.slane %v6722_v11, %v16170_v58  ;;  %v6751_v41 = vcombine.high %v6729_v61, %v6729_v61 }
0x124a   : > { %v6803_v18 = vcombine.high %v14729_v21, %v14729_v21  ;;  %v6851_v50 = vrot.slane %v6802_v59, %v11686_v17  ;;  %v6859_v29 = vrot.slane %v14729_v21, %v11686_v17  ;;  %v14744_v28 = vrot.slane %v6801_v42, %v11686_v17 }
0x124b   : > { %v6752_v0 = vcombine.high %v6736_v36, %v6736_v36  ;;  %v6753_v49 = vcombine.high %v6743_v6, %v6743_v6  ;;  %v6754_v7 = vcombine.high %v6750_v56, %v6750_v56  ;;  %v6807_v54 = vrot.slane %v6729_v61, %v11686_v17 }
0x124c   : > { %v14748_v30 = vrot.slane %v6803_v18, %v11686_v17  ;;  %v6811_v11 = vrot.slane %v6743_v6, %v11686_v17  ;;  %v6815_v19 = vrot.slane %v6751_v41, %v11686_v17  ;;  %v6823_v59 = vrot.slane %v6736_v36, %v11686_v17 }
0x124d   : > { %v6819_v14 = vrot.slane %v6753_v49, %v11686_v17  ;;  %v6827_v21 = vrot.slane %v6750_v56, %v11686_v17  ;;  %v6831_v42 = vrot.slane %v6752_v0, %v11686_v17  ;;  %v6835_v51 = vrot.slane %v6754_v7, %v11686_v17 }
0x124e   : > { %v6884_v58 = vadd.f32 %v6807_v54, %v6619_v8  ;;  %v6885_v16 = vadd.f32 %v6811_v11, %v6619_v8  ;;  %v6886_v61 = vadd.f32 %v6815_v19, %v6619_v8  ;;  %v6888_v46 = vadd.f32 %v6823_v59, %v6619_v8 }
0x124f   : > { %v6887_v18 = vadd.f32 %v6819_v14, %v6619_v8  ;;  %v6889_v39 = vadd.f32 %v6827_v21, %v6619_v8  ;;  %v6890_v34 = vadd.f32 %v6831_v42, %v6619_v8  ;;  %v6891_v6 = vadd.f32 %v6835_v51, %v6619_v8 }
0x1250   : > { %v14758_v41 = vadd.f32 %v6884_v58, %v14647_v35  ;;  %v14761_v36 = vadd.f32 %v6885_v16, %v14651_v2  ;;  %v14764_v56 = vadd.f32 %v6886_v61, %v14655_v23  ;;  %v14767_v0 = vadd.f32 %v6888_v46, %v14659_v1 }
0x1251   : > { %v14770_v49 = vadd.f32 %v6887_v18, %v14663_v10  ;;  %v14773_v19 = vadd.f32 %v6889_v39, %v14671_v24  ;;  %v14776_v51 = vadd.f32 %v6890_v34, %v14667_v40  ;;  %v14779_v35 = vadd.f32 %v6891_v6, %v14675_v25 }
0x1252   : > { %v6916_v16 = vsub.f32 0.0, %v14758_v41  ;;  %v6917_v2 = vsub.f32 0.0, %v14761_v36  ;;  %v6918_v23 = vsub.f32 0.0, %v14764_v56  ;;  %v6920_v46 = vsub.f32 0.0, %v14767_v0 }
0x1253   : > { %v6919_v1 = vsub.f32 0.0, %v14770_v49  ;;  %v6921_v10 = vsub.f32 0.0, %v14773_v19  ;;  %v6922_v39 = vsub.f32 0.0, %v14776_v51  ;;  %v6923_v34 = vsub.f32 0.0, %v14779_v35 }
0x1254   : > { %v6932_v40 = vmul.f32 1.442695, %v6916_v16  ;;  %v6934_v24 = vmul.f32 1.442695, %v6917_v2  ;;  %v6936_v25 = vmul.f32 1.442695, %v6918_v23  ;;  %v6892_v14 = vadd.f32 %v14687_v9, %v6839_v13 }
0x1255   : > { %v6938_v58 = vmul.f32 1.442695, %v6919_v1  ;;  %v6940_v8 = vmul.f32 1.442695, %v6920_v46  ;;  %v6942_v7 = vmul.f32 1.442695, %v6921_v10  ;;  %v6893_v54 = vadd.f32 %v14687_v9, %v6843_v48 }
0x1256   : > { %11269 = vpow2.f32 %v6932_v40  ;;  %v6944_v11 = vmul.f32 1.442695, %v6922_v39  ;;  %v6946_v59 = vmul.f32 1.442695, %v6923_v34  ;;  %v14792_v21 = vadd.f32 %v6892_v14, %v14679_v5 }
0x1257   : > { %11271 = vpow2.f32 %v6934_v24  ;;  %v14795_v42 = vadd.f32 %v6893_v54, %v14683_v33  ;;  %v6894_v61 = vadd.f32 %v14687_v9, %v6847_v43  ;;  %v6895_v18 = vadd.f32 %v14687_v9, %v6851_v50 }
0x1258   : > { %11273 = vpow2.f32 %v6936_v25  ;;  %v6924_v13 = vsub.f32 0.0, %v14792_v21  ;;  %v6896_v6 = vadd.f32 %v14687_v9, %v6855_v3  ;;  %v6897_v48 = vadd.f32 %v14687_v9, %v6859_v29 }
0x1259   : > { %11275 = vpow2.f32 %v6938_v58  ;;  %v6925_v16 = vsub.f32 0.0, %v14795_v42  ;;  %v14804_v5 = vadd.f32 %v6894_v61, %v14691_v15  ;;  %v14807_v33 = vadd.f32 %v6895_v18, %v14695_v20 }
0x125a   : > { %11277 = vpow2.f32 %v6940_v8  ;;  %v6948_v43 = vmul.f32 1.442695, %v6924_v13  ;;  %v14810_v50 = vadd.f32 %v6896_v6, %v14700_v53  ;;  %v14813_v2 = vadd.f32 %v6897_v48, %v14704_v63 }
0x125b   : > { %11279 = vpow2.f32 %v6942_v7  ;;  %v6950_v3 = vmul.f32 1.442695, %v6925_v16  ;;  %v6926_v29 = vsub.f32 0.0, %v14804_v5  ;;  %v6927_v23 = vsub.f32 0.0, %v14807_v33 }
0x125c   : > { %v6703_v15 = vadd.f32 %v14637_v57, %v14714_v31  ;;  %11281 = vpow2.f32 %v6944_v11  ;;  %v6928_v20 = vsub.f32 0.0, %v14810_v50  ;;  %v6898_v46 = vadd.f32 %v14687_v9, %v14744_v28 }
0x125d   : > { %11283 = vpow2.f32 %v6946_v59  ;;  %v6952_v53 = vmul.f32 1.442695, %v6926_v29  ;;  %v6954_v1 = vmul.f32 1.442695, %v6927_v23  ;;  %v6899_v63 = vadd.f32 %v14687_v9, %v14748_v30 }
0x125e   : > { %11285 = vpow2.f32 %v6948_v43  ;;  %v6956_v10 = vmul.f32 1.442695, %v6928_v20  ;;  %v14825_v39 = vadd.f32 %v6898_v46, %v14708_v52  ;;  %v6929_v61 = vsub.f32 0.0, %v14813_v2 }
0x125f   : > { %11287 = vpow2.f32 %v6950_v3  ;;  %v14827_v34 = vadd.f32 %v6899_v63, %v6703_v15 }
0x1260   : > { %v11270_v57 = vpop.eup %11269  ;;  %11289 = vpow2.f32 %v6952_v53  ;;  %v6930_v6 = vsub.f32 0.0, %v14825_v39  ;;  %v6958_v15 = vmul.f32 1.442695, %v6929_v61 }
0x1261   : > { %v11272_v31 = vpop.eup %11271  ;;  %v6964_v40 = vadd.f32 1.0, %v11270_v57  ;;  %11291 = vpow2.f32 %v6954_v1  ;;  %v6931_v43 = vsub.f32 0.0, %v14827_v34 }
0x1262   : > { %v11274_v28 = vpop.eup %11273  ;;  %v6965_v24 = vadd.f32 1.0, %v11272_v31  ;;  %11293 = vpow2.f32 %v6956_v10  ;;  %v6960_v46 = vmul.f32 1.442695, %v6930_v6 }
0x1263   : > { %v11276_v25 = vpop.eup %11275  ;;  %11295 = vrcp.f32 %v6964_v40  ;;  %v6966_v14 = vadd.f32 1.0, %v11274_v28  ;;  %v6962_v63 = vmul.f32 1.442695, %v6931_v43 }
0x1264   : > { %v11278_v9 = vpop.eup %11277  ;;  %11297 = vrcp.f32 %v6965_v24  ;;  %v6967_v30 = vadd.f32 1.0, %v11276_v25 }
0x1265   : > { %v11280_v58 = vpop.eup %11279  ;;  %11299 = vrcp.f32 %v6966_v14  ;;  %v6968_v52 = vadd.f32 1.0, %v11278_v9 }
0x1266   : > { %v11282_v8 = vpop.eup %11281  ;;  %11301 = vrcp.f32 %v6967_v30  ;;  %v6969_v7 = vadd.f32 1.0, %v11280_v58 }
0x1267   : > { %v11284_v54 = vpop.eup %11283  ;;  %11303 = vrcp.f32 %v6968_v52  ;;  %v6970_v11 = vadd.f32 1.0, %v11282_v8 }
0x1268   : > { %v11286_v59 = vpop.eup %11285  ;;  %v6971_v13 = vadd.f32 1.0, %v11284_v54  ;;  %11305 = vrcp.f32 %v6969_v7 }
0x1269   : > { %v11288_v18 = vpop.eup %11287  ;;  %v6972_v16 = vadd.f32 1.0, %v11286_v59  ;;  %11307 = vrcp.f32 %v6970_v11 }
0x126a   : > { %v11290_v48 = vpop.eup %11289  ;;  %v6973_v29 = vadd.f32 1.0, %v11288_v18  ;;  %11309 = vrcp.f32 %v6971_v13 }
0x126b   : > { %v11292_v3 = vpop.eup %11291  ;;  %11311 = vrcp.f32 %v6972_v16  ;;  %v6974_v31 = vadd.f32 1.0, %v11290_v48 }
0x126c   : > { %v11294_v23 = vpop.eup %11293  ;;  %11313 = vrcp.f32 %v6973_v29 }
0x126d   : > { %v11296_v20 = vpop.eup %11295  ;;  %11315 = vpow2.f32 %v6958_v15  ;;  %v9467_v15 = vld [vmem:[%s15626_s2 + $0x2d8] sm:$0xff] }
0x126e   : > { %v11298_v53 = vpop.eup %11297  ;;  %v6996_v1 = vmul.f32 %v11296_v20, %v14758_v41  ;;  %11317 = vpow2.f32 %v6960_v46  ;;  %v6975_v41 = vadd.f32 1.0, %v11292_v3  ;;  %v9460_v20 = vld [vmem:[%s15626_s2 + $0x2a0] sm:$0xff]  ;;  %v9461_v46 = vld [vmem:[%s15626_s2 + $0x2a8] sm:$0xff] }
0x126f   : > { %v11300_v10 = vpop.eup %11299  ;;  %v6997_v57 = vmul.f32 %v11298_v53, %v14761_v36  ;;  %11319 = vpow2.f32 %v6962_v63  ;;  %v6976_v36 = vadd.f32 1.0, %v11294_v23  ;;  %v14882_v53 = vpack.c.bf16 %v9461_v46, %v9460_v20 }
0x1270   : > { %v11302_v40 = vpop.eup %11301  ;;  %10253 = vmatprep.mubr.msk.f32.mxu0 %vm804_vm4, %v6996_v1  ;;  %v6998_v28 = vmul.f32 %v11300_v10, %v14764_v56  ;;  %11321 = vrcp.f32 %v6974_v31  ;;  %v16173_v1 = vld [vmem:[#allocation83_spill] sm:$0xff] }
0x1271   : > { %v11304_v24 = vpop.eup %11303  ;;  %10254 = vmatmul.mubr.msk.f32.vlgmr.msra.gmra.mrb[52].mxu0 %vm804_vm4, %v6997_v57  ;;  %v6999_v25 = vmul.f32 %v11302_v40, %v14770_v49  ;;  %11323 = vrcp.f32 %v6975_v41  ;;  %v14887_v63 = vrot.slane %v14633_v32, %v16173_v1 }
0x1272   : > { %10256 = vmatprep.mubr.msk.f32.mxu0 %vm804_vm4, %v6998_v28  ;;  %v11306_v14 = vpop.eup %11305  ;;  %v7000_v9 = vmul.f32 %v11304_v24, %v14767_v0  ;;  %11325 = vrcp.f32 %v6976_v36 }
0x1273   : > { %v11308_v30 = vpop.eup %11307  ;;  %v7001_v58 = vmul.f32 %v11306_v14, %v14773_v19 }
0x1274   : > { %v11310_v56 = vpop.eup %11309  ;;  %v7002_v8 = vmul.f32 %v11308_v30, %v14776_v51 }
0x1275   : > { %10257 = vmatmul.mubr.msk.f32.gmra.mrb[54].mxu0 %vm804_vm4, %v6999_v25  ;;  %v11312_v52 = vpop.eup %11311  ;;  %v7003_v54 = vmul.f32 %v11310_v56, %v14779_v35 }
0x1276   : > { %10259 = vmatprep.mubr.msk.f32.mxu0 %vm804_vm4, %v7000_v9  ;;  %v11314_v7 = vpop.eup %11313  ;;  %v7004_v61 = vmul.f32 %v11312_v52, %v14792_v21 }
0x1277   : > { %v11316_v49 = vpop.eup %11315  ;;  %v7005_v51 = vmul.f32 %v11314_v7, %v14795_v42 }
0x1278   : > { %v11318_v0 = vpop.eup %11317  ;;  %v6977_v11 = vadd.f32 1.0, %v11316_v49 }
0x1279   : > { %10260 = vmatmul.mubr.msk.f32.gmra.mrb[56].mxu0 %vm804_vm4, %v7001_v58  ;;  %v11320_v59 = vpop.eup %11319  ;;  %v6978_v18 = vadd.f32 1.0, %v11318_v0 }
0x127a   : > { %10262 = vmatprep.mubr.msk.f32.mxu0 %vm804_vm4, %v7002_v8  ;;  %v11322_v13 = vpop.eup %11321  ;;  %11327 = vrcp.f32 %v6977_v11  ;;  %v6979_v19 = vadd.f32 1.0, %v11320_v59 }
0x127b   : > { %11329 = vrcp.f32 %v6978_v18  ;;  %v11324_v6 = vpop.eup %11323  ;;  %v7006_v48 = vmul.f32 %v11322_v13, %v14804_v5 }
0x127c   : > { %11331 = vrcp.f32 %v6979_v19  ;;  %v11326_v35 = vpop.eup %11325  ;;  %v7007_v21 = vmul.f32 %v11324_v6, %v14807_v33  ;;  %v9464_v33 = vld [vmem:[%s15626_s2 + $0x2c0] sm:$0xff] }
0x127d   : > { %10263 = vmatmul.mubr.msk.f32.gmra.mrb[58].mxu0 %vm804_vm4, %v7003_v54  ;;  %v7008_v16 = vmul.f32 %v11326_v35, %v14810_v50  ;;  %v9465_v50 = vld [vmem:[%s15626_s2 + $0x2c8] sm:$0xff] }
0x127e   : > { %10265 = vmatprep.mubr.msk.f32.mxu0 %vm804_vm4, %v7004_v61 }
0x1281   : > { %10266 = vmatmul.mubr.msk.f32.gmra.mrb[60].mxu0 %vm804_vm4, %v7005_v51 }
0x1282   : > { %10268 = vmatprep.mubr.msk.f32.mxu0 %vm804_vm4, %v7006_v48 }
0x1284   : > { %v11328_v43 = vpop.eup %11327 }
0x1285   : > { %10269 = vmatmul.mubr.msk.f32.gmra.mrb[62].mxu0 %vm804_vm4, %v7007_v21  ;;  %v11330_v3 = vpop.eup %11329  ;;  %v7009_v42 = vmul.f32 %v11328_v43, %v14813_v2  ;;  %v9466_v2 = vld [vmem:[%s15626_s2 + $0x2d0] sm:$0xff] }
0x1286   : > { %10271 = vmatprep.mubr.msk.f32.mxu0 %vm804_vm4, %v7008_v16  ;;  %v11332_v29 = vpop.eup %11331  ;;  %v7010_v5 = vmul.f32 %v11330_v3, %v14825_v39  ;;  %v10607_v39 = vpack.c.bf16 %v9465_v50, %v9464_v33 }
0x1287   : > { %v7011_v23 = vmul.f32 %v11332_v29, %v14827_v34  ;;  %v10611_v34 = vpack.c.bf16 %v9467_v15, %v9466_v2 }
0x1288   : > { %10608 = vmatprep.subr.bf16.mxu1 %v10607_v39 }
0x1289   : > { %10272 = vmatmul.mubr.msk.f32.gmra.mrb[64].mxu0 %vm804_vm4, %v7009_v42  ;;  %10610 = vmatpush3.bf16.msra.mxu1 %v10607_v39 }
0x128a   : > { %10274 = vmatprep.mubr.msk.f32.mxu0 %vm804_vm4, %v7010_v5  ;;  %10612 = vmatprep.subr.bf16.mxu1 %v10611_v34 }
0x128d   : > { %10275 = vmatmul.mubr.msk.f32.gmra.mrb[66].mxu0 %vm804_vm4, %v7011_v23  ;;  %10614 = vmatpush3.bf16.msra.mxu1 %v10611_v34 }
0x128e   : > { %10616 = vmatprep.subr.bf16.mxu1 %v14882_v53 }
0x1344   : > { %v10255_v10 = vpop.f32.mrb[52].mxu0 }
0x1345   : > { %v14890_v57 = vadd.f32 %v10255_v10, %v14887_v63  ;;  %v7130_v31 = vpop.f32.mrb[53].mxu0 }
0x1346   : > { %v14893_v40 = vadd.f32 %v7130_v31, %v14887_v63 }
0x1347   : > { %v7210_v28 = vsub.f32 0.0, %v14890_v57 }
0x1348   : > { %v7209_v24 = vsub.f32 0.0, %v14893_v40  ;;  %v10258_v41 = vpop.f32.mrb[54].mxu0 }
0x1349   : > { %v7227_v25 = vmul.f32 1.442695, %v7210_v28  ;;  %v14898_v36 = vadd.f32 %v10258_v41, %v14887_v63  ;;  %v7140_v14 = vpop.f32.mrb[55].mxu0 }
0x134a   : > { %v7225_v32 = vmul.f32 1.442695, %v7209_v24  ;;  %v14901_v9 = vadd.f32 %v7140_v14, %v14887_v63 }
0x134b   : > { %11333 = vpow2.f32 %v7227_v25  ;;  %v7212_v30 = vsub.f32 0.0, %v14898_v36 }
0x134c   : > { %11335 = vpow2.f32 %v7225_v32  ;;  %v7211_v56 = vsub.f32 0.0, %v14901_v9  ;;  %v10261_v58 = vpop.f32.mrb[56].mxu0 }
0x134d   : > { %v7231_v52 = vmul.f32 1.442695, %v7212_v30  ;;  %v14906_v8 = vadd.f32 %v10261_v58, %v14887_v63  ;;  %v7150_v7 = vpop.f32.mrb[57].mxu0 }
0x134e   : > { %v7229_v49 = vmul.f32 1.442695, %v7211_v56  ;;  %v14909_v0 = vadd.f32 %v7150_v7, %v14887_v63 }
0x134f   : > { %11337 = vpow2.f32 %v7231_v52  ;;  %v7214_v54 = vsub.f32 0.0, %v14906_v8 }
0x1350   : > { %11339 = vpow2.f32 %v7229_v49  ;;  %v7213_v11 = vsub.f32 0.0, %v14909_v0  ;;  %v10264_v59 = vpop.f32.mrb[58].mxu0 }
0x1351   : > { %v7235_v61 = vmul.f32 1.442695, %v7214_v54  ;;  %v14914_v18 = vadd.f32 %v10264_v59, %v14887_v63  ;;  %v7160_v13 = vpop.f32.mrb[59].mxu0 }
0x1352   : > { %v7233_v19 = vmul.f32 1.442695, %v7213_v11  ;;  %v14917_v51 = vadd.f32 %v7160_v13, %v14887_v63 }
0x1353   : > { %11341 = vpow2.f32 %v7235_v61  ;;  %v7216_v6 = vsub.f32 0.0, %v14914_v18 }
0x1354   : > { %11343 = vpow2.f32 %v7233_v19  ;;  %v7215_v48 = vsub.f32 0.0, %v14917_v51  ;;  %v10267_v35 = vpop.f32.mrb[60].mxu0 }
0x1355   : > { %v11334_v21 = vpop.eup %11333  ;;  %v7239_v16 = vmul.f32 1.442695, %v7216_v6  ;;  %v14922_v43 = vadd.f32 %v10267_v35, %v14887_v63  ;;  %v7170_v3 = vpop.f32.mrb[61].mxu0 }
0x1356   : > { %v11336_v42 = vpop.eup %11335  ;;  %v7258_v29 = vadd.f32 1.0, %v11334_v21  ;;  %v7237_v5 = vmul.f32 1.442695, %v7215_v48  ;;  %v14925_v23 = vadd.f32 %v7170_v3, %v14887_v63 }
0x1357   : > { %v7257_v33 = vadd.f32 1.0, %v11336_v42  ;;  %11345 = vpow2.f32 %v7239_v16  ;;  %v7218_v50 = vsub.f32 0.0, %v14922_v43 }
0x1358   : > { %11347 = vrcp.f32 %v7258_v29  ;;  %v7217_v2 = vsub.f32 0.0, %v14925_v23  ;;  %v10270_v39 = vpop.f32.mrb[62].mxu0 }
0x1359   : > { %v11338_v15 = vpop.eup %11337  ;;  %11349 = vrcp.f32 %v7257_v33  ;;  %v7243_v34 = vmul.f32 1.442695, %v7218_v50  ;;  %v14930_v20 = vadd.f32 %v10270_v39, %v14887_v63  ;;  %v7180_v46 = vpop.f32.mrb[63].mxu0 }
0x135a   : > { %v11340_v10 = vpop.eup %11339  ;;  %v7260_v31 = vadd.f32 1.0, %v11338_v15  ;;  %11351 = vpow2.f32 %v7237_v5  ;;  %v7241_v28 = vmul.f32 1.442695, %v7217_v2  ;;  %v14933_v24 = vadd.f32 %v7180_v46, %v14887_v63 }
0x135b   : > { %v7259_v41 = vadd.f32 1.0, %v11340_v10  ;;  %11353 = vpow2.f32 %v7243_v34  ;;  %v7220_v25 = vsub.f32 0.0, %v14930_v20  ;;  %v16174_v34 = vld [vmem:[#allocation90_spill] sm:$0xff] }
0x135c   : > { %11355 = vrcp.f32 %v7260_v31  ;;  %v7219_v14 = vsub.f32 0.0, %v14933_v24  ;;  %v10273_v56 = vpop.f32.mrb[64].mxu0 }
0x135d   : > { %v11342_v32 = vpop.eup %11341  ;;  %11357 = vrcp.f32 %v7259_v41  ;;  %v7247_v30 = vmul.f32 1.442695, %v7220_v25  ;;  %v14938_v7 = vadd.f32 %v10273_v56, %v14887_v63  ;;  %v7190_v49 = vpop.f32.mrb[65].mxu0 }
0x135e   : > { %v11344_v58 = vpop.eup %11343  ;;  %v7262_v52 = vadd.f32 1.0, %v11342_v32  ;;  %11359 = vpow2.f32 %v7241_v28  ;;  %v7245_v11 = vmul.f32 1.442695, %v7219_v14  ;;  %v14941_v59 = vadd.f32 %v7190_v49, %v14887_v63 }
0x135f   : > { %v7261_v54 = vadd.f32 1.0, %v11344_v58  ;;  %11361 = vpow2.f32 %v7247_v30  ;;  %v7222_v61 = vsub.f32 0.0, %v14938_v7 }
0x1360   : > { %11363 = vrcp.f32 %v7262_v52  ;;  %v7221_v19 = vsub.f32 0.0, %v14941_v59  ;;  %v10276_v6 = vpop.f32.mrb[66].mxu0 }
0x1361   : > { %v11346_v13 = vpop.eup %11345  ;;  %11365 = vrcp.f32 %v7261_v54  ;;  %v7251_v21 = vmul.f32 1.442695, %v7222_v61  ;;  %v14946_v16 = vadd.f32 %v10276_v6, %v14887_v63  ;;  %v7200_v3 = vpop.f32.mrb[67].mxu0  ;;  %v16176_v61 = vld [vmem:[#allocation87_spill] sm:$0xff] }
0x1362   : > { %v11348_v48 = vpop.eup %11347  ;;  %v7264_v35 = vadd.f32 1.0, %v11346_v13  ;;  %11367 = vpow2.f32 %v7245_v11  ;;  %v7249_v5 = vmul.f32 1.442695, %v7221_v19  ;;  %v14950_v33 = vadd.f32 %v7200_v3, %v14887_v63 }
0x1363   : > { %v11350_v42 = vpop.eup %11349  ;;  %v7290_v29 = vmul.f32 %v11348_v48, %v14890_v57  ;;  %v7224_v39 = vsub.f32 0.0, %v14946_v16  ;;  %v16175_v57 = vld [vmem:[#allocation82_spill] sm:$0xff] }
0x1364   : > { %v11352_v50 = vpop.eup %11351  ;;  %v7289_v2 = vmul.f32 %v11350_v42, %v14893_v40  ;;  %11369 = vrcp.f32 %v7264_v35  ;;  %v7223_v31 = vsub.f32 0.0, %v14950_v33  ;;  %v16177_v35 = vld [vmem:[#allocation84_spill] sm:$0xff] }
0x1365   : > { %v11354_v15 = vpop.eup %11353  ;;  %v7306_v46 = vmul.f32 %v7290_v29, %v16174_v34  ;;  %v7263_v10 = vadd.f32 1.0, %v11352_v50  ;;  %11371 = vpow2.f32 %v7251_v21  ;;  %v7255_v63 = vmul.f32 1.442695, %v7224_v39 }
0x1366   : > { %v11356_v28 = vpop.eup %11355  ;;  %v7305_v41 = vmul.f32 %v7289_v2, %v16175_v57  ;;  %v7266_v25 = vadd.f32 1.0, %v11354_v15  ;;  %11373 = vpow2.f32 %v7249_v5  ;;  %v7253_v49 = vmul.f32 1.442695, %v7223_v31  ;;  %v16178_v31 = vld [vmem:[#allocation92_spill] sm:$0xff] }
0x1367   : > { %v11358_v14 = vpop.eup %11357  ;;  %v7328_v32 = vsel %vm804_vm4, %v7306_v46, 0.0  ;;  %v7292_v40 = vmul.f32 %v11356_v28, %v14898_v36  ;;  %11375 = vrcp.f32 %v7263_v10 }
0x1368   : > { %v11360_v30 = vpop.eup %11359  ;;  %v7329_v56 = vrot.slane %v7328_v32, 4  ;;  %v7321_v58 = vsel %vm804_vm4, %v7305_v41, 0.0  ;;  %v7291_v52 = vmul.f32 %v11358_v14, %v14901_v9  ;;  %11377 = vrcp.f32 %v7266_v25  ;;  %v16179_v14 = vld [vmem:[#allocation89_spill] sm:$0xff] }
0x1369   : > { %v11362_v54 = vpop.eup %11361  ;;  %v7322_v11 = vrot.slane %v7321_v58, 4  ;;  %v7308_v13 = vmul.f32 %v7292_v40, %v16176_v61  ;;  %v7265_v19 = vadd.f32 1.0, %v11360_v30  ;;  %11379 = vpow2.f32 %v7255_v63 }
0x136a   : > { %v11364_v6 = vpop.eup %11363  ;;  %v7330_v48 = vadd.f32 %v7329_v56, %v7328_v32  ;;  %v7307_v21 = vmul.f32 %v7291_v52, %v16177_v35  ;;  %v7268_v3 = vadd.f32 1.0, %v11362_v54 }
0x136b   : > { %v11366_v36 = vpop.eup %11365  ;;  %v7323_v42 = vadd.f32 %v7322_v11, %v7321_v58  ;;  %v7342_v29 = vsel %vm804_vm4, %v7308_v13, 0.0  ;;  %v7294_v5 = vmul.f32 %v11364_v6, %v14906_v8  ;;  %11381 = vrcp.f32 %v7265_v19 }
0x136c   : > { %v7331_v9 = vrot.slane %v7330_v48, 2  ;;  %v7343_v50 = vrot.slane %v7342_v29, 4  ;;  %v7335_v2 = vsel %vm804_vm4, %v7307_v21, 0.0  ;;  %v7293_v39 = vmul.f32 %v11366_v36, %v14909_v0  ;;  %v11368_v15 = vpop.eup %11367 }
0x136d   : > { %v7324_v46 = vrot.slane %v7323_v42, 2  ;;  %v7336_v10 = vrot.slane %v7335_v2, 4  ;;  %v7310_v28 = vmul.f32 %v7294_v5, %v16178_v31  ;;  %11383 = vrcp.f32 %v7268_v3 }
0x136e   : > { %v11370_v41 = vpop.eup %11369  ;;  %v7332_v25 = vadd.f32 %v7331_v9, %v7330_v48  ;;  %v7344_v63 = vadd.f32 %v7343_v50, %v7342_v29  ;;  %v7309_v32 = vmul.f32 %v7293_v39, %v16179_v14  ;;  %11385 = vpow2.f32 %v7253_v49 }
0x136f   : > { %v14969_v8 = vpop.eup %11371  ;;  %v7325_v40 = vadd.f32 %v7324_v46, %v7323_v42  ;;  %v7337_v30 = vadd.f32 %v7336_v10, %v7335_v2  ;;  %v7356_v56 = vsel %vm804_vm4, %v7310_v28, 0.0  ;;  %v7296_v0 = vmul.f32 %v11370_v41, %v14914_v18 }
0x1370   : > { %v11374_v58 = vpop.eup %11373  ;;  %v7333_v52 = vrot.slane %v7332_v25, 1  ;;  %v7345_v54 = vrot.slane %v7344_v63, 2  ;;  %v7357_v11 = vrot.slane %v7356_v56, 4  ;;  %v7349_v13 = vsel %vm804_vm4, %v7309_v32, 0.0 }
0x1371   : > { %v11376_v19 = vpop.eup %11375  ;;  %v7326_v6 = vrot.slane %v7325_v40, 1  ;;  %v7338_v48 = vrot.slane %v7337_v30, 2  ;;  %v7350_v21 = vrot.slane %v7349_v13, 4  ;;  %v7312_v49 = vmul.f32 %v7296_v0, %v16153_v62 }
0x1372   : > { %v7334_v3 = vadd.f32 %v7333_v52, %v7332_v25  ;;  %v7346_v36 = vadd.f32 %v7345_v54, %v7344_v63  ;;  %v7358_v42 = vadd.f32 %v7357_v11, %v7356_v56  ;;  %v7295_v29 = vmul.f32 %v11376_v19, %v14917_v51  ;;  %v11378_v5 = vpop.eup %11377 }
0x1373   : > { %v7327_v9 = vadd.f32 %v7326_v6, %v7325_v40  ;;  %v7339_v18 = vadd.f32 %v7338_v48, %v7337_v30  ;;  %v7351_v50 = vadd.f32 %v7350_v21, %v7349_v13  ;;  %v7370_v2 = vsel %vm804_vm4, %v7312_v49, 0.0  ;;  %v11380_v39 = vpop.eup %11379 }
0x1374   : > { %v7434_v46 = vmul.f32 0.01, %v7334_v3  ;;  %v7347_v10 = vrot.slane %v7346_v36, 1  ;;  %v7359_v28 = vrot.slane %v7358_v42, 2  ;;  %v7371_v41 = vrot.slane %v7370_v2, 4 }
0x1375   : > { %v11382_v32 = vpop.eup %11381  ;;  %v7433_v14 = vmul.f32 0.01, %v7327_v9  ;;  %v7340_v31 = vrot.slane %v7339_v18, 1  ;;  %v7352_v0 = vrot.slane %v7351_v50, 2  ;;  %v7311_v25 = vmul.f32 %v7295_v29, %v16154_v44 }
0x1376   : > { %v7360_v63 = vadd.f32 %v7359_v28, %v7358_v42  ;;  %v7372_v56 = vadd.f32 %v7371_v41, %v7370_v2  ;;  %v7298_v51 = vmul.f32 %v11378_v5, %v14922_v43  ;;  %v7267_v40 = vadd.f32 1.0, %v11368_v15 }
0x1377   : > { %v11384_v30 = vpop.eup %11383  ;;  %v7465_v52 = vsel %vm1878_vm5, %v7434_v46, %v7433_v14  ;;  %v7341_v54 = vadd.f32 %v7340_v31, %v7339_v18  ;;  %v7353_v11 = vadd.f32 %v7352_v0, %v7351_v50  ;;  %v7363_v13 = vsel %vm804_vm4, %v7311_v25, 0.0 }
0x1378   : > { %v11386_v19 = vpop.eup %11385  ;;  %v7361_v6 = vrot.slane %v7360_v63, 1  ;;  %v7373_v48 = vrot.slane %v7372_v56, 2  ;;  %v7364_v21 = vrot.slane %v7363_v13, 4  ;;  %v7348_v49 = vadd.f32 %v7347_v10, %v7346_v36 }
0x1379   : > { %v7354_v3 = vrot.slane %v7353_v11, 1  ;;  %v7314_v29 = vmul.f32 %v7298_v51, %v16026_v22  ;;  %v7297_v42 = vmul.f32 %v11382_v32, %v14925_v23  ;;  %v7435_v9 = vmul.f32 0.01, %v7341_v54 }
0x137a   : > { %v7362_v43 = vadd.f32 %v7361_v6, %v7360_v63  ;;  %v7365_v15 = vadd.f32 %v7364_v21, %v7363_v13  ;;  %v7300_v5 = vmul.f32 %v11384_v30, %v14930_v20  ;;  %11387 = vrcp.f32 %v7267_v40 }
0x137b   : > { %v7355_v14 = vadd.f32 %v7354_v3, %v7353_v11  ;;  %v7384_v31 = vsel %vm804_vm4, %v7314_v29, 0.0  ;;  %v7313_v18 = vmul.f32 %v7297_v42, %v16024_v37  ;;  %v7374_v50 = vadd.f32 %v7373_v48, %v7372_v56 }
0x137c   : > { %v7366_v2 = vrot.slane %v7365_v15, 2  ;;  %v7385_v46 = vrot.slane %v7384_v31, 4  ;;  %v7316_v36 = vmul.f32 %v7300_v5, %v16029_v47  ;;  %v7270_v23 = vadd.f32 1.0, %v14969_v8 }
0x137d   : > { %v7437_v10 = vmul.f32 0.01, %v7355_v14  ;;  %v7377_v28 = vsel %vm804_vm4, %v7313_v18, 0.0  ;;  %v7269_v41 = vadd.f32 1.0, %v11374_v58  ;;  %v7272_v51 = vadd.f32 1.0, %v11380_v39 }
0x137e   : > { %v7367_v32 = vadd.f32 %v7366_v2, %v7365_v15  ;;  %v7386_v0 = vadd.f32 %v7385_v46, %v7384_v31  ;;  %v7378_v20 = vrot.slane %v7377_v28, 4  ;;  %v7398_v25 = vsel %vm804_vm4, %v7316_v36, 0.0 }
0x137f   : > { %v7399_v63 = vrot.slane %v7398_v25, 4  ;;  %11389 = vrcp.f32 %v7270_v23  ;;  %v7271_v40 = vadd.f32 1.0, %v11386_v19  ;;  %v7436_v11 = vmul.f32 0.01, %v7348_v49 }
0x1380   : > { %v7368_v56 = vrot.slane %v7367_v32, 1  ;;  %v7387_v30 = vrot.slane %v7386_v0, 2  ;;  %v7379_v54 = vadd.f32 %v7378_v20, %v7377_v28  ;;  %11391 = vrcp.f32 %v7269_v41 }
0x1381   : > { %11393 = vrcp.f32 %v7272_v51  ;;  %v7375_v13 = vrot.slane %v7374_v50, 1  ;;  %v7466_v6 = vsel %vm1880_vm6, %v7435_v9, %v7465_v52  ;;  %v7438_v21 = vmul.f32 0.01, %v7362_v43 }
0x1382   : > { %v7388_v8 = vadd.f32 %v7387_v30, %v7386_v0  ;;  %v7380_v58 = vrot.slane %v7379_v54, 2  ;;  %11395 = vrcp.f32 %v7271_v40  ;;  %v7369_v48 = vadd.f32 %v7368_v56, %v7367_v32 }
0x1383   : > { %v7400_v3 = vadd.f32 %v7399_v63, %v7398_v25  ;;  %v7376_v29 = vadd.f32 %v7375_v13, %v7374_v50  ;;  %v7467_v42 = vsel %vm1882_vm7, %v7436_v11, %v7466_v6 }
0x1384   : > { %v7389_v39 = vrot.slane %v7388_v8, 1  ;;  %v7381_v19 = vadd.f32 %v7380_v58, %v7379_v54  ;;  %v7439_v15 = vmul.f32 0.01, %v7369_v48  ;;  %v7468_v5 = vsel %vm1884_vm8, %v7437_v10, %v7467_v42  ;;  %v11388_v14 = vpop.eup %11387 }
0x1385   : > { %v7440_v49 = vmul.f32 0.01, %v7376_v29  ;;  %v7469_v31 = vsel %vm1886_vm9, %v7438_v21, %v7468_v5  ;;  %v7299_v9 = vmul.f32 %v11388_v14, %v14933_v24  ;;  %v7401_v36 = vrot.slane %v7400_v3, 2 }
0x1386   : > { %v7390_v18 = vadd.f32 %v7389_v39, %v7388_v8  ;;  %v7382_v52 = vrot.slane %v7381_v19, 1  ;;  %v7470_v2 = vsel %vm1888_vm10, %v7439_v15, %v7469_v31 }
0x1387   : > { %v7471_v43 = vsel %vm1890_vm11, %v7440_v49, %v7470_v2  ;;  %v7315_v28 = vmul.f32 %v7299_v9, %v16031_v45  ;;  %v7402_v40 = vadd.f32 %v7401_v36, %v7400_v3 }
0x1388   : > { %v7442_v50 = vmul.f32 0.01, %v7390_v18  ;;  %v7383_v46 = vadd.f32 %v7382_v52, %v7381_v19  ;;  %10285 = vmatprep.mubr.msk.f32.mxu1 %vm804_vm4, %v7471_v43 }
0x1389   : > { %v11390_v10 = vpop.eup %11389  ;;  %v7391_v32 = vsel %vm804_vm4, %v7315_v28, 0.0  ;;  %v7403_v21 = vrot.slane %v7402_v40, 1 }
0x138a   : > { %v11392_v23 = vpop.eup %11391  ;;  %v7441_v41 = vmul.f32 0.01, %v7383_v46  ;;  %v7302_v0 = vmul.f32 %v11390_v10, %v14938_v7  ;;  %v7392_v24 = vrot.slane %v7391_v32, 4 }
0x138b   : > { %v11394_v20 = vpop.eup %11393  ;;  %v7301_v25 = vmul.f32 %v11392_v23, %v14941_v59  ;;  %v7404_v31 = vadd.f32 %v7403_v21, %v7402_v40 }
0x138c   : > { %v11396_v63 = vpop.eup %11395  ;;  %v7472_v51 = vsel %vm1878_vm5, %v7442_v50, %v7441_v41  ;;  %v7318_v56 = vmul.f32 %v7302_v0, %v16036_v55  ;;  %v7304_v30 = vmul.f32 %v11394_v20, %v14946_v16  ;;  %v7393_v54 = vadd.f32 %v7392_v24, %v7391_v32 }
0x138d   : > { %v7317_v11 = vmul.f32 %v7301_v25, %v16030_v12  ;;  %v7303_v13 = vmul.f32 %v11396_v63, %v14950_v33  ;;  %v7444_v23 = vmul.f32 0.01, %v7404_v31  ;;  %v11574_v31 = vld [vmem:[%s15627_s3 + $0x18] sm:$0x3f] }
0x138e   : > { %v7412_v6 = vsel %vm804_vm4, %v7318_v56, 0.0  ;;  %v7320_v7 = vmul.f32 %v7304_v30, %v16033_v26  ;;  %v7394_v8 = vrot.slane %v7393_v54, 2 }
0x138f   : > { %v7413_v58 = vrot.slane %v7412_v6, 4  ;;  %v7405_v59 = vsel %vm804_vm4, %v7317_v11, 0.0  ;;  %v7319_v48 = vmul.f32 %v7303_v13, %v16038_v60  ;;  %v9462_v13 = vld [vmem:[%s15626_s2 + $0x2b0] sm:$0xff] }
0x1390   : > { %v7406_v3 = vrot.slane %v7405_v59, 4  ;;  %v7426_v29 = vsel %vm804_vm4, %v7320_v7, 0.0  ;;  %v7395_v16 = vadd.f32 %v7394_v8, %v7393_v54 }
0x1391   : > { %v7414_v42 = vadd.f32 %v7413_v58, %v7412_v6  ;;  %v7427_v39 = vrot.slane %v7426_v29, 4  ;;  %v7419_v19 = vsel %vm804_vm4, %v7319_v48, 0.0  ;;  %v9463_v6 = vld [vmem:[%s15626_s2 + $0x2b8] sm:$0xff] }
0x1392   : > { %v7407_v33 = vadd.f32 %v7406_v3, %v7405_v59  ;;  %v7420_v15 = vrot.slane %v7419_v19, 4  ;;  %v7396_v5 = vrot.slane %v7395_v16, 1  ;;  %v10619_v48 = vpack.c.bf16 %v9463_v6, %v9462_v13  ;;  %v9468_v3 = vld [vmem:[%s15626_s2 + $0x2e0] sm:$0xff] }
0x1393   : > { %v7415_v14 = vrot.slane %v7414_v42, 2  ;;  %v7428_v49 = vadd.f32 %v7427_v39, %v7426_v29  ;;  %v9469_v29 = vld [vmem:[%s15626_s2 + $0x2e8] sm:$0xff] }
0x1394   : > { %v7408_v18 = vrot.slane %v7407_v33, 2  ;;  %v7421_v52 = vadd.f32 %v7420_v15, %v7419_v19  ;;  %v7397_v9 = vadd.f32 %v7396_v5, %v7395_v16  ;;  %v10623_v16 = vpack.c.bf16 %v9469_v29, %v9468_v3  ;;  %v9503_v19 = vld [vmem:[%s15628_s4 + $0xa0] sm:$0xff]  ;;  %v9505_v15 = vld [vmem:[%s15628_s4 + $0xb0] sm:$0xff] }
0x1395   : > { %v7416_v2 = vadd.f32 %v7415_v14, %v7414_v42  ;;  %v7429_v43 = vrot.slane %v7428_v49, 2  ;;  %v9471_v42 = vld [vmem:[%s15626_s2 + $0x2f8] sm:$0xff]  ;;  %v16182_v3 = vld [vmem:[#allocation4_spill] sm:$0xff] }
0x1396   : > { %v7409_v50 = vadd.f32 %v7408_v18, %v7407_v33  ;;  %v7422_v46 = vrot.slane %v7421_v52, 2  ;;  %v7443_v36 = vmul.f32 0.01, %v7397_v9  ;;  %v9504_v33 = vld [vmem:[%s15628_s4 + $0xa8] sm:$0xff]  ;;  %v9506_v14 = vld [vmem:[%s15628_s4 + $0xb8] sm:$0xff]  ;;  %v7636_v18 = vrot.slane %v11574_v31, %v16059_v27 }
0x1397   : > { %v7417_v28 = vrot.slane %v7416_v2, 1  ;;  %v7430_v10 = vadd.f32 %v7429_v43, %v7428_v49  ;;  %v10639_v5 = vpack.c.bf16 %v9504_v33, %v9503_v19  ;;  %v10643_v49 = vpack.c.bf16 %v9506_v14, %v9505_v15  ;;  %v9093_v19 = vld [vmem:[%s15631_s7] sm:$0xff]  ;;  %v9094_v33 = vld [vmem:[%s15631_s7 + $0x8] sm:$0xff] }
0x1398   : > { %v7410_v41 = vrot.slane %v7409_v50, 1  ;;  %v7423_v32 = vadd.f32 %v7422_v46, %v7421_v52  ;;  %v7473_v0 = vsel %vm1880_vm6, %v7443_v36, %v7472_v51  ;;  %v15108_v15 = vpack.c.bf16 %v9094_v33, %v9093_v19  ;;  %v16200_v19 = vld [vmem:[#allocation14_spill] sm:$0xff] }
0x1399   : > { %v7418_v20 = vadd.f32 %v7417_v28, %v7416_v2  ;;  %v7431_v24 = vrot.slane %v7430_v10, 1  ;;  %v7474_v40 = vsel %vm1882_vm7, %v7444_v23, %v7473_v0  ;;  %10640 = vmatprep.subr.bf16.mxu0 %v10639_v5 }
0x139a   : > { %v7411_v25 = vadd.f32 %v7410_v41, %v7409_v50  ;;  %v7424_v63 = vrot.slane %v7423_v32, 1  ;;  %10642 = vmatpush3.bf16.msra.mxu0 %v10639_v5  ;;  %v15114_v5 = vld [vmem:[%s15629_s5 + $0x4] sm:$0xf] }
0x139b   : > { %v7432_v56 = vadd.f32 %v7431_v24, %v7430_v10  ;;  %v7446_v11 = vmul.f32 0.01, %v7418_v20  ;;  %10644 = vmatprep.subr.bf16.mxu0 %v10643_v49  ;;  %v15118_v14 = vrot.slane %v15114_v5, %v11686_v17 }
0x139c   : > { %v7445_v30 = vmul.f32 0.01, %v7411_v25  ;;  %v7425_v54 = vadd.f32 %v7424_v63, %v7423_v32  ;;  %v9499_v25 = vld [vmem:[%s15628_s4 + $0x80] sm:$0xff]  ;;  %v9500_v63 = vld [vmem:[%s15628_s4 + $0x88] sm:$0xff] }
0x139d   : > { %v7448_v8 = vmul.f32 0.01, %v7432_v56  ;;  %v10631_v56 = vpack.c.bf16 %v9500_v63, %v9499_v25  ;;  %v16193_v25 = vld [vmem:[#allocation109_spill] sm:$0xff] }
0x139e   : > { %v7447_v7 = vmul.f32 0.01, %v7425_v54  ;;  %v7475_v51 = vsel %vm1884_vm8, %v7445_v30, %v7474_v40  ;;  %10646 = vmatpush3.bf16.msra.mxu0 %v10643_v49  ;;  %v9501_v40 = vld [vmem:[%s15628_s4 + $0x90] sm:$0xff]  ;;  %v9502_v30 = vld [vmem:[%s15628_s4 + $0x98] sm:$0xff]  ;;  %v15158_v63 = vadd.f32 %v15118_v14, %v16193_v25 }
0x139f   : > { %v7476_v58 = vsel %vm1886_vm9, %v7446_v11, %v7475_v51  ;;  %v10635_v54 = vpack.c.bf16 %v9502_v30, %v9501_v40  ;;  %v16180_v11 = vld [vmem:[#allocation100_spill] sm:$0xff]  ;;  %v16194_v30 = vld [vmem:[#allocation111_spill] sm:$0xff] }
0x13a0   : > { %v7477_v59 = vsel %vm1888_vm10, %v7447_v7, %v7476_v58  ;;  %v7654_v13 = vrot.slane %v11574_v31, %v16180_v11  ;;  %v16183_v49 = vld [vmem:[#allocation16_spill] sm:$0xff]  ;;  %v16195_v11 = vld [vmem:[#allocation113_spill] sm:$0xff] }
0x13a1   : > { %v7478_v21 = vsel %vm1890_vm11, %v7448_v8, %v7477_v59  ;;  %v15122_v31 = vadd.f32 %v15118_v14, %v16183_v49 }
0x13a2   : > { %10286 = vmatmul.mubr.msk.f32.vlgmr.msra.gmra.mrb[62].mxu1 %vm804_vm4, %v7478_v21 }
0x13a3   : > { %10618 = vmatpush3.bf16.msra.mxu1 %v14882_v53  ;;  %10296 = vmatprep.mubr.msk.f32.mxu1 %vm804_vm4, %v14605_v4  ;;  %v9470_v53 = vld [vmem:[%s15626_s2 + $0x2f0] sm:$0xff] }
0x13a4   : > { %10620 = vmatprep.subr.bf16.mxu1 %v10619_v48  ;;  %v10627_v39 = vpack.c.bf16 %v9471_v42, %v9470_v53  ;;  %v9509_v53 = vld [vmem:[%s15628_s4 + $0xd0] sm:$0xff]  ;;  %v9510_v42 = vld [vmem:[%s15628_s4 + $0xd8] sm:$0xff] }
0x13a7   : > { %10622 = vmatpush3.bf16.msra.mxu1 %v10619_v48  ;;  %v16181_v48 = vld [vmem:[#allocation2_spill] sm:$0xff] }
0x13a8   : > { %10624 = vmatprep.subr.bf16.mxu1 %v10623_v16 }
0x13aa   : > { %10297 = vmatmul.mubr.msk.f32.vlgmr.msra.gmra.mrb[62].mxu1 %vm804_vm4, %v14608_v38 }
0x13ab   : > { %10626 = vmatpush3.bf16.msra.mxu1 %v10623_v16 }
0x13ac   : > { %10628 = vmatprep.subr.bf16.mxu1 %v10627_v39 }
0x13af   : > { %10630 = vmatpush3.bf16.msra.mxu1 %v10627_v39  ;;  %v10651_v39 = vpack.c.bf16 %v9510_v42, %v9509_v53 }
0x13b0   : > { %10632 = vmatprep.subr.bf16.mxu1 %v10631_v56 }
0x147d   : > { %v10298_v52 = vpop.f32.mrb[62].mxu1 }
0x147e   : > { %v7638_v9 = vadd.f32 %v10298_v52, %v7636_v18  ;;  %v7624_v2 = vpop.f32.mrb[63].mxu1  ;;  %v16185_v52 = vld [vmem:[#allocation13_spill] sm:$0xff] }
0x147f   : > { %v7637_v43 = vadd.f32 %v7636_v18, %v7624_v2  ;;  %v16184_v18 = vld [vmem:[#allocation80_spill] sm:$0xff]  ;;  %v16186_v2 = vld [vmem:[#allocation22_spill] sm:$0xff] }
0x1480   : > { %v7640_v50 = vsub.f32 0.0, %v7638_v9 }
0x1481   : > { %v7639_v46 = vsub.f32 0.0, %v7637_v43 }
0x1482   : > { %v7643_v36 = vmul.f32 1.442695, %v7640_v50  ;;  %v16187_v50 = vld [vmem:[#allocation23_spill] sm:$0xff] }
0x1483   : > { %v7641_v28 = vmul.f32 1.442695, %v7639_v46  ;;  %v15134_v46 = vadd.f32 %v15118_v14, %v16187_v50  ;;  %v16201_v50 = vld [vmem:[#allocation66_spill] sm:$0xff] }
0x1484   : > { %11397 = vpow2.f32 %v7643_v36  ;;  %v16188_v36 = vld [vmem:[#allocation28_spill] sm:$0xff] }
0x1485   : > { %11399 = vpow2.f32 %v7641_v28  ;;  %v15138_v28 = vadd.f32 %v15118_v14, %v16188_v36  ;;  %v15190_v36 = vadd.f32 %v15118_v14, %v16201_v50 }
0x148e   : > { %v11398_v10 = vpop.eup %11397 }
0x148f   : > { %v11400_v23 = vpop.eup %11399  ;;  %v7646_v41 = vadd.f32 1.0, %v11398_v10  ;;  %v16189_v10 = vld [vmem:[#allocation59_spill] sm:$0xff] }
0x1490   : > { %v7645_v32 = vadd.f32 1.0, %v11400_v23  ;;  %v15142_v23 = vadd.f32 %v15118_v14, %v16189_v10 }
0x1491   : > { %11401 = vrcp.f32 %v7646_v41  ;;  %v16190_v41 = vld [vmem:[#allocation63_spill] sm:$0xff] }
0x1492   : > { %11403 = vrcp.f32 %v7645_v32  ;;  %v15146_v32 = vadd.f32 %v15118_v14, %v16190_v41 }
0x149b   : > { %v11402_v0 = vpop.eup %11401 }
0x149c   : > { %v11404_v20 = vpop.eup %11403  ;;  %v7650_v27 = vmul.f32 %v11402_v0, %v7638_v9  ;;  %v15126_v9 = vmul.f32 %v16185_v52, %v16184_v18  ;;  %v16191_v0 = vld [vmem:[#allocation105_spill] sm:$0xff] }
0x149d   : > { %v7649_v24 = vmul.f32 %v11404_v20, %v7637_v43  ;;  %v15130_v43 = vadd.f32 %v15118_v14, %v16186_v2  ;;  %v15150_v20 = vadd.f32 %v15118_v14, %v16191_v0 }
0x149f   : > { %10307 = vmatprep.mubr.msk.f32.mxu1 %vm804_vm4, %v7649_v24  ;;  %v16192_v24 = vld [vmem:[#allocation107_spill] sm:$0xff] }
0x14a0   : > { %10308 = vmatmul.mubr.msk.f32.vlgmr.msra.gmra.mrb[64].mxu1 %vm804_vm4, %v7650_v27  ;;  %v15154_v27 = vadd.f32 %v15118_v14, %v16192_v24 }
0x14a1   : > { %10634 = vmatpush3.bf16.msra.mxu1 %v10631_v56 }
0x14a2   : > { %10636 = vmatprep.subr.bf16.mxu1 %v10635_v54 }
0x14a5   : > { %10638 = vmatpush3.bf16.msra.mxu1 %v10635_v54  ;;  %v15164_v54 = vadd.f32 %v15118_v14, %v16194_v30 }
0x1573   : > { %v10309_v6 = vpop.f32.mrb[64].mxu1 }
0x1574   : > { %v7733_v7 = vadd.f32 %v10309_v6, %v7654_v13  ;;  %v7727_v51 = vpop.f32.mrb[65].mxu1 }
0x1575   : > { %v7728_v8 = vadd.f32 %v7727_v51, %v7654_v13  ;;  %v15168_v13 = vadd.f32 %v15118_v14, %v16195_v11 }
0x1576   : > { %v7737_v58 = vadd.f32 %v7733_v7, %v14608_v38  ;;  %v9508_v38 = vld [vmem:[%s15628_s4 + $0xc8] sm:$0xff]  ;;  %v16196_v7 = vld [vmem:[#allocation6_spill] sm:$0xff] }
0x1577   : > { %v7736_v59 = vadd.f32 %v7728_v8, %v14605_v4  ;;  %v9507_v4 = vld [vmem:[%s15628_s4 + $0xc0] sm:$0xff] }
0x1578   : > { %v15080_v29 = vmul.f32 %v7737_v58, %v16182_v3  ;;  %v10647_v16 = vpack.c.bf16 %v9508_v38, %v9507_v4  ;;  %v16198_v38 = vld [vmem:[#allocation62_spill] sm:$0xff] }
0x1579   : > { %v15077_v21 = vmul.f32 %v7736_v59, %v16181_v48  ;;  %v16197_v59 = vld [vmem:[#allocation75_spill] sm:$0xff]  ;;  %v15177_v53 = vadd.f32 %v15118_v14, %v16198_v38 }
0x157a   : > { %10648 = vmatprep.subr.bf16.mxu1 %v10647_v16  ;;  %v15173_v4 = vadd.f32 %v15118_v14, %v16197_v59 }
0x157b   : > { %10318 = vmatprep.mubr.msk.f32.mxu1 %vm804_vm4, %v15077_v21  ;;  %10329 = vmatprep.mubr.msk.f32.mxu0 %vm804_vm4, %v15077_v21 }
0x157c   : > { %10319 = vmatmul.mubr.msk.f32.vlgmr.msra.gmra.mrb[66].mxu1 %vm804_vm4, %v15080_v29  ;;  %10330 = vmatmul.mubr.msk.f32.vlgmr.msra.gmra.mrb[68].mxu0 %vm804_vm4, %v15080_v29 }
0x157d   : > { %10650 = vmatpush3.bf16.msra.mxu1 %v10647_v16 }
0x157e   : > { %10652 = vmatprep.subr.bf16.mxu1 %v10651_v39 }
0x1581   : > { %10654 = vmatpush3.bf16.msra.mxu1 %v10651_v39  ;;  %v16199_v39 = vld [vmem:[#allocation60_spill] sm:$0xff] }
0x1582   : > { %10664 = vmatprep.subr.bf16.mxu1 %v15108_v15  ;;  %v15182_v33 = vmul.f32 %v16200_v19, %v16199_v39 }
0x164f   : > { %v10320_v40 = vpop.f32.mrb[66].mxu1  ;;  %v15160_v56 = vpop.f32.mrb[68].mxu0 }
0x1650   : > { %v8042_v6 = vcombine.high %v10320_v40, %v10320_v40  ;;  %v8049_v51 = vrot.slane %v10320_v40, %v16196_v7  ;;  %v7831_v8 = vpop.f32.mrb[67].mxu1  ;;  %v7906_v58 = vpop.f32.mrb[69].mxu0 }
0x1651   : > { %v7993_v16 = vcombine.high %v7831_v8, %v7831_v8  ;;  %v8000_v42 = vrot.slane %v7831_v8, %v16196_v7 }
0x1652   : > { %v8056_v49 = vrot.slane %v8042_v6, %v16196_v7  ;;  %v8057_v18 = vcombine.high %v8049_v51, %v8049_v51  ;;  %v15186_v2 = vrot.slane %v8049_v51, %v16196_v7 }
0x1653   : > { %v8007_v10 = vrot.slane %v7993_v16, %v16196_v7  ;;  %v8008_v41 = vcombine.high %v8000_v42, %v8000_v42  ;;  %v8016_v0 = vrot.slane %v8000_v42, %v16196_v7 }
0x1654   : > { %v8058_v24 = vcombine.high %v8056_v49, %v8056_v49  ;;  %v15195_v25 = vrot.slane %v8056_v49, %v16196_v7  ;;  %v8079_v40 = vrot.slane %v8057_v18, %v16196_v7  ;;  %v8087_v30 = vcombine.high %v15186_v2, %v15186_v2 }
0x1655   : > { %v8126_v11 = vrot.slane %v15186_v2, %v11686_v17  ;;  %v8009_v6 = vcombine.high %v8007_v10, %v8007_v10  ;;  %v8023_v51 = vrot.slane %v8007_v10, %v16196_v7  ;;  %v8030_v8 = vrot.slane %v8008_v41, %v16196_v7 }
0x1656   : > { %v15205_v59 = vrot.slane %v8058_v24, %v16196_v7  ;;  %v8088_v38 = vcombine.high %v15195_v25, %v15195_v25  ;;  %v8089_v16 = vcombine.high %v8079_v40, %v8079_v40  ;;  %v8130_v42 = vrot.slane %v8079_v40, %v11686_v17 }
0x1657   : > { %v8134_v49 = vrot.slane %v8087_v30, %v11686_v17  ;;  %v8142_v18 = vrot.slane %v15195_v25, %v11686_v17  ;;  %v8037_v2 = vrot.slane %v8009_v6, %v16196_v7  ;;  %v8038_v50 = vcombine.high %v8016_v0, %v8016_v0 }
0x1658   : > { %v8090_v10 = vcombine.high %v15205_v59, %v15205_v59  ;;  %v8138_v41 = vrot.slane %v8089_v16, %v11686_v17  ;;  %v8146_v24 = vrot.slane %v15205_v59, %v11686_v17  ;;  %v15220_v26 = vrot.slane %v8088_v38, %v11686_v17 }
0x1659   : > { %v8039_v40 = vcombine.high %v8023_v51, %v8023_v51  ;;  %v8040_v60 = vcombine.high %v8030_v8, %v8030_v8  ;;  %v8041_v30 = vcombine.high %v8037_v2, %v8037_v2  ;;  %v8094_v62 = vrot.slane %v8016_v0, %v11686_v17 }
0x165a   : > { %v15224_v25 = vrot.slane %v8090_v10, %v11686_v17  ;;  %v8098_v7 = vrot.slane %v8030_v8, %v11686_v17  ;;  %v8102_v6 = vrot.slane %v8038_v50, %v11686_v17  ;;  %v8110_v16 = vrot.slane %v8023_v51, %v11686_v17 }
0x165b   : > { %v8106_v12 = vrot.slane %v8040_v60, %v11686_v17  ;;  %v8114_v59 = vrot.slane %v8037_v2, %v11686_v17  ;;  %v8118_v38 = vrot.slane %v8039_v40, %v11686_v17  ;;  %v8122_v45 = vrot.slane %v8041_v30, %v11686_v17 }
0x165c   : > { %v8171_v55 = vadd.f32 %v8094_v62, %v7906_v58  ;;  %v8172_v37 = vadd.f32 %v8098_v7, %v7906_v58  ;;  %v8173_v0 = vadd.f32 %v8102_v6, %v7906_v58  ;;  %v8175_v47 = vadd.f32 %v8110_v16, %v7906_v58 }
0x165d   : > { %v8174_v10 = vadd.f32 %v8106_v12, %v7906_v58  ;;  %v8176_v22 = vadd.f32 %v8114_v59, %v7906_v58  ;;  %v8177_v44 = vadd.f32 %v8118_v38, %v7906_v58  ;;  %v8178_v8 = vadd.f32 %v8122_v45, %v7906_v58 }
0x165e   : > { %v15234_v50 = vadd.f32 %v8171_v55, %v15122_v31  ;;  %v15237_v51 = vadd.f32 %v8172_v37, %v15130_v43  ;;  %v15240_v60 = vadd.f32 %v8173_v0, %v15134_v46  ;;  %v15243_v2 = vadd.f32 %v8175_v47, %v15138_v28 }
0x165f   : > { %v15246_v17 = vadd.f32 %v8174_v10, %v15142_v23  ;;  %v15249_v12 = vadd.f32 %v8176_v22, %v15150_v20  ;;  %v15252_v45 = vadd.f32 %v8177_v44, %v15146_v32  ;;  %v15255_v55 = vadd.f32 %v8178_v8, %v15154_v27 }
0x1660   : > { %v8203_v37 = vsub.f32 0.0, %v15234_v50  ;;  %v8204_v62 = vsub.f32 0.0, %v15237_v51  ;;  %v8205_v31 = vsub.f32 0.0, %v15240_v60  ;;  %v8207_v47 = vsub.f32 0.0, %v15243_v2 }
0x1661   : > { %v8206_v43 = vsub.f32 0.0, %v15246_v17  ;;  %v8208_v46 = vsub.f32 0.0, %v15249_v12  ;;  %v8209_v22 = vsub.f32 0.0, %v15252_v45  ;;  %v8210_v44 = vsub.f32 0.0, %v15255_v55 }
0x1662   : > { %v8219_v28 = vmul.f32 1.442695, %v8203_v37  ;;  %v8221_v23 = vmul.f32 1.442695, %v8204_v62  ;;  %v8223_v32 = vmul.f32 1.442695, %v8205_v31  ;;  %v8179_v20 = vadd.f32 %v15160_v56, %v8126_v11 }
0x1663   : > { %v8225_v27 = vmul.f32 1.442695, %v8206_v43  ;;  %v8227_v58 = vmul.f32 1.442695, %v8207_v47  ;;  %v8229_v40 = vmul.f32 1.442695, %v8208_v46  ;;  %v8180_v30 = vadd.f32 %v15160_v56, %v8130_v42 }
0x1664   : > { %11405 = vpow2.f32 %v8219_v28  ;;  %v8231_v7 = vmul.f32 1.442695, %v8209_v22  ;;  %v8233_v6 = vmul.f32 1.442695, %v8210_v44  ;;  %v15268_v16 = vadd.f32 %v8179_v20, %v15158_v63  ;;  %v16202_v31 = vld [vmem:[#allocation64_spill] sm:$0xff]  ;;  %v16203_v46 = vld [vmem:[#allocation81_spill] sm:$0xff] }
0x1665   : > { %11407 = vpow2.f32 %v8221_v23  ;;  %v15271_v59 = vadd.f32 %v8180_v30, %v15164_v54  ;;  %v8181_v38 = vadd.f32 %v15160_v56, %v8134_v49  ;;  %v8182_v0 = vadd.f32 %v15160_v56, %v8138_v41 }
0x1666   : > { %11409 = vpow2.f32 %v8223_v32  ;;  %v8211_v11 = vsub.f32 0.0, %v15268_v16  ;;  %v8183_v10 = vadd.f32 %v15160_v56, %v8142_v18  ;;  %v8184_v42 = vadd.f32 %v15160_v56, %v8146_v24 }
0x1667   : > { %11411 = vpow2.f32 %v8225_v27  ;;  %v8212_v8 = vsub.f32 0.0, %v15271_v59  ;;  %v15280_v63 = vadd.f32 %v8181_v38, %v15168_v13  ;;  %v15283_v54 = vadd.f32 %v8182_v0, %v15173_v4 }
0x1668   : > { %11413 = vpow2.f32 %v8227_v58  ;;  %v8235_v49 = vmul.f32 1.442695, %v8211_v11  ;;  %v15286_v41 = vadd.f32 %v8183_v10, %v15177_v53  ;;  %v15289_v37 = vadd.f32 %v8184_v42, %v15190_v36 }
0x1669   : > { %11415 = vpow2.f32 %v8229_v40  ;;  %v8237_v18 = vmul.f32 1.442695, %v8212_v8  ;;  %v8213_v24 = vsub.f32 0.0, %v15280_v63  ;;  %v8214_v62 = vsub.f32 0.0, %v15283_v54 }
0x166a   : > { %v7934_v13 = vmul.f32 %v16200_v19, %v16202_v31  ;;  %11417 = vpow2.f32 %v8231_v7  ;;  %v8215_v4 = vsub.f32 0.0, %v15286_v41  ;;  %v8185_v47 = vadd.f32 %v15160_v56, %v15220_v26 }
0x166b   : > { %11419 = vpow2.f32 %v8233_v6  ;;  %v8239_v53 = vmul.f32 1.442695, %v8213_v24  ;;  %v8241_v43 = vmul.f32 1.442695, %v8214_v62  ;;  %v8186_v36 = vadd.f32 %v15160_v56, %v15224_v25 }
0x166c   : > { %v7954_v22 = vmul.f32 %v16185_v52, %v16203_v46  ;;  %11421 = vpow2.f32 %v8235_v49  ;;  %v8243_v44 = vmul.f32 1.442695, %v8215_v4  ;;  %v7969_v19 = vadd.f32 %v15126_v9, %v15182_v33  ;;  %v9096_v46 = vld [vmem:[%s15631_s7 + $0x18] sm:$0xff] }
0x166d   : > { %11423 = vpow2.f32 %v8237_v18  ;;  %v8216_v8 = vsub.f32 0.0, %v15289_v37 }
0x166e   : > { %v11406_v28 = vpop.eup %11405  ;;  %v7970_v23 = vadd.f32 %v7954_v22, %v7934_v13  ;;  %11425 = vpow2.f32 %v8239_v53  ;;  %v7989_v56 = vadd.f32 %v15118_v14, %v7969_v19 }
0x166f   : > { %v11408_v32 = vpop.eup %11407  ;;  %v8251_v26 = vadd.f32 1.0, %v11406_v28  ;;  %11427 = vpow2.f32 %v8241_v43  ;;  %v8245_v43 = vmul.f32 1.442695, %v8216_v8 }
0x1670   : > { %v11410_v20 = vpop.eup %11409  ;;  %v8252_v27 = vadd.f32 1.0, %v11408_v32  ;;  %11429 = vpow2.f32 %v8243_v44  ;;  %v7990_v40 = vadd.f32 %v15118_v14, %v7970_v23  ;;  %v15306_v7 = vadd.f32 %v8185_v47, %v7989_v56 }
0x1671   : > { %v11412_v58 = vpop.eup %11411  ;;  %11431 = vrcp.f32 %v8251_v26  ;;  %v8253_v52 = vadd.f32 1.0, %v11410_v20 }
0x1672   : > { %v11414_v25 = vpop.eup %11413  ;;  %11433 = vrcp.f32 %v8252_v27  ;;  %v8254_v9 = vadd.f32 1.0, %v11412_v58  ;;  %v15308_v0 = vadd.f32 %v8186_v36, %v7990_v40  ;;  %v8217_v18 = vsub.f32 0.0, %v15306_v7  ;;  %v9095_v36 = vld [vmem:[%s15631_s7 + $0x10] sm:$0xff] }
0x1673   : > { %v11416_v33 = vpop.eup %11415  ;;  %11435 = vrcp.f32 %v8253_v52  ;;  %v8255_v30 = vadd.f32 1.0, %v11414_v25  ;;  %v10667_v27 = vpack.c.bf16 %v9096_v46, %v9095_v36  ;;  %v15372_v36 = vrot.slane %v15114_v5, %v16173_v1 }
0x1674   : > { %v11418_v6 = vpop.eup %11417  ;;  %11437 = vrcp.f32 %v8254_v9  ;;  %v8256_v38 = vadd.f32 1.0, %v11416_v33  ;;  %v8218_v13 = vsub.f32 0.0, %v15308_v0  ;;  %v8247_v44 = vmul.f32 1.442695, %v8217_v18 }
0x1675   : > { %v11420_v11 = vpop.eup %11419  ;;  %11439 = vrcp.f32 %v8255_v30  ;;  %v8257_v10 = vadd.f32 1.0, %v11418_v6 }
0x1676   : > { %v11422_v42 = vpop.eup %11421  ;;  %v8258_v14 = vadd.f32 1.0, %v11420_v11  ;;  %11441 = vrcp.f32 %v8256_v38  ;;  %v8249_v23 = vmul.f32 1.442695, %v8218_v13 }
0x1677   : > { %v11424_v49 = vpop.eup %11423  ;;  %v8259_v62 = vadd.f32 1.0, %v11422_v42  ;;  %11443 = vrcp.f32 %v8257_v10 }
0x1678   : > { %v11426_v24 = vpop.eup %11425  ;;  %v8260_v47 = vadd.f32 1.0, %v11424_v49  ;;  %11445 = vrcp.f32 %v8258_v14 }
0x1679   : > { %v11428_v4 = vpop.eup %11427  ;;  %11447 = vrcp.f32 %v8259_v62  ;;  %v8261_v20 = vadd.f32 1.0, %v11426_v24 }
0x167a   : > { %v11430_v53 = vpop.eup %11429  ;;  %11449 = vrcp.f32 %v8260_v47 }
0x167b   : > { %v11432_v22 = vpop.eup %11431  ;;  %11451 = vpow2.f32 %v8245_v43  ;;  %v8263_v25 = vadd.f32 1.0, %v11430_v53 }
0x167c   : > { %v11434_v19 = vpop.eup %11433  ;;  %v8283_v28 = vmul.f32 %v11432_v22, %v15234_v50  ;;  %11453 = vpow2.f32 %v8247_v44  ;;  %v8262_v50 = vadd.f32 1.0, %v11428_v4 }
0x167d   : > { %v11436_v32 = vpop.eup %11435  ;;  %v8284_v26 = vmul.f32 %v11434_v19, %v15237_v51  ;;  %11455 = vpow2.f32 %v8249_v23 }
0x167e   : > { %v11438_v58 = vpop.eup %11437  ;;  %10340 = vmatprep.mubr.msk.f32.mxu1 %vm804_vm4, %v8283_v28  ;;  %v8285_v56 = vmul.f32 %v11436_v32, %v15240_v60  ;;  %11457 = vrcp.f32 %v8261_v20 }
0x167f   : > { %v11440_v52 = vpop.eup %11439  ;;  %10341 = vmatmul.mubr.msk.f32.vlgmr.msra.gmra.mrb[68].mxu1 %vm804_vm4, %v8284_v26  ;;  %v8286_v51 = vmul.f32 %v11438_v58, %v15246_v17  ;;  %11459 = vrcp.f32 %v8262_v50 }
0x1680   : > { %10343 = vmatprep.mubr.msk.f32.mxu1 %vm804_vm4, %v8285_v56  ;;  %10666 = vmatpush3.bf16.msra.mxu1 %v15108_v15  ;;  %v11442_v40 = vpop.eup %11441  ;;  %v8287_v9 = vmul.f32 %v11440_v52, %v15243_v2  ;;  %11461 = vrcp.f32 %v8263_v25 }
0x1681   : > { %10668 = vmatprep.subr.bf16.mxu1 %v10667_v27  ;;  %v11444_v60 = vpop.eup %11443  ;;  %v8288_v30 = vmul.f32 %v11442_v40, %v15249_v12 }
0x1682   : > { %v11446_v33 = vpop.eup %11445  ;;  %v8289_v17 = vmul.f32 %v11444_v60, %v15252_v45 }
0x1683   : > { %10344 = vmatmul.mubr.msk.f32.gmra.mrb[70].mxu1 %vm804_vm4, %v8286_v51  ;;  %v11448_v15 = vpop.eup %11447  ;;  %v8290_v11 = vmul.f32 %v11446_v33, %v15255_v55 }
0x1684   : > { %10346 = vmatprep.mubr.msk.f32.mxu1 %vm804_vm4, %v8287_v9  ;;  %10670 = vmatpush3.bf16.msra.mxu1 %v10667_v27  ;;  %v11450_v6 = vpop.eup %11449  ;;  %v8291_v8 = vmul.f32 %v11448_v15, %v15268_v16 }
0x1685   : > { %v11452_v38 = vpop.eup %11451  ;;  %v8292_v45 = vmul.f32 %v11450_v6, %v15271_v59 }
0x1686   : > { %v11454_v2 = vpop.eup %11453  ;;  %v8264_v10 = vadd.f32 1.0, %v11452_v38 }
0x1687   : > { %10347 = vmatmul.mubr.msk.f32.gmra.mrb[72].mxu1 %vm804_vm4, %v8288_v30  ;;  %v11456_v42 = vpop.eup %11455  ;;  %v8265_v49 = vadd.f32 1.0, %v11454_v2 }
0x1688   : > { %10349 = vmatprep.mubr.msk.f32.mxu1 %vm804_vm4, %v8289_v17  ;;  %v11458_v14 = vpop.eup %11457  ;;  %11463 = vrcp.f32 %v8264_v10  ;;  %v8266_v12 = vadd.f32 1.0, %v11456_v42 }
0x1689   : > { %11465 = vrcp.f32 %v8265_v49  ;;  %v11460_v18 = vpop.eup %11459  ;;  %v8293_v24 = vmul.f32 %v11458_v14, %v15280_v63 }
0x168a   : > { %11467 = vrcp.f32 %v8266_v12  ;;  %v11462_v55 = vpop.eup %11461  ;;  %v8294_v16 = vmul.f32 %v11460_v18, %v15283_v54  ;;  %v9091_v54 = vmul.f32 %v15077_v21, %v16181_v48  ;;  %v9513_v21 = vld [vmem:[%s15628_s4 + $0xf0] sm:$0xff] }
0x168b   : > { %10350 = vmatmul.mubr.msk.f32.gmra.mrb[74].mxu1 %vm804_vm4, %v8290_v11  ;;  %v8295_v62 = vmul.f32 %v11462_v55, %v15286_v41  ;;  %v9092_v41 = vmul.f32 %v15080_v29, %v16182_v3  ;;  %v9514_v29 = vld [vmem:[%s15628_s4 + $0xf8] sm:$0xff] }
0x168c   : > { %10352 = vmatprep.mubr.msk.f32.mxu1 %vm804_vm4, %v8291_v8  ;;  %v10659_v43 = vpack.c.bf16 %v9514_v29, %v9513_v21 }
0x168f   : > { %10353 = vmatmul.mubr.msk.f32.gmra.mrb[76].mxu1 %vm804_vm4, %v8292_v45 }
0x1690   : > { %10355 = vmatprep.mubr.msk.f32.mxu1 %vm804_vm4, %v8293_v24 }
0x1692   : > { %v11464_v13 = vpop.eup %11463 }
0x1693   : > { %10356 = vmatmul.mubr.msk.f32.gmra.mrb[78].mxu1 %vm804_vm4, %v8294_v16  ;;  %v11466_v4 = vpop.eup %11465  ;;  %v8296_v59 = vmul.f32 %v11464_v13, %v15289_v37  ;;  %v9511_v37 = vld [vmem:[%s15628_s4 + $0xe0] sm:$0xff] }
0x1694   : > { %10358 = vmatprep.mubr.msk.f32.mxu1 %vm804_vm4, %v8295_v62  ;;  %v11468_v47 = vpop.eup %11467  ;;  %v8297_v63 = vmul.f32 %v11466_v4, %v15306_v7  ;;  %v9512_v7 = vld [vmem:[%s15628_s4 + $0xe8] sm:$0xff] }
0x1695   : > { %v8298_v53 = vmul.f32 %v11468_v47, %v15308_v0  ;;  %v10655_v0 = vpack.c.bf16 %v9512_v7, %v9511_v37 }
0x1697   : > { %10359 = vmatmul.mubr.msk.f32.gmra.mrb[80].mxu1 %vm804_vm4, %v8296_v59  ;;  %10656 = vmatprep.subr.bf16.mxu0 %v10655_v0 }
0x1698   : > { %10361 = vmatprep.mubr.msk.f32.mxu1 %vm804_vm4, %v8297_v63  ;;  %10658 = vmatpush3.bf16.msra.mxu0 %v10655_v0 }
0x1699   : > { %10660 = vmatprep.subr.bf16.mxu0 %v10659_v43 }
0x169b   : > { %10362 = vmatmul.mubr.msk.f32.gmra.mrb[82].mxu1 %vm804_vm4, %v8298_v53 }
0x169c   : > { %10404 = vmatprep.mubr.msk.f32.mxu1 %vm804_vm4, %v9091_v54  ;;  %10662 = vmatpush3.bf16.msra.mxu0 %v10659_v43 }
0x169f   : > { %10405 = vmatmul.mubr.msk.f32.vlgmr.msra.gmra.mrb[84].mxu1 %vm804_vm4, %v9092_v41 }
0x1752   : > { %v10342_v46 = vpop.f32.mrb[68].mxu1 }
0x1753   : > { %v15375_v22 = vadd.f32 %v10342_v46, %v15372_v36  ;;  %v8417_v44 = vpop.f32.mrb[69].mxu1 }
0x1754   : > { %v15378_v19 = vadd.f32 %v8417_v44, %v15372_v36 }
0x1755   : > { %v8497_v28 = vsub.f32 0.0, %v15375_v22 }
0x1756   : > { %v8496_v23 = vsub.f32 0.0, %v15378_v19  ;;  %v10345_v32 = vpop.f32.mrb[70].mxu1 }
0x1757   : > { %v8514_v26 = vmul.f32 1.442695, %v8497_v28  ;;  %v15383_v20 = vadd.f32 %v10345_v32, %v15372_v36  ;;  %v8427_v27 = vpop.f32.mrb[71].mxu1 }
0x1758   : > { %v8512_v1 = vmul.f32 1.442695, %v8496_v23  ;;  %v15386_v5 = vadd.f32 %v8427_v27, %v15372_v36 }
0x1759   : > { %11469 = vpow2.f32 %v8514_v26  ;;  %v8499_v58 = vsub.f32 0.0, %v15383_v20 }
0x175a   : > { %11471 = vpow2.f32 %v8512_v1  ;;  %v8498_v56 = vsub.f32 0.0, %v15386_v5  ;;  %v10348_v52 = vpop.f32.mrb[72].mxu1 }
0x175b   : > { %v8518_v50 = vmul.f32 1.442695, %v8499_v58  ;;  %v15391_v51 = vadd.f32 %v10348_v52, %v15372_v36  ;;  %v8437_v25 = vpop.f32.mrb[73].mxu1 }
0x175c   : > { %v8516_v40 = vmul.f32 1.442695, %v8498_v56  ;;  %v15394_v9 = vadd.f32 %v8437_v25, %v15372_v36 }
0x175d   : > { %11473 = vpow2.f32 %v8518_v50  ;;  %v8501_v60 = vsub.f32 0.0, %v15391_v51 }
0x175e   : > { %11475 = vpow2.f32 %v8516_v40  ;;  %v8500_v33 = vsub.f32 0.0, %v15394_v9  ;;  %v10351_v30 = vpop.f32.mrb[74].mxu1 }
0x175f   : > { %v8522_v15 = vmul.f32 1.442695, %v8501_v60  ;;  %v15399_v17 = vadd.f32 %v10351_v30, %v15372_v36  ;;  %v8447_v6 = vpop.f32.mrb[75].mxu1 }
0x1760   : > { %v8520_v38 = vmul.f32 1.442695, %v8500_v33  ;;  %v15402_v2 = vadd.f32 %v8447_v6, %v15372_v36 }
0x1761   : > { %11477 = vpow2.f32 %v8522_v15  ;;  %v8503_v11 = vsub.f32 0.0, %v15399_v17 }
0x1762   : > { %11479 = vpow2.f32 %v8520_v38  ;;  %v8502_v10 = vsub.f32 0.0, %v15402_v2  ;;  %v10354_v42 = vpop.f32.mrb[76].mxu1 }
0x1763   : > { %v11470_v8 = vpop.eup %11469  ;;  %v8526_v49 = vmul.f32 1.442695, %v8503_v11  ;;  %v15407_v14 = vadd.f32 %v10354_v42, %v15372_v36  ;;  %v8457_v12 = vpop.f32.mrb[77].mxu1 }
0x1764   : > { %v11472_v45 = vpop.eup %11471  ;;  %v8545_v18 = vadd.f32 1.0, %v11470_v8  ;;  %v8524_v24 = vmul.f32 1.442695, %v8502_v10  ;;  %v15410_v55 = vadd.f32 %v8457_v12, %v15372_v36 }
0x1765   : > { %v8544_v16 = vadd.f32 1.0, %v11472_v45  ;;  %11481 = vpow2.f32 %v8526_v49  ;;  %v8505_v62 = vsub.f32 0.0, %v15407_v14 }
0x1766   : > { %11483 = vrcp.f32 %v8545_v18  ;;  %v8504_v13 = vsub.f32 0.0, %v15410_v55  ;;  %v10357_v4 = vpop.f32.mrb[78].mxu1 }
0x1767   : > { %v11474_v59 = vpop.eup %11473  ;;  %11485 = vrcp.f32 %v8544_v16  ;;  %v8530_v47 = vmul.f32 1.442695, %v8505_v62  ;;  %v15415_v63 = vadd.f32 %v10357_v4, %v15372_v36  ;;  %v8467_v53 = vpop.f32.mrb[79].mxu1 }
0x1768   : > { %v11476_v54 = vpop.eup %11475  ;;  %v8547_v41 = vadd.f32 1.0, %v11474_v59  ;;  %11487 = vpow2.f32 %v8524_v24  ;;  %v8528_v37 = vmul.f32 1.442695, %v8504_v13  ;;  %v15418_v7 = vadd.f32 %v8467_v53, %v15372_v36 }
0x1769   : > { %v8546_v0 = vadd.f32 1.0, %v11476_v54  ;;  %11489 = vpow2.f32 %v8530_v47  ;;  %v8507_v21 = vsub.f32 0.0, %v15415_v63 }
0x176a   : > { %11491 = vrcp.f32 %v8547_v41  ;;  %v8506_v29 = vsub.f32 0.0, %v15418_v7  ;;  %v10360_v44 = vpop.f32.mrb[80].mxu1 }
0x176b   : > { %v11478_v43 = vpop.eup %11477  ;;  %11493 = vrcp.f32 %v8546_v0  ;;  %v8534_v46 = vmul.f32 1.442695, %v8507_v21  ;;  %v15423_v26 = vadd.f32 %v10360_v44, %v15372_v36  ;;  %v8477_v27 = vpop.f32.mrb[81].mxu1 }
0x176c   : > { %v11480_v28 = vpop.eup %11479  ;;  %v8549_v23 = vadd.f32 1.0, %v11478_v43  ;;  %11495 = vpow2.f32 %v8528_v37  ;;  %v8532_v32 = vmul.f32 1.442695, %v8506_v29  ;;  %v15426_v58 = vadd.f32 %v8477_v27, %v15372_v36 }
0x176d   : > { %v8548_v1 = vadd.f32 1.0, %v11480_v28  ;;  %11497 = vpow2.f32 %v8534_v46  ;;  %v8509_v56 = vsub.f32 0.0, %v15423_v26 }
0x176e   : > { %11499 = vrcp.f32 %v8549_v23  ;;  %v8508_v50 = vsub.f32 0.0, %v15426_v58  ;;  %v10363_v25 = vpop.f32.mrb[82].mxu1 }
0x176f   : > { %v11482_v52 = vpop.eup %11481  ;;  %11501 = vrcp.f32 %v8548_v1  ;;  %v8538_v33 = vmul.f32 1.442695, %v8509_v56  ;;  %v15431_v30 = vadd.f32 %v10363_v25, %v15372_v36  ;;  %v8487_v15 = vpop.f32.mrb[83].mxu1 }
0x1770   : > { %v11484_v40 = vpop.eup %11483  ;;  %v8551_v60 = vadd.f32 1.0, %v11482_v52  ;;  %11503 = vpow2.f32 %v8532_v32  ;;  %v8536_v38 = vmul.f32 1.442695, %v8508_v50  ;;  %v15434_v11 = vadd.f32 %v8487_v15, %v15372_v36 }
0x1771   : > { %v11486_v6 = vpop.eup %11485  ;;  %v8511_v8 = vsub.f32 0.0, %v15431_v30  ;;  %v8577_v12 = vmul.f32 %v11484_v40, %v15375_v22 }
0x1772   : > { %v11488_v10 = vpop.eup %11487  ;;  %v8576_v42 = vmul.f32 %v11486_v6, %v15378_v19  ;;  %11505 = vrcp.f32 %v8551_v60  ;;  %v8510_v18 = vsub.f32 0.0, %v15434_v11  ;;  %v15440_v24 = vpop.f32.mrb[84].mxu1 }
0x1773   : > { %v11490_v49 = vpop.eup %11489  ;;  %v8550_v45 = vadd.f32 1.0, %v11488_v10  ;;  %11507 = vpow2.f32 %v8538_v33  ;;  %v8542_v36 = vmul.f32 1.442695, %v8511_v8  ;;  %v15442_v13 = vpop.f32.mrb[85].mxu1 }
0x1774   : > { %v11492_v16 = vpop.eup %11491  ;;  %v8553_v62 = vadd.f32 1.0, %v11490_v49  ;;  %11509 = vpow2.f32 %v8536_v38  ;;  %10372 = vmatprep.mubr.msk.f32.mxu0 %vm804_vm4, %v8576_v42  ;;  %v8540_v4 = vmul.f32 1.442695, %v8510_v18 }
0x1775   : > { %v11494_v19 = vpop.eup %11493  ;;  %11511 = vrcp.f32 %v8550_v45  ;;  %10373 = vmatmul.mubr.msk.f32.vlgmr.msra.gmra.mrb[70].mxu0 %vm804_vm4, %v8577_v12  ;;  %v8579_v53 = vmul.f32 %v11492_v16, %v15383_v20 }
0x1776   : > { %v11496_v22 = vpop.eup %11495  ;;  %v8578_v59 = vmul.f32 %v11494_v19, %v15386_v5  ;;  %11513 = vrcp.f32 %v8553_v62 }
0x1777   : > { %v11498_v47 = vpop.eup %11497  ;;  %v8552_v54 = vadd.f32 1.0, %v11496_v22  ;;  %11515 = vpow2.f32 %v8542_v36  ;;  %v9552_v22 = vld [vmem:[%s15631_s7 + $0x20] ss:$0 sm:$0xff] }
0x1778   : > { %v11500_v41 = vpop.eup %11499  ;;  %v8555_v37 = vadd.f32 1.0, %v11498_v47  ;;  %11517 = vpow2.f32 %v8540_v4  ;;  %10375 = vmatprep.mubr.msk.f32.mxu0 %vm804_vm4, %v8578_v59 }
0x1779   : > { %v11502_v0 = vpop.eup %11501  ;;  %11519 = vrcp.f32 %v8552_v54  ;;  %10376 = vmatmul.mubr.msk.f32.gmra.mrb[72].mxu0 %vm804_vm4, %v8579_v53  ;;  %v8581_v5 = vmul.f32 %v11500_v41, %v15391_v51  ;;  %v9175_v53 = vadd.f32 %v9552_v22, %v15442_v13  ;;  %v9180_v54 = vadd.f32 %v15440_v24, %v9552_v22  ;;  %v16207_v13 = vld [vmem:[#allocation19_spill] sm:$0xff] }
0x177a   : > { %v11504_v21 = vpop.eup %11503  ;;  %v8580_v29 = vmul.f32 %v11502_v0, %v15394_v9  ;;  %11521 = vrcp.f32 %v8555_v37  ;;  %v16204_v0 = vld [vmem:[#allocation18_spill] sm:$0xff]  ;;  %v16208_v24 = vld [vmem:[#allocation55_spill] sm:$0xff] }
0x177b   : > { %v8554_v43 = vadd.f32 1.0, %v11504_v21  ;;  %v9183_v41 = vmul.f32 %v9175_v53, %v16181_v48  ;;  %v9184_v37 = vmul.f32 %v9180_v54, %v16182_v3  ;;  %v5103_v21 = vadd.f32 1e-08, %v16204_v0  ;;  %v16221_v53 = vld [vmem:[#allocation32_spill] sm:$0xff] }
0x177c   : > { %v11506_v46 = vpop.eup %11505  ;;  %10378 = vmatprep.mubr.msk.f32.mxu0 %vm804_vm4, %v8580_v29  ;;  %v16205_v29 = vld [vmem:[#allocation15_spill] sm:$0xff] }
0x177d   : > { %v11508_v20 = vpop.eup %11507  ;;  %11523 = vrcp.f32 %v8554_v43  ;;  %10379 = vmatmul.mubr.msk.f32.gmra.mrb[74].mxu0 %vm804_vm4, %v8581_v5  ;;  %v8583_v51 = vmul.f32 %v11506_v46, %v15399_v17  ;;  %v5102_v5 = vadd.f32 1e-08, %v16205_v29  ;;  %v16206_v43 = vld [vmem:[#allocation21_spill] sm:$0xff] }
0x177e   : > { %v11510_v44 = vpop.eup %11509  ;;  %v8557_v28 = vadd.f32 1.0, %v11508_v20  ;;  %v5105_v46 = vadd.f32 1e-08, %v16206_v43  ;;  %v5104_v20 = vadd.f32 1e-08, %v16207_v13 }
0x177f   : > { %v11512_v23 = vpop.eup %11511  ;;  %v8556_v32 = vadd.f32 1.0, %v11510_v44  ;;  %v5107_v44 = vadd.f32 1e-08, %v16208_v24 }
0x1780   : > { %v11514_v27 = vpop.eup %11513  ;;  %v8582_v1 = vmul.f32 %v11512_v23, %v15402_v2  ;;  %11525 = vrcp.f32 %v8557_v28  ;;  %v16209_v28 = vld [vmem:[#allocation20_spill] sm:$0xff] }
0x1781   : > { %v11516_v9 = vpop.eup %11515  ;;  %11527 = vrcp.f32 %v8556_v32  ;;  %v8585_v60 = vmul.f32 %v11514_v27, %v15407_v14  ;;  %v5106_v23 = vadd.f32 1e-08, %v16209_v28  ;;  %v16210_v32 = vld [vmem:[#allocation54_spill] sm:$0xff] }
0x1782   : > { %v11518_v56 = vpop.eup %11517  ;;  %v8559_v52 = vadd.f32 1.0, %v11516_v9  ;;  %10381 = vmatprep.mubr.msk.f32.mxu0 %vm804_vm4, %v8582_v1  ;;  %v5108_v27 = vadd.f32 1e-08, %v16210_v32  ;;  %v16211_v1 = vld [vmem:[#allocation106_spill] sm:$0xff] }
0x1783   : > { %v11520_v50 = vpop.eup %11519  ;;  %v8558_v25 = vadd.f32 1.0, %v11518_v56  ;;  %10382 = vmatmul.mubr.msk.f32.gmra.mrb[76].mxu0 %vm804_vm4, %v8583_v51  ;;  %v5111_v9 = vadd.f32 1e-08, %v16211_v1  ;;  %v16212_v56 = vld [vmem:[#allocation110_spill] sm:$0xff] }
0x1784   : > { %v8584_v40 = vmul.f32 %v11520_v50, %v15410_v55  ;;  %11529 = vrcp.f32 %v8559_v52  ;;  %v11522_v2 = vpop.eup %11521  ;;  %v5113_v52 = vadd.f32 1e-08, %v16212_v56  ;;  %v16213_v50 = vld [vmem:[#allocation104_spill] sm:$0xff] }
0x1785   : > { %11531 = vrcp.f32 %v8558_v25  ;;  %v8587_v15 = vmul.f32 %v11522_v2, %v15415_v63  ;;  %v5110_v25 = vadd.f32 1e-08, %v16213_v50 }
0x1786   : > { %10384 = vmatprep.mubr.msk.f32.mxu0 %vm804_vm4, %v8584_v40  ;;  %11533 = vrsqrt.f32 %v5103_v21  ;;  %v16214_v40 = vld [vmem:[#allocation56_spill] sm:$0xff] }
0x1787   : > { %v11524_v33 = vpop.eup %11523  ;;  %10385 = vmatmul.mubr.msk.f32.gmra.mrb[78].mxu0 %vm804_vm4, %v8585_v60  ;;  %11535 = vrsqrt.f32 %v5102_v5  ;;  %v5115_v60 = vadd.f32 1e-08, %v16214_v40 }
0x1788   : > { %v8586_v17 = vmul.f32 %v11524_v33, %v15418_v7  ;;  %11537 = vrsqrt.f32 %v5105_v46  ;;  %v16215_v33 = vld [vmem:[#allocation34_spill] sm:$0xff] }
0x1789   : > { %11539 = vrsqrt.f32 %v5104_v20 }
0x178a   : > { %v11526_v6 = vpop.eup %11525  ;;  %10387 = vmatprep.mubr.msk.f32.mxu0 %vm804_vm4, %v8586_v17  ;;  %11541 = vrsqrt.f32 %v5107_v44 }
0x178b   : > { %v11528_v38 = vpop.eup %11527  ;;  %10388 = vmatmul.mubr.msk.f32.gmra.mrb[80].mxu0 %vm804_vm4, %v8587_v15  ;;  %v8589_v14 = vmul.f32 %v11526_v6, %v15423_v26  ;;  %11543 = vrsqrt.f32 %v5106_v23  ;;  %v16216_v6 = vld [vmem:[#allocation108_spill] sm:$0xff] }
0x178c   : > { %v8588_v55 = vmul.f32 %v11528_v38, %v15426_v58  ;;  %11545 = vrsqrt.f32 %v5108_v27  ;;  %v5112_v38 = vadd.f32 1e-08, %v16216_v6  ;;  %v16223_v23 = vld [vmem:[#allocation92_spill] sm:$0xff]  ;;  %v16224_v27 = vld [vmem:[#allocation38_spill] sm:$0xff] }
0x178d   : > { %11547 = vrsqrt.f32 %v5111_v9  ;;  %v16225_v9 = vld [vmem:[#allocation42_spill] sm:$0xff] }
0x178e   : > { %v11530_v10 = vpop.eup %11529  ;;  %10390 = vmatprep.mubr.msk.f32.mxu0 %vm804_vm4, %v8588_v55  ;;  %11549 = vrsqrt.f32 %v5113_v52  ;;  %v16227_v6 = vld [vmem:[#allocation10_spill] sm:$0xff] }
0x178f   : > { %v11532_v42 = vpop.eup %11531  ;;  %10391 = vmatmul.mubr.msk.f32.gmra.mrb[82].mxu0 %vm804_vm4, %v8589_v14  ;;  %v8591_v63 = vmul.f32 %v11530_v10, %v15431_v30  ;;  %v16217_v14 = vld [vmem:[#allocation103_spill] sm:$0xff]  ;;  %11551 = vrsqrt.f32 %v5110_v25 }
0x1790   : > { %v8590_v7 = vmul.f32 %v11532_v42, %v15434_v11  ;;  %v11534_v51 = vpop.eup %11533  ;;  %v5109_v10 = vadd.f32 1e-08, %v16217_v14  ;;  %11553 = vrsqrt.f32 %v5115_v60  ;;  %v16226_v60 = vld [vmem:[#allocation50_spill] sm:$0xff] }
0x1791   : > { %v11536_v2 = vpop.eup %11535  ;;  %v5135_v17 = vmul.f32 %v11534_v51, %v16215_v33  ;;  %11555 = vrsqrt.f32 %v5112_v38 }
0x1792   : > { %10393 = vmatprep.mubr.msk.f32.mxu0 %vm804_vm4, %v8590_v7  ;;  %v11538_v15 = vpop.eup %11537  ;;  %v16218_v7 = vld [vmem:[#allocation112_spill] sm:$0xff]  ;;  %11557 = vrsqrt.f32 %v5109_v10 }
0x1793   : > { %10394 = vmatmul.mubr.msk.f32.gmra.mrb[84].mxu0 %vm804_vm4, %v8591_v63  ;;  %v5114_v63 = vadd.f32 1e-08, %v16218_v7 }
0x1795   : > { %11559 = vrsqrt.f32 %v5114_v63 }
0x1848   : > { %v10374_v8 = vpop.f32.mrb[70].mxu0 }
0x1849   : > { %8792 = vperm.xlu1 %10700, %v10374_v8   ;;  %v8706_v49 = vpop.f32.mrb[71].mxu0  ;;  %v11540_v8 = vpop.eup %11539 }
0x184a   : > { %v5136_v54 = vmul.f32 %v11540_v8, %v16221_v53  ;;  %v16228_v8 = vld [vmem:[#allocation89_spill] sm:$0xff] }
0x184c   : > { %v10377_v58 = vpop.f32.mrb[72].mxu0 }
0x184d   : > { %8787 = vperm.xlu1 %10700, %v8706_v49   ;;  %8802 = vperm.xlu0 %10698, %v10377_v58   ;;  %v8716_v26 = vpop.f32.mrb[73].mxu0  ;;  %v16219_v58 = vld [vmem:[#allocation29_spill] sm:$0xff] }
0x1850   : > { %v10380_v12 = vpop.f32.mrb[74].mxu0 }
0x1851   : > { %8797 = vperm.xlu0 %10698, %v8716_v26   ;;  %8812 = vperm.xlu1 %10700, %v10380_v12   ;;  %v8726_v45 = vpop.f32.mrb[75].mxu0  ;;  %v5134_v26 = vmul.f32 %v11536_v2, %v16219_v58  ;;  %v16220_v12 = vld [vmem:[#allocation35_spill] sm:$0xff] }
0x1855   : > { %8807 = vperm.xlu0 %10698, %v8726_v45   ;;  %v5137_v45 = vmul.f32 %v11538_v15, %v16220_v12 }
0x1856   : > { %v10383_v18 = vpop.f32.mrb[76].mxu0 }
0x1857   : > { %v8736_v11 = vpop.f32.mrb[77].mxu0 }
0x1858   : > { %8817 = vperm.xlu1 %10700, %v8736_v11   ;;  %v5116_v11 = vadd.f32 1e-08, %v16199_v39 }
0x185a   : > { %v10386_v30 = vpop.f32.mrb[78].mxu0  ;;  %11561 = vrsqrt.f32 %v5116_v11 }
0x185b   : > { %v8746_v16 = vpop.f32.mrb[79].mxu0 }
0x185c   : > { %8832 = vperm.xlu1 %10700, %v10386_v30  }
0x185e   : > { %v10389_v62 = vpop.f32.mrb[80].mxu0 }
0x185f   : > { %8842 = vperm.xlu0 %10698, %v10389_v62   ;;  %v8756_v36 = vpop.f32.mrb[81].mxu0 }
0x1860   : > { %8827 = vperm.xlu1 %10700, %v8746_v16  }
0x1862   : > { %v10392_v19 = vpop.f32.mrb[82].mxu0 }
0x1863   : > { %8852 = vperm.xlu0 %10698, %v10392_v19   ;;  %v8766_v4 = vpop.f32.mrb[83].mxu0 }
0x1864   : > { %8837 = vperm.xlu1 %10700, %v8756_v36  }
0x1866   : > { %v10395_v59 = vpop.f32.mrb[84].mxu0 }
0x1867   : > { %8847 = vperm.xlu0 %10698, %v8766_v4   ;;  %v8776_v47 = vpop.f32.mrb[85].mxu0  ;;  %v5117_v4 = vadd.f32 1e-08, %v16202_v31 }
0x1868   : > { %8822 = vperm.xlu1 %10700, %v10383_v18   ;;  %v11542_v18 = vpop.eup %11541 }
0x1869   : > { %11563 = vrsqrt.f32 %v5117_v4 }
0x186b   : > { %8857 = vperm.xlu0 %10698, %v8776_v47  }
0x186c   : > { %8862 = vperm.xlu1 %10700, %v10395_v59  }
0x186f   : > { %9191 = vrot.lane.b32.xlu0 %v9183_v41, %s11590_s20  ;;  %v16222_v41 = vld [vmem:[#allocation46_spill] sm:$0xff] }
0x1870   : > { %9193 = vrot.lane.b32.xlu1 %v9184_v37, %s11590_s20  ;;  %v5139_v39 = vmul.f32 %v11542_v18, %v16222_v41 }
0x18c8   : > { %v8793_v55 = vpop.permute.xlu1 %8792 }
0x18c9   : > { %v8866_v42 = vmul.f32 %v8793_v55, %v5135_v17 }
0x18cb   : > { %v8882_v49 = vmul.f32 %v8866_v42, %v16174_v34  ;;  %v11544_v34 = vpop.eup %11543 }
0x18cc   : > { %v8788_v30 = vpop.permute.xlu1 %8787  ;;  %v8803_v16 = vpop.permute.xlu0 %8802  ;;  %v5138_v1 = vmul.f32 %v11544_v34, %v16224_v27  ;;  %v16231_v34 = vld [vmem:[#allocation9_spill] sm:$0xff] }
0x18cd   : > { %v8904_v62 = vsel %vm682_vm1, %v8882_v49, 0.0  ;;  %v8865_v36 = vmul.f32 %v8788_v30, %v5134_v26  ;;  %v8868_v19 = vmul.f32 %v8803_v16, %v5137_v45  ;;  %v11546_v37 = vpop.eup %11545  ;;  %v16229_v26 = vld [vmem:[#allocation43_spill] sm:$0xff]  ;;  %v16230_v45 = vld [vmem:[#allocation8_spill] sm:$0xff] }
0x18ce   : > { %v8905_v22 = vrot.slane %v8904_v62, 4  ;;  %v11548_v5 = vpop.eup %11547  ;;  %v5140_v51 = vmul.f32 %v11546_v37, %v16225_v9 }
0x18cf   : > { %v8881_v59 = vmul.f32 %v8865_v36, %v16175_v57  ;;  %v8884_v47 = vmul.f32 %v8868_v19, %v16176_v61  ;;  %v11550_v20 = vpop.eup %11549  ;;  %v5143_v2 = vmul.f32 %v11548_v5, %v16226_v60  ;;  %v16236_v60 = vld [vmem:[#allocation86_spill] sm:$0xff] }
0x18d0   : > { %v8906_v0 = vadd.f32 %v8905_v22, %v8904_v62  ;;  %v8798_v21 = vpop.permute.xlu0 %8797  ;;  %v8813_v29 = vpop.permute.xlu1 %8812 }
0x18d1   : > { %v8897_v43 = vsel %vm682_vm1, %v8881_v59, 0.0  ;;  %v8918_v31 = vsel %vm682_vm1, %v8884_v47, 0.0  ;;  %v8867_v46 = vmul.f32 %v8798_v21, %v5136_v54  ;;  %v8870_v13 = vmul.f32 %v8813_v29, %v5139_v39  ;;  %v11552_v44 = vpop.eup %11551  ;;  %v16232_v21 = vld [vmem:[#allocation93_spill] sm:$0xff] }
0x18d2   : > { %v8907_v57 = vrot.slane %v8906_v0, 2  ;;  %v8898_v61 = vrot.slane %v8897_v43, 4  ;;  %v8919_v24 = vrot.slane %v8918_v31, 4  ;;  %v11554_v56 = vpop.eup %11553  ;;  %v5142_v12 = vmul.f32 %v11552_v44, %v16229_v26 }
0x18d3   : > { %v8883_v28 = vmul.f32 %v8867_v46, %v16177_v35  ;;  %v8886_v32 = vmul.f32 %v8870_v13, %v16223_v23  ;;  %v5145_v35 = vmul.f32 %v11550_v20, %v16227_v6  ;;  %v11556_v38 = vpop.eup %11555  ;;  %v5147_v18 = vmul.f32 %v11554_v56, %v16230_v45  ;;  %v16234_v13 = vld [vmem:[#allocation26_spill] sm:$0xff]  ;;  %v16238_v45 = vld [vmem:[#allocation47_spill] sm:$0xff] }
0x18d4   : > { %v8908_v52 = vadd.f32 %v8907_v57, %v8906_v0  ;;  %v8899_v50 = vadd.f32 %v8898_v61, %v8897_v43  ;;  %v8920_v25 = vadd.f32 %v8919_v24, %v8918_v31  ;;  %v8808_v40 = vpop.permute.xlu0 %8807  ;;  %v11558_v7 = vpop.eup %11557  ;;  %v15521_v59 = vmul.f32 %v11556_v38, %v16231_v34  ;;  %v16233_v43 = vld [vmem:[#allocation7_spill] sm:$0xff] }
0x18d5   : > { %v8911_v33 = vsel %vm682_vm1, %v8883_v28, 0.0  ;;  %v8932_v17 = vsel %vm682_vm1, %v8886_v32, 0.0  ;;  %v8869_v15 = vmul.f32 %v8808_v40, %v5138_v1  ;;  %v11560_v11 = vpop.eup %11559  ;;  %v16235_v20 = vrot.slane %v16234_v13, 1 }
0x18d6   : > { %v8909_v55 = vrot.slane %v8908_v52, 1  ;;  %v8900_v14 = vrot.slane %v8899_v50, 2  ;;  %v8921_v10 = vrot.slane %v8920_v25, 2  ;;  %v8912_v42 = vrot.slane %v8911_v33, 4  ;;  %v15523_v47 = vpop.eup %11561 }
0x18d7   : > { %v8933_v63 = vrot.slane %v8932_v17, 4  ;;  %v8885_v49 = vmul.f32 %v8869_v15, %v16228_v8  ;;  %v8818_v58 = vpop.permute.xlu1 %8817  ;;  %v15527_v31 = vmul.f32 %v11560_v11, %v16233_v43  ;;  %v15529_v46 = vpop.eup %11563  ;;  %v16237_v6 = vrot.slane %v16234_v13, 3 }
0x18d8   : > { %v8910_v30 = vadd.f32 %v8909_v55, %v8908_v52  ;;  %v8901_v16 = vadd.f32 %v8900_v14, %v8899_v50  ;;  %v8922_v62 = vadd.f32 %v8921_v10, %v8920_v25  ;;  %v8913_v36 = vadd.f32 %v8912_v42, %v8911_v33 }
0x18d9   : > { %v8934_v19 = vadd.f32 %v8933_v63, %v8932_v17  ;;  %v8925_v4 = vsel %vm682_vm1, %v8885_v49, 0.0  ;;  %v8871_v22 = vmul.f32 %v8818_v58, %v5140_v51  ;;  %v5141_v11 = vmul.f32 %v11558_v7, %v16238_v45 }
0x18da   : > { %v9010_v53 = vmul.f32 0.01, %v8910_v30  ;;  %v8902_v54 = vrot.slane %v8901_v16, 1  ;;  %v8923_v41 = vrot.slane %v8922_v62, 1  ;;  %v8914_v39 = vrot.slane %v8913_v36, 2 }
0x18db   : > { %v8935_v37 = vrot.slane %v8934_v19, 2  ;;  %v8926_v0 = vrot.slane %v8925_v4, 4  ;;  %v8887_v29 = vmul.f32 %v8871_v22, %v16232_v21  ;;  %v8833_v5 = vpop.permute.xlu1 %8832 }
0x18dc   : > { %v9026_v57 = vmul.f32 %v9010_v53, %v16235_v20  ;;  %v8903_v61 = vadd.f32 %v8902_v54, %v8901_v16  ;;  %v8924_v24 = vadd.f32 %v8923_v41, %v8922_v62  ;;  %v8915_v44 = vadd.f32 %v8914_v39, %v8913_v36  ;;  %v16239_v36 = vld [vmem:[#allocation91_spill] sm:$0xff] }
0x18dd   : > { %v8936_v28 = vadd.f32 %v8935_v37, %v8934_v19  ;;  %v8927_v23 = vadd.f32 %v8926_v0, %v8925_v4  ;;  %v8939_v32 = vsel %vm682_vm1, %v8887_v29, 0.0  ;;  %v8874_v27 = vmul.f32 %v8833_v5, %v5143_v2  ;;  %v16241_v5 = vld [vmem:[#allocation85_spill] sm:$0xff] }
0x18de   : > { %v9057_v1 = vrot.slane %v9026_v57, 7  ;;  %v9009_v9 = vmul.f32 0.01, %v8903_v61  ;;  %v9012_v51 = vmul.f32 0.01, %v8924_v24  ;;  %v8916_v56 = vrot.slane %v8915_v44, 1  ;;  %v8843_v52 = vpop.permute.xlu0 %8842 }
0x18df   : > { %v8937_v50 = vrot.slane %v8936_v28, 1  ;;  %v8928_v25 = vrot.slane %v8927_v23, 2  ;;  %v8940_v40 = vrot.slane %v8939_v32, 4  ;;  %v8890_v33 = vmul.f32 %v8874_v27, %v16236_v60  ;;  %v8828_v17 = vpop.permute.xlu1 %8827 }
0x18e0   : > { %v9025_v15 = vmul.f32 %v9009_v9, %v16234_v13  ;;  %v9028_v38 = vmul.f32 %v9012_v51, %v16237_v6  ;;  %v8917_v55 = vadd.f32 %v8916_v56, %v8915_v44  ;;  %v8876_v14 = vmul.f32 %v8843_v52, %v5145_v35  ;;  %v16243_v44 = vld [vmem:[#allocation96_spill] sm:$0xff] }
0x18e1   : > { %v8938_v10 = vadd.f32 %v8937_v50, %v8936_v28  ;;  %v8929_v2 = vadd.f32 %v8928_v25, %v8927_v23  ;;  %v8941_v42 = vadd.f32 %v8940_v40, %v8939_v32  ;;  %v8960_v63 = vsel %vm682_vm1, %v8890_v33, 0.0 }
0x18e2   : > { %v9058_v8 = vsel %vm1878_vm5, %v9057_v1, %v9025_v15  ;;  %v9011_v49 = vmul.f32 0.01, %v8917_v55  ;;  %v8961_v58 = vrot.slane %v8960_v63, 4  ;;  %v8853_v26 = vpop.permute.xlu0 %8852  ;;  %v8892_v19 = vmul.f32 %v8876_v14, %v16239_v36 }
0x18e3   : > { %v9014_v30 = vmul.f32 0.01, %v8938_v10  ;;  %v8930_v16 = vrot.slane %v8929_v2, 1  ;;  %v8942_v62 = vrot.slane %v8941_v42, 2  ;;  %v16240_v4 = vrot.slane %v16234_v13, 2  ;;  %v8838_v0 = vpop.permute.xlu1 %8837  ;;  %v16245_v10 = vld [vmem:[#allocation88_spill] sm:$0xff] }
0x18e4   : > { %v8962_v22 = vadd.f32 %v8961_v58, %v8960_v63  ;;  %v8873_v34 = vmul.f32 %v8828_v17, %v5142_v12  ;;  %v8878_v53 = vmul.f32 %v8853_v26, %v5147_v18  ;;  %v9061_v54 = vrot.slane %v9028_v38, 5  ;;  %v16246_v58 = vld [vmem:[#allocation11_spill] sm:$0xff] }
0x18e5   : > { %v9027_v35 = vmul.f32 %v9011_v49, %v16240_v4  ;;  %v8931_v41 = vadd.f32 %v8930_v16, %v8929_v2  ;;  %v8943_v39 = vadd.f32 %v8942_v62, %v8941_v42  ;;  %v8974_v37 = vsel %vm682_vm1, %v8892_v19, 0.0  ;;  %v16247_v16 = vld [vmem:[#allocation95_spill] sm:$0xff] }
0x18e6   : > { %v8963_v29 = vrot.slane %v8962_v22, 2  ;;  %v8975_v7 = vrot.slane %v8974_v37, 4  ;;  %v8889_v43 = vmul.f32 %v8873_v34, %v16241_v5  ;;  %v16242_v20 = vrot.slane %v16234_v13, 5  ;;  %v8848_v52 = vpop.permute.xlu0 %8847 }
0x18e7   : > { %v9059_v21 = vrot.slane %v9027_v35, 6  ;;  %v9013_v61 = vmul.f32 0.01, %v8931_v41  ;;  %v8944_v24 = vrot.slane %v8943_v39, 1  ;;  %v8894_v12 = vmul.f32 %v8878_v53, %v16243_v44  ;;  %v8823_v38 = vpop.permute.xlu1 %8822 }
0x18e8   : > { %v15548_v57 = vmul.f32 %v9014_v30, %v16242_v20  ;;  %v8964_v28 = vadd.f32 %v8963_v29, %v8962_v22  ;;  %v8976_v23 = vadd.f32 %v8975_v7, %v8974_v37  ;;  %v8953_v32 = vsel %vm682_vm1, %v8889_v43, 0.0  ;;  %v16248_v22 = vld [vmem:[#allocation12_spill] sm:$0xff]  ;;  %v16250_v7 = vld [vmem:[#allocation31_spill] sm:$0xff] }
0x18e9   : > { %v9060_v18 = vsel %vm1880_vm6, %v9059_v21, %v9058_v8  ;;  %v16244_v1 = vrot.slane %v16234_v13, 4  ;;  %v8945_v51 = vadd.f32 %v8944_v24, %v8943_v39  ;;  %v8954_v56 = vrot.slane %v8953_v32, 4 }
0x18ea   : > { %v9062_v27 = vsel %vm1882_vm7, %v9061_v54, %v9060_v18  ;;  %v8965_v50 = vrot.slane %v8964_v28, 1  ;;  %v8977_v25 = vrot.slane %v8976_v23, 2  ;;  %v8988_v40 = vsel %vm682_vm1, %v8894_v12, 0.0  ;;  %v8858_v35 = vpop.permute.xlu0 %8857 }
0x18eb   : > { %v9029_v9 = vmul.f32 %v9013_v61, %v16244_v1  ;;  %v8875_v60 = vmul.f32 %v8838_v0, %v15521_v59  ;;  %v9015_v17 = vmul.f32 0.01, %v8945_v51  ;;  %v8955_v15 = vadd.f32 %v8954_v56, %v8953_v32  ;;  %v8863_v29 = vpop.permute.xlu1 %8862  ;;  %v16252_v61 = vld [vmem:[#allocation94_spill] sm:$0xff] }
0x18ec   : > { %v8989_v6 = vrot.slane %v8988_v40, 4  ;;  %v8966_v55 = vadd.f32 %v8965_v50, %v8964_v28  ;;  %v8978_v14 = vadd.f32 %v8977_v25, %v8976_v23  ;;  %v8877_v42 = vmul.f32 %v8848_v52, %v15527_v31 }
0x18ed   : > { %v9063_v33 = vrot.slane %v9029_v9, 4  ;;  %v8891_v2 = vmul.f32 %v8875_v60, %v16245_v10  ;;  %v8956_v8 = vrot.slane %v8955_v15, 2  ;;  %v5148_v26 = vmul.f32 %v15523_v47, %v16246_v58 }
0x18ee   : > { %v8990_v49 = vadd.f32 %v8989_v6, %v8988_v40  ;;  %v9018_v45 = vmul.f32 0.01, %v8966_v55  ;;  %v8979_v59 = vrot.slane %v8978_v14, 1  ;;  %v8893_v62 = vmul.f32 %v8877_v42, %v16247_v16  ;;  %v16254_v40 = vld [vmem:[#allocation97_spill] sm:$0xff] }
0x18ef   : > { %v9064_v63 = vsel %vm1884_vm8, %v9063_v33, %v9062_v27  ;;  %v8967_v30 = vsel %vm682_vm1, %v8891_v2, 0.0  ;;  %v8957_v36 = vadd.f32 %v8956_v8, %v8955_v15  ;;  %v5149_v31 = vmul.f32 %v15529_v46, %v16248_v22 }
0x18f0   : > { %v8991_v19 = vrot.slane %v8990_v49, 2  ;;  %v8968_v4 = vrot.slane %v8967_v30, 4  ;;  %v9065_v34 = vrot.slane %v15548_v57, 3  ;;  %v16249_v53 = vrot.slane %v16234_v13, 6 }
0x18f1   : > { %v8981_v47 = vsel %vm682_vm1, %v8893_v62, 0.0  ;;  %v8872_v41 = vmul.f32 %v8823_v38, %v5141_v11  ;;  %v8958_v39 = vrot.slane %v8957_v36, 1  ;;  %v16251_v5 = vrot.slane %v16250_v7, 1  ;;  %v16253_v11 = vld [vmem:[#allocation98_spill] sm:$0xff] }
0x18f2   : > { %v9031_v54 = vmul.f32 %v9015_v17, %v16249_v53  ;;  %v8992_v37 = vadd.f32 %v8991_v19, %v8990_v49  ;;  %v8969_v0 = vadd.f32 %v8968_v4, %v8967_v30  ;;  %v8982_v21 = vrot.slane %v8981_v47, 4 }
0x18f3   : > { %v9034_v43 = vmul.f32 %v9018_v45, %v16251_v5  ;;  %v8980_v20 = vadd.f32 %v8979_v59, %v8978_v14  ;;  %v8888_v24 = vmul.f32 %v8872_v41, %v16252_v61  ;;  %v8879_v46 = vmul.f32 %v8858_v35, %v5148_v26 }
0x18f4   : > { %v8959_v44 = vadd.f32 %v8958_v39, %v8957_v36  ;;  %v8993_v57 = vrot.slane %v8992_v37, 1  ;;  %v8970_v12 = vrot.slane %v8969_v0, 2  ;;  %v8983_v18 = vadd.f32 %v8982_v21, %v8981_v47 }
0x18f5   : > { %v9067_v28 = vrot.slane %v9031_v54, 2  ;;  %v8946_v23 = vsel %vm682_vm1, %v8888_v24, 0.0  ;;  %v8895_v32 = vmul.f32 %v8879_v46, %v16253_v11  ;;  %v8880_v27 = vmul.f32 %v8863_v29, %v5149_v31 }
0x18f6   : > { %v9017_v1 = vmul.f32 0.01, %v8959_v44  ;;  %v8994_v9 = vadd.f32 %v8993_v57, %v8992_v37  ;;  %v8971_v51 = vadd.f32 %v8970_v12, %v8969_v0  ;;  %v8984_v56 = vrot.slane %v8983_v18, 2 }
0x18f7   : > { %v9071_v52 = vrot.slane %v9034_v43, 7  ;;  %v8947_v50 = vrot.slane %v8946_v23, 4  ;;  %v8995_v25 = vsel %vm682_vm1, %v8895_v32, 0.0  ;;  %v8896_v60 = vmul.f32 %v8880_v27, %v16254_v40 }
0x18f8   : > { %v9020_v33 = vmul.f32 0.01, %v8980_v20  ;;  %v9033_v17 = vmul.f32 %v9017_v1, %v16250_v7  ;;  %v8972_v15 = vrot.slane %v8971_v51, 1  ;;  %v8985_v6 = vadd.f32 %v8984_v56, %v8983_v18 }
0x18f9   : > { %v8948_v38 = vadd.f32 %v8947_v50, %v8946_v23  ;;  %v8996_v55 = vrot.slane %v8995_v25, 4  ;;  %v9002_v14 = vsel %vm682_vm1, %v8896_v60, 0.0  ;;  %v9066_v10 = vsel %vm1886_vm9, %v9065_v34, %v9064_v63  ;;  %v16262_v60 = vld [vmem:[#allocation30_spill] sm:$0xff] }
0x18fa   : > { %v9072_v2 = vsel %vm1878_vm5, %v9071_v52, %v9033_v17  ;;  %v9022_v42 = vmul.f32 0.01, %v8994_v9  ;;  %v8973_v8 = vadd.f32 %v8972_v15, %v8971_v51  ;;  %v8986_v49 = vrot.slane %v8985_v6, 1 }
0x18fb   : > { %v8949_v58 = vrot.slane %v8948_v38, 2  ;;  %v8997_v26 = vadd.f32 %v8996_v55, %v8995_v25  ;;  %v9003_v45 = vrot.slane %v9002_v14, 4  ;;  %v9068_v59 = vsel %vm1888_vm10, %v9067_v28, %v9066_v10 }
0x18fc   : > { %v9019_v30 = vmul.f32 0.01, %v8973_v8  ;;  %v8987_v16 = vadd.f32 %v8986_v49, %v8985_v6  ;;  %v16255_v62 = vrot.slane %v16250_v7, 3  ;;  %v16256_v63 = vrot.slane %v16250_v7, 5  ;;  %v16265_v49 = vld [vmem:[#allocation5_spill] sm:$0xff] }
0x18fd   : > { %v8950_v19 = vadd.f32 %v8949_v58, %v8948_v38  ;;  %v8998_v4 = vrot.slane %v8997_v26, 2  ;;  %v9004_v35 = vadd.f32 %v9003_v45, %v9002_v14  ;;  %v16257_v31 = vrot.slane %v16250_v7, 2  ;;  %v16263_v38 = vld [vmem:[#allocation3_spill] sm:$0xff]  ;;  %v9194_v45 = vpop.permute.xlu1 %9193 }
0x18fe   : > { %v9036_v36 = vmul.f32 %v9020_v33, %v16255_v62  ;;  %v9038_v22 = vmul.f32 %v9022_v42, %v16256_v63  ;;  %v9021_v53 = vmul.f32 0.01, %v8987_v16  ;;  %v16258_v37 = vrot.slane %v16250_v7, 4  ;;  %v16264_v14 = vld [vmem:[#allocation39_spill] sm:$0xff]  ;;  %v9192_v42 = vpop.permute.xlu0 %9191 }
0x18ff   : > { %v9035_v34 = vmul.f32 %v9019_v30, %v16257_v31  ;;  %v8951_v54 = vrot.slane %v8950_v19, 1  ;;  %v8999_v47 = vadd.f32 %v8998_v4, %v8997_v26  ;;  %v9005_v41 = vrot.slane %v9004_v35, 2 }
0x1900   : > { %v9037_v0 = vmul.f32 %v9021_v53, %v16258_v37  ;;  %v9075_v21 = vrot.slane %v9036_v36, 5  ;;  %v9079_v20 = vrot.slane %v9038_v22, 3  ;;  %v16259_v28 = vrot.slane %v16234_v13, 7 }
0x1901   : > { %v9073_v39 = vrot.slane %v9035_v34, 6  ;;  %v8952_v29 = vadd.f32 %v8951_v54, %v8950_v19  ;;  %v9000_v5 = vrot.slane %v8999_v47, 1  ;;  %v9006_v43 = vadd.f32 %v9005_v41, %v9004_v35 }
0x1902   : > { %v9077_v24 = vrot.slane %v9037_v0, 4  ;;  %v16260_v9 = vrot.slane %v16250_v7, 6  ;;  %v16261_v50 = vrot.slane %v16250_v7, 7 }
0x1903   : > { %v9074_v61 = vsel %vm1880_vm6, %v9073_v39, %v9072_v2  ;;  %v9016_v44 = vmul.f32 0.01, %v8952_v29  ;;  %v9001_v57 = vadd.f32 %v9000_v5, %v8999_v47  ;;  %v9007_v12 = vrot.slane %v9006_v43, 1 }
0x1904   : > { %v9076_v46 = vsel %vm1882_vm7, %v9075_v21, %v9074_v61 }
0x1905   : > { %v9078_v18 = vsel %vm1884_vm8, %v9077_v24, %v9076_v46  ;;  %v9032_v23 = vmul.f32 %v9016_v44, %v16259_v28  ;;  %v9023_v11 = vmul.f32 0.01, %v9001_v57  ;;  %v9008_v32 = vadd.f32 %v9007_v12, %v9006_v43 }
0x1906   : > { %v9080_v27 = vsel %vm1886_vm9, %v9079_v20, %v9078_v18 }
0x1907   : > { %v9069_v1 = vrot.slane %v9032_v23, 1  ;;  %v9039_v51 = vmul.f32 %v9023_v11, %v16260_v9  ;;  %v9024_v56 = vmul.f32 0.01, %v9008_v32 }
0x1909   : > { %v9081_v52 = vrot.slane %v9039_v51, 2  ;;  %v9040_v25 = vmul.f32 %v9024_v56, %v16261_v50  ;;  %v9070_v40 = vsel %vm1890_vm11, %v9069_v1, %v9068_v59 }
0x190a   : > { %v9087_v33 = vadd.f32 %v9070_v40, %v16262_v60 }
0x190b   : > { %v9083_v13 = vrot.slane %v9040_v25, 1  ;;  %v9082_v17 = vsel %vm1888_vm10, %v9081_v52, %v9080_v27 }
0x190c   : > { %v9089_v15 = vmul.f32 %v9087_v33, %v16181_v48 }
0x190d   : > { %v9084_v6 = vsel %vm1890_vm11, %v9083_v13, %v9082_v17 }
0x190e   : > { %v9185_v55 = vsub.f32 %v9089_v15, %v16263_v38  ;;  %v9088_v10 = vadd.f32 %v9084_v6, %v16264_v14 }
0x1910   : > { %v9187_v7 = vmul.f32 %v9185_v55, %v16181_v48  ;;  %v9090_v2 = vmul.f32 %v9088_v10, %v16182_v3 }
0x1912   : > { %v9197_v8 = vsel %vm682_vm1, %v9187_v7, %v9192_v42  ;;  %v9186_v58 = vsub.f32 %v9090_v2, %v16265_v49 }
0x1913   : > { %9199 = vst.msk [vmem:[%s332_s23] sm:$0xff] %vm370_vm3, %v9197_v8 }
0x1914   : > { %v9188_v26 = vmul.f32 %v9186_v58, %v16182_v3 }
0x1916   : > { %v9198_v59 = vsel %vm682_vm1, %v9188_v26, %v9194_v45 }
0x1917   : > { %9200 = vst.msk [vmem:[%s332_s23 + $0x8] sm:$0xff] %vm370_vm3, %v9198_v59 }
0x1918 PF: > { %s18_s27 = sadd.s32 1, %s11582_s27  }
0x1919   : > { %p15_p4 = scmp.ge.s32.totalorder %s18_s27, 4  }
0x191b   :  { %17 = sbr.rel (!%p15_p4) target bundleno = 1 (0x1), region = 93 }

</bundles_post_ra>
